<compile_context>
chip_gen: v5e
topology: v5e:2x2
jax: 0.10.0
libtpu: 0.0.40
codegen_flags: <defaults>
</compile_context>

<pallas_src>
import functools

import jax
import jax.numpy as jnp
import numpy as np
from jax import lax
from jax.experimental import pallas as pl
from jax.experimental.pallas import tpu as pltpu

LANE = 128
_TAPS = tuple((kh, kw) for kh in range(3) for kw in range(3))


def _round_up(x, m):
    return ((x + m - 1) // m) * m


def _pick_nb(n):
    """Images per grid step (amortize per-step overhead)."""
    for nb in (8, 4, 2, 1):
        if n % nb == 0:
            return nb
    return 1


def _vmem_bytes_estimate(nb, h, w, c_pad, p_pad):
    bf16, f32 = 2, 4
    m = nb * h * w
    io = 2 * 2 * (nb * h * w * c_pad * bf16)                 # in + out blocks, double-buffered
    wts = 2 * bf16 * (c_pad * p_pad + 9 * p_pad * p_pad + p_pad * c_pad)
    scratch = nb * (h + 2) * (w + 2) * p_pad * bf16
    tmp = 8 * m * max(c_pad, p_pad) * f32                    # t1/t2/t3/acc/tap copies (generous)
    est = io + wts + scratch + tmp
    # Floor gives headroom at tiny shapes; cap keeps us well under v7x's 64 MiB physical.
    return int(min(max(2 * est, 32 * (1 << 20)), 48 * (1 << 20)))


def _bottleneck_kernel(x_ref, w1_ref, b1_ref, w2_ref, b2_ref, w3_ref, b3_ref,
                       o_ref, pad_ref, *, NB, H, W, C_PAD, P_PAD):
    """NB images (NHWC, channel-padded) per grid step.

    x_ref : (NB, H, W, C_PAD)        bf16 activations
    w1_ref: (C_PAD, P_PAD)           bf16, BN1 scale folded in
    b1_ref: (1, P_PAD)               f32 folded BN1 bias
    w2_ref: (9, P_PAD, P_PAD)        bf16, tap index = kh*3+kw, BN2 scale folded in
    b2_ref: (1, P_PAD)               f32
    w3_ref: (P_PAD, C_PAD)           bf16, BN3 scale folded in
    b3_ref: (1, C_PAD)               f32
    o_ref : (NB, H, W, C_PAD)        bf16
    pad_ref: (NB, H+2, W+2, P_PAD)   bf16 persistent VMEM scratch (spatially padded t1)
    """
    M = NB * H * W
    xf = x_ref[...].reshape(M, C_PAD)                         # bf16, lane-dense

    # ---- conv1 (1x1) + folded BN1 bias + relu (bf16 matmul, f32 accumulate) ----
    t1 = jnp.dot(xf, w1_ref[...], preferred_element_type=jnp.float32)
    t1 = jnp.maximum(t1 + b1_ref[...], 0.0)
    t1_bf = t1.astype(jnp.bfloat16)

    # ---- persistent spatially-padded buffer for the 3x3 conv ----
    # Zero only the 1-pixel border (cheap); interior is fully overwritten.
    # Per-step (NOT program_id-gated) so it stays correct if the batch grid
    # axis is split across TensorCores (each core has its own scratch).
    pad_ref[:, 0:1, :, :] = jnp.zeros((NB, 1, W + 2, P_PAD), jnp.bfloat16)
    pad_ref[:, H + 1:H + 2, :, :] = jnp.zeros((NB, 1, W + 2, P_PAD), jnp.bfloat16)
    pad_ref[:, 1:H + 1, 0:1, :] = jnp.zeros((NB, H, 1, P_PAD), jnp.bfloat16)
    pad_ref[:, 1:H + 1, W + 1:W + 2, :] = jnp.zeros((NB, H, 1, P_PAD), jnp.bfloat16)
    pad_ref[:, 1:H + 1, 1:W + 1, :] = t1_bf.reshape(NB, H, W, P_PAD)

    # ---- conv2 (3x3, stride 1, pad 1): 9 accumulating per-tap matmuls ----
    # No im2col materialization; each tap is a (M, P_PAD) x (P_PAD, P_PAD) matmul
    # accumulated in f32 (K = P_PAD = 128 fills the MXU depth on v5e exactly).
    acc = None
    for idx, (kh, kw) in enumerate(_TAPS):
        tap = pad_ref[:, kh:kh + H, kw:kw + W, :].reshape(M, P_PAD)
        part = jnp.dot(tap, w2_ref[idx], preferred_element_type=jnp.float32)
        acc = part if acc is None else acc + part
    t2 = jnp.maximum(acc + b2_ref[...], 0.0)
    t2_bf = t2.astype(jnp.bfloat16)

    # ---- conv3 (1x1) + folded BN3 bias ----
    t3 = jnp.dot(t2_bf, w3_ref[...], preferred_element_type=jnp.float32)
    t3 = t3 + b3_ref[...]

    # ---- residual add + relu; bf16 lane-dense store ----
    out = jnp.maximum(t3 + xf.astype(jnp.float32), 0.0)
    o_ref[...] = out.reshape(NB, H, W, C_PAD).astype(o_ref.dtype)


def prepare_params(params, c_in):
    """Fold BN scales into conv weights, pad channels to LANE multiples, cast bf16.

    Call this ONCE (off the hot path) and reuse the result across forward calls.
    """
    p = params["w1"].shape[1]
    assert c_in == 4 * p, "residual add requires inplanes == 4 * planes"
    c_pad = _round_up(c_in, LANE)
    p_pad = _round_up(p, LANE)

    w1 = params["w1"] * params["s1"]            # (C_IN, P)   * (1, P)  scale over cout
    w2 = params["w2"] * params["s2"]            # (3,3,P,P)   * (1, P)  scale over cout
    w3 = params["w3"] * params["s3"]            # (P, 4P)     * (1, 4P) scale over cout

    w1p = jnp.zeros((c_pad, p_pad), jnp.float32).at[:c_in, :p].set(w1)
    w2p = jnp.zeros((3, 3, p_pad, p_pad), jnp.float32).at[:, :, :p, :p].set(w2)
    w3p = jnp.zeros((p_pad, c_pad), jnp.float32).at[:p, :c_in].set(w3)
    b1p = jnp.zeros((1, p_pad), jnp.float32).at[:, :p].set(params["b1"])
    b2p = jnp.zeros((1, p_pad), jnp.float32).at[:, :p].set(params["b2"])
    b3p = jnp.zeros((1, c_pad), jnp.float32).at[:, :c_in].set(params["b3"])

    return dict(
        w1=w1p.astype(jnp.bfloat16),
        w2=w2p.reshape(9, p_pad, p_pad).astype(jnp.bfloat16),   # tap index = kh*3+kw
        w3=w3p.astype(jnp.bfloat16),
        b1=b1p, b2=b2p, b3=b3p)


def bottleneck_pallas(x_pad, prep, nb=None):
    """x_pad: (N, H, W, C_PAD) bf16. Returns (N, H, W, C_PAD) bf16."""
    N, H, W, C_PAD = x_pad.shape
    P_PAD = prep["b1"].shape[1]
    NB = _pick_nb(N) if nb is None else nb
    assert N % NB == 0

    kernel = functools.partial(_bottleneck_kernel, NB=NB, H=H, W=W,
                               C_PAD=C_PAD, P_PAD=P_PAD)

    def full_spec(shape):
        nd = len(shape)
        return pl.BlockSpec(shape, lambda b, _nd=nd: (0,) * _nd)

    in_specs = [
        pl.BlockSpec((NB, H, W, C_PAD), lambda b: (b, 0, 0, 0)),
        full_spec(prep["w1"].shape), full_spec(prep["b1"].shape),
        full_spec(prep["w2"].shape), full_spec(prep["b2"].shape),
        full_spec(prep["w3"].shape), full_spec(prep["b3"].shape),
    ]
    out_spec = pl.BlockSpec((NB, H, W, C_PAD), lambda b: (b, 0, 0, 0))

    return pl.pallas_call(
        kernel,
        out_shape=jax.ShapeDtypeStruct((N, H, W, C_PAD), jnp.bfloat16),
        grid=(N // NB,),
        in_specs=in_specs,
        out_specs=out_spec,
        scratch_shapes=[pltpu.VMEM((NB, H + 2, W + 2, P_PAD), jnp.bfloat16)],
        compiler_params=pltpu.CompilerParams(
            dimension_semantics=("parallel",),
            vmem_limit_bytes=_vmem_bytes_estimate(NB, H, W, C_PAD, P_PAD)),
    )(x_pad, prep["w1"], prep["b1"], prep["w2"], prep["b2"], prep["w3"], prep["b3"])


def bottleneck_nchw(x_nchw, prep):
    """PyTorch-compatible interface: NCHW f32 in, NCHW f32 out.

    (When stacking blocks, prefer calling bottleneck_pallas directly on NHWC
    bf16 activations to avoid the per-call transposes/pads/casts.)
    """
    N, C, H, W = x_nchw.shape
    c_pad = prep["w1"].shape[0]
    x_nhwc = jnp.transpose(x_nchw, (0, 2, 3, 1)).astype(jnp.bfloat16)
    x_pad = jnp.pad(x_nhwc, ((0, 0), (0, 0), (0, 0), (0, c_pad - C)))
    y = bottleneck_pallas(x_pad, prep)
    return jnp.transpose(y[..., :C].astype(jnp.float32), (0, 3, 1, 2))


def make_params(key, inplanes, planes):
    """Deterministic parameter init matching the module's shapes (inference BN folded)."""
    k1, k2, k3 = jax.random.split(key, 3)
    eps = 1e-5

    def bn_fold(c, base):
        gamma = 1.0 + 0.01 * jnp.arange(c, dtype=jnp.float32)
        beta = 0.01 * jnp.arange(c, dtype=jnp.float32) - 0.02 * base
        mean = 0.02 * jnp.arange(c, dtype=jnp.float32)
        var = 1.0 + 0.03 * jnp.arange(c, dtype=jnp.float32)
        scale = gamma / jnp.sqrt(var + eps)
        bias = beta - mean * scale
        return scale.reshape(1, c), bias.reshape(1, c)

    # conv weights stored as (kh, kw,) cin x cout for the NHWC kernel
    w1 = 0.1 * jax.random.normal(k1, (inplanes, planes), jnp.float32)
    w2 = 0.1 * jax.random.normal(k2, (3, 3, planes, planes), jnp.float32)
    w3 = 0.1 * jax.random.normal(k3, (planes, planes * 4), jnp.float32)
    s1, b1 = bn_fold(planes, 1.0)
    s2, b2 = bn_fold(planes, 2.0)
    s3, b3 = bn_fold(planes * 4, 3.0)
    return dict(w1=w1, s1=s1, b1=b1, w2=w2, s2=s2, b2=b2, w3=w3, s3=s3, b3=b3)


def _reference_nchw_bf16(x_nchw, params):
    """Pure-JAX reference mirroring the kernel numerics:
    BN scale folded into weights, weights / inter-stage activations / final
    output rounded to bf16, f32 accumulation."""
    def r(v):
        return v.astype(jnp.bfloat16).astype(jnp.float32)

    x = r(jnp.transpose(x_nchw, (0, 2, 3, 1)))                      # NHWC
    w1 = r(params["w1"] * params["s1"])                             # (C_IN, P)
    w2 = r(params["w2"] * params["s2"])                             # (3,3,P,P)  HWIO
    w3 = r(params["w3"] * params["s3"])                             # (P, 4P)

    t1 = jnp.einsum("nhwc,cp->nhwp", x, w1) + params["b1"].reshape(1, 1, 1, -1)
    t1 = r(jnp.maximum(t1, 0.0))
    t2 = lax.conv_general_dilated(
        t1, w2, window_strides=(1, 1), padding="SAME",
        dimension_numbers=("NHWC", "HWIO", "NHWC"),
        preferred_element_type=jnp.float32) + params["b2"].reshape(1, 1, 1, -1)
    t2 = r(jnp.maximum(t2, 0.0))
    t3 = jnp.einsum("nhwp,pc->nhwc", t2, w3) + params["b3"].reshape(1, 1, 1, -1)
    out = r(jnp.maximum(t3 + x, 0.0))                               # kernel emits bf16
    return jnp.transpose(out, (0, 3, 1, 2))


def _reference_nchw_f32(x_nchw, params):
    """Full-f32 reference of the original module semantics (loose check)."""
    def conv(x, w_hwio, pad):
        return lax.conv_general_dilated(
            x, w_hwio, window_strides=(1, 1), padding=pad,
            dimension_numbers=("NCHW", "HWIO", "NCHW"),
            preferred_element_type=jnp.float32)

    w1 = params["w1"].reshape(1, 1, *params["w1"].shape)
    w2 = params["w2"]
    w3 = params["w3"].reshape(1, 1, *params["w3"].shape)

    def bn(x, s, b):
        return x * s.reshape(1, -1, 1, 1) + b.reshape(1, -1, 1, 1)

    out = jax.nn.relu(bn(conv(x_nchw, w1, "VALID"), params["s1"], params["b1"]))
    out = jax.nn.relu(bn(conv(out, w2, "SAME"), params["s2"], params["b2"]))
    out = bn(conv(out, w3, "VALID"), params["s3"], params["b3"])
    return jax.nn.relu(out + x_nchw)


if __name__ == "__main__":
    # Small shapes consistent with the module: inplanes = 4 * planes so that
    # the residual add in forward() is valid.
    N, INPLANES, H, W = 2, 16, 16, 16
    PLANES = INPLANES // 4

    key = jax.random.PRNGKey(0)
    kx, kp = jax.random.split(key)
    x = jax.random.normal(kx, (N, INPLANES, H, W), jnp.float32)   # NCHW like PyTorch
    params = make_params(kp, INPLANES, PLANES)

    # BN fold / pad / bf16 cast computed once, off the hot path.
    prep = prepare_params(params, INPLANES)

    fwd = jax.jit(bottleneck_nchw)
    y = jax.block_until_ready(fwd(x, prep))

    # Tight check vs. a reference with identical (bf16-rounded) numerics.
    # Tolerance covers one bf16 ulp of the final rounding (~0.4% relative).
    y_bf = jax.block_until_ready(_reference_nchw_bf16(x, params))
    np.testing.assert_allclose(np.asarray(y), np.asarray(y_bf), rtol=1e-2, atol=1e-2)

    # Loose check vs. the full-precision original-module semantics.
    y_f32 = jax.block_until_ready(_reference_nchw_f32(x, params))
    np.testing.assert_allclose(np.asarray(y), np.asarray(y_f32), rtol=6e-2, atol=6e-2)

    print("KERNEL_OK")
</pallas_src>

<mosaic_0001>
module attributes {stable_mosaic.version = 11 : i64} {
  func.func @_bottleneck_kernel(%arg0: i32, %arg1: memref<2x16x16x128xbf16, #tpu.memory_space<vmem>>, %arg2: memref<128x128xbf16, #tpu.memory_space<vmem>>, %arg3: memref<1x128xf32, #tpu.memory_space<vmem>>, %arg4: memref<9x128x128xbf16, #tpu.memory_space<vmem>>, %arg5: memref<1x128xf32, #tpu.memory_space<vmem>>, %arg6: memref<128x128xbf16, #tpu.memory_space<vmem>>, %arg7: memref<1x128xf32, #tpu.memory_space<vmem>>, %arg8: memref<2x16x16x128xbf16, #tpu.memory_space<vmem>>, %arg9: memref<2x18x18x128xbf16, #tpu.memory_space<vmem>>) attributes {dimension_semantics = [#tpu.dimension_semantics<parallel>], iteration_bounds = array<i64: 1>, scalar_prefetch = 0 : i64, scratch_operands = 1 : i64, tpu.core_type = #tpu.core_type<tc>, window_params = [{transform_indices = @transform_0, window_bounds = array<i64: 2, 16, 16, 128>}, {pipeline_mode = #tpu.pipeline_mode<synchronous>, transform_indices = @transform_1, window_bounds = array<i64: 128, 128>}, {pipeline_mode = #tpu.pipeline_mode<synchronous>, transform_indices = @transform_2, window_bounds = array<i64: 1, 128>}, {pipeline_mode = #tpu.pipeline_mode<synchronous>, transform_indices = @transform_3, window_bounds = array<i64: 9, 128, 128>}, {pipeline_mode = #tpu.pipeline_mode<synchronous>, transform_indices = @transform_4, window_bounds = array<i64: 1, 128>}, {pipeline_mode = #tpu.pipeline_mode<synchronous>, transform_indices = @transform_5, window_bounds = array<i64: 128, 128>}, {pipeline_mode = #tpu.pipeline_mode<synchronous>, transform_indices = @transform_6, window_bounds = array<i64: 1, 128>}, {transform_indices = @transform_7, window_bounds = array<i64: 2, 16, 16, 128>}]} {
    %c0 = arith.constant 0 : index
    %c0_0 = arith.constant 0 : index
    %c0_1 = arith.constant 0 : index
    %c0_2 = arith.constant 0 : index
    %0 = vector.load %arg1[%c0, %c0_0, %c0_1, %c0_2] : memref<2x16x16x128xbf16, #tpu.memory_space<vmem>>, vector<2x16x16x128xbf16>
    %1 = vector.shape_cast %0 : vector<2x16x16x128xbf16> to vector<512x128xbf16>
    %c0_3 = arith.constant 0 : index
    %c0_4 = arith.constant 0 : index
    %2 = vector.load %arg2[%c0_3, %c0_4] : memref<128x128xbf16, #tpu.memory_space<vmem>>, vector<128x128xbf16>
    %cst = arith.constant dense<0.000000e+00> : vector<512x128xf32>
    %3 = tpu.matmul %1, %2, %cst {dimension_numbers = #tpu.dot_dimension_numbers<[1], [0], [0], [1], [0, 0, 1, 1], [], []>} : vector<512x128xbf16>, vector<128x128xbf16>, vector<512x128xf32> -> vector<512x128xf32>
    %c0_5 = arith.constant 0 : index
    %c0_6 = arith.constant 0 : index
    %4 = vector.load %arg3[%c0_5, %c0_6] : memref<1x128xf32, #tpu.memory_space<vmem>>, vector<1x128xf32>
    %5 = vector.broadcast %4 : vector<1x128xf32> to vector<512x128xf32>
    %6 = arith.addf %3, %5 : vector<512x128xf32>
    %cst_7 = arith.constant 0.000000e+00 : f32
    %7 = vector.broadcast %cst_7 : f32 to vector<512x128xf32>
    %8 = arith.maximumf %6, %7 : vector<512x128xf32>
    %9 = arith.truncf %8 : vector<512x128xf32> to vector<512x128xbf16>
    %cst_8 = arith.constant 0.000000e+00 : bf16
    %10 = vector.broadcast %cst_8 : bf16 to vector<2x1x18x128xbf16>
    %c0_9 = arith.constant 0 : index
    %c0_10 = arith.constant 0 : index
    %c0_11 = arith.constant 0 : index
    %c0_12 = arith.constant 0 : index
    %11 = vector.load %arg9[%c0_9, %c0_10, %c0_11, %c0_12] : memref<2x18x18x128xbf16, #tpu.memory_space<vmem>>, vector<2x1x18x128xbf16>
    tpu.vector_store %arg9[%c0_9, %c0_10, %c0_11, %c0_12], %10 {strides = array<i32>} : memref<2x18x18x128xbf16, #tpu.memory_space<vmem>>, vector<2x1x18x128xbf16>,
    %cst_13 = arith.constant 0.000000e+00 : bf16
    %12 = vector.broadcast %cst_13 : bf16 to vector<2x1x18x128xbf16>
    %c0_14 = arith.constant 0 : index
    %c17 = arith.constant 17 : index
    %c0_15 = arith.constant 0 : index
    %c0_16 = arith.constant 0 : index
    %13 = vector.load %arg9[%c0_14, %c17, %c0_15, %c0_16] : memref<2x18x18x128xbf16, #tpu.memory_space<vmem>>, vector<2x1x18x128xbf16>
    tpu.vector_store %arg9[%c0_14, %c17, %c0_15, %c0_16], %12 {strides = array<i32>} : memref<2x18x18x128xbf16, #tpu.memory_space<vmem>>, vector<2x1x18x128xbf16>,
    %cst_17 = arith.constant 0.000000e+00 : bf16
    %14 = vector.broadcast %cst_17 : bf16 to vector<2x16x1x128xbf16>
    %c0_18 = arith.constant 0 : index
    %c1 = arith.constant 1 : index
    %c0_19 = arith.constant 0 : index
    %c0_20 = arith.constant 0 : index
    %15 = vector.load %arg9[%c0_18, %c1, %c0_19, %c0_20] : memref<2x18x18x128xbf16, #tpu.memory_space<vmem>>, vector<2x16x1x128xbf16>
    tpu.vector_store %arg9[%c0_18, %c1, %c0_19, %c0_20], %14 {strides = array<i32>} : memref<2x18x18x128xbf16, #tpu.memory_space<vmem>>, vector<2x16x1x128xbf16>,
    %cst_21 = arith.constant 0.000000e+00 : bf16
    %16 = vector.broadcast %cst_21 : bf16 to vector<2x16x1x128xbf16>
    %c0_22 = arith.constant 0 : index
    %c1_23 = arith.constant 1 : index
    %c17_24 = arith.constant 17 : index
    %c0_25 = arith.constant 0 : index
    %17 = vector.load %arg9[%c0_22, %c1_23, %c17_24, %c0_25] : memref<2x18x18x128xbf16, #tpu.memory_space<vmem>>, vector<2x16x1x128xbf16>
    tpu.vector_store %arg9[%c0_22, %c1_23, %c17_24, %c0_25], %16 {strides = array<i32>} : memref<2x18x18x128xbf16, #tpu.memory_space<vmem>>, vector<2x16x1x128xbf16>,
    %18 = vector.shape_cast %9 : vector<512x128xbf16> to vector<2x16x16x128xbf16>
    %c0_26 = arith.constant 0 : index
    %c1_27 = arith.constant 1 : index
    %c1_28 = arith.constant 1 : index
    %c0_29 = arith.constant 0 : index
    %19 = vector.load %arg9[%c0_26, %c1_27, %c1_28, %c0_29] : memref<2x18x18x128xbf16, #tpu.memory_space<vmem>>, vector<2x16x16x128xbf16>
    tpu.vector_store %arg9[%c0_26, %c1_27, %c1_28, %c0_29], %18 {strides = array<i32>} : memref<2x18x18x128xbf16, #tpu.memory_space<vmem>>, vector<2x16x16x128xbf16>,
    %c0_30 = arith.constant 0 : index
    %c0_31 = arith.constant 0 : index
    %c0_32 = arith.constant 0 : index
    %c0_33 = arith.constant 0 : index
    %20 = vector.load %arg9[%c0_30, %c0_31, %c0_32, %c0_33] : memref<2x18x18x128xbf16, #tpu.memory_space<vmem>>, vector<2x16x16x128xbf16>
    %21 = vector.shape_cast %20 : vector<2x16x16x128xbf16> to vector<512x128xbf16>
    %c0_34 = arith.constant 0 : index
    %c0_35 = arith.constant 0 : index
    %c0_36 = arith.constant 0 : index
    %22 = vector.load %arg4[%c0_34, %c0_35, %c0_36] : memref<9x128x128xbf16, #tpu.memory_space<vmem>>, vector<1x128x128xbf16>
    %23 = vector.shape_cast %22 : vector<1x128x128xbf16> to vector<128x128xbf16>
    %cst_37 = arith.constant dense<0.000000e+00> : vector<512x128xf32>
    %24 = tpu.matmul %21, %23, %cst_37 {dimension_numbers = #tpu.dot_dimension_numbers<[1], [0], [0], [1], [0, 0, 1, 1], [], []>} : vector<512x128xbf16>, vector<128x128xbf16>, vector<512x128xf32> -> vector<512x128xf32>
    %c0_38 = arith.constant 0 : index
    %c0_39 = arith.constant 0 : index
    %c1_40 = arith.constant 1 : index
    %c0_41 = arith.constant 0 : index
    %25 = vector.load %arg9[%c0_38, %c0_39, %c1_40, %c0_41] : memref<2x18x18x128xbf16, #tpu.memory_space<vmem>>, vector<2x16x16x128xbf16>
    %26 = vector.shape_cast %25 : vector<2x16x16x128xbf16> to vector<512x128xbf16>
    %c1_42 = arith.constant 1 : index
    %c0_43 = arith.constant 0 : index
    %c0_44 = arith.constant 0 : index
    %27 = vector.load %arg4[%c1_42, %c0_43, %c0_44] : memref<9x128x128xbf16, #tpu.memory_space<vmem>>, vector<1x128x128xbf16>
    %28 = vector.shape_cast %27 : vector<1x128x128xbf16> to vector<128x128xbf16>
    %cst_45 = arith.constant dense<0.000000e+00> : vector<512x128xf32>
    %29 = tpu.matmul %26, %28, %cst_45 {dimension_numbers = #tpu.dot_dimension_numbers<[1], [0], [0], [1], [0, 0, 1, 1], [], []>} : vector<512x128xbf16>, vector<128x128xbf16>, vector<512x128xf32> -> vector<512x128xf32>
    %30 = arith.addf %24, %29 : vector<512x128xf32>
    %c0_46 = arith.constant 0 : index
    %c0_47 = arith.constant 0 : index
    %c2 = arith.constant 2 : index
    %c0_48 = arith.constant 0 : index
    %31 = vector.load %arg9[%c0_46, %c0_47, %c2, %c0_48] : memref<2x18x18x128xbf16, #tpu.memory_space<vmem>>, vector<2x16x16x128xbf16>
    %32 = vector.shape_cast %31 : vector<2x16x16x128xbf16> to vector<512x128xbf16>
    %c2_49 = arith.constant 2 : index
    %c0_50 = arith.constant 0 : index
    %c0_51 = arith.constant 0 : index
    %33 = vector.load %arg4[%c2_49, %c0_50, %c0_51] : memref<9x128x128xbf16, #tpu.memory_space<vmem>>, vector<1x128x128xbf16>
    %34 = vector.shape_cast %33 : vector<1x128x128xbf16> to vector<128x128xbf16>
    %cst_52 = arith.constant dense<0.000000e+00> : vector<512x128xf32>
    %35 = tpu.matmul %32, %34, %cst_52 {dimension_numbers = #tpu.dot_dimension_numbers<[1], [0], [0], [1], [0, 0, 1, 1], [], []>} : vector<512x128xbf16>, vector<128x128xbf16>, vector<512x128xf32> -> vector<512x128xf32>
    %36 = arith.addf %30, %35 : vector<512x128xf32>
    %c0_53 = arith.constant 0 : index
    %c1_54 = arith.constant 1 : index
    %c0_55 = arith.constant 0 : index
    %c0_56 = arith.constant 0 : index
    %37 = vector.load %arg9[%c0_53, %c1_54, %c0_55, %c0_56] : memref<2x18x18x128xbf16, #tpu.memory_space<vmem>>, vector<2x16x16x128xbf16>
    %38 = vector.shape_cast %37 : vector<2x16x16x128xbf16> to vector<512x128xbf16>
    %c3 = arith.constant 3 : index
    %c0_57 = arith.constant 0 : index
    %c0_58 = arith.constant 0 : index
    %39 = vector.load %arg4[%c3, %c0_57, %c0_58] : memref<9x128x128xbf16, #tpu.memory_space<vmem>>, vector<1x128x128xbf16>
    %40 = vector.shape_cast %39 : vector<1x128x128xbf16> to vector<128x128xbf16>
    %cst_59 = arith.constant dense<0.000000e+00> : vector<512x128xf32>
    %41 = tpu.matmul %38, %40, %cst_59 {dimension_numbers = #tpu.dot_dimension_numbers<[1], [0], [0], [1], [0, 0, 1, 1], [], []>} : vector<512x128xbf16>, vector<128x128xbf16>, vector<512x128xf32> -> vector<512x128xf32>
    %42 = arith.addf %36, %41 : vector<512x128xf32>
    %c0_60 = arith.constant 0 : index
    %c1_61 = arith.constant 1 : index
    %c1_62 = arith.constant 1 : index
    %c0_63 = arith.constant 0 : index
    %43 = vector.load %arg9[%c0_60, %c1_61, %c1_62, %c0_63] : memref<2x18x18x128xbf16, #tpu.memory_space<vmem>>, vector<2x16x16x128xbf16>
    %44 = vector.shape_cast %43 : vector<2x16x16x128xbf16> to vector<512x128xbf16>
    %c4 = arith.constant 4 : index
    %c0_64 = arith.constant 0 : index
    %c0_65 = arith.constant 0 : index
    %45 = vector.load %arg4[%c4, %c0_64, %c0_65] : memref<9x128x128xbf16, #tpu.memory_space<vmem>>, vector<1x128x128xbf16>
    %46 = vector.shape_cast %45 : vector<1x128x128xbf16> to vector<128x128xbf16>
    %cst_66 = arith.constant dense<0.000000e+00> : vector<512x128xf32>
    %47 = tpu.matmul %44, %46, %cst_66 {dimension_numbers = #tpu.dot_dimension_numbers<[1], [0], [0], [1], [0, 0, 1, 1], [], []>} : vector<512x128xbf16>, vector<128x128xbf16>, vector<512x128xf32> -> vector<512x128xf32>
    %48 = arith.addf %42, %47 : vector<512x128xf32>
    %c0_67 = arith.constant 0 : index
    %c1_68 = arith.constant 1 : index
    %c2_69 = arith.constant 2 : index
    %c0_70 = arith.constant 0 : index
    %49 = vector.load %arg9[%c0_67, %c1_68, %c2_69, %c0_70] : memref<2x18x18x128xbf16, #tpu.memory_space<vmem>>, vector<2x16x16x128xbf16>
    %50 = vector.shape_cast %49 : vector<2x16x16x128xbf16> to vector<512x128xbf16>
    %c5 = arith.constant 5 : index
    %c0_71 = arith.constant 0 : index
    %c0_72 = arith.constant 0 : index
    %51 = vector.load %arg4[%c5, %c0_71, %c0_72] : memref<9x128x128xbf16, #tpu.memory_space<vmem>>, vector<1x128x128xbf16>
    %52 = vector.shape_cast %51 : vector<1x128x128xbf16> to vector<128x128xbf16>
    %cst_73 = arith.constant dense<0.000000e+00> : vector<512x128xf32>
    %53 = tpu.matmul %50, %52, %cst_73 {dimension_numbers = #tpu.dot_dimension_numbers<[1], [0], [0], [1], [0, 0, 1, 1], [], []>} : vector<512x128xbf16>, vector<128x128xbf16>, vector<512x128xf32> -> vector<512x128xf32>
    %54 = arith.addf %48, %53 : vector<512x128xf32>
    %c0_74 = arith.constant 0 : index
    %c2_75 = arith.constant 2 : index
    %c0_76 = arith.constant 0 : index
    %c0_77 = arith.constant 0 : index
    %55 = vector.load %arg9[%c0_74, %c2_75, %c0_76, %c0_77] : memref<2x18x18x128xbf16, #tpu.memory_space<vmem>>, vector<2x16x16x128xbf16>
    %56 = vector.shape_cast %55 : vector<2x16x16x128xbf16> to vector<512x128xbf16>
    %c6 = arith.constant 6 : index
    %c0_78 = arith.constant 0 : index
    %c0_79 = arith.constant 0 : index
    %57 = vector.load %arg4[%c6, %c0_78, %c0_79] : memref<9x128x128xbf16, #tpu.memory_space<vmem>>, vector<1x128x128xbf16>
    %58 = vector.shape_cast %57 : vector<1x128x128xbf16> to vector<128x128xbf16>
    %cst_80 = arith.constant dense<0.000000e+00> : vector<512x128xf32>
    %59 = tpu.matmul %56, %58, %cst_80 {dimension_numbers = #tpu.dot_dimension_numbers<[1], [0], [0], [1], [0, 0, 1, 1], [], []>} : vector<512x128xbf16>, vector<128x128xbf16>, vector<512x128xf32> -> vector<512x128xf32>
    %60 = arith.addf %54, %59 : vector<512x128xf32>
    %c0_81 = arith.constant 0 : index
    %c2_82 = arith.constant 2 : index
    %c1_83 = arith.constant 1 : index
    %c0_84 = arith.constant 0 : index
    %61 = vector.load %arg9[%c0_81, %c2_82, %c1_83, %c0_84] : memref<2x18x18x128xbf16, #tpu.memory_space<vmem>>, vector<2x16x16x128xbf16>
    %62 = vector.shape_cast %61 : vector<2x16x16x128xbf16> to vector<512x128xbf16>
    %c7 = arith.constant 7 : index
    %c0_85 = arith.constant 0 : index
    %c0_86 = arith.constant 0 : index
    %63 = vector.load %arg4[%c7, %c0_85, %c0_86] : memref<9x128x128xbf16, #tpu.memory_space<vmem>>, vector<1x128x128xbf16>
    %64 = vector.shape_cast %63 : vector<1x128x128xbf16> to vector<128x128xbf16>
    %cst_87 = arith.constant dense<0.000000e+00> : vector<512x128xf32>
    %65 = tpu.matmul %62, %64, %cst_87 {dimension_numbers = #tpu.dot_dimension_numbers<[1], [0], [0], [1], [0, 0, 1, 1], [], []>} : vector<512x128xbf16>, vector<128x128xbf16>, vector<512x128xf32> -> vector<512x128xf32>
    %66 = arith.addf %60, %65 : vector<512x128xf32>
    %c0_88 = arith.constant 0 : index
    %c2_89 = arith.constant 2 : index
    %c2_90 = arith.constant 2 : index
    %c0_91 = arith.constant 0 : index
    %67 = vector.load %arg9[%c0_88, %c2_89, %c2_90, %c0_91] : memref<2x18x18x128xbf16, #tpu.memory_space<vmem>>, vector<2x16x16x128xbf16>
    %68 = vector.shape_cast %67 : vector<2x16x16x128xbf16> to vector<512x128xbf16>
    %c8 = arith.constant 8 : index
    %c0_92 = arith.constant 0 : index
    %c0_93 = arith.constant 0 : index
    %69 = vector.load %arg4[%c8, %c0_92, %c0_93] : memref<9x128x128xbf16, #tpu.memory_space<vmem>>, vector<1x128x128xbf16>
    %70 = vector.shape_cast %69 : vector<1x128x128xbf16> to vector<128x128xbf16>
    %cst_94 = arith.constant dense<0.000000e+00> : vector<512x128xf32>
    %71 = tpu.matmul %68, %70, %cst_94 {dimension_numbers = #tpu.dot_dimension_numbers<[1], [0], [0], [1], [0, 0, 1, 1], [], []>} : vector<512x128xbf16>, vector<128x128xbf16>, vector<512x128xf32> -> vector<512x128xf32>
    %72 = arith.addf %66, %71 : vector<512x128xf32>
    %c0_95 = arith.constant 0 : index
    %c0_96 = arith.constant 0 : index
    %73 = vector.load %arg5[%c0_95, %c0_96] : memref<1x128xf32, #tpu.memory_space<vmem>>, vector<1x128xf32>
    %74 = vector.broadcast %73 : vector<1x128xf32> to vector<512x128xf32>
    %75 = arith.addf %72, %74 : vector<512x128xf32>
    %cst_97 = arith.constant 0.000000e+00 : f32
    %76 = vector.broadcast %cst_97 : f32 to vector<512x128xf32>
    %77 = arith.maximumf %75, %76 : vector<512x128xf32>
    %78 = arith.truncf %77 : vector<512x128xf32> to vector<512x128xbf16>
    %c0_98 = arith.constant 0 : index
    %c0_99 = arith.constant 0 : index
    %79 = vector.load %arg6[%c0_98, %c0_99] : memref<128x128xbf16, #tpu.memory_space<vmem>>, vector<128x128xbf16>
    %cst_100 = arith.constant dense<0.000000e+00> : vector<512x128xf32>
    %80 = tpu.matmul %78, %79, %cst_100 {dimension_numbers = #tpu.dot_dimension_numbers<[1], [0], [0], [1], [0, 0, 1, 1], [], []>} : vector<512x128xbf16>, vector<128x128xbf16>, vector<512x128xf32> -> vector<512x128xf32>
    %c0_101 = arith.constant 0 : index
    %c0_102 = arith.constant 0 : index
    %81 = vector.load %arg7[%c0_101, %c0_102] : memref<1x128xf32, #tpu.memory_space<vmem>>, vector<1x128xf32>
    %82 = vector.broadcast %81 : vector<1x128xf32> to vector<512x128xf32>
    %83 = arith.addf %80, %82 : vector<512x128xf32>
    %84 = arith.extf %1 : vector<512x128xbf16> to vector<512x128xf32>
    %85 = arith.addf %83, %84 : vector<512x128xf32>
    %cst_103 = arith.constant 0.000000e+00 : f32
    %86 = vector.broadcast %cst_103 : f32 to vector<512x128xf32>
    %87 = arith.maximumf %85, %86 : vector<512x128xf32>
    %88 = vector.shape_cast %87 : vector<512x128xf32> to vector<2x16x16x128xf32>
    %89 = arith.truncf %88 : vector<2x16x16x128xf32> to vector<2x16x16x128xbf16>
    %c0_104 = arith.constant 0 : index
    %c0_105 = arith.constant 0 : index
    %c0_106 = arith.constant 0 : index
    %c0_107 = arith.constant 0 : index
    %90 = vector.load %arg8[%c0_104, %c0_105, %c0_106, %c0_107] : memref<2x16x16x128xbf16, #tpu.memory_space<vmem>>, vector<2x16x16x128xbf16>
    tpu.vector_store %arg8[%c0_104, %c0_105, %c0_106, %c0_107], %89 {strides = array<i32>} : memref<2x16x16x128xbf16, #tpu.memory_space<vmem>>, vector<2x16x16x128xbf16>,
    return
  }
  func.func @transform_0(%arg0: i32) -> (i32, i32, i32, i32) {
    %c0_i32 = arith.constant 0 : i32
    %c0_i32_0 = arith.constant 0 : i32
    %c0_i32_1 = arith.constant 0 : i32
    %c0_i32_2 = arith.constant 0 : i32
    return %arg0, %c0_i32, %c0_i32_0, %c0_i32_1 : i32, i32, i32, i32
  }
  func.func @transform_1(%arg0: i32) -> (i32, i32) {
    %c0_i32 = arith.constant 0 : i32
    %c0_i32_0 = arith.constant 0 : i32
    %c0_i32_1 = arith.constant 0 : i32
    return %c0_i32, %c0_i32_0 : i32, i32
  }
  func.func @transform_2(%arg0: i32) -> (i32, i32) {
    %c0_i32 = arith.constant 0 : i32
    %c0_i32_0 = arith.constant 0 : i32
    %c0_i32_1 = arith.constant 0 : i32
    return %c0_i32, %c0_i32_0 : i32, i32
  }
  func.func @transform_3(%arg0: i32) -> (i32, i32, i32) {
    %c0_i32 = arith.constant 0 : i32
    %c0_i32_0 = arith.constant 0 : i32
    %c0_i32_1 = arith.constant 0 : i32
    %c0_i32_2 = arith.constant 0 : i32
    return %c0_i32, %c0_i32_0, %c0_i32_1 : i32, i32, i32
  }
  func.func @transform_4(%arg0: i32) -> (i32, i32) {
    %c0_i32 = arith.constant 0 : i32
    %c0_i32_0 = arith.constant 0 : i32
    %c0_i32_1 = arith.constant 0 : i32
    return %c0_i32, %c0_i32_0 : i32, i32
  }
  func.func @transform_5(%arg0: i32) -> (i32, i32) {
    %c0_i32 = arith.constant 0 : i32
    %c0_i32_0 = arith.constant 0 : i32
    %c0_i32_1 = arith.constant 0 : i32
    return %c0_i32, %c0_i32_0 : i32, i32
  }
  func.func @transform_6(%arg0: i32) -> (i32, i32) {
    %c0_i32 = arith.constant 0 : i32
    %c0_i32_0 = arith.constant 0 : i32
    %c0_i32_1 = arith.constant 0 : i32
    return %c0_i32, %c0_i32_0 : i32, i32
  }
  func.func @transform_7(%arg0: i32) -> (i32, i32, i32, i32) {
    %c0_i32 = arith.constant 0 : i32
    %c0_i32_0 = arith.constant 0 : i32
    %c0_i32_1 = arith.constant 0 : i32
    %c0_i32_2 = arith.constant 0 : i32
    return %arg0, %c0_i32, %c0_i32_0, %c0_i32_1 : i32, i32, i32, i32
  }
}

</mosaic_0001>

<bundles_post_ra>
// kernel: bottleneck_nchw.1
= control target key start
LH: loop header
LB: loop body
LE: loop exit
PB: predicated region body
PF: predicated region fallthrough
CT: control target
= control target key end

     0   :  { %vm662_vm0 = vcmask 1040384   ;;  %vm663_vm1 = vsmask.f32 256  ;;  %v665_v25 = vld [vmem:[#allocation2 + $0xc] sm:$0x1]  ;;  %v11748_v29 = vmov 0   ;;  %s15757_s1 = inlined_call_operand.vmem [shape: bf16[128,128], index: 1, kind: input, shape index: {}]   ;;  %s15758_s2 = inlined_call_operand.vmem [shape: f32[1,128], index: 2, kind: input, shape index: {}]   ;;  %s15759_s0 = inlined_call_operand.vmem [shape: bf16[2,16,16,128], index: 0, kind: input, shape index: {}]   ;;  %s15760_s3 = inlined_call_operand.vmem [shape: bf16[9,128,128], index: 3, kind: input, shape index: {}]   ;;  %s15761_s5 = inlined_call_operand.vmem [shape: bf16[128,128], index: 5, kind: input, shape index: {}]   ;;  %s15762_s4 = inlined_call_operand.vmem [shape: f32[1,128], index: 4, kind: input, shape index: {}]   ;;  %s15763_s6 = inlined_call_operand.vmem [shape: f32[1,128], index: 6, kind: input, shape index: {}]   ;;  %s15764_s7 = inlined_call_operand.vmem [shape: bf16[2,16,16,128], index: 7, kind: output, shape index: {}]  }
   0x1   :  { %v11227_v0 = vld [vmem:[%s15757_s1 + $0x38] sm:$0xff]  ;;  %v11226_v1 = vld [vmem:[%s15757_s1 + $0x30] sm:$0xff]  ;;  %v11225_v2 = vld [vmem:[%s15757_s1 + $0x28] sm:$0xff]  ;;  %648 = vst [vmem:[#allocation2] sm:$0xf] %v11748_v29  ;;  %vm1501_vm8 = vcmask 1043456  }
   0x2   :  { %351 = vmatpush.bf16.msra.mxu0 %v11227_v0  ;;  %11595 = vmatpush.bf16.msra.mxu3 %v11227_v0  ;;  %v11224_v3 = vld [vmem:[%s15757_s1 + $0x20] sm:$0xff]  ;;  %v11223_v4 = vld [vmem:[%s15757_s1 + $0x18] sm:$0xff]  ;;  %v11222_v5 = vld [vmem:[%s15757_s1 + $0x10] sm:$0xff]  ;;  %vm761_vm3 = vsmask.f32 7938  ;;  %vm3477_vm12 = vcmask 1042432  }
   0x3   :  { %v11221_v6 = vld [vmem:[%s15757_s1 + $0x8] sm:$0xff]  ;;  %v11220_v7 = vld [vmem:[%s15757_s1] sm:$0xff]  ;;  %v11190_v10 = vld [vmem:[%s15759_s0 + $0x10] sm:$0xff]  ;;  %649 = vst [vmem:[#allocation2 + $0x4] sm:$0xf] %v11748_v29  ;;  %vm3478_vm13 = vcmask 1046532  }
   0x4   :  { %v11188_v8 = vld [vmem:[%s15759_s0] sm:$0xff]  ;;  %v11189_v9 = vld [vmem:[%s15759_s0 + $0x8] sm:$0xff]  ;;  %v11191_v11 = vld [vmem:[%s15759_s0 + $0x18] sm:$0xff]  ;;  %650 = vst [vmem:[#allocation2 + $0x8] sm:$0x1] %v11748_v29 }
   0x5   :  { %v11192_v12 = vld [vmem:[%s15759_s0 + $0x20] sm:$0xff]  ;;  %v11267_v13 = vld [vmem:[%s15760_s3 + $0x38] sm:$0xff]  ;;  %v11193_v14 = vld [vmem:[%s15759_s0 + $0x28] sm:$0xff]  ;;  %651 = vst [vmem:[#allocation2 + $0xd8] sm:$0xf] %v11748_v29 }
   0x6   :  { %352 = vmatpush.bf16.msra.mxu0 %v11226_v1  ;;  %11596 = vmatpush.bf16.msra.mxu3 %v11226_v1  ;;  %v11266_v15 = vld [vmem:[%s15760_s3 + $0x30] sm:$0xff]  ;;  %v11275_v16 = vld [vmem:[%s15760_s3 + $0x78] sm:$0xff]  ;;  %v11265_v17 = vld [vmem:[%s15760_s3 + $0x28] sm:$0xff]  ;;  %652 = vst [vmem:[#allocation2 + $0xdc] sm:$0xf] %v11748_v29 }
   0x7   :  { %3212 = vmatpush.bf16.msra.mxu2 %v11267_v13  ;;  %2803 = vmatpush.bf16.msra.mxu1 %v11275_v16  ;;  %v11264_v18 = vld [vmem:[%s15760_s3 + $0x20] sm:$0xff]  ;;  %v11274_v19 = vld [vmem:[%s15760_s3 + $0x70] sm:$0xff]  ;;  %v11263_v20 = vld [vmem:[%s15760_s3 + $0x18] sm:$0xff]  ;;  %653 = vst [vmem:[#allocation2 + $0xe0] sm:$0x1] %v11748_v29 }
   0x8   :  { %v11194_v21 = vld [vmem:[%s15759_s0 + $0x30] sm:$0xff]  ;;  %v11273_v22 = vld [vmem:[%s15760_s3 + $0x68] sm:$0xff]  ;;  %vm11863_vm2 = vmand %vm662_vm0, %vm663_vm1  ;;  %655 = vst [vmem:[#allocation2 + $0xcc] sm:$0xf] %v11748_v29  ;;  %vm1839_vm5 = vsmask.f32 3328 }
   0x9   :  { %v11262_v23 = vld [vmem:[%s15760_s3 + $0x10] sm:$0xff]  ;;  %v666_v26 = vsel %vm11863_vm2, 0, %v665_v25  ;;  %v11272_v27 = vld [vmem:[%s15760_s3 + $0x60] sm:$0xff]  ;;  %v11261_v28 = vld [vmem:[%s15760_s3 + $0x8] sm:$0xff]  ;;  %656 = vst [vmem:[#allocation2 + $0xd0] sm:$0xf] %v11748_v29 }
   0xa   :  { %353 = vmatpush.bf16.msra.mxu0 %v11225_v2  ;;  %11597 = vmatpush.bf16.msra.mxu3 %v11225_v2  ;;  %667 = vst [vmem:[#allocation2 + $0xc] sm:$0x1] %v666_v26  ;;  %vm11877_vm4 = vmand %vm662_vm0, %vm761_vm3  ;;  %v763_v31 = vld [vmem:[#allocation2 + $0x14] sm:$0x1]  ;;  %v11271_v32 = vld [vmem:[%s15760_s3 + $0x58] sm:$0xff] }
   0xb   :  { %3213 = vmatpush.bf16.msra.mxu2 %v11266_v15  ;;  %2804 = vmatpush.bf16.msra.mxu1 %v11274_v19  ;;  %v764_v33 = vsel %vm11877_vm4, 0, %v763_v31  ;;  %v11260_v34 = vld [vmem:[%s15760_s3] sm:$0xff]  ;;  %v11195_v35 = vld [vmem:[%s15759_s0 + $0x38] sm:$0xff]  ;;  %v11270_v37 = vld [vmem:[%s15760_s3 + $0x50] sm:$0xff]  ;;  %657 = vst [vmem:[#allocation2 + $0xd4] sm:$0x1] %v11748_v29 }
   0xc   :  { %765 = vst [vmem:[#allocation2 + $0x14] sm:$0x1] %v764_v33  ;;  %v1727_v36 = vld [vmem:[#allocation2] sm:$0xf]  ;;  %v1728_v41 = vld [vmem:[#allocation2 + $0x4] sm:$0xf]  ;;  %vm11926_vm9 = vmand %vm1501_vm8, %vm761_vm3 }
   0xd   :  { %v11228_v38 = vld [vmem:[#allocation2] sm:$0xff]  ;;  %v1843_v39 = vshrl.u32 %v1727_v36, 16  ;;  %v1846_v40 = vshll.u32 %v1727_v36, 16  ;;  %658 = vst [vmem:[#allocation2 + $0x1a4] sm:$0xf] %v11748_v29  ;;  %v1852_v44 = vshll.u32 %v1728_v41, 16  ;;  %vm12456_vm14 = vmor %vm3477_vm12, %vm3478_vm13 }
   0xe   :  { %354 = vmatpush.bf16.msra.mxu0 %v11224_v3  ;;  %11598 = vmatpush.bf16.msra.mxu3 %v11224_v3  ;;  %v1856_v45 = vshrl.u32 %v1728_v41, 16  ;;  %659 = vst [vmem:[#allocation2 + $0x1a8] sm:$0xf] %v11748_v29  ;;  %v1807_v46 = vld [vmem:[#allocation2 + $0x8] sm:$0x1]  ;;  %v11268_v58 = vld [vmem:[%s15760_s3 + $0x40] sm:$0xff] }
   0xf   :  { %3214 = vmatpush.bf16.msra.mxu2 %v11265_v17  ;;  %2805 = vmatpush.bf16.msra.mxu1 %v11273_v22  ;;  %v1845_v42 = vrot.slane %v1843_v39, 4  ;;  %v1848_v43 = vrot.slane %v1846_v40, 5  ;;  %660 = vst [vmem:[#allocation2 + $0x1ac] sm:$0x1] %v11748_v29  ;;  %v11269_v47 = vld [vmem:[%s15760_s3 + $0x48] sm:$0xff]  ;;  %v1854_v49 = vrot.slane %v1852_v44, 5 }
  0x10   :  { %v1858_v50 = vrot.slane %v1856_v45, 4  ;;  %v1862_v51 = vshll.u32 %v1807_v46, 16  ;;  %v668_v52 = vld [vmem:[#allocation2 + $0x18] sm:$0x1]  ;;  %vm1840_vm6 = vsmask.f32 7440 }
  0x11   :  { %v1849_v48 = vor.u32 %v1848_v43, %v1845_v42  ;;  %v669_v53 = vsel %vm11863_vm2, 0, %v668_v52  ;;  %vm11900_vm7 = vmor %vm1839_vm5, %vm1840_vm6  ;;  %v766_v0 = vld [vmem:[#allocation2 + $0x20] sm:$0x1]  ;;  %v1503_v17 = vld [vmem:[#allocation2 + $0xc] sm:$0xf] }
  0x12   :  { %355 = vmatpush.bf16.msra.mxu0 %v11223_v4  ;;  %11599 = vmatpush.bf16.msra.mxu3 %v11223_v4  ;;  %670 = vst [vmem:[#allocation2 + $0x18] sm:$0x1] %v669_v53  ;;  %v1859_v56 = vor.u32 %v1858_v50, %v1854_v49  ;;  %v1864_v57 = vrot.slane %v1862_v51, 5  ;;  %v11914_v1 = vld [vmem:[%s15758_s2] ss:$0 sm:$0xff]  ;;  %v767_v2 = vsel %vm11877_vm4, 0, %v766_v0 }
  0x13   :  { %3215 = vmatpush.bf16.msra.mxu2 %v11264_v18  ;;  %2806 = vmatpush.bf16.msra.mxu1 %v11272_v27  ;;  %v1850_v54 = vrot.slane %v1849_v48, 4  ;;  %768 = vst [vmem:[#allocation2 + $0x20] sm:$0x1] %v767_v2  ;;  %v11196_v4 = vld [vmem:[%s15759_s0 + $0x40] sm:$0xff]  ;;  %vm859_vm10 = vsmask.f32 4368 }
  0x14   :  { %v1860_v60 = vrot.slane %v1859_v56, 4  ;;  %v11197_v26 = vld [vmem:[%s15759_s0 + $0x48] sm:$0xff]  ;;  %vm11939_vm11 = vmor %vm663_vm1, %vm859_vm10  ;;  %v1507_v33 = vld [vmem:[#allocation2 + $0x14] sm:$0x1] }
  0x15   :  { %v1855_v59 = vsel %vm11900_vm7, %v1850_v54, %v1854_v49 }
  0x16   :  { %356 = vmatpush.bf16.msra.mxu0 %v11222_v5  ;;  %11600 = vmatpush.bf16.msra.mxu3 %v11222_v5  ;;  %v2627_v61 = vunpack.c.l.b16 %v1855_v59  ;;  %v1865_v62 = vsel %vm11900_vm7, %v1860_v60, %v1864_v57  ;;  %v772_v57 = vld [vmem:[#allocation2 + $0x38] sm:$0x1] }
  0x17   :  { %3216 = vmatpush.bf16.msra.mxu2 %v11263_v20  ;;  %2807 = vmatpush.bf16.msra.mxu1 %v11271_v32  ;;  %v2628_v63 = vunpack.c.l.b16 %v1865_v62  ;;  %v769_v20 = vld [vmem:[#allocation2 + $0x2c] sm:$0x1]  ;;  %v773_v62 = vsel %vm11877_vm4, 0, %v772_v57 }
  0x18   :  { %774 = vst [vmem:[#allocation2 + $0x38] sm:$0x1] %v773_v62 }
  0x19   :  { %v2691_v3 = vpack.c.b16 %v2628_v63, %v2627_v61  ;;  %v1510_v51 = vld [vmem:[#allocation2 + $0x18] sm:$0xf] }
  0x1a   :  { %357 = vmatpush.bf16.msra.mxu0 %v11221_v6  ;;  %11601 = vmatpush.bf16.msra.mxu3 %v11221_v6 }
  0x1b   :  { %3217 = vmatpush.bf16.msra.mxu2 %v11262_v23  ;;  %2808 = vmatpush.bf16.msra.mxu1 %v11270_v37  ;;  %v770_v23 = vsel %vm11877_vm4, 0, %v769_v20 }
  0x1c   :  { %771 = vst [vmem:[#allocation2 + $0x2c] sm:$0x1] %v770_v23 }
  0x1e   :  { %358 = vmatpush.bf16.msra.mxu0 %v11220_v7  ;;  %11602 = vmatpush.bf16.msra.mxu3 %v11220_v7 }
  0x1f   :  { %3218 = vmatpush.bf16.msra.mxu2 %v11261_v28  ;;  %2809 = vmatpush.bf16.msra.mxu1 %v11269_v47 }
  0x21   :  { %359 = vmatmul.bf16.vlgmr.msra.gmra.mxu0 %v11188_v8  ;;  %v671_v8 = vld [vmem:[#allocation2 + $0x24] sm:$0x1] }
  0x22   :  { %11603 = vmatpush.bf16.msrb.mxu3 %v11275_v16 }
  0x23   :  { %3219 = vmatpush.bf16.msra.mxu2 %v11260_v34  ;;  %2810 = vmatpush.bf16.msra.mxu1 %v11268_v58 }
  0x26   :  { %11604 = vmatpush.bf16.msrb.mxu3 %v11274_v19  ;;  %3220 = vmatmul.bf16.vlgmr.msra.gmra.mxu2 %v11228_v38  ;;  %v674_v38 = vld [vmem:[#allocation2 + $0x30] sm:$0x1] }
  0x27   :  { %2811 = vmatmul.bf16.vlgmr.msra.gmra.mxu1 %v2691_v3  ;;  %v675_v43 = vsel %vm11863_vm2, 0, %v674_v38 }
  0x28   :  { %676 = vst [vmem:[#allocation2 + $0x30] sm:$0x1] %v675_v43 }
  0x2a   :  { %11605 = vmatpush.bf16.msrb.mxu3 %v11273_v22 }
  0x2e   :  { %11606 = vmatpush.bf16.msrb.mxu3 %v11272_v27 }
  0x31   :  { %364 = vmatmul.bf16.gmra.mxu0 %v11189_v9 }
  0x32   :  { %11607 = vmatpush.bf16.msrb.mxu3 %v11271_v32 }
  0x36   :  { %11608 = vmatpush.bf16.msrb.mxu3 %v11270_v37 }
  0x3a   :  { %11609 = vmatpush.bf16.msrb.mxu3 %v11269_v47 }
  0x3e   :  { %11610 = vmatpush.bf16.msrb.mxu3 %v11268_v58 }
  0x41   :  { %369 = vmatmul.bf16.gmra.mxu0 %v11190_v10  ;;  %v672_v10 = vsel %vm11863_vm2, 0, %v671_v8 }
  0x42   :  { %673 = vst [vmem:[#allocation2 + $0x24] sm:$0x1] %v672_v10 }
  0x51   :  { %374 = vmatmul.bf16.gmra.mxu0 %v11191_v11 }
  0x61   :  { %379 = vmatmul.bf16.gmra.mxu0 %v11192_v12 }
  0x71   :  { %384 = vmatmul.bf16.gmra.mxu0 %v11193_v14 }
  0x81   :  { %389 = vmatmul.bf16.gmra.mxu0 %v11194_v21 }
  0x91   :  { %394 = vmatmul.bf16.gmra.mxu0 %v11195_v35 }
  0x9e   :  { %v360_v5 = vpop.f32.mrf.mxu0 }
  0x9f   :  { %v361_v6 = vadd.f32 %v11914_v1, %v360_v5  ;;  %v11198_v5 = vld [vmem:[%s15759_s0 + $0x50] sm:$0xff] }
  0xa1   :  { %v520_v7 = vmax.f32 %v361_v6, 0.0  ;;  %399 = vmatmul.bf16.gmra.mxu0 %v11196_v4 }
  0xa3   :  { %v584_v9 = vpack.c.bf16 %v520_v7, %v520_v7 }
  0xa5   :  { %v862_v11 = vshrl.u32 %v584_v9, 16  ;;  %v865_v14 = vshll.u32 %v584_v9, 16 }
  0xa6   :  { %v362_v12 = vpop.f32.mrf.mxu0 }
  0xa7   :  { %v864_v13 = vrot.slane %v862_v11, 7  ;;  %v363_v15 = vadd.f32 %v11914_v1, %v362_v12 }
  0xa9   :  { %v867_v18 = vor.u32 %v865_v14, %v864_v13  ;;  %v521_v19 = vmax.f32 %v363_v15, 0.0  ;;  %v868_v34 = vrot.slane %v864_v13, 4  ;;  %v1514_v13 = vld [vmem:[#allocation2 + $0x20] sm:$0x1] }
  0xab   :  { %v1504_v21 = vsel %vm11926_vm9, %v867_v18, %v1503_v17  ;;  %v585_v22 = vpack.c.bf16 %v521_v19, %v521_v19 }
  0xac   :  { %1505 = vst [vmem:[#allocation2 + $0xc] sm:$0xf] %v1504_v21 }
  0xad   :  { %v870_v25 = vshrl.u32 %v585_v22, 16  ;;  %v873_v29 = vshll.u32 %v585_v22, 16 }
  0xae   :  { %v365_v27 = vpop.f32.mrf.mxu0 }
  0xaf   :  { %v872_v28 = vrot.slane %v870_v25, 7  ;;  %v366_v31 = vadd.f32 %v11914_v1, %v365_v27  ;;  %v677_v25 = vld [vmem:[#allocation2 + $0x3c] sm:$0x1] }
  0xb1   :  { %v875_v35 = vor.u32 %v873_v29, %v872_v28  ;;  %v877_v36 = vrot.slane %v872_v28, 4  ;;  %v522_v37 = vmax.f32 %v366_v31, 0.0  ;;  %404 = vmatmul.bf16.gmra.mxu0 %v11197_v26  ;;  %v678_v31 = vsel %vm11863_vm2, 0, %v677_v25 }
  0xb2   :  { %679 = vst [vmem:[#allocation2 + $0x3c] sm:$0x1] %v678_v31 }
  0xb3   :  { %v876_v39 = vsel %vm11939_vm11, %v868_v34, %v875_v35  ;;  %v1508_v40 = vsel %vm11863_vm2, %v877_v36, %v1507_v33  ;;  %v586_v41 = vpack.c.bf16 %v522_v37, %v522_v37  ;;  %v1729_v42 = vld [vmem:[#allocation2 + $0xc] sm:$0xf] }
  0xb4   :  { %1506 = vst [vmem:[#allocation2 + $0x10] sm:$0xf] %v876_v39  ;;  %v1867_v44 = vshrl.u32 %v1729_v42, 16  ;;  %v1870_v45 = vshll.u32 %v1729_v42, 16 }
  0xb5   :  { %1509 = vst [vmem:[#allocation2 + $0x14] sm:$0x1] %v1508_v40  ;;  %v879_v46 = vshrl.u32 %v586_v41, 16  ;;  %v882_v49 = vshll.u32 %v586_v41, 16 }
  0xb6   :  { %v367_v47 = vpop.f32.mrf.mxu0  ;;  %v1869_v52 = vrot.slane %v1867_v44, 4  ;;  %v1872_v53 = vrot.slane %v1870_v45, 5  ;;  %v1517_v44 = vld [vmem:[#allocation2 + $0x24] sm:$0xf] }
  0xb7   :  { %v881_v48 = vrot.slane %v879_v46, 7  ;;  %v368_v50 = vadd.f32 %v11914_v1, %v367_v47 }
  0xb8   :  { %v1873_v0 = vor.u32 %v1872_v53, %v1869_v52 }
  0xb9   :  { %v884_v54 = vor.u32 %v882_v49, %v881_v48  ;;  %v523_v56 = vmax.f32 %v368_v50, 0.0  ;;  %v885_v17 = vrot.slane %v881_v48, 4  ;;  %v775_v49 = vld [vmem:[#allocation2 + $0x44] sm:$0x1] }
  0xba   :  { %v1874_v14 = vrot.slane %v1873_v0, 4 }
  0xbb   :  { %v1511_v58 = vsel %vm11926_vm9, %v884_v54, %v1510_v51  ;;  %v587_v59 = vpack.c.bf16 %v523_v56, %v523_v56  ;;  %v11229_v60 = vld [vmem:[#allocation2 + $0xc] sm:$0xff]  ;;  %v776_v54 = vsel %vm11877_vm4, 0, %v775_v49 }
  0xbc   :  { %v1730_v61 = vld [vmem:[#allocation2 + $0x10] sm:$0xf]  ;;  %1512 = vst [vmem:[#allocation2 + $0x18] sm:$0xf] %v1511_v58  ;;  %v1808_v63 = vld [vmem:[#allocation2 + $0x14] sm:$0x1]  ;;  %3225 = vmatmul.bf16.gmra.mxu2 %v11229_v60 }
  0xbd   :  { %v1876_v2 = vshll.u32 %v1730_v61, 16  ;;  %v1880_v3 = vshrl.u32 %v1730_v61, 16  ;;  %v887_v4 = vshrl.u32 %v587_v59, 16  ;;  %v1886_v9 = vshll.u32 %v1808_v63, 16  ;;  %v11199_v61 = vld [vmem:[%s15759_s0 + $0x58] sm:$0xff] }
  0xbe   :  { %v370_v6 = vpop.f32.mrf.mxu0  ;;  %v890_v11 = vshll.u32 %v587_v59, 16  ;;  %777 = vst [vmem:[#allocation2 + $0x44] sm:$0x1] %v776_v54 }
  0xbf   :  { %v1878_v7 = vrot.slane %v1876_v2, 5  ;;  %v1882_v8 = vrot.slane %v1880_v3, 4  ;;  %v889_v10 = vrot.slane %v887_v4, 7  ;;  %v371_v12 = vadd.f32 %v11914_v1, %v370_v6  ;;  %v1521_v6 = vld [vmem:[#allocation2 + $0x2c] sm:$0x1] }
  0xc0   :  { %v1888_v23 = vrot.slane %v1886_v9, 5 }
  0xc1   :  { %v1883_v15 = vor.u32 %v1882_v8, %v1878_v7  ;;  %v892_v18 = vor.u32 %v890_v11, %v889_v10  ;;  %v894_v19 = vrot.slane %v889_v10, 4  ;;  %v524_v20 = vmax.f32 %v371_v12, 0.0  ;;  %409 = vmatmul.bf16.gmra.mxu0 %v11198_v5 }
  0xc2   :  { %v1879_v21 = vsel %vm11900_vm7, %v1874_v14, %v1878_v7 }
  0xc3   :  { %v1884_v22 = vrot.slane %v1883_v15, 4  ;;  %v893_v26 = vsel %vm11939_vm11, %v885_v17, %v892_v18  ;;  %v1515_v27 = vsel %vm11863_vm2, %v894_v19, %v1514_v13  ;;  %v588_v28 = vpack.c.bf16 %v524_v20, %v524_v20  ;;  %v1731_v29 = vld [vmem:[#allocation2 + $0x18] sm:$0xf]  ;;  %v680_v17 = vld [vmem:[#allocation2 + $0x48] sm:$0x1] }
  0xc4   :  { %1513 = vst [vmem:[#allocation2 + $0x1c] sm:$0xf] %v893_v26  ;;  %v1891_v34 = vshrl.u32 %v1731_v29, 16  ;;  %v1894_v35 = vshll.u32 %v1731_v29, 16  ;;  %v2629_v37 = vunpack.c.l.b16 %v1879_v21 }
  0xc5   :  { %v1889_v33 = vsel %vm11900_vm7, %v1884_v22, %v1888_v23  ;;  %1516 = vst [vmem:[#allocation2 + $0x20] sm:$0x1] %v1515_v27  ;;  %v896_v36 = vshrl.u32 %v588_v28, 16  ;;  %v899_v41 = vshll.u32 %v588_v28, 16  ;;  %v681_v22 = vsel %vm11863_vm2, 0, %v680_v17 }
  0xc6   :  { %v2630_v38 = vunpack.c.l.b16 %v1889_v33  ;;  %v372_v39 = vpop.f32.mrf.mxu0  ;;  %v1893_v45 = vrot.slane %v1891_v34, 4  ;;  %v1896_v46 = vrot.slane %v1894_v35, 5  ;;  %682 = vst [vmem:[#allocation2 + $0x48] sm:$0x1] %v681_v22 }
  0xc7   :  { %v898_v40 = vrot.slane %v896_v36, 7  ;;  %v373_v42 = vadd.f32 %v11914_v1, %v372_v39 }
  0xc8   :  { %v2692_v43 = vpack.c.b16 %v2630_v38, %v2629_v37  ;;  %v1897_v57 = vor.u32 %v1896_v46, %v1893_v45  ;;  %v1524_v37 = vld [vmem:[#allocation2 + $0x30] sm:$0xf] }
  0xc9   :  { %v901_v47 = vor.u32 %v899_v41, %v898_v40  ;;  %v525_v48 = vmax.f32 %v373_v42, 0.0  ;;  %v902_v9 = vrot.slane %v898_v40, 4  ;;  %v778_v42 = vld [vmem:[#allocation2 + $0x50] sm:$0x1] }
  0xca   :  { %2816 = vmatmul.bf16.gmra.mxu1 %v2692_v43  ;;  %v1898_v7 = vrot.slane %v1897_v57, 4 }
  0xcb   :  { %v1518_v50 = vsel %vm11926_vm9, %v901_v47, %v1517_v44  ;;  %v589_v51 = vpack.c.bf16 %v525_v48, %v525_v48  ;;  %v11230_v52 = vld [vmem:[#allocation2 + $0x18] sm:$0xff]  ;;  %v779_v47 = vsel %vm11877_vm4, 0, %v778_v42 }
  0xcc   :  { %v1732_v53 = vld [vmem:[#allocation2 + $0x1c] sm:$0xf]  ;;  %1519 = vst [vmem:[#allocation2 + $0x24] sm:$0xf] %v1518_v50  ;;  %v1809_v56 = vld [vmem:[#allocation2 + $0x20] sm:$0x1]  ;;  %3230 = vmatmul.bf16.gmra.mxu2 %v11230_v52 }
  0xcd   :  { %v1900_v58 = vshll.u32 %v1732_v53, 16  ;;  %v1904_v59 = vshrl.u32 %v1732_v53, 16  ;;  %v904_v60 = vshrl.u32 %v589_v51, 16  ;;  %v1910_v2 = vshll.u32 %v1809_v56, 16  ;;  %v11200_v53 = vld [vmem:[%s15759_s0 + $0x60] sm:$0xff] }
  0xce   :  { %v375_v62 = vpop.f32.mrf.mxu0  ;;  %v907_v4 = vshll.u32 %v589_v51, 16  ;;  %780 = vst [vmem:[#allocation2 + $0x50] sm:$0x1] %v779_v47  ;;  %v7309_v24 = vld [vmem:[#allocation2 + $0x20] sm:$0x1] }
  0xcf   :  { %v1902_v63 = vrot.slane %v1900_v58, 5  ;;  %v1906_v0 = vrot.slane %v1904_v59, 4  ;;  %v906_v3 = vrot.slane %v904_v60, 7  ;;  %v376_v5 = vadd.f32 %v11914_v1, %v375_v62  ;;  %v1528_v62 = vld [vmem:[#allocation2 + $0x38] sm:$0x1] }
  0xd0   :  { %v1912_v15 = vrot.slane %v1910_v2, 5 }
  0xd1   :  { %v1907_v8 = vor.u32 %v1906_v0, %v1902_v63  ;;  %v909_v10 = vor.u32 %v907_v4, %v906_v3  ;;  %v911_v11 = vrot.slane %v906_v3, 4  ;;  %v526_v12 = vmax.f32 %v376_v5, 0.0  ;;  %414 = vmatmul.bf16.gmra.mxu0 %v11199_v61 }
  0xd2   :  { %v1903_v13 = vsel %vm11900_vm7, %v1898_v7, %v1902_v63 }
  0xd3   :  { %v1908_v14 = vrot.slane %v1907_v8, 4  ;;  %v910_v18 = vsel %vm11939_vm11, %v902_v9, %v909_v10  ;;  %v1522_v19 = vsel %vm11863_vm2, %v911_v11, %v1521_v6  ;;  %v590_v20 = vpack.c.bf16 %v526_v12, %v526_v12  ;;  %v1733_v21 = vld [vmem:[#allocation2 + $0x24] sm:$0xf]  ;;  %v683_v9 = vld [vmem:[#allocation2 + $0x54] sm:$0x1] }
  0xd4   :  { %1520 = vst [vmem:[#allocation2 + $0x28] sm:$0xf] %v910_v18  ;;  %v1915_v25 = vshrl.u32 %v1733_v21, 16  ;;  %v1918_v26 = vshll.u32 %v1733_v21, 16  ;;  %v2631_v28 = vunpack.c.l.b16 %v1903_v13 }
  0xd5   :  { %v1913_v23 = vsel %vm11900_vm7, %v1908_v14, %v1912_v15  ;;  %1523 = vst [vmem:[#allocation2 + $0x2c] sm:$0x1] %v1522_v19  ;;  %v913_v27 = vshrl.u32 %v590_v20, 16  ;;  %v916_v34 = vshll.u32 %v590_v20, 16  ;;  %v684_v14 = vsel %vm11863_vm2, 0, %v683_v9 }
  0xd6   :  { %v2632_v29 = vunpack.c.l.b16 %v1913_v23  ;;  %v377_v31 = vpop.f32.mrf.mxu0  ;;  %v1917_v38 = vrot.slane %v1915_v25, 4  ;;  %v1920_v39 = vrot.slane %v1918_v26, 5  ;;  %685 = vst [vmem:[#allocation2 + $0x54] sm:$0x1] %v684_v14 }
  0xd7   :  { %v915_v33 = vrot.slane %v913_v27, 7  ;;  %v378_v35 = vadd.f32 %v11914_v1, %v377_v31 }
  0xd8   :  { %v2693_v36 = vpack.c.b16 %v2632_v29, %v2631_v28  ;;  %v1921_v49 = vor.u32 %v1920_v39, %v1917_v38  ;;  %v1531_v28 = vld [vmem:[#allocation2 + $0x3c] sm:$0xf] }
  0xd9   :  { %v918_v40 = vor.u32 %v916_v34, %v915_v33  ;;  %v527_v41 = vmax.f32 %v378_v35, 0.0  ;;  %v919_v2 = vrot.slane %v915_v33, 4  ;;  %v781_v35 = vld [vmem:[#allocation2 + $0x5c] sm:$0x1] }
  0xda   :  { %2821 = vmatmul.bf16.gmra.mxu1 %v2693_v36  ;;  %v1922_v63 = vrot.slane %v1921_v49, 4 }
  0xdb   :  { %v1525_v43 = vsel %vm11926_vm9, %v918_v40, %v1524_v37  ;;  %v591_v44 = vpack.c.bf16 %v527_v41, %v527_v41  ;;  %v11231_v45 = vld [vmem:[#allocation2 + $0x24] sm:$0xff]  ;;  %v782_v40 = vsel %vm11877_vm4, 0, %v781_v35 }
  0xdc   :  { %v1734_v46 = vld [vmem:[#allocation2 + $0x28] sm:$0xf]  ;;  %1526 = vst [vmem:[#allocation2 + $0x30] sm:$0xf] %v1525_v43  ;;  %v1810_v48 = vld [vmem:[#allocation2 + $0x2c] sm:$0x1]  ;;  %3235 = vmatmul.bf16.gmra.mxu2 %v11231_v45 }
  0xdd   :  { %v1924_v50 = vshll.u32 %v1734_v46, 16  ;;  %v1928_v51 = vshrl.u32 %v1734_v46, 16  ;;  %v921_v52 = vshrl.u32 %v591_v44, 16  ;;  %v1934_v58 = vshll.u32 %v1810_v48, 16  ;;  %v11201_v46 = vld [vmem:[%s15759_s0 + $0x68] sm:$0xff] }
  0xde   :  { %v380_v54 = vpop.f32.mrf.mxu0  ;;  %v924_v60 = vshll.u32 %v591_v44, 16  ;;  %783 = vst [vmem:[#allocation2 + $0x5c] sm:$0x1] %v782_v40 }
  0xdf   :  { %v1926_v56 = vrot.slane %v1924_v50, 5  ;;  %v1930_v57 = vrot.slane %v1928_v51, 4  ;;  %v923_v59 = vrot.slane %v921_v52, 7  ;;  %v381_v61 = vadd.f32 %v11914_v1, %v380_v54  ;;  %v1535_v54 = vld [vmem:[#allocation2 + $0x44] sm:$0x1] }
  0xe0   :  { %v1936_v8 = vrot.slane %v1934_v58, 5 }
  0xe1   :  { %v1931_v0 = vor.u32 %v1930_v57, %v1926_v56  ;;  %v926_v3 = vor.u32 %v924_v60, %v923_v59  ;;  %v928_v4 = vrot.slane %v923_v59, 4  ;;  %v528_v5 = vmax.f32 %v381_v61, 0.0  ;;  %419 = vmatmul.bf16.gmra.mxu0 %v11200_v53 }
  0xe2   :  { %v1927_v6 = vsel %vm11900_vm7, %v1922_v63, %v1926_v56 }
  0xe3   :  { %v1932_v7 = vrot.slane %v1931_v0, 4  ;;  %v927_v10 = vsel %vm11939_vm11, %v919_v2, %v926_v3  ;;  %v1529_v11 = vsel %vm11863_vm2, %v928_v4, %v1528_v62  ;;  %v592_v12 = vpack.c.bf16 %v528_v5, %v528_v5  ;;  %v1735_v13 = vld [vmem:[#allocation2 + $0x30] sm:$0xf]  ;;  %v686_v2 = vld [vmem:[#allocation2 + $0x60] sm:$0x1] }
  0xe4   :  { %1527 = vst [vmem:[#allocation2 + $0x34] sm:$0xf] %v927_v10  ;;  %v1939_v17 = vshrl.u32 %v1735_v13, 16  ;;  %v1942_v18 = vshll.u32 %v1735_v13, 16  ;;  %v2633_v20 = vunpack.c.l.b16 %v1927_v6 }
  0xe5   :  { %v1937_v15 = vsel %vm11900_vm7, %v1932_v7, %v1936_v8  ;;  %1530 = vst [vmem:[#allocation2 + $0x38] sm:$0x1] %v1529_v11  ;;  %v930_v19 = vshrl.u32 %v592_v12, 16  ;;  %v933_v25 = vshll.u32 %v592_v12, 16  ;;  %v687_v7 = vsel %vm11863_vm2, 0, %v686_v2 }
  0xe6   :  { %v2634_v21 = vunpack.c.l.b16 %v1937_v15  ;;  %v382_v22 = vpop.f32.mrf.mxu0  ;;  %v1941_v29 = vrot.slane %v1939_v17, 4  ;;  %v1944_v31 = vrot.slane %v1942_v18, 5  ;;  %688 = vst [vmem:[#allocation2 + $0x60] sm:$0x1] %v687_v7 }
  0xe7   :  { %v932_v23 = vrot.slane %v930_v19, 7  ;;  %v383_v26 = vadd.f32 %v11914_v1, %v382_v22 }
  0xe8   :  { %v2694_v27 = vpack.c.b16 %v2634_v21, %v2633_v20  ;;  %v1945_v42 = vor.u32 %v1944_v31, %v1941_v29  ;;  %v1538_v20 = vld [vmem:[#allocation2 + $0x48] sm:$0xf] }
  0xe9   :  { %v935_v33 = vor.u32 %v933_v25, %v932_v23  ;;  %v529_v34 = vmax.f32 %v383_v26, 0.0  ;;  %v936_v58 = vrot.slane %v932_v23, 4  ;;  %v784_v26 = vld [vmem:[#allocation2 + $0x68] sm:$0x1] }
  0xea   :  { %2826 = vmatmul.bf16.gmra.mxu1 %v2694_v27  ;;  %v1946_v56 = vrot.slane %v1945_v42, 4 }
  0xeb   :  { %v1532_v36 = vsel %vm11926_vm9, %v935_v33, %v1531_v28  ;;  %v593_v37 = vpack.c.bf16 %v529_v34, %v529_v34  ;;  %v11232_v38 = vld [vmem:[#allocation2 + $0x30] sm:$0xff]  ;;  %v785_v33 = vsel %vm11877_vm4, 0, %v784_v26 }
  0xec   :  { %v1736_v39 = vld [vmem:[#allocation2 + $0x34] sm:$0xf]  ;;  %1533 = vst [vmem:[#allocation2 + $0x3c] sm:$0xf] %v1532_v36  ;;  %v1811_v41 = vld [vmem:[#allocation2 + $0x38] sm:$0x1]  ;;  %3240 = vmatmul.bf16.gmra.mxu2 %v11232_v38 }
  0xed   :  { %v1948_v43 = vshll.u32 %v1736_v39, 16  ;;  %v1952_v44 = vshrl.u32 %v1736_v39, 16  ;;  %v938_v45 = vshrl.u32 %v593_v37, 16  ;;  %v1958_v50 = vshll.u32 %v1811_v41, 16  ;;  %v11202_v39 = vld [vmem:[%s15759_s0 + $0x70] sm:$0xff] }
  0xee   :  { %v385_v47 = vpop.f32.mrf.mxu0  ;;  %v941_v52 = vshll.u32 %v593_v37, 16  ;;  %786 = vst [vmem:[#allocation2 + $0x68] sm:$0x1] %v785_v33 }
  0xef   :  { %v1950_v48 = vrot.slane %v1948_v43, 5  ;;  %v1954_v49 = vrot.slane %v1952_v44, 4  ;;  %v940_v51 = vrot.slane %v938_v45, 7  ;;  %v386_v53 = vadd.f32 %v11914_v1, %v385_v47  ;;  %v1542_v47 = vld [vmem:[#allocation2 + $0x50] sm:$0x1] }
  0xf0   :  { %v1960_v0 = vrot.slane %v1958_v50, 5 }
  0xf1   :  { %v1955_v57 = vor.u32 %v1954_v49, %v1950_v48  ;;  %v943_v59 = vor.u32 %v941_v52, %v940_v51  ;;  %v945_v60 = vrot.slane %v940_v51, 4  ;;  %v530_v61 = vmax.f32 %v386_v53, 0.0  ;;  %424 = vmatmul.bf16.gmra.mxu0 %v11201_v46 }
  0xf2   :  { %v1951_v62 = vsel %vm11900_vm7, %v1946_v56, %v1950_v48 }
  0xf3   :  { %v1956_v63 = vrot.slane %v1955_v57, 4  ;;  %v944_v3 = vsel %vm11939_vm11, %v936_v58, %v943_v59  ;;  %v1536_v4 = vsel %vm11863_vm2, %v945_v60, %v1535_v54  ;;  %v594_v5 = vpack.c.bf16 %v530_v61, %v530_v61  ;;  %v1737_v6 = vld [vmem:[#allocation2 + $0x3c] sm:$0xf]  ;;  %v689_v58 = vld [vmem:[#allocation2 + $0x6c] sm:$0x1] }
  0xf4   :  { %1534 = vst [vmem:[#allocation2 + $0x40] sm:$0xf] %v944_v3  ;;  %v1963_v9 = vshrl.u32 %v1737_v6, 16  ;;  %v1966_v10 = vshll.u32 %v1737_v6, 16  ;;  %v2635_v12 = vunpack.c.l.b16 %v1951_v62 }
  0xf5   :  { %v1961_v8 = vsel %vm11900_vm7, %v1956_v63, %v1960_v0  ;;  %1537 = vst [vmem:[#allocation2 + $0x44] sm:$0x1] %v1536_v4  ;;  %v947_v11 = vshrl.u32 %v594_v5, 16  ;;  %v950_v17 = vshll.u32 %v594_v5, 16  ;;  %v690_v63 = vsel %vm11863_vm2, 0, %v689_v58 }
  0xf6   :  { %v2636_v13 = vunpack.c.l.b16 %v1961_v8  ;;  %v387_v14 = vpop.f32.mrf.mxu0  ;;  %v1965_v21 = vrot.slane %v1963_v9, 4  ;;  %v1968_v22 = vrot.slane %v1966_v10, 5  ;;  %691 = vst [vmem:[#allocation2 + $0x6c] sm:$0x1] %v690_v63 }
  0xf7   :  { %v949_v15 = vrot.slane %v947_v11, 7  ;;  %v388_v18 = vadd.f32 %v11914_v1, %v387_v14 }
  0xf8   :  { %v2695_v19 = vpack.c.b16 %v2636_v13, %v2635_v12  ;;  %v1969_v35 = vor.u32 %v1968_v22, %v1965_v21  ;;  %v1545_v12 = vld [vmem:[#allocation2 + $0x54] sm:$0xf] }
  0xf9   :  { %v952_v23 = vor.u32 %v950_v17, %v949_v15  ;;  %v531_v25 = vmax.f32 %v388_v18, 0.0  ;;  %v953_v50 = vrot.slane %v949_v15, 4  ;;  %v787_v18 = vld [vmem:[#allocation2 + $0x74] sm:$0x1] }
  0xfa   :  { %2831 = vmatmul.bf16.gmra.mxu1 %v2695_v19  ;;  %v1970_v48 = vrot.slane %v1969_v35, 4 }
  0xfb   :  { %v1539_v27 = vsel %vm11926_vm9, %v952_v23, %v1538_v20  ;;  %v595_v28 = vpack.c.bf16 %v531_v25, %v531_v25  ;;  %v11233_v29 = vld [vmem:[#allocation2 + $0x3c] sm:$0xff]  ;;  %v788_v23 = vsel %vm11877_vm4, 0, %v787_v18 }
  0xfc   :  { %v1738_v31 = vld [vmem:[#allocation2 + $0x40] sm:$0xf]  ;;  %1540 = vst [vmem:[#allocation2 + $0x48] sm:$0xf] %v1539_v27  ;;  %v1812_v34 = vld [vmem:[#allocation2 + $0x44] sm:$0x1]  ;;  %3245 = vmatmul.bf16.gmra.mxu2 %v11233_v29 }
  0xfd   :  { %v1972_v36 = vshll.u32 %v1738_v31, 16  ;;  %v1976_v37 = vshrl.u32 %v1738_v31, 16  ;;  %v955_v38 = vshrl.u32 %v595_v28, 16  ;;  %v1982_v43 = vshll.u32 %v1812_v34, 16  ;;  %v11203_v31 = vld [vmem:[%s15759_s0 + $0x78] sm:$0xff] }
  0xfe   :  { %v390_v40 = vpop.f32.mrf.mxu0  ;;  %v958_v45 = vshll.u32 %v595_v28, 16  ;;  %789 = vst [vmem:[#allocation2 + $0x74] sm:$0x1] %v788_v23 }
  0xff   :  { %v1974_v41 = vrot.slane %v1972_v36, 5  ;;  %v1978_v42 = vrot.slane %v1976_v37, 4  ;;  %v957_v44 = vrot.slane %v955_v38, 7  ;;  %v391_v46 = vadd.f32 %v11914_v1, %v390_v40  ;;  %v1549_v40 = vld [vmem:[#allocation2 + $0x5c] sm:$0x1] }
 0x100   :  { %v1984_v57 = vrot.slane %v1982_v43, 5 }
 0x101   :  { %v1979_v49 = vor.u32 %v1978_v42, %v1974_v41  ;;  %v960_v51 = vor.u32 %v958_v45, %v957_v44  ;;  %v962_v52 = vrot.slane %v957_v44, 4  ;;  %v532_v53 = vmax.f32 %v391_v46, 0.0  ;;  %429 = vmatmul.bf16.gmra.mxu0 %v11202_v39 }
 0x102   :  { %v1975_v54 = vsel %vm11900_vm7, %v1970_v48, %v1974_v41 }
 0x103   :  { %v1980_v56 = vrot.slane %v1979_v49, 4  ;;  %v961_v59 = vsel %vm11939_vm11, %v953_v50, %v960_v51  ;;  %v1543_v60 = vsel %vm11863_vm2, %v962_v52, %v1542_v47  ;;  %v596_v61 = vpack.c.bf16 %v532_v53, %v532_v53  ;;  %v1739_v62 = vld [vmem:[#allocation2 + $0x48] sm:$0xf]  ;;  %v692_v50 = vld [vmem:[#allocation2 + $0x78] sm:$0x1] }
 0x104   :  { %1541 = vst [vmem:[#allocation2 + $0x4c] sm:$0xf] %v961_v59  ;;  %v1987_v2 = vshrl.u32 %v1739_v62, 16  ;;  %v1990_v3 = vshll.u32 %v1739_v62, 16  ;;  %v2637_v5 = vunpack.c.l.b16 %v1975_v54 }
 0x105   :  { %v1985_v0 = vsel %vm11900_vm7, %v1980_v56, %v1984_v57  ;;  %1544 = vst [vmem:[#allocation2 + $0x50] sm:$0x1] %v1543_v60  ;;  %v964_v4 = vshrl.u32 %v596_v61, 16  ;;  %v967_v9 = vshll.u32 %v596_v61, 16  ;;  %v693_v56 = vsel %vm11863_vm2, 0, %v692_v50  ;;  %v3221_v50 = vpop.f32.mrf.mxu2 }
 0x106   :  { %v2638_v6 = vunpack.c.l.b16 %v1985_v0  ;;  %v392_v7 = vpop.f32.mrf.mxu0  ;;  %v1989_v13 = vrot.slane %v1987_v2, 4  ;;  %v1992_v14 = vrot.slane %v1990_v3, 5  ;;  %694 = vst [vmem:[#allocation2 + $0x78] sm:$0x1] %v693_v56 }
 0x107   :  { %v966_v8 = vrot.slane %v964_v4, 7  ;;  %v393_v10 = vadd.f32 %v11914_v1, %v392_v7 }
 0x108   :  { %v2696_v11 = vpack.c.b16 %v2638_v6, %v2637_v5  ;;  %v1993_v26 = vor.u32 %v1992_v14, %v1989_v13  ;;  %v1552_v5 = vld [vmem:[#allocation2 + $0x60] sm:$0xf] }
 0x109   :  { %v969_v15 = vor.u32 %v967_v9, %v966_v8  ;;  %v533_v17 = vmax.f32 %v393_v10, 0.0  ;;  %v970_v43 = vrot.slane %v966_v8, 4  ;;  %v790_v10 = vld [vmem:[#allocation2 + $0x80] sm:$0x1] }
 0x10a   :  { %2836 = vmatmul.bf16.gmra.mxu1 %v2696_v11  ;;  %v1994_v41 = vrot.slane %v1993_v26, 4 }
 0x10b   :  { %v1546_v19 = vsel %vm11926_vm9, %v969_v15, %v1545_v12  ;;  %v597_v20 = vpack.c.bf16 %v533_v17, %v533_v17  ;;  %v11234_v21 = vld [vmem:[#allocation2 + $0x48] sm:$0xff]  ;;  %v791_v15 = vsel %vm11877_vm4, 0, %v790_v10 }
 0x10c   :  { %v1740_v22 = vld [vmem:[#allocation2 + $0x4c] sm:$0xf]  ;;  %1547 = vst [vmem:[#allocation2 + $0x54] sm:$0xf] %v1546_v19  ;;  %v1813_v25 = vld [vmem:[#allocation2 + $0x50] sm:$0x1]  ;;  %3250 = vmatmul.bf16.gmra.mxu2 %v11234_v21 }
 0x10d   :  { %v1996_v27 = vshll.u32 %v1740_v22, 16  ;;  %v2000_v28 = vshrl.u32 %v1740_v22, 16  ;;  %v972_v29 = vshrl.u32 %v597_v20, 16  ;;  %v2006_v36 = vshll.u32 %v1813_v25, 16  ;;  %v11204_v22 = vld [vmem:[%s15759_s0 + $0x80] sm:$0xff] }
 0x10e   :  { %v395_v33 = vpop.f32.mrf.mxu0  ;;  %v975_v38 = vshll.u32 %v597_v20, 16  ;;  %792 = vst [vmem:[#allocation2 + $0x80] sm:$0x1] %v791_v15 }
 0x10f   :  { %v1998_v34 = vrot.slane %v1996_v27, 5  ;;  %v2002_v35 = vrot.slane %v2000_v28, 4  ;;  %v974_v37 = vrot.slane %v972_v29, 7  ;;  %v396_v39 = vadd.f32 %v11914_v1, %v395_v33  ;;  %v1556_v33 = vld [vmem:[#allocation2 + $0x68] sm:$0x1] }
 0x110   :  { %v2008_v49 = vrot.slane %v2006_v36, 5 }
 0x111   :  { %v2003_v42 = vor.u32 %v2002_v35, %v1998_v34  ;;  %v977_v44 = vor.u32 %v975_v38, %v974_v37  ;;  %v979_v45 = vrot.slane %v974_v37, 4  ;;  %v534_v46 = vmax.f32 %v396_v39, 0.0  ;;  %434 = vmatmul.bf16.gmra.mxu0 %v11203_v31 }
 0x112   :  { %v1999_v47 = vsel %vm11900_vm7, %v1994_v41, %v1998_v34 }
 0x113   :  { %v2004_v48 = vrot.slane %v2003_v42, 4  ;;  %v978_v51 = vsel %vm11939_vm11, %v970_v43, %v977_v44  ;;  %v1550_v52 = vsel %vm11863_vm2, %v979_v45, %v1549_v40  ;;  %v598_v53 = vpack.c.bf16 %v534_v46, %v534_v46  ;;  %v1741_v54 = vld [vmem:[#allocation2 + $0x54] sm:$0xf]  ;;  %v695_v43 = vld [vmem:[#allocation2 + $0x84] sm:$0x1] }
 0x114   :  { %1548 = vst [vmem:[#allocation2 + $0x58] sm:$0xf] %v978_v51  ;;  %v2011_v58 = vshrl.u32 %v1741_v54, 16  ;;  %v2014_v59 = vshll.u32 %v1741_v54, 16  ;;  %v2639_v61 = vunpack.c.l.b16 %v1999_v47  ;;  %v2812_v51 = vpop.f32.mrf.mxu1 }
 0x115   :  { %v2009_v57 = vsel %vm11900_vm7, %v2004_v48, %v2008_v49  ;;  %1551 = vst [vmem:[#allocation2 + $0x5c] sm:$0x1] %v1550_v52  ;;  %v981_v60 = vshrl.u32 %v598_v53, 16  ;;  %v984_v2 = vshll.u32 %v598_v53, 16  ;;  %v696_v48 = vsel %vm11863_vm2, 0, %v695_v43 }
 0x116   :  { %v2640_v62 = vunpack.c.l.b16 %v2009_v57  ;;  %v397_v63 = vpop.f32.mrf.mxu0  ;;  %v2013_v6 = vrot.slane %v2011_v58, 4  ;;  %v2016_v7 = vrot.slane %v2014_v59, 5  ;;  %v12082_v58 = vadd.f32 %v3221_v50, %v2812_v51  ;;  %697 = vst [vmem:[#allocation2 + $0x84] sm:$0x1] %v696_v48  ;;  %v12103_v51 = vpop.f32.mrf.mxu2 }
 0x117   :  { %v983_v0 = vrot.slane %v981_v60, 7  ;;  %v398_v3 = vadd.f32 %v11914_v1, %v397_v63  ;;  %15779 = vst [vmem:[#allocation3_spill] sm:$0xff] %v12103_v51 }
 0x118   :  { %v2697_v4 = vpack.c.b16 %v2640_v62, %v2639_v61  ;;  %v2017_v18 = vor.u32 %v2016_v7, %v2013_v6  ;;  %v793_v6 = vld [vmem:[#allocation2 + $0x8c] sm:$0x1] }
 0x119   :  { %v986_v8 = vor.u32 %v984_v2, %v983_v0  ;;  %v535_v9 = vmax.f32 %v398_v3, 0.0  ;;  %v987_v36 = vrot.slane %v983_v0, 4  ;;  %v1559_v0 = vld [vmem:[#allocation2 + $0x6c] sm:$0xf] }
 0x11a   :  { %2841 = vmatmul.bf16.gmra.mxu1 %v2697_v4  ;;  %v2018_v34 = vrot.slane %v2017_v18, 4  ;;  %v11205_v18 = vld [vmem:[%s15759_s0 + $0x88] sm:$0xff] }
 0x11b   :  { %v1553_v11 = vsel %vm11926_vm9, %v986_v8, %v1552_v5  ;;  %v599_v12 = vpack.c.bf16 %v535_v9, %v535_v9  ;;  %v11235_v13 = vld [vmem:[#allocation2 + $0x54] sm:$0xff] }
 0x11c   :  { %v1742_v14 = vld [vmem:[#allocation2 + $0x58] sm:$0xf]  ;;  %1554 = vst [vmem:[#allocation2 + $0x60] sm:$0xf] %v1553_v11  ;;  %v1814_v17 = vld [vmem:[#allocation2 + $0x5c] sm:$0x1]  ;;  %3255 = vmatmul.bf16.gmra.mxu2 %v11235_v13 }
 0x11d   :  { %v2020_v19 = vshll.u32 %v1742_v14, 16  ;;  %v2024_v20 = vshrl.u32 %v1742_v14, 16  ;;  %v989_v21 = vshrl.u32 %v599_v12, 16  ;;  %v2030_v27 = vshll.u32 %v1814_v17, 16 }
 0x11e   :  { %v400_v23 = vpop.f32.mrf.mxu0  ;;  %v992_v29 = vshll.u32 %v599_v12, 16  ;;  %v794_v11 = vsel %vm11877_vm4, 0, %v793_v6 }
 0x11f   :  { %v2022_v25 = vrot.slane %v2020_v19, 5  ;;  %v2026_v26 = vrot.slane %v2024_v20, 4  ;;  %v991_v28 = vrot.slane %v989_v21, 7  ;;  %v401_v31 = vadd.f32 %v11914_v1, %v400_v23  ;;  %795 = vst [vmem:[#allocation2 + $0x8c] sm:$0x1] %v794_v11 }
 0x120   :  { %v2032_v42 = vrot.slane %v2030_v27, 5  ;;  %v1563_v27 = vld [vmem:[#allocation2 + $0x74] sm:$0x1] }
 0x121   :  { %v2027_v35 = vor.u32 %v2026_v26, %v2022_v25  ;;  %v994_v37 = vor.u32 %v992_v29, %v991_v28  ;;  %v996_v38 = vrot.slane %v991_v28, 4  ;;  %v536_v39 = vmax.f32 %v401_v31, 0.0  ;;  %439 = vmatmul.bf16.gmra.mxu0 %v11204_v22 }
 0x122   :  { %v2023_v40 = vsel %vm11900_vm7, %v2018_v34, %v2022_v25 }
 0x123   :  { %v2028_v41 = vrot.slane %v2027_v35, 4  ;;  %v995_v44 = vsel %vm11939_vm11, %v987_v36, %v994_v37  ;;  %v1557_v45 = vsel %vm11863_vm2, %v996_v38, %v1556_v33  ;;  %v600_v46 = vpack.c.bf16 %v536_v39, %v536_v39  ;;  %v1743_v47 = vld [vmem:[#allocation2 + $0x60] sm:$0xf]  ;;  %v698_v39 = vld [vmem:[#allocation2 + $0x90] sm:$0x1] }
 0x124   :  { %1555 = vst [vmem:[#allocation2 + $0x64] sm:$0xf] %v995_v44  ;;  %v2035_v52 = vshrl.u32 %v1743_v47, 16  ;;  %v2038_v53 = vshll.u32 %v1743_v47, 16  ;;  %v2641_v56 = vunpack.c.l.b16 %v2023_v40  ;;  %v699_v43 = vsel %vm11863_vm2, 0, %v698_v39 }
 0x125   :  { %v2033_v49 = vsel %vm11900_vm7, %v2028_v41, %v2032_v42  ;;  %1558 = vst [vmem:[#allocation2 + $0x68] sm:$0x1] %v1557_v45  ;;  %v998_v54 = vshrl.u32 %v600_v46, 16  ;;  %v1001_v61 = vshll.u32 %v600_v46, 16 }
 0x126   :  { %v2642_v57 = vunpack.c.l.b16 %v2033_v49  ;;  %v402_v59 = vpop.f32.mrf.mxu0  ;;  %v2037_v2 = vrot.slane %v2035_v52, 4  ;;  %v2040_v3 = vrot.slane %v2038_v53, 5  ;;  %700 = vst [vmem:[#allocation2 + $0x90] sm:$0x1] %v699_v43 }
 0x127   :  { %v1000_v60 = vrot.slane %v998_v54, 7  ;;  %v403_v62 = vadd.f32 %v11914_v1, %v402_v59  ;;  %v12108_v54 = vld [vmem:[%s15758_s2] ss:$0 sm:$0xff]  ;;  %v1566_v59 = vld [vmem:[#allocation2 + $0x78] sm:$0xf] }
 0x128   :  { %v2698_v63 = vpack.c.b16 %v2642_v57, %v2641_v56  ;;  %v2041_v13 = vor.u32 %v2040_v3, %v2037_v2 }
 0x129   :  { %v1003_v4 = vor.u32 %v1001_v61, %v1000_v60  ;;  %v537_v5 = vmax.f32 %v403_v62, 0.0  ;;  %v1004_v31 = vrot.slane %v1000_v60, 4 }
 0x12a   :  { %2846 = vmatmul.bf16.gmra.mxu1 %v2698_v63  ;;  %v2042_v28 = vrot.slane %v2041_v13, 4  ;;  %v11206_v13 = vld [vmem:[%s15759_s0 + $0x90] sm:$0xff] }
 0x12b   :  { %v1560_v7 = vsel %vm11926_vm9, %v1003_v4, %v1559_v0  ;;  %v601_v8 = vpack.c.bf16 %v537_v5, %v537_v5  ;;  %v11236_v9 = vld [vmem:[#allocation2 + $0x60] sm:$0xff]  ;;  %v796_v0 = vld [vmem:[#allocation2 + $0x98] sm:$0x1] }
 0x12c   :  { %v1744_v10 = vld [vmem:[#allocation2 + $0x64] sm:$0xf]  ;;  %1561 = vst [vmem:[#allocation2 + $0x6c] sm:$0xf] %v1560_v7  ;;  %v1815_v12 = vld [vmem:[#allocation2 + $0x68] sm:$0x1]  ;;  %3260 = vmatmul.bf16.gmra.mxu2 %v11236_v9  ;;  %v12115_v7 = vpop.f32.mrf.mxu1 }
 0x12d   :  { %v2044_v14 = vshll.u32 %v1744_v10, 16  ;;  %v2048_v15 = vshrl.u32 %v1744_v10, 16  ;;  %v1006_v17 = vshrl.u32 %v601_v8, 16  ;;  %v2054_v22 = vshll.u32 %v1815_v12, 16  ;;  %15780 = vst [vmem:[#allocation4_spill] sm:$0xff] %v12115_v7 }
 0x12e   :  { %v405_v19 = vpop.f32.mrf.mxu0  ;;  %v1009_v25 = vshll.u32 %v601_v8, 16  ;;  %v797_v6 = vsel %vm11877_vm4, 0, %v796_v0  ;;  %v799_v0 = vld [vmem:[#allocation2 + $0xa4] sm:$0x1] }
 0x12f   :  { %v2046_v20 = vrot.slane %v2044_v14, 5  ;;  %v2050_v21 = vrot.slane %v2048_v15, 4  ;;  %v1008_v23 = vrot.slane %v1006_v17, 7  ;;  %v406_v26 = vadd.f32 %v11914_v1, %v405_v19  ;;  %798 = vst [vmem:[#allocation2 + $0x98] sm:$0x1] %v797_v6 }
 0x130   :  { %v2056_v38 = vrot.slane %v2054_v22, 5  ;;  %v1570_v22 = vld [vmem:[#allocation2 + $0x80] sm:$0x1]  ;;  %v800_v6 = vsel %vm11877_vm4, 0, %v799_v0  ;;  %v737_v7 = vld [vmem:[#allocation2 + $0x144] sm:$0x1] }
 0x131   :  { %v2051_v29 = vor.u32 %v2050_v21, %v2046_v20  ;;  %v1011_v33 = vor.u32 %v1009_v25, %v1008_v23  ;;  %v1013_v34 = vrot.slane %v1008_v23, 4  ;;  %v538_v35 = vmax.f32 %v406_v26, 0.0  ;;  %444 = vmatmul.bf16.gmra.mxu0 %v11205_v18  ;;  %801 = vst [vmem:[#allocation2 + $0xa4] sm:$0x1] %v800_v6 }
 0x132   :  { %v2047_v36 = vsel %vm11900_vm7, %v2042_v28, %v2046_v20 }
 0x133   :  { %v2052_v37 = vrot.slane %v2051_v29, 4  ;;  %v1012_v40 = vsel %vm11939_vm11, %v1004_v31, %v1011_v33  ;;  %v1564_v1 = vsel %vm11863_vm2, %v1013_v34, %v1563_v27  ;;  %v602_v41 = vpack.c.bf16 %v538_v35, %v538_v35  ;;  %v1745_v42 = vld [vmem:[#allocation2 + $0x6c] sm:$0xf] }
 0x134   :  { %1562 = vst [vmem:[#allocation2 + $0x70] sm:$0xf] %v1012_v40  ;;  %v2059_v45 = vshrl.u32 %v1745_v42, 16  ;;  %v2062_v46 = vshll.u32 %v1745_v42, 16  ;;  %v2643_v48 = vunpack.c.l.b16 %v2047_v36  ;;  %v701_v36 = vld [vmem:[#allocation2 + $0x9c] sm:$0x1] }
 0x135   :  { %v2057_v44 = vsel %vm11900_vm7, %v2052_v37, %v2056_v38  ;;  %1565 = vst [vmem:[#allocation2 + $0x74] sm:$0x1] %v1564_v1  ;;  %v1015_v47 = vshrl.u32 %v602_v41, 16  ;;  %v1018_v53 = vshll.u32 %v602_v41, 16  ;;  %v702_v1 = vsel %vm11863_vm2, 0, %v701_v36 }
 0x136   :  { %v2644_v49 = vunpack.c.l.b16 %v2057_v44  ;;  %v407_v50 = vpop.f32.mrf.mxu0  ;;  %v2061_v60 = vrot.slane %v2059_v45, 4  ;;  %v2064_v61 = vrot.slane %v2062_v46, 5  ;;  %703 = vst [vmem:[#allocation2 + $0x9c] sm:$0x1] %v702_v1 }
 0x137   :  { %v1017_v52 = vrot.slane %v1015_v47, 7  ;;  %v408_v56 = vadd.f32 %v12108_v54, %v407_v50 }
 0x138   :  { %v2699_v57 = vpack.c.b16 %v2644_v49, %v2643_v48  ;;  %v2065_v9 = vor.u32 %v2064_v61, %v2061_v60 }
 0x139   :  { %v1020_v62 = vor.u32 %v1018_v53, %v1017_v52  ;;  %v539_v63 = vmax.f32 %v408_v56, 0.0  ;;  %v1021_v27 = vrot.slane %v1017_v52, 4 }
 0x13a   :  { %2851 = vmatmul.bf16.gmra.mxu1 %v2699_v57  ;;  %v2066_v25 = vrot.slane %v2065_v9, 4  ;;  %v1573_v57 = vld [vmem:[#allocation2 + $0x84] sm:$0xf] }
 0x13b   :  { %v1567_v2 = vsel %vm11926_vm9, %v1020_v62, %v1566_v59  ;;  %v603_v3 = vpack.c.bf16 %v539_v63, %v539_v63  ;;  %v11237_v4 = vld [vmem:[#allocation2 + $0x6c] sm:$0xff] }
 0x13c   :  { %v1746_v5 = vld [vmem:[#allocation2 + $0x70] sm:$0xf]  ;;  %1568 = vst [vmem:[#allocation2 + $0x78] sm:$0xf] %v1567_v2  ;;  %v1816_v8 = vld [vmem:[#allocation2 + $0x74] sm:$0x1]  ;;  %3265 = vmatmul.bf16.gmra.mxu2 %v11237_v4 }
 0x13d   :  { %v2068_v10 = vshll.u32 %v1746_v5, 16  ;;  %v2072_v11 = vshrl.u32 %v1746_v5, 16  ;;  %v1023_v12 = vshrl.u32 %v603_v3, 16  ;;  %v2078_v18 = vshll.u32 %v1816_v8, 16 }
 0x13e   :  { %v410_v14 = vpop.f32.mrf.mxu0  ;;  %v1026_v20 = vshll.u32 %v603_v3, 16 }
 0x13f   :  { %v2070_v15 = vrot.slane %v2068_v10, 5  ;;  %v2074_v17 = vrot.slane %v2072_v11, 4  ;;  %v1025_v19 = vrot.slane %v1023_v12, 7  ;;  %v411_v21 = vadd.f32 %v12108_v54, %v410_v14  ;;  %v3226_v23 = vpop.f32.mrf.mxu2 }
 0x140   :  { %v2080_v35 = vrot.slane %v2078_v18, 5 }
 0x141   :  { %v2075_v26 = vor.u32 %v2074_v17, %v2070_v15  ;;  %v1028_v28 = vor.u32 %v1026_v20, %v1025_v19  ;;  %v1030_v29 = vrot.slane %v1025_v19, 4  ;;  %v540_v31 = vmax.f32 %v411_v21, 0.0  ;;  %449 = vmatmul.bf16.gmra.mxu0 %v11206_v13  ;;  %v11207_v13 = vld [vmem:[%s15759_s0 + $0x98] sm:$0xff] }
 0x142   :  { %v2071_v33 = vsel %vm11900_vm7, %v2066_v25, %v2070_v15  ;;  %v1577_v25 = vld [vmem:[#allocation2 + $0x8c] sm:$0x1] }
 0x143   :  { %v2076_v34 = vrot.slane %v2075_v26, 4  ;;  %v1029_v37 = vsel %vm11939_vm11, %v1021_v27, %v1028_v28  ;;  %v1571_v38 = vsel %vm11863_vm2, %v1030_v29, %v1570_v22  ;;  %v604_v39 = vpack.c.bf16 %v540_v31, %v540_v31  ;;  %v1747_v40 = vld [vmem:[#allocation2 + $0x78] sm:$0xf] }
 0x144   :  { %1569 = vst [vmem:[#allocation2 + $0x7c] sm:$0xf] %v1029_v37  ;;  %v2083_v42 = vshrl.u32 %v1747_v40, 16  ;;  %v2086_v43 = vshll.u32 %v1747_v40, 16  ;;  %v2645_v45 = vunpack.c.l.b16 %v2071_v33 }
 0x145   :  { %v2081_v41 = vsel %vm11900_vm7, %v2076_v34, %v2080_v35  ;;  %1572 = vst [vmem:[#allocation2 + $0x80] sm:$0x1] %v1571_v38  ;;  %v1032_v44 = vshrl.u32 %v604_v39, 16  ;;  %v1035_v47 = vshll.u32 %v604_v39, 16  ;;  %v704_v38 = vld [vmem:[#allocation2 + $0xa8] sm:$0x1] }
 0x146   :  { %v2646_v46 = vunpack.c.l.b16 %v2081_v41  ;;  %v412_v48 = vpop.f32.mrf.mxu0  ;;  %v2085_v60 = vrot.slane %v2083_v42, 4  ;;  %v2088_v61 = vrot.slane %v2086_v43, 5  ;;  %v705_v42 = vsel %vm11863_vm2, 0, %v704_v38 }
 0x147   :  { %v2817_v49 = vpop.f32.mrf.mxu1  ;;  %v1034_v50 = vrot.slane %v1032_v44, 7  ;;  %v413_v52 = vadd.f32 %v12108_v54, %v412_v48  ;;  %v3228_v59 = vpop.f32.mrf.mxu2  ;;  %706 = vst [vmem:[#allocation2 + $0xa8] sm:$0x1] %v705_v42  ;;  %v707_v42 = vld [vmem:[#allocation2 + $0xb4] sm:$0x1] }
 0x148   :  { %v12132_v53 = vadd.f32 %v3226_v23, %v2817_v49  ;;  %v2700_v56 = vpack.c.b16 %v2646_v46, %v2645_v45  ;;  %v2089_v9 = vor.u32 %v2088_v61, %v2085_v60  ;;  %v1580_v61 = vld [vmem:[#allocation2 + $0x90] sm:$0xf] }
 0x149   :  { %v1037_v62 = vor.u32 %v1035_v47, %v1034_v50  ;;  %v541_v63 = vmax.f32 %v413_v52, 0.0  ;;  %v1038_v29 = vrot.slane %v1034_v50, 4 }
 0x14a   :  { %2856 = vmatmul.bf16.gmra.mxu1 %v2700_v56  ;;  %v2090_v27 = vrot.slane %v2089_v9, 4 }
 0x14b   :  { %v1574_v2 = vsel %vm11926_vm9, %v1037_v62, %v1573_v57  ;;  %v605_v3 = vpack.c.bf16 %v541_v63, %v541_v63  ;;  %v11238_v4 = vld [vmem:[#allocation2 + $0x78] sm:$0xff] }
 0x14c   :  { %v1748_v5 = vld [vmem:[#allocation2 + $0x7c] sm:$0xf]  ;;  %1575 = vst [vmem:[#allocation2 + $0x84] sm:$0xf] %v1574_v2  ;;  %v1817_v8 = vld [vmem:[#allocation2 + $0x80] sm:$0x1]  ;;  %3270 = vmatmul.bf16.gmra.mxu2 %v11238_v4 }
 0x14d   :  { %v2092_v10 = vshll.u32 %v1748_v5, 16  ;;  %v2096_v11 = vshrl.u32 %v1748_v5, 16  ;;  %v1040_v12 = vshrl.u32 %v605_v3, 16  ;;  %v2102_v19 = vshll.u32 %v1817_v8, 16  ;;  %v802_v4 = vld [vmem:[#allocation2 + $0xb0] sm:$0x1] }
 0x14e   :  { %v415_v14 = vpop.f32.mrf.mxu0  ;;  %v1043_v21 = vshll.u32 %v605_v3, 16 }
 0x14f   :  { %v2819_v15 = vpop.f32.mrf.mxu1  ;;  %v2094_v17 = vrot.slane %v2092_v10, 5  ;;  %v2098_v18 = vrot.slane %v2096_v11, 4  ;;  %v1042_v20 = vrot.slane %v1040_v12, 7  ;;  %v416_v22 = vadd.f32 %v12108_v54, %v415_v14  ;;  %v3231_v26 = vpop.f32.mrf.mxu2 }
 0x150   :  { %v12142_v23 = vadd.f32 %v3228_v59, %v2819_v15  ;;  %v2104_v37 = vrot.slane %v2102_v19, 5  ;;  %v803_v10 = vsel %vm11877_vm4, 0, %v802_v4 }
 0x151   :  { %v2099_v28 = vor.u32 %v2098_v18, %v2094_v17  ;;  %v1045_v31 = vor.u32 %v1043_v21, %v1042_v20  ;;  %v1047_v33 = vrot.slane %v1042_v20, 4  ;;  %v542_v34 = vmax.f32 %v416_v22, 0.0  ;;  %454 = vmatmul.bf16.gmra.mxu0 %v11207_v13  ;;  %804 = vst [vmem:[#allocation2 + $0xb0] sm:$0x1] %v803_v10 }
 0x152   :  { %v2095_v35 = vsel %vm11900_vm7, %v2090_v27, %v2094_v17  ;;  %v11208_v17 = vld [vmem:[%s15759_s0 + $0xa0] sm:$0xff] }
 0x153   :  { %v2100_v36 = vrot.slane %v2099_v28, 4  ;;  %v1046_v39 = vsel %vm11939_vm11, %v1038_v29, %v1045_v31  ;;  %v1578_v40 = vsel %vm11863_vm2, %v1047_v33, %v1577_v25  ;;  %v606_v1 = vpack.c.bf16 %v542_v34, %v542_v34  ;;  %v1749_v41 = vld [vmem:[#allocation2 + $0x84] sm:$0xf]  ;;  %v1584_v29 = vld [vmem:[#allocation2 + $0x98] sm:$0x1] }
 0x154   :  { %1576 = vst [vmem:[#allocation2 + $0x88] sm:$0xf] %v1046_v39  ;;  %v2107_v44 = vshrl.u32 %v1749_v41, 16  ;;  %v2110_v45 = vshll.u32 %v1749_v41, 16  ;;  %v2647_v47 = vunpack.c.l.b16 %v2095_v35  ;;  %v11323_v39 = vld [vmem:[%s15760_s3 + $0xf8] sm:$0xff] }
 0x155   :  { %v2105_v43 = vsel %vm11900_vm7, %v2100_v36, %v2104_v37  ;;  %1579 = vst [vmem:[#allocation2 + $0x8c] sm:$0x1] %v1578_v40  ;;  %v1049_v46 = vshrl.u32 %v606_v1, 16  ;;  %v1052_v49 = vshll.u32 %v606_v1, 16  ;;  %4451 = vmatpush.bf16.msrb.mxu0 %v11323_v39 }
 0x156   :  { %v2648_v48 = vunpack.c.l.b16 %v2105_v43  ;;  %v417_v50 = vpop.f32.mrf.mxu0  ;;  %v2109_v63 = vrot.slane %v2107_v44, 4  ;;  %v2112_v0 = vrot.slane %v2110_v45, 5 }
 0x157   :  { %v2822_v52 = vpop.f32.mrf.mxu1  ;;  %v1051_v56 = vrot.slane %v1049_v46, 7  ;;  %v418_v57 = vadd.f32 %v12108_v54, %v417_v50  ;;  %v3233_v62 = vpop.f32.mrf.mxu2 }
 0x158   :  { %v12155_v59 = vadd.f32 %v3231_v26, %v2822_v52  ;;  %v2701_v60 = vpack.c.b16 %v2648_v48, %v2647_v47  ;;  %v2113_v12 = vor.u32 %v2112_v0, %v2109_v63  ;;  %v708_v47 = vsel %vm11863_vm2, 0, %v707_v42  ;;  %v11322_v63 = vld [vmem:[%s15760_s3 + $0xf0] sm:$0xff] }
 0x159   :  { %v1054_v2 = vor.u32 %v1052_v49, %v1051_v56  ;;  %v543_v3 = vmax.f32 %v418_v57, 0.0  ;;  %v1055_v35 = vrot.slane %v1051_v56, 4  ;;  %709 = vst [vmem:[#allocation2 + $0xb4] sm:$0x1] %v708_v47  ;;  %4452 = vmatpush.bf16.msrb.mxu0 %v11322_v63 }
 0x15a   :  { %2861 = vmatmul.bf16.gmra.mxu1 %v2701_v60  ;;  %v2114_v33 = vrot.slane %v2113_v12, 4  ;;  %v11321_v12 = vld [vmem:[%s15760_s3 + $0xe8] sm:$0xff] }
 0x15b   :  { %v1581_v5 = vsel %vm11926_vm9, %v1054_v2, %v1580_v61  ;;  %v607_v6 = vpack.c.bf16 %v543_v3, %v543_v3  ;;  %v11239_v8 = vld [vmem:[#allocation2 + $0x84] sm:$0xff] }
 0x15c   :  { %v1750_v9 = vld [vmem:[#allocation2 + $0x88] sm:$0xf]  ;;  %1582 = vst [vmem:[#allocation2 + $0x90] sm:$0xf] %v1581_v5  ;;  %v1818_v11 = vld [vmem:[#allocation2 + $0x8c] sm:$0x1]  ;;  %3275 = vmatmul.bf16.gmra.mxu2 %v11239_v8 }
 0x15d   :  { %v2116_v13 = vshll.u32 %v1750_v9, 16  ;;  %v2120_v14 = vshrl.u32 %v1750_v9, 16  ;;  %v1057_v15 = vshrl.u32 %v607_v6, 16  ;;  %v2126_v22 = vshll.u32 %v1818_v11, 16  ;;  %v1587_v5 = vld [vmem:[#allocation2 + $0x9c] sm:$0xf]  ;;  %4453 = vmatpush.bf16.msrb.mxu0 %v11321_v12 }
 0x15e   :  { %v420_v18 = vpop.f32.mrf.mxu0  ;;  %v1060_v26 = vshll.u32 %v607_v6, 16 }
 0x15f   :  { %v2824_v19 = vpop.f32.mrf.mxu1  ;;  %v2118_v20 = vrot.slane %v2116_v13, 5  ;;  %v2122_v21 = vrot.slane %v2120_v14, 4  ;;  %v1059_v25 = vrot.slane %v1057_v15, 7  ;;  %v421_v27 = vadd.f32 %v12108_v54, %v420_v18  ;;  %v3236_v31 = vpop.f32.mrf.mxu2  ;;  %v805_v13 = vld [vmem:[#allocation2 + $0xbc] sm:$0x1] }
 0x160   :  { %v12165_v28 = vadd.f32 %v3233_v62, %v2824_v19  ;;  %v2128_v41 = vrot.slane %v2126_v22, 5  ;;  %v806_v19 = vsel %vm11877_vm4, 0, %v805_v13 }
 0x161   :  { %v2123_v34 = vor.u32 %v2122_v21, %v2118_v20  ;;  %v1062_v36 = vor.u32 %v1060_v26, %v1059_v25  ;;  %v1064_v37 = vrot.slane %v1059_v25, 4  ;;  %v544_v38 = vmax.f32 %v421_v27, 0.0  ;;  %459 = vmatmul.bf16.gmra.mxu0 %v11208_v17  ;;  %v11209_v27 = vld [vmem:[%s15759_s0 + $0xa8] sm:$0xff]  ;;  %807 = vst [vmem:[#allocation2 + $0xbc] sm:$0x1] %v806_v19 }
 0x162   :  { %v2119_v40 = vsel %vm11900_vm7, %v2114_v33, %v2118_v20 }
 0x163   :  { %v2124_v1 = vrot.slane %v2123_v34, 4  ;;  %v1063_v43 = vsel %vm11939_vm11, %v1055_v35, %v1062_v36  ;;  %v1585_v44 = vsel %vm11863_vm2, %v1064_v37, %v1584_v29  ;;  %v608_v45 = vpack.c.bf16 %v544_v38, %v544_v38  ;;  %v1751_v46 = vld [vmem:[#allocation2 + $0x90] sm:$0xf]  ;;  %v11212_v29 = vld [vmem:[%s15759_s0 + $0xc0] sm:$0xff] }
 0x164   :  { %1583 = vst [vmem:[#allocation2 + $0x94] sm:$0xf] %v1063_v43  ;;  %v2131_v49 = vshrl.u32 %v1751_v46, 16  ;;  %v2134_v50 = vshll.u32 %v1751_v46, 16  ;;  %v2649_v56 = vunpack.c.l.b16 %v2119_v40  ;;  %v11320_v37 = vld [vmem:[%s15760_s3 + $0xe0] sm:$0xff]  ;;  %479 = vmatmul.bf16.vlgmr.msra.gmra.mxu3 %v11212_v29 }
 0x165   :  { %v2129_v48 = vsel %vm11900_vm7, %v2124_v1, %v2128_v41  ;;  %1586 = vst [vmem:[#allocation2 + $0x98] sm:$0x1] %v1585_v44  ;;  %v1066_v52 = vshrl.u32 %v608_v45, 16  ;;  %v1069_v60 = vshll.u32 %v608_v45, 16  ;;  %v1591_v41 = vld [vmem:[#allocation2 + $0xa4] sm:$0x1]  ;;  %4454 = vmatpush.bf16.msrb.mxu0 %v11320_v37 }
 0x166   :  { %v2650_v57 = vunpack.c.l.b16 %v2129_v48  ;;  %v422_v61 = vpop.f32.mrf.mxu0  ;;  %v2133_v8 = vrot.slane %v2131_v49, 4  ;;  %v2136_v9 = vrot.slane %v2134_v50, 5  ;;  %v11624_v45 = vld [vmem:[%s15760_s3 + $0x38] sm:$0xff] }
 0x167   :  { %v2827_v62 = vpop.f32.mrf.mxu1  ;;  %v1068_v0 = vrot.slane %v1066_v52, 7  ;;  %v423_v2 = vadd.f32 %v12108_v54, %v422_v61  ;;  %v3238_v6 = vpop.f32.mrf.mxu2  ;;  %11611 = vmatpush.bf16.msra.mxu3 %v11624_v45  ;;  %v11319_v50 = vld [vmem:[%s15760_s3 + $0xd8] sm:$0xff] }
 0x168   :  { %v12184_v3 = vadd.f32 %v3236_v31, %v2827_v62  ;;  %v2702_v4 = vpack.c.b16 %v2650_v57, %v2649_v56  ;;  %v2137_v21 = vor.u32 %v2136_v9, %v2133_v8  ;;  %v11625_v8 = vld [vmem:[%s15760_s3 + $0x30] sm:$0xff] }
 0x169   :  { %v1071_v10 = vor.u32 %v1069_v60, %v1068_v0  ;;  %v545_v11 = vmax.f32 %v423_v2, 0.0  ;;  %v1072_v46 = vrot.slane %v1068_v0, 4  ;;  %v710_v60 = vld [vmem:[#allocation2 + $0xc0] sm:$0x1]  ;;  %4455 = vmatpush.bf16.msrb.mxu0 %v11319_v50 }
 0x16a   :  { %2866 = vmatmul.bf16.gmra.mxu1 %v2702_v4  ;;  %v2138_v43 = vrot.slane %v2137_v21, 4  ;;  %v711_v2 = vsel %vm11863_vm2, 0, %v710_v60  ;;  %v1594_v21 = vld [vmem:[#allocation2 + $0xa8] sm:$0xf] }
 0x16b   :  { %v1588_v14 = vsel %vm11926_vm9, %v1071_v10, %v1587_v5  ;;  %v609_v15 = vpack.c.bf16 %v545_v11, %v545_v11  ;;  %v11240_v17 = vld [vmem:[#allocation2 + $0x90] sm:$0xff]  ;;  %11612 = vmatpush.bf16.msra.mxu3 %v11625_v8  ;;  %712 = vst [vmem:[#allocation2 + $0xc0] sm:$0x1] %v711_v2 }
 0x16c   :  { %v1752_v18 = vld [vmem:[#allocation2 + $0x94] sm:$0xf]  ;;  %1589 = vst [vmem:[#allocation2 + $0x9c] sm:$0xf] %v1588_v14  ;;  %v1819_v20 = vld [vmem:[#allocation2 + $0x98] sm:$0x1]  ;;  %3280 = vmatmul.bf16.gmra.mxu2 %v11240_v17 }
 0x16d   :  { %v2140_v22 = vshll.u32 %v1752_v18, 16  ;;  %v2144_v25 = vshrl.u32 %v1752_v18, 16  ;;  %v1074_v26 = vshrl.u32 %v609_v15, 16  ;;  %v2150_v36 = vshll.u32 %v1819_v20, 16 }
 0x16e   :  { %v425_v31 = vpop.f32.mrf.mxu0  ;;  %v1077_v39 = vshll.u32 %v609_v15, 16  ;;  %v11318_v15 = vld [vmem:[%s15760_s3 + $0xd0] sm:$0xff] }
 0x16f   :  { %v2829_v33 = vpop.f32.mrf.mxu1  ;;  %v2142_v34 = vrot.slane %v2140_v22, 5  ;;  %v2146_v35 = vrot.slane %v2144_v25, 4  ;;  %v1076_v38 = vrot.slane %v1074_v26, 7  ;;  %v426_v40 = vadd.f32 %v12108_v54, %v425_v31  ;;  %v3241_v42 = vpop.f32.mrf.mxu2  ;;  %4456 = vmatpush.bf16.msrb.mxu0 %v11318_v15  ;;  %v713_v15 = vld [vmem:[#allocation2 + $0xe4] sm:$0x1] }
 0x170   :  { %v12203_v1 = vadd.f32 %v3238_v6, %v2829_v33  ;;  %v2152_v57 = vrot.slane %v2150_v36, 5  ;;  %v11317_v33 = vld [vmem:[%s15760_s3 + $0xc8] sm:$0xff] }
 0x171   :  { %v2147_v44 = vor.u32 %v2146_v35, %v2142_v34  ;;  %v1079_v47 = vor.u32 %v1077_v39, %v1076_v38  ;;  %v1081_v48 = vrot.slane %v1076_v38, 4  ;;  %v546_v49 = vmax.f32 %v426_v40, 0.0  ;;  %464 = vmatmul.bf16.gmra.mxu0 %v11209_v27  ;;  %v11626_v27 = vld [vmem:[%s15760_s3 + $0x28] sm:$0xff] }
 0x172   :  { %v2143_v52 = vsel %vm11900_vm7, %v2138_v43, %v2142_v34  ;;  %11613 = vmatpush.bf16.msra.mxu3 %v11626_v27  ;;  %v808_v34 = vld [vmem:[#allocation2 + $0xc8] sm:$0x1] }
 0x173   :  { %v2148_v56 = vrot.slane %v2147_v44, 4  ;;  %v1080_v61 = vsel %vm11939_vm11, %v1072_v46, %v1079_v47  ;;  %v1592_v62 = vsel %vm11863_vm2, %v1081_v48, %v1591_v41  ;;  %v610_v63 = vpack.c.bf16 %v546_v49, %v546_v49  ;;  %v1753_v0 = vld [vmem:[#allocation2 + $0x9c] sm:$0xf]  ;;  %4457 = vmatpush.bf16.msrb.mxu0 %v11317_v33  ;;  %v11627_v44 = vld [vmem:[%s15760_s3 + $0x20] sm:$0xff]  ;;  %v11210_v46 = vld [vmem:[%s15759_s0 + $0xb0] sm:$0xff] }
 0x174   :  { %1590 = vst [vmem:[#allocation2 + $0xa0] sm:$0xf] %v1080_v61  ;;  %v2155_v5 = vshrl.u32 %v1753_v0, 16  ;;  %v2158_v6 = vshll.u32 %v1753_v0, 16  ;;  %v2651_v10 = vunpack.c.l.b16 %v2143_v52  ;;  %v809_v39 = vsel %vm11877_vm4, 0, %v808_v34  ;;  %v11213_v47 = vld [vmem:[%s15759_s0 + $0xc8] sm:$0xff] }
 0x175   :  { %v2153_v4 = vsel %vm11900_vm7, %v2148_v56, %v2152_v57  ;;  %1593 = vst [vmem:[#allocation2 + $0xa4] sm:$0x1] %v1592_v62  ;;  %v1083_v9 = vshrl.u32 %v610_v63, 16  ;;  %v1086_v12 = vshll.u32 %v610_v63, 16  ;;  %v11316_v57 = vld [vmem:[%s15760_s3 + $0xc0] sm:$0xff]  ;;  %484 = vmatmul.bf16.gmra.mxu3 %v11213_v47 }
 0x176   :  { %v2652_v11 = vunpack.c.l.b16 %v2153_v4  ;;  %v427_v13 = vpop.f32.mrf.mxu0  ;;  %v2157_v25 = vrot.slane %v2155_v5, 4  ;;  %v2160_v26 = vrot.slane %v2158_v6, 5  ;;  %11614 = vmatpush.bf16.msra.mxu3 %v11627_v44  ;;  %810 = vst [vmem:[#allocation2 + $0xc8] sm:$0x1] %v809_v39  ;;  %v1598_v0 = vld [vmem:[#allocation2 + $0xb0] sm:$0x1] }
 0x177   :  { %v2832_v14 = vpop.f32.mrf.mxu1  ;;  %v12227_v17 = vrot.slane %v1083_v9, 7  ;;  %v428_v18 = vadd.f32 %v12108_v54, %v427_v13  ;;  %v3243_v22 = vpop.f32.mrf.mxu2  ;;  %4458 = vmatpush.bf16.msrb.mxu0 %v11316_v57  ;;  %v11628_v6 = vld [vmem:[%s15760_s3 + $0x18] sm:$0xff] }
 0x178   :  { %v12230_v19 = vadd.f32 %v3241_v42, %v2832_v14  ;;  %v2703_v20 = vpack.c.b16 %v2652_v11, %v2651_v10  ;;  %v2161_v41 = vor.u32 %v2160_v26, %v2157_v25 }
 0x179   :  { %v1088_v29 = vor.u32 %v1086_v12, %v12227_v17  ;;  %v547_v31 = vmax.f32 %v428_v18, 0.0  ;;  %v1089_v8 = vrot.slane %v12227_v17, 4  ;;  %v714_v17 = vsel %vm11863_vm2, 0, %v713_v15 }
 0x17a   :  { %2871 = vmatmul.bf16.gmra.mxu1 %v2703_v20  ;;  %v2162_v4 = vrot.slane %v2161_v41, 4  ;;  %11615 = vmatpush.bf16.msra.mxu3 %v11628_v6  ;;  %715 = vst [vmem:[#allocation2 + $0xe4] sm:$0x1] %v714_v17  ;;  %v11211_v6 = vld [vmem:[%s15759_s0 + $0xb8] sm:$0xff] }
 0x17b   :  { %v1595_v35 = vsel %vm11926_vm9, %v1088_v29, %v1594_v21  ;;  %v611_v36 = vpack.c.bf16 %v547_v31, %v547_v31  ;;  %v11241_v37 = vld [vmem:[#allocation2 + $0x9c] sm:$0xff]  ;;  %v11629_v29 = vld [vmem:[%s15760_s3 + $0x10] sm:$0xff] }
 0x17c   :  { %v1754_v38 = vld [vmem:[#allocation2 + $0xa0] sm:$0xf]  ;;  %1596 = vst [vmem:[#allocation2 + $0xa8] sm:$0xf] %v1595_v35  ;;  %v1820_v40 = vld [vmem:[#allocation2 + $0xa4] sm:$0x1]  ;;  %3285 = vmatmul.bf16.gmra.mxu2 %v11241_v37 }
 0x17d   :  { %v2164_v42 = vshll.u32 %v1754_v38, 16  ;;  %v2168_v43 = vshrl.u32 %v1754_v38, 16  ;;  %v1091_v45 = vshrl.u32 %v611_v36, 16  ;;  %v2174_v56 = vshll.u32 %v1820_v40, 16 }
 0x17e   :  { %v430_v48 = vpop.f32.mrf.mxu0  ;;  %v1094_v61 = vshll.u32 %v611_v36, 16  ;;  %11616 = vmatpush.bf16.msra.mxu3 %v11629_v29 }
 0x17f   :  { %v2834_v49 = vpop.f32.mrf.mxu1  ;;  %v2166_v50 = vrot.slane %v2164_v42, 5  ;;  %v2170_v52 = vrot.slane %v2168_v43, 4  ;;  %v1093_v60 = vrot.slane %v1091_v45, 7  ;;  %v431_v62 = vadd.f32 %v12108_v54, %v430_v48  ;;  %v3246_v2 = vpop.f32.mrf.mxu2  ;;  %v1601_v42 = vld [vmem:[#allocation2 + $0xb4] sm:$0xf] }
 0x180   :  { %v12256_v63 = vadd.f32 %v3243_v22, %v2834_v49  ;;  %v2176_v14 = vrot.slane %v2174_v56, 5  ;;  %v811_v49 = vld [vmem:[#allocation2 + $0xec] sm:$0x1] }
 0x181   :  { %v2171_v5 = vor.u32 %v2170_v52, %v2166_v50  ;;  %v1096_v9 = vor.u32 %v1094_v61, %v1093_v60  ;;  %v1098_v10 = vrot.slane %v1093_v60, 4  ;;  %v548_v11 = vmax.f32 %v431_v62, 0.0  ;;  %469 = vmatmul.bf16.gmra.mxu0 %v11210_v46  ;;  %v11630_v46 = vld [vmem:[%s15760_s3 + $0x8] sm:$0xff] }
 0x182   :  { %v2167_v12 = vsel %vm11900_vm7, %v2162_v4, %v2166_v50  ;;  %11617 = vmatpush.bf16.msra.mxu3 %v11630_v46  ;;  %v812_v60 = vsel %vm11877_vm4, 0, %v811_v49  ;;  %v11631_v4 = vld [vmem:[%s15760_s3] sm:$0xff] }
 0x183   :  { %v2172_v13 = vrot.slane %v2171_v5, 4  ;;  %v1097_v18 = vsel %vm11939_vm11, %v1089_v8, %v1096_v9  ;;  %v1599_v20 = vsel %vm11863_vm2, %v1098_v10, %v1598_v0  ;;  %v612_v21 = vpack.c.bf16 %v548_v11, %v548_v11  ;;  %v1755_v22 = vld [vmem:[#allocation2 + $0xa8] sm:$0xf]  ;;  %v11214_v8 = vld [vmem:[%s15759_s0 + $0xd0] sm:$0xff]  ;;  %813 = vst [vmem:[#allocation2 + $0xec] sm:$0x1] %v812_v60 }
 0x184   :  { %1597 = vst [vmem:[#allocation2 + $0xac] sm:$0xf] %v1097_v18  ;;  %v2179_v26 = vshrl.u32 %v1755_v22, 16  ;;  %v2182_v27 = vshll.u32 %v1755_v22, 16  ;;  %v2653_v33 = vunpack.c.l.b16 %v2167_v12 }
 0x185   :  { %v2177_v25 = vsel %vm11900_vm7, %v2172_v13, %v2176_v14  ;;  %1600 = vst [vmem:[#allocation2 + $0xb0] sm:$0x1] %v1599_v20  ;;  %v1100_v31 = vshrl.u32 %v612_v21, 16  ;;  %v1103_v35 = vshll.u32 %v612_v21, 16  ;;  %489 = vmatmul.bf16.gmra.mxu3 %v11214_v8  ;;  %v1605_v21 = vld [vmem:[#allocation2 + $0xbc] sm:$0x1] }
 0x186   :  { %v2654_v34 = vunpack.c.l.b16 %v2177_v25  ;;  %v432_v36 = vpop.f32.mrf.mxu0  ;;  %v2181_v44 = vrot.slane %v2179_v26, 4  ;;  %v2184_v45 = vrot.slane %v2182_v27, 5  ;;  %11618 = vmatpush.bf16.msra.mxu3 %v11631_v4 }
 0x187   :  { %v2837_v37 = vpop.f32.mrf.mxu1  ;;  %v1102_v38 = vrot.slane %v1100_v31, 7  ;;  %v433_v39 = vadd.f32 %v12108_v54, %v432_v36  ;;  %v3248_v43 = vpop.f32.mrf.mxu2  ;;  %v716_v36 = vld [vmem:[#allocation2 + $0xf0] sm:$0x1] }
 0x188   :  { %v12276_v40 = vadd.f32 %v3246_v2, %v2837_v37  ;;  %v2704_v41 = vpack.c.b16 %v2654_v34, %v2653_v33  ;;  %v2185_v62 = vor.u32 %v2184_v45, %v2181_v44 }
 0x189   :  { %v1105_v47 = vor.u32 %v1103_v35, %v1102_v38  ;;  %v549_v48 = vmax.f32 %v433_v39, 0.0  ;;  %v1106_v26 = vrot.slane %v1102_v38, 4  ;;  %v717_v38 = vsel %vm11863_vm2, 0, %v716_v36 }
 0x18a   :  { %2876 = vmatmul.bf16.gmra.mxu1 %v2704_v41  ;;  %v2186_v17 = vrot.slane %v2185_v62, 4  ;;  %718 = vst [vmem:[#allocation2 + $0xf0] sm:$0x1] %v717_v38 }
 0x18b   :  { %v1602_v50 = vsel %vm11926_vm9, %v1105_v47, %v1601_v42  ;;  %v613_v52 = vpack.c.bf16 %v549_v48, %v549_v48  ;;  %v11242_v56 = vld [vmem:[#allocation2 + $0xa8] sm:$0xff] }
 0x18c   :  { %v1756_v57 = vld [vmem:[#allocation2 + $0xac] sm:$0xf]  ;;  %1603 = vst [vmem:[#allocation2 + $0xb4] sm:$0xf] %v1602_v50  ;;  %v1821_v61 = vld [vmem:[#allocation2 + $0xb0] sm:$0x1]  ;;  %3290 = vmatmul.bf16.gmra.mxu2 %v11242_v56 }
 0x18d   :  { %v2188_v0 = vshll.u32 %v1756_v57, 16  ;;  %v2192_v2 = vshrl.u32 %v1756_v57, 16  ;;  %v1108_v5 = vshrl.u32 %v613_v52, 16  ;;  %v2198_v13 = vshll.u32 %v1821_v61, 16  ;;  %v1759_v56 = vld [vmem:[#allocation2 + $0xd8] sm:$0xf] }
 0x18e   :  { %v435_v9 = vpop.f32.mrf.mxu0  ;;  %v1111_v15 = vshll.u32 %v613_v52, 16 }
 0x18f   :  { %v2839_v10 = vpop.f32.mrf.mxu1  ;;  %v2190_v11 = vrot.slane %v2188_v0, 5  ;;  %v2194_v12 = vrot.slane %v2192_v2, 4  ;;  %v1110_v14 = vrot.slane %v1108_v5, 7  ;;  %v436_v18 = vadd.f32 %v12108_v54, %v435_v9  ;;  %v3251_v22 = vpop.f32.mrf.mxu2  ;;  %v1608_v0 = vld [vmem:[#allocation2 + $0xc0] sm:$0xf] }
 0x190   :  { %v12295_v20 = vadd.f32 %v3248_v43, %v2839_v10  ;;  %v2200_v35 = vrot.slane %v2198_v13, 5  ;;  %v2227_v10 = vshrl.u32 %v1759_v56, 16 }
 0x191   :  { %v2195_v25 = vor.u32 %v2194_v12, %v2190_v11  ;;  %v1113_v27 = vor.u32 %v1111_v15, %v1110_v14  ;;  %v1115_v29 = vrot.slane %v1110_v14, 4  ;;  %v550_v31 = vmax.f32 %v436_v18, 0.0  ;;  %474 = vmatmul.bf16.gmra.mxu0 %v11211_v6  ;;  %v1760_v6 = vld [vmem:[#allocation2 + $0xdc] sm:$0xf] }
 0x192   :  { %v2191_v33 = vsel %vm11900_vm7, %v2186_v17, %v2190_v11  ;;  %v814_v11 = vld [vmem:[#allocation2 + $0xf8] sm:$0x1]  ;;  %v2230_v12 = vshll.u32 %v1759_v56, 16 }
 0x193   :  { %v2196_v34 = vrot.slane %v2195_v25, 4  ;;  %v1114_v37 = vsel %vm11939_vm11, %v1106_v26, %v1113_v27  ;;  %v1606_v39 = vsel %vm11863_vm2, %v1115_v29, %v1605_v21  ;;  %v614_v41 = vpack.c.bf16 %v550_v31, %v550_v31  ;;  %v1757_v42 = vld [vmem:[#allocation2 + $0xb4] sm:$0xf] }
 0x194   :  { %1604 = vst [vmem:[#allocation2 + $0xb8] sm:$0xf] %v1114_v37  ;;  %v2203_v44 = vshrl.u32 %v1757_v42, 16  ;;  %v2206_v45 = vshll.u32 %v1757_v42, 16  ;;  %v2655_v47 = vunpack.c.l.b16 %v2191_v33  ;;  %v815_v21 = vsel %vm11877_vm4, 0, %v814_v11 }
 0x195   :  { %v2201_v43 = vsel %vm11900_vm7, %v2196_v34, %v2200_v35  ;;  %1607 = vst [vmem:[#allocation2 + $0xbc] sm:$0x1] %v1606_v39  ;;  %v1117_v46 = vshrl.u32 %v614_v41, 16  ;;  %v1120_v49 = vshll.u32 %v614_v41, 16  ;;  %v2229_v31 = vrot.slane %v2227_v10, 4  ;;  %v11215_v34 = vld [vmem:[%s15759_s0 + $0xd8] sm:$0xff] }
 0x196   :  { %v2656_v48 = vunpack.c.l.b16 %v2201_v43  ;;  %v437_v50 = vpop.f32.mrf.mxu0  ;;  %v2205_v4 = vrot.slane %v2203_v44, 4  ;;  %v2208_v5 = vrot.slane %v2206_v45, 5  ;;  %v2240_v33 = vshrl.u32 %v1760_v6, 16  ;;  %816 = vst [vmem:[#allocation2 + $0xf8] sm:$0x1] %v815_v21  ;;  %494 = vmatmul.bf16.gmra.mxu3 %v11215_v34 }
 0x197   :  { %v2842_v52 = vpop.f32.mrf.mxu1  ;;  %v1119_v57 = vrot.slane %v1117_v46, 7  ;;  %v438_v60 = vadd.f32 %v12108_v54, %v437_v50  ;;  %v3253_v2 = vpop.f32.mrf.mxu2  ;;  %v2232_v42 = vrot.slane %v2230_v12, 5  ;;  %v11284_v46 = vld [vmem:[#allocation2 + $0xc] sm:$0xff] }
 0x198   :  { %v12308_v61 = vadd.f32 %v3251_v22, %v2842_v52  ;;  %v2705_v62 = vpack.c.b16 %v2656_v48, %v2655_v47  ;;  %v2236_v22 = vshll.u32 %v1760_v6, 16  ;;  %v2209_v25 = vor.u32 %v2208_v5, %v2205_v4  ;;  %v1612_v48 = vld [vmem:[#allocation2 + $0xc8] sm:$0x1]  ;;  %v1823_v4 = vld [vmem:[#allocation2 + $0xe0] sm:$0x1] }
 0x199   :  { %v1122_v8 = vor.u32 %v1120_v49, %v1119_v57  ;;  %v551_v9 = vmax.f32 %v438_v60, 0.0  ;;  %v1123_v47 = vrot.slane %v1119_v57, 4  ;;  %v2242_v5 = vrot.slane %v2240_v33, 4 }
 0x19a   :  { %2881 = vmatmul.bf16.gmra.mxu1 %v2705_v62  ;;  %v2210_v50 = vrot.slane %v2209_v25, 4  ;;  %v12320_v56 = vrot.slane %v2236_v22, 5 }
 0x19b   :  { %v1609_v13 = vsel %vm11926_vm9, %v1122_v8, %v1608_v0  ;;  %v615_v14 = vpack.c.bf16 %v551_v9, %v551_v9  ;;  %v11243_v15 = vld [vmem:[#allocation2 + $0xb4] sm:$0xff]  ;;  %v719_v9 = vld [vmem:[#allocation2 + $0xfc] sm:$0x1] }
 0x19c   :  { %v1758_v18 = vld [vmem:[#allocation2 + $0xb8] sm:$0xf]  ;;  %1610 = vst [vmem:[#allocation2 + $0xc0] sm:$0xf] %v1609_v13  ;;  %v1822_v17 = vld [vmem:[#allocation2 + $0xbc] sm:$0x1]  ;;  %3295 = vmatmul.bf16.gmra.mxu2 %v11243_v15 }
 0x19d   :  { %v2212_v26 = vshll.u32 %v1758_v18, 16  ;;  %v2216_v27 = vshrl.u32 %v1758_v18, 16  ;;  %v1125_v29 = vshrl.u32 %v615_v14, 16  ;;  %v2222_v41 = vshll.u32 %v1822_v17, 16 }
 0x19e   :  { %v440_v35 = vpop.f32.mrf.mxu0  ;;  %v1128_v43 = vshll.u32 %v615_v14, 16  ;;  %v720_v12 = vsel %vm11863_vm2, 0, %v719_v9  ;;  %v2233_v14 = vor.u32 %v2232_v42, %v2229_v31  ;;  %v2246_v15 = vshll.u32 %v1823_v4, 16  ;;  %v11244_v42 = vld [vmem:[#allocation2 + $0xd8] sm:$0xff] }
 0x19f   :  { %v2844_v36 = vpop.f32.mrf.mxu1  ;;  %v2214_v37 = vrot.slane %v2212_v26, 5  ;;  %v2218_v39 = vrot.slane %v2216_v27, 4  ;;  %v1127_v38 = vrot.slane %v1125_v29, 7  ;;  %v441_v44 = vadd.f32 %v12108_v54, %v440_v35  ;;  %v3256_v49 = vpop.f32.mrf.mxu2  ;;  %721 = vst [vmem:[#allocation2 + $0xfc] sm:$0x1] %v720_v12  ;;  %v11285_v9 = vld [vmem:[#allocation2 + $0x18] sm:$0xff] }
 0x1a0   :  { %v12318_v45 = vadd.f32 %v3253_v2, %v2844_v36  ;;  %v2224_v8 = vrot.slane %v2222_v41, 5  ;;  %v2243_v17 = vor.u32 %v2242_v5, %v12320_v56  ;;  %v1615_v36 = vld [vmem:[#allocation2 + $0xe4] sm:$0xf]  ;;  %v2234_v31 = vrot.slane %v2233_v14, 4 }
 0x1a1   :  { %v2219_v52 = vor.u32 %v2218_v39, %v2214_v37  ;;  %v1130_v60 = vor.u32 %v1128_v43, %v1127_v38  ;;  %v1132_v62 = vrot.slane %v1127_v38, 4  ;;  %v552_v0 = vmax.f32 %v441_v44, 0.0  ;;  %4459 = vmatmul.bf16.vlgmr.msrb.gmra.mxu0 %v11284_v46  ;;  %v817_v44 = vld [vmem:[#allocation2 + $0x104] sm:$0x1] }
 0x1a2   :  { %v2215_v6 = vsel %vm11900_vm7, %v2210_v50, %v2214_v37  ;;  %v2244_v38 = vrot.slane %v2243_v17, 4  ;;  %v2248_v43 = vrot.slane %v2246_v15, 5 }
 0x1a3   :  { %v2220_v2 = vrot.slane %v2219_v52, 4  ;;  %v1131_v57 = vsel %vm11939_vm11, %v1123_v47, %v1130_v60  ;;  %v1613_v10 = vsel %vm11863_vm2, %v1132_v62, %v1612_v48  ;;  %v616_v11 = vpack.c.bf16 %v552_v0, %v552_v0  ;;  %v11331_v48 = vld [vmem:[%s15760_s3 + $0x138] sm:$0xff] }
 0x1a4   :  { %1611 = vst [vmem:[#allocation2 + $0xc4] sm:$0xf] %v1131_v57  ;;  %v2657_v21 = vunpack.c.l.b16 %v2215_v6  ;;  %v2239_v52 = vsel %vm11900_vm7, %v2234_v31, %v12320_v56  ;;  %v2249_v60 = vsel %vm11900_vm7, %v2244_v38, %v2248_v43  ;;  %5741 = vmatpush.bf16.msrb.mxu1 %v11331_v48  ;;  %v12354_v6 = vld [vmem:[%s15758_s2] ss:$0 sm:$0xff]  ;;  %v1619_v56 = vld [vmem:[#allocation2 + $0xec] sm:$0x1] }
 0x1a5   :  { %v2225_v13 = vsel %vm11900_vm7, %v2220_v2, %v2224_v8  ;;  %1614 = vst [vmem:[#allocation2 + $0xc8] sm:$0x1] %v1613_v10  ;;  %v1134_v18 = vshrl.u32 %v616_v11, 16  ;;  %v1137_v25 = vshll.u32 %v616_v11, 16  ;;  %v2659_v10 = vunpack.c.l.b16 %v2239_v52  ;;  %v1622_v38 = vld [vmem:[#allocation2 + $0xf0] sm:$0xf] }
 0x1a6   :  { %v2658_v22 = vunpack.c.l.b16 %v2225_v13  ;;  %v442_v26 = vpop.f32.mrf.mxu0  ;;  %v2660_v11 = vunpack.c.l.b16 %v2249_v60  ;;  %v820_v48 = vld [vmem:[#allocation2 + $0x110] sm:$0x1] }
 0x1a7   :  { %v2847_v27 = vpop.f32.mrf.mxu1  ;;  %v1136_v29 = vrot.slane %v1134_v18, 7  ;;  %v443_v33 = vadd.f32 %v12108_v54, %v442_v26  ;;  %v3258_v37 = vpop.f32.mrf.mxu2  ;;  %v818_v54 = vsel %vm11877_vm4, 0, %v817_v44  ;;  %v722_v18 = vld [vmem:[#allocation2 + $0x108] sm:$0x1] }
 0x1a8   :  { %v12334_v34 = vadd.f32 %v3256_v49, %v2847_v27  ;;  %v2706_v35 = vpack.c.b16 %v2658_v22, %v2657_v21  ;;  %v11216_v49 = vld [vmem:[%s15759_s0 + $0xe0] sm:$0xff]  ;;  %819 = vst [vmem:[#allocation2 + $0x104] sm:$0x1] %v818_v54  ;;  %v723_v26 = vsel %vm11863_vm2, 0, %v722_v18 }
 0x1a9   :  { %v1139_v39 = vor.u32 %v1137_v25, %v1136_v29  ;;  %v553_v41 = vmax.f32 %v443_v33, 0.0  ;;  %499 = vmatmul.bf16.gmra.mxu3 %v11216_v49  ;;  %v1140_v12 = vrot.slane %v1136_v29, 4  ;;  %724 = vst [vmem:[#allocation2 + $0x108] sm:$0x1] %v723_v26 }
 0x1aa   :  { %2886 = vmatmul.bf16.gmra.mxu1 %v2706_v35  ;;  %v2707_v35 = vpack.c.b16 %v2660_v11, %v2659_v10 }
 0x1ab   :  { %v1616_v46 = vsel %vm11926_vm9, %v1139_v39, %v1615_v36  ;;  %v617_v47 = vpack.c.bf16 %v553_v41, %v553_v41 }
 0x1ac   :  { %1617 = vst [vmem:[#allocation2 + $0xe4] sm:$0xf] %v1616_v46  ;;  %3300 = vmatmul.bf16.gmra.mxu2 %v11244_v42 }
 0x1ad   :  { %v1142_v50 = vshrl.u32 %v617_v47, 16  ;;  %v1145_v5 = vshll.u32 %v617_v47, 16 }
 0x1ae   :  { %v445_v62 = vpop.f32.mrf.mxu0 }
 0x1af   :  { %v2849_v0 = vpop.f32.mrf.mxu1  ;;  %v1144_v4 = vrot.slane %v1142_v50, 7  ;;  %v446_v2 = vadd.f32 %v12354_v6, %v445_v62  ;;  %v3261_v57 = vpop.f32.mrf.mxu2  ;;  %v821_v62 = vsel %vm11877_vm4, 0, %v820_v48 }
 0x1b0   :  { %v12357_v8 = vadd.f32 %v3258_v37, %v2849_v0  ;;  %822 = vst [vmem:[#allocation2 + $0x110] sm:$0x1] %v821_v62 }
 0x1b1   :  { %v1147_v13 = vor.u32 %v1145_v5, %v1144_v4  ;;  %v1149_v14 = vrot.slane %v1144_v4, 4  ;;  %v554_v15 = vmax.f32 %v446_v2, 0.0  ;;  %4464 = vmatmul.bf16.gmra.mxu0 %v11285_v9 }
 0x1b3   :  { %v1148_v21 = vsel %vm11939_vm11, %v1140_v12, %v1147_v13  ;;  %v1620_v22 = vsel %vm11863_vm2, %v1149_v14, %v1619_v56  ;;  %v618_v17 = vpack.c.bf16 %v554_v15, %v554_v15  ;;  %v1761_v25 = vld [vmem:[#allocation2 + $0xe4] sm:$0xf]  ;;  %v11217_v56 = vld [vmem:[%s15759_s0 + $0xe8] sm:$0xff] }
 0x1b4   :  { %1618 = vst [vmem:[#allocation2 + $0xe8] sm:$0xf] %v1148_v21  ;;  %v2251_v27 = vshrl.u32 %v1761_v25, 16  ;;  %v2254_v33 = vshll.u32 %v1761_v25, 16 }
 0x1b5   :  { %1621 = vst [vmem:[#allocation2 + $0xec] sm:$0x1] %v1620_v22  ;;  %v1151_v29 = vshrl.u32 %v618_v17, 16  ;;  %v1154_v39 = vshll.u32 %v618_v17, 16  ;;  %v11286_v22 = vld [vmem:[#allocation2 + $0x24] sm:$0xff] }
 0x1b6   :  { %v447_v36 = vpop.f32.mrf.mxu0  ;;  %v2253_v44 = vrot.slane %v2251_v27, 4  ;;  %v2256_v46 = vrot.slane %v2254_v33, 5  ;;  %v1626_v17 = vld [vmem:[#allocation2 + $0xf8] sm:$0x1] }
 0x1b7   :  { %v2852_v37 = vpop.f32.mrf.mxu1  ;;  %v1153_v31 = vrot.slane %v1151_v29, 7  ;;  %v448_v41 = vadd.f32 %v12354_v6, %v447_v36  ;;  %v3263_v43 = vpop.f32.mrf.mxu2 }
 0x1b8   :  { %v12366_v42 = vadd.f32 %v3261_v57, %v2852_v37  ;;  %v2257_v4 = vor.u32 %v2256_v46, %v2253_v44 }
 0x1b9   :  { %v1156_v47 = vor.u32 %v1154_v39, %v1153_v31  ;;  %v555_v54 = vmax.f32 %v448_v41, 0.0  ;;  %504 = vmatmul.bf16.gmra.mxu3 %v11217_v56  ;;  %v1157_v33 = vrot.slane %v1153_v31, 4 }
 0x1ba   :  { %2891 = vmatmul.bf16.gmra.mxu1 %v2707_v35  ;;  %v2258_v26 = vrot.slane %v2257_v4, 4 }
 0x1bb   :  { %v1623_v49 = vsel %vm11926_vm9, %v1156_v47, %v1622_v38  ;;  %v619_v50 = vpack.c.bf16 %v555_v54, %v555_v54  ;;  %v11245_v52 = vld [vmem:[#allocation2 + $0xe4] sm:$0xff]  ;;  %v725_v38 = vld [vmem:[#allocation2 + $0x114] sm:$0x1] }
 0x1bc   :  { %v1762_v60 = vld [vmem:[#allocation2 + $0xe8] sm:$0xf]  ;;  %1624 = vst [vmem:[#allocation2 + $0xf0] sm:$0xf] %v1623_v49  ;;  %v1824_v0 = vld [vmem:[#allocation2 + $0xec] sm:$0x1]  ;;  %3305 = vmatmul.bf16.gmra.mxu2 %v11245_v52 }
 0x1bd   :  { %v2260_v5 = vshll.u32 %v1762_v60, 16  ;;  %v2264_v2 = vshrl.u32 %v1762_v60, 16  ;;  %v1159_v9 = vshrl.u32 %v619_v50, 16  ;;  %v2270_v13 = vshll.u32 %v1824_v0, 16 }
 0x1be   :  { %v450_v57 = vpop.f32.mrf.mxu0  ;;  %v1162_v15 = vshll.u32 %v619_v50, 16  ;;  %v726_v31 = vsel %vm11863_vm2, 0, %v725_v38 }
 0x1bf   :  { %v2854_v10 = vpop.f32.mrf.mxu1  ;;  %v2262_v11 = vrot.slane %v2260_v5, 5  ;;  %v2266_v12 = vrot.slane %v2264_v2, 4  ;;  %v1161_v14 = vrot.slane %v1159_v9, 7  ;;  %v451_v18 = vadd.f32 %v12354_v6, %v450_v57  ;;  %v3266_v25 = vpop.f32.mrf.mxu2  ;;  %727 = vst [vmem:[#allocation2 + $0x114] sm:$0x1] %v726_v31 }
 0x1c0   :  { %v12376_v21 = vadd.f32 %v3263_v43, %v2854_v10  ;;  %v2272_v41 = vrot.slane %v2270_v13, 5  ;;  %v1629_v57 = vld [vmem:[#allocation2 + $0xfc] sm:$0xf] }
 0x1c1   :  { %v2267_v27 = vor.u32 %v2266_v12, %v2262_v11  ;;  %v1164_v29 = vor.u32 %v1162_v15, %v1161_v14  ;;  %v1166_v35 = vrot.slane %v1161_v14, 4  ;;  %v556_v36 = vmax.f32 %v451_v18, 0.0  ;;  %4469 = vmatmul.bf16.gmra.mxu0 %v11286_v22  ;;  %v823_v15 = vld [vmem:[#allocation2 + $0x11c] sm:$0x1] }
 0x1c2   :  { %v2263_v37 = vsel %vm11900_vm7, %v2258_v26, %v2262_v11 }
 0x1c3   :  { %v2268_v39 = vrot.slane %v2267_v27, 4  ;;  %v1165_v43 = vsel %vm11939_vm11, %v1157_v33, %v1164_v29  ;;  %v1627_v44 = vsel %vm11863_vm2, %v1166_v35, %v1626_v17  ;;  %v620_v46 = vpack.c.bf16 %v556_v36, %v556_v36  ;;  %v1763_v47 = vld [vmem:[#allocation2 + $0xf0] sm:$0xf] }
 0x1c4   :  { %1625 = vst [vmem:[#allocation2 + $0xf4] sm:$0xf] %v1165_v43  ;;  %v2275_v48 = vshrl.u32 %v1763_v47, 16  ;;  %v2278_v49 = vshll.u32 %v1763_v47, 16  ;;  %v2661_v52 = vunpack.c.l.b16 %v2263_v37  ;;  %v824_v27 = vsel %vm11877_vm4, 0, %v823_v15  ;;  %v11218_v37 = vld [vmem:[%s15759_s0 + $0xf0] sm:$0xff] }
 0x1c5   :  { %v2273_v54 = vsel %vm11900_vm7, %v2268_v39, %v2272_v41  ;;  %1628 = vst [vmem:[#allocation2 + $0xf8] sm:$0x1] %v1627_v44  ;;  %v1168_v50 = vshrl.u32 %v620_v46, 16  ;;  %v1171_v62 = vshll.u32 %v620_v46, 16 }
 0x1c6   :  { %v2662_v60 = vunpack.c.l.b16 %v2273_v54  ;;  %v452_v0 = vpop.f32.mrf.mxu0  ;;  %v2277_v11 = vrot.slane %v2275_v48, 4  ;;  %v2280_v12 = vrot.slane %v2278_v49, 5  ;;  %825 = vst [vmem:[#allocation2 + $0x11c] sm:$0x1] %v824_v27  ;;  %v11287_v48 = vld [vmem:[#allocation2 + $0x30] sm:$0xff] }
 0x1c7   :  { %v2857_v4 = vpop.f32.mrf.mxu1  ;;  %v1170_v5 = vrot.slane %v1168_v50, 7  ;;  %v453_v2 = vadd.f32 %v12354_v6, %v452_v0  ;;  %v3268_v10 = vpop.f32.mrf.mxu2  ;;  %v1633_v49 = vld [vmem:[#allocation2 + $0x104] sm:$0x1] }
 0x1c8   :  { %v12389_v9 = vadd.f32 %v3266_v25, %v2857_v4  ;;  %v2708_v56 = vpack.c.b16 %v2662_v60, %v2661_v52  ;;  %v2281_v33 = vor.u32 %v2280_v12, %v2277_v11  ;;  %v728_v12 = vld [vmem:[#allocation2 + $0x120] sm:$0x1] }
 0x1c9   :  { %v1173_v13 = vor.u32 %v1171_v62, %v1170_v5  ;;  %v557_v14 = vmax.f32 %v453_v2, 0.0  ;;  %509 = vmatmul.bf16.gmra.mxu3 %v11218_v37  ;;  %v1174_v62 = vrot.slane %v1170_v5, 4  ;;  %v729_v5 = vsel %vm11863_vm2, 0, %v728_v12 }
 0x1ca   :  { %2896 = vmatmul.bf16.gmra.mxu1 %v2708_v56  ;;  %v2282_v52 = vrot.slane %v2281_v33, 4  ;;  %730 = vst [vmem:[#allocation2 + $0x120] sm:$0x1] %v729_v5  ;;  %v11330_v5 = vld [vmem:[%s15760_s3 + $0x130] sm:$0xff] }
 0x1cb   :  { %v1630_v18 = vsel %vm11926_vm9, %v1173_v13, %v1629_v57  ;;  %v621_v22 = vpack.c.bf16 %v557_v14, %v557_v14  ;;  %v11246_v17 = vld [vmem:[#allocation2 + $0xf0] sm:$0xff]  ;;  %5742 = vmatpush.bf16.msrb.mxu1 %v11330_v5 }
 0x1cc   :  { %v1764_v26 = vld [vmem:[#allocation2 + $0xf4] sm:$0xf]  ;;  %1631 = vst [vmem:[#allocation2 + $0xfc] sm:$0xf] %v1630_v18  ;;  %v1825_v25 = vld [vmem:[#allocation2 + $0xf8] sm:$0x1]  ;;  %3310 = vmatmul.bf16.gmra.mxu2 %v11246_v17 }
 0x1cd   :  { %v2284_v29 = vshll.u32 %v1764_v26, 16  ;;  %v2288_v35 = vshrl.u32 %v1764_v26, 16  ;;  %v1176_v36 = vshrl.u32 %v621_v22, 16  ;;  %v2294_v44 = vshll.u32 %v1825_v25, 16 }
 0x1ce   :  { %v455_v39 = vpop.f32.mrf.mxu0  ;;  %v1179_v47 = vshll.u32 %v621_v22, 16 }
 0x1cf   :  { %v2859_v41 = vpop.f32.mrf.mxu1  ;;  %v2286_v38 = vrot.slane %v2284_v29, 5  ;;  %v2290_v43 = vrot.slane %v2288_v35, 4  ;;  %v1178_v46 = vrot.slane %v1176_v36, 7  ;;  %v456_v31 = vadd.f32 %v12354_v6, %v455_v39  ;;  %v3271_v50 = vpop.f32.mrf.mxu2  ;;  %v4684_v36 = vld [vmem:[#allocation2 + $0xc] sm:$0xf] }
 0x1d0   :  { %v12399_v54 = vadd.f32 %v3268_v10, %v2859_v41  ;;  %v2296_v11 = vrot.slane %v2294_v44, 5  ;;  %v1636_v44 = vld [vmem:[#allocation2 + $0x108] sm:$0xf] }
 0x1d1   :  { %v2291_v60 = vor.u32 %v2290_v43, %v2286_v38  ;;  %v1181_v0 = vor.u32 %v1179_v47, %v1178_v46  ;;  %v1183_v4 = vrot.slane %v1178_v46, 4  ;;  %v558_v2 = vmax.f32 %v456_v31, 0.0  ;;  %4474 = vmatmul.bf16.gmra.mxu0 %v11287_v48  ;;  %v12416_v43 = vld [vmem:[#allocation2 + $0x10] sm:$0xf] }
 0x1d2   :  { %15781 = vst [vmem:[#allocation5_spill] sm:$0xff] %v12399_v54  ;;  %v2287_v56 = vsel %vm11900_vm7, %v2282_v52, %v2286_v38  ;;  %v4781_v52 = vshrl.u32 %v4684_v36, 16 }
 0x1d3   :  { %v2292_v57 = vrot.slane %v2291_v60, 4  ;;  %v1182_v10 = vsel %vm11939_vm11, %v1174_v62, %v1181_v0  ;;  %v1634_v13 = vsel %vm11863_vm2, %v1183_v4, %v1633_v49  ;;  %v622_v14 = vpack.c.bf16 %v558_v2, %v558_v2  ;;  %v1765_v15 = vld [vmem:[#allocation2 + $0xfc] sm:$0xf]  ;;  %v826_v62 = vld [vmem:[#allocation2 + $0x128] sm:$0x1] }
 0x1d4   :  { %1632 = vst [vmem:[#allocation2 + $0x100] sm:$0xf] %v1182_v10  ;;  %v2299_v22 = vshrl.u32 %v1765_v15, 16  ;;  %v2302_v17 = vshll.u32 %v1765_v15, 16  ;;  %v2663_v27 = vunpack.c.l.b16 %v2287_v56  ;;  %v4784_v60 = vshll.u32 %v4684_v36, 16 }
 0x1d5   :  { %v2297_v18 = vsel %vm11900_vm7, %v2292_v57, %v2296_v11  ;;  %1635 = vst [vmem:[#allocation2 + $0x104] sm:$0x1] %v1634_v13  ;;  %v1185_v26 = vshrl.u32 %v622_v14, 16  ;;  %v1188_v33 = vshll.u32 %v622_v14, 16  ;;  %v6104_v0 = vrot.slane %v12416_v43, 5 }
 0x1d6   :  { %v2664_v25 = vunpack.c.l.b16 %v2297_v18  ;;  %v457_v29 = vpop.f32.mrf.mxu0  ;;  %v2301_v47 = vrot.slane %v2299_v22, 4  ;;  %v2304_v31 = vrot.slane %v2302_v17, 5  ;;  %v827_v57 = vsel %vm11877_vm4, 0, %v826_v62 }
 0x1d7   :  { %v2862_v35 = vpop.f32.mrf.mxu1  ;;  %v12411_v37 = vrot.slane %v1185_v26, 7  ;;  %v458_v39 = vadd.f32 %v12354_v6, %v457_v29  ;;  %v3273_v46 = vpop.f32.mrf.mxu2  ;;  %v4790_v11 = vshll.u32 %v12416_v43, 16  ;;  %v12428_v18 = vrot.slane %v4781_v52, 4  ;;  %828 = vst [vmem:[#allocation2 + $0x128] sm:$0x1] %v827_v57 }
 0x1d8   :  { %v12414_v41 = vadd.f32 %v3271_v50, %v2862_v35  ;;  %v2709_v38 = vpack.c.b16 %v2664_v25, %v2663_v27  ;;  %v2305_v10 = vor.u32 %v2304_v31, %v2301_v47  ;;  %v12430_v22 = vrot.slane %v4784_v60, 5  ;;  %v1640_v47 = vld [vmem:[#allocation2 + $0x110] sm:$0x1] }
 0x1d9   :  { %v1190_v48 = vor.u32 %v1188_v33, %v12411_v37  ;;  %v559_v49 = vmax.f32 %v458_v39, 0.0  ;;  %v4794_v29 = vshrl.u32 %v12416_v43, 16  ;;  %v6106_v52 = vrot.slane %v6104_v0, 4 }
 0x1da   :  { %15782 = vst [vmem:[#allocation6_spill] sm:$0xff] %v12414_v41  ;;  %2901 = vmatmul.bf16.gmra.mxu1 %v2709_v38  ;;  %v12438_v60 = vrot.slane %v4790_v11, 5  ;;  %v1191_v62 = vrot.slane %v12411_v37, 4 }
 0x1db   :  { %v1637_v50 = vsel %vm11926_vm9, %v1190_v48, %v1636_v44  ;;  %v623_v4 = vpack.c.bf16 %v559_v49, %v559_v49  ;;  %v11247_v2 = vld [vmem:[#allocation2 + $0xfc] sm:$0xff]  ;;  %v2306_v48 = vrot.slane %v2305_v10, 4  ;;  %v731_v10 = vld [vmem:[#allocation2 + $0x12c] sm:$0x1] }
 0x1dc   :  { %v1766_v56 = vld [vmem:[#allocation2 + $0x100] sm:$0xf]  ;;  %1638 = vst [vmem:[#allocation2 + $0x108] sm:$0xf] %v1637_v50  ;;  %v1826_v12 = vld [vmem:[#allocation2 + $0x104] sm:$0x1]  ;;  %3315 = vmatmul.bf16.gmra.mxu2 %v11247_v2 }
 0x1dd   :  { %v2308_v13 = vshll.u32 %v1766_v56, 16  ;;  %v2312_v14 = vshrl.u32 %v1766_v56, 16  ;;  %v1193_v15 = vshrl.u32 %v623_v4, 16  ;;  %v2318_v33 = vshll.u32 %v1826_v12, 16  ;;  %v11288_v44 = vld [vmem:[#allocation2 + $0x3c] sm:$0xff] }
 0x1de   :  { %v460_v17 = vpop.f32.mrf.mxu0  ;;  %v1196_v36 = vshll.u32 %v623_v4, 16  ;;  %v12441_v56 = vld [vmem:[#allocation2 + $0x14] sm:$0x1]  ;;  %v732_v5 = vsel %vm11863_vm2, 0, %v731_v10 }
 0x1df   :  { %v2864_v26 = vpop.f32.mrf.mxu1  ;;  %v2310_v27 = vrot.slane %v2308_v13, 5  ;;  %v2314_v25 = vrot.slane %v2312_v14, 4  ;;  %v1195_v35 = vrot.slane %v1193_v15, 7  ;;  %v461_v39 = vadd.f32 %v12354_v6, %v460_v17  ;;  %v3276_v31 = vpop.f32.mrf.mxu2  ;;  %v5974_v17 = vld [vmem:[#allocation2 + $0xc] sm:$0xe] }
 0x1e0   :  { %v12434_v38 = vadd.f32 %v3273_v46, %v2864_v26  ;;  %v2320_v12 = vrot.slane %v2318_v33, 5  ;;  %v4796_v13 = vrot.slane %v4794_v29, 4  ;;  %v6107_v33 = vrot.slane %v12441_v56, 5  ;;  %733 = vst [vmem:[#allocation2 + $0x12c] sm:$0x1] %v732_v5 }
 0x1e1   :  { %v2315_v49 = vor.u32 %v2314_v25, %v2310_v27  ;;  %v1198_v50 = vor.u32 %v1196_v36, %v1195_v35  ;;  %v1200_v2 = vrot.slane %v1195_v35, 4  ;;  %v560_v4 = vmax.f32 %v461_v39, 0.0  ;;  %4479 = vmatmul.bf16.gmra.mxu0 %v11288_v44 }
 0x1e2   :  { %15783 = vst [vmem:[#allocation7_spill] sm:$0xff] %v12434_v38  ;;  %v2311_v46 = vsel %vm11900_vm7, %v2306_v48, %v2310_v27 }
 0x1e3   :  { %v2316_v57 = vrot.slane %v2315_v49, 4  ;;  %v1199_v14 = vsel %vm11939_vm11, %v1191_v62, %v1198_v50  ;;  %v1641_v11 = vsel %vm11863_vm2, %v1200_v2, %v1640_v47  ;;  %v624_v37 = vpack.c.bf16 %v560_v4, %v560_v4  ;;  %v1767_v15 = vld [vmem:[#allocation2 + $0x108] sm:$0xf] }
 0x1e4   :  { %1639 = vst [vmem:[#allocation2 + $0x10c] sm:$0xf] %v1199_v14  ;;  %v2323_v27 = vshrl.u32 %v1767_v15, 16  ;;  %v2326_v25 = vshll.u32 %v1767_v15, 16  ;;  %v2665_v35 = vunpack.c.l.b16 %v2311_v46  ;;  %v10772_v49 = vrot.slane %v5974_v17, 9 }
 0x1e5   :  { %v2321_v26 = vsel %vm11900_vm7, %v2316_v57, %v2320_v12  ;;  %1642 = vst [vmem:[#allocation2 + $0x110] sm:$0x1] %v1641_v11  ;;  %v1202_v29 = vshrl.u32 %v624_v37, 16  ;;  %v1205_v44 = vshll.u32 %v624_v37, 16  ;;  %v6108_v62 = vsel %vm12456_vm14, %v6106_v52, %v6107_v33  ;;  %v1643_v12 = vld [vmem:[#allocation2 + $0x114] sm:$0xf] }
 0x1e6   :  { %v2666_v36 = vunpack.c.l.b16 %v2321_v26  ;;  %v462_v47 = vpop.f32.mrf.mxu0  ;;  %v4797_v50 = vor.u32 %v4796_v13, %v12438_v60  ;;  %v2325_v14 = vrot.slane %v2323_v27, 4  ;;  %v2328_v11 = vrot.slane %v2326_v25, 5  ;;  %v829_v17 = vld [vmem:[#allocation2 + $0x134] sm:$0x1] }
 0x1e7   :  { %v2867_v48 = vpop.f32.mrf.mxu1  ;;  %v12463_v2 = vrot.slane %v1202_v29, 7  ;;  %v463_v4 = vadd.f32 %v12354_v6, %v462_v47  ;;  %v3278_v10 = vpop.f32.mrf.mxu2  ;;  %v6105_v37 = vsel %vm12456_vm14, %v10772_v49, %v6104_v0  ;;  %v4787_v52 = vor.u32 %v12430_v22, %v12428_v18  ;;  %v12482_v22 = vld [vmem:[#allocation2 + $0x1c] sm:$0xf] }
 0x1e8   :  { %v12466_v46 = vadd.f32 %v3276_v31, %v2867_v48  ;;  %v2710_v57 = vpack.c.b16 %v2666_v36, %v2665_v35  ;;  %v6344_v5 = vunpack.c.l.b16 %v6108_v62  ;;  %v4800_v31 = vshll.u32 %v12441_v56, 16  ;;  %v11339_v47 = vld [vmem:[%s15760_s3 + $0x178] sm:$0xff] }
 0x1e9   :  { %v1207_v13 = vor.u32 %v1205_v44, %v12463_v2  ;;  %v561_v15 = vmax.f32 %v463_v4, 0.0  ;;  %v12476_v26 = vrot.slane %v4797_v50, 4  ;;  %v830_v0 = vsel %vm11877_vm4, 0, %v829_v17  ;;  %6519 = vmatpush.bf16.msrb.mxu2 %v11339_v47 }
 0x1ea   :  { %15786 = vst [vmem:[#allocation8_spill] sm:$0xff] %v12466_v46  ;;  %2906 = vmatmul.bf16.gmra.mxu1 %v2710_v57  ;;  %v6343_v18 = vunpack.c.l.b16 %v6105_v37  ;;  %v2329_v35 = vor.u32 %v2328_v11, %v2325_v14  ;;  %v4788_v49 = vrot.slane %v4787_v52, 4  ;;  %v12489_v62 = vrot.slane %v4800_v31, 5 }
 0x1eb   :  { %v1644_v27 = vsel %vm11926_vm9, %v1207_v13, %v1643_v12  ;;  %v625_v43 = vpack.c.bf16 %v561_v15, %v561_v15  ;;  %v11248_v25 = vld [vmem:[#allocation2 + $0x108] sm:$0xff]  ;;  %831 = vst [vmem:[#allocation2 + $0x134] sm:$0x1] %v830_v0  ;;  %v15765_v14 = vrot.slane %v12482_v22, 5 }
 0x1ec   :  { %v1768_v33 = vld [vmem:[#allocation2 + $0x10c] sm:$0xf]  ;;  %1645 = vst [vmem:[#allocation2 + $0x114] sm:$0xf] %v1644_v27  ;;  %v1827_v29 = vld [vmem:[#allocation2 + $0x110] sm:$0x1]  ;;  %3320 = vmatmul.bf16.gmra.mxu2 %v11248_v25  ;;  %v12487_v48 = vpack.c.b16 %v6344_v5, %v6343_v18  ;;  %v4803_v0 = vsel %vm11900_vm7, %v12476_v26, %v12489_v62 }
 0x1ed   :  { %v2332_v36 = vshll.u32 %v1768_v33, 16  ;;  %v2336_v56 = vshrl.u32 %v1768_v33, 16  ;;  %v1210_v44 = vshrl.u32 %v625_v43, 16  ;;  %v2342_v37 = vshll.u32 %v1827_v29, 16  ;;  %v11289_v27 = vld [vmem:[#allocation2 + $0x48] sm:$0xff] }
 0x1ee   :  { %v465_v50 = vpop.f32.mrf.mxu0  ;;  %v1213_v13 = vshll.u32 %v625_v43, 16  ;;  %v1647_v5 = vld [vmem:[#allocation2 + $0x11c] sm:$0x1]  ;;  %v2330_v31 = vrot.slane %v2329_v35, 4  ;;  %v4793_v33 = vsel %vm11900_vm7, %v4788_v49, %v12438_v60  ;;  %v12502_v43 = vld [vmem:[#allocation2 + $0x18] sm:$0xf]  ;;  %v480_v49 = vpop.f32.mrf.mxu3 }
 0x1ef   :  { %v2869_v4 = vpop.f32.mrf.mxu1  ;;  %v2334_v57 = vrot.slane %v2332_v36, 5  ;;  %v2338_v12 = vrot.slane %v2336_v56, 4  ;;  %v1212_v11 = vrot.slane %v1210_v44, 7  ;;  %v466_v15 = vadd.f32 %v12354_v6, %v465_v50  ;;  %v3281_v52 = vpop.f32.mrf.mxu2  ;;  %v11338_v35 = vld [vmem:[%s15760_s3 + $0x170] sm:$0xff]  ;;  %v12508_v56 = vld [vmem:[#allocation2 + $0x20] sm:$0x1] }
 0x1f0   :  { %v12493_v17 = vadd.f32 %v3278_v10, %v2869_v4  ;;  %v1208_v10 = vrot.slane %v12463_v2, 4  ;;  %v2344_v47 = vrot.slane %v2342_v37, 5  ;;  %v734_v26 = vld [vmem:[#allocation2 + $0x138] sm:$0x1]  ;;  %v6113_v2 = vrot.slane %v15765_v14, 4  ;;  %6520 = vmatpush.bf16.msrb.mxu2 %v11338_v35 }
 0x1f1   :  { %v2339_v25 = vor.u32 %v2338_v12, %v2334_v57  ;;  %v1215_v18 = vor.u32 %v1213_v13, %v1212_v11  ;;  %v1217_v29 = vrot.slane %v1212_v11, 4  ;;  %v562_v36 = vmax.f32 %v466_v15, 0.0  ;;  %4484 = vmatmul.bf16.gmra.mxu0 %v11289_v27 }
 0x1f2   :  { %15787 = vst [vmem:[#allocation9_spill] sm:$0xff] %v12493_v17  ;;  %v2335_v60 = vsel %vm11900_vm7, %v2330_v31, %v2334_v57  ;;  %v735_v11 = vsel %vm11863_vm2, 0, %v734_v26  ;;  %v6114_v15 = vrot.slane %v12508_v56, 5 }
 0x1f3   :  { %v2340_v44 = vrot.slane %v2339_v25, 4  ;;  %v1216_v62 = vsel %vm11939_vm11, %v1208_v10, %v1215_v18  ;;  %v1648_v50 = vsel %vm11863_vm2, %v1217_v29, %v1647_v5  ;;  %v626_v4 = vpack.c.bf16 %v562_v36, %v562_v36  ;;  %v1769_v12 = vld [vmem:[#allocation2 + $0x114] sm:$0xf]  ;;  %v5975_v10 = vld [vmem:[#allocation2 + $0x18] sm:$0xe] }
 0x1f4   :  { %1646 = vst [vmem:[#allocation2 + $0x118] sm:$0xf] %v1216_v62  ;;  %v2347_v37 = vshrl.u32 %v1769_v12, 16  ;;  %v2350_v13 = vshll.u32 %v1769_v12, 16  ;;  %v2667_v31 = vunpack.c.l.b16 %v2335_v60  ;;  %v4805_v5 = vshrl.u32 %v12502_v43, 16 }
 0x1f5   :  { %v2345_v57 = vsel %vm11900_vm7, %v2340_v44, %v2344_v47  ;;  %1649 = vst [vmem:[#allocation2 + $0x11c] sm:$0x1] %v1648_v50  ;;  %v1219_v27 = vshrl.u32 %v626_v4, 16  ;;  %v1222_v18 = vshll.u32 %v626_v4, 16  ;;  %v11337_v44 = vld [vmem:[%s15760_s3 + $0x168] sm:$0xff]  ;;  %v12527_v47 = vunpack.c.l.b16 %v4793_v33 }
 0x1f6   :  { %v2668_v25 = vunpack.c.l.b16 %v2345_v57  ;;  %v467_v29 = vpop.f32.mrf.mxu0  ;;  %v2349_v26 = vrot.slane %v2347_v37, 4  ;;  %v2352_v35 = vrot.slane %v2350_v13, 5  ;;  %736 = vst [vmem:[#allocation2 + $0x138] sm:$0x1] %v735_v11  ;;  %v1650_v57 = vld [vmem:[#allocation2 + $0x120] sm:$0xf]  ;;  %6521 = vmatpush.bf16.msrb.mxu2 %v11337_v44  ;;  %v12534_v37 = vunpack.c.l.b16 %v4803_v0  ;;  %v482_v0 = vpop.f32.mrf.mxu3 }
 0x1f7   :  { %v2872_v36 = vpop.f32.mrf.mxu1  ;;  %v12529_v62 = vrot.slane %v1219_v27, 7  ;;  %v468_v60 = vadd.f32 %v12354_v6, %v467_v29  ;;  %v3283_v4 = vpop.f32.mrf.mxu2  ;;  %v10773_v11 = vrot.slane %v5975_v10, 9  ;;  %v12538_v13 = vsel %vm12456_vm14, %v6113_v2, %v6114_v15  ;;  %v832_v29 = vld [vmem:[#allocation2 + $0x140] sm:$0x1] }
 0x1f8   :  { %v12532_v50 = vadd.f32 %v3281_v52, %v2872_v36  ;;  %v2711_v12 = vpack.c.b16 %v2668_v25, %v2667_v31  ;;  %v2353_v14 = vor.u32 %v2352_v35, %v2349_v26  ;;  %v12541_v51 = vrot.slane %v4805_v5, 4 }
 0x1f9   :  { %v1224_v33 = vor.u32 %v1222_v18, %v12529_v62  ;;  %v563_v27 = vmax.f32 %v468_v60, 0.0  ;;  %v1225_v31 = vrot.slane %v12529_v62, 4  ;;  %v481_v25 = vadd.f32 %v12354_v6, %v480_v49 }
 0x1fa   :  { %15788 = vst [vmem:[#allocation10_spill] sm:$0xff] %v12532_v50  ;;  %2911 = vmatmul.bf16.gmra.mxu1 %v2711_v12  ;;  %v2354_v5 = vrot.slane %v2353_v14, 4  ;;  %v833_v35 = vsel %vm11877_vm4, 0, %v832_v29  ;;  %v15789_v12 = vrot.slane %v12482_v22, 5 }
 0x1fb   :  { %v1651_v2 = vsel %vm11926_vm9, %v1224_v33, %v1650_v57  ;;  %v627_v15 = vpack.c.bf16 %v563_v27, %v563_v27  ;;  %v11249_v18 = vld [vmem:[#allocation2 + $0x114] sm:$0xff]  ;;  %v568_v27 = vmax.f32 %v481_v25, 0.0  ;;  %834 = vst [vmem:[#allocation2 + $0x140] sm:$0x1] %v833_v35  ;;  %v1654_v35 = vld [vmem:[#allocation2 + $0x128] sm:$0x1] }
 0x1fc   :  { %v1770_v26 = vld [vmem:[#allocation2 + $0x118] sm:$0xf]  ;;  %1652 = vst [vmem:[#allocation2 + $0x120] sm:$0xf] %v1651_v2  ;;  %v1828_v44 = vld [vmem:[#allocation2 + $0x11c] sm:$0x1]  ;;  %v12558_v36 = vsel %vm12456_vm14, %v10773_v11, %v15789_v12  ;;  %3325 = vmatmul.bf16.gmra.mxu2 %v11249_v18 }
 0x1fd   :  { %v2356_v62 = vshll.u32 %v1770_v26, 16  ;;  %v2360_v49 = vshrl.u32 %v1770_v26, 16  ;;  %v1227_v57 = vshrl.u32 %v627_v15, 16  ;;  %v1230_v33 = vshll.u32 %v627_v15, 16  ;;  %v11290_v12 = vld [vmem:[#allocation2 + $0x54] sm:$0xff]  ;;  %v11336_v18 = vld [vmem:[%s15760_s3 + $0x160] sm:$0xff] }
 0x1fe   :  { %v2366_v14 = vshll.u32 %v1828_v44, 16  ;;  %v470_v10 = vpop.f32.mrf.mxu0  ;;  %v483_v26 = vadd.f32 %v12354_v6, %v482_v0  ;;  %v11219_v25 = vld [vmem:[%s15759_s0 + $0xf8] sm:$0xff]  ;;  %6522 = vmatpush.bf16.msrb.mxu2 %v11336_v18 }
 0x1ff   :  { %v2874_v29 = vpop.f32.mrf.mxu1  ;;  %v2358_v2 = vrot.slane %v2356_v62, 5  ;;  %v2362_v52 = vrot.slane %v2360_v49, 4  ;;  %v1229_v50 = vrot.slane %v1227_v57, 7  ;;  %v471_v17 = vadd.f32 %v12354_v6, %v470_v10  ;;  %v3286_v44 = vpop.f32.mrf.mxu2  ;;  %v835_v10 = vld [vmem:[#allocation2 + $0x14c] sm:$0x1]  ;;  %514 = vmatmul.bf16.gmra.mxu3 %v11219_v25 }
 0x200   :  { %v12563_v11 = vadd.f32 %v3283_v4, %v2874_v29  ;;  %v2368_v15 = vrot.slane %v2366_v14, 5  ;;  %v632_v49 = vpack.c.bf16 %v568_v27, %v568_v27  ;;  %v738_v4 = vsel %vm11863_vm2, 0, %v737_v7  ;;  %v485_v25 = vpop.f32.mrf.mxu3 }
 0x201   :  { %v2359_v0 = vsel %vm11900_vm7, %v2354_v5, %v2358_v2  ;;  %v2363_v62 = vor.u32 %v2362_v52, %v2358_v2  ;;  %v1232_v57 = vor.u32 %v1230_v33, %v1229_v50  ;;  %v1234_v14 = vrot.slane %v1229_v50, 4  ;;  %4489 = vmatmul.bf16.gmra.mxu0 %v11290_v12  ;;  %739 = vst [vmem:[#allocation2 + $0x144] sm:$0x1] %v738_v4  ;;  %v11335_v52 = vld [vmem:[%s15760_s3 + $0x158] sm:$0xff] }
 0x202   :  { %15790 = vst [vmem:[#allocation11_spill] sm:$0xff] %v12563_v11  ;;  %v564_v29 = vmax.f32 %v471_v17, 0.0  ;;  %v2669_v60 = vunpack.c.l.b16 %v2359_v0  ;;  %v1270_v46 = vshrl.u32 %v632_v49, 16  ;;  %v1273_v38 = vshll.u32 %v632_v49, 16  ;;  %6523 = vmatpush.bf16.msrb.mxu2 %v11335_v52 }
 0x203   :  { %v2364_v11 = vrot.slane %v2363_v62, 4  ;;  %v569_v41 = vmax.f32 %v483_v26, 0.0  ;;  %v1233_v7 = vsel %vm11939_vm11, %v1225_v31, %v1232_v57  ;;  %v1655_v50 = vsel %vm11863_vm2, %v1234_v14, %v1654_v35  ;;  %v1771_v33 = vld [vmem:[#allocation2 + $0x120] sm:$0xf]  ;;  %v11329_v31 = vld [vmem:[%s15760_s3 + $0x128] sm:$0xff] }
 0x204   :  { %v628_v17 = vpack.c.bf16 %v564_v29, %v564_v29  ;;  %v836_v5 = vsel %vm11877_vm4, 0, %v835_v10  ;;  %1653 = vst [vmem:[#allocation2 + $0x124] sm:$0xf] %v1233_v7  ;;  %v1272_v2 = vrot.slane %v1270_v46, 7  ;;  %v2371_v12 = vshrl.u32 %v1771_v33, 16  ;;  %5743 = vmatpush.bf16.msrb.mxu1 %v11329_v31 }
 0x205   :  { %v2369_v27 = vsel %vm11900_vm7, %v2364_v11, %v2368_v15  ;;  %v633_v26 = vpack.c.bf16 %v569_v41, %v569_v41  ;;  %1656 = vst [vmem:[#allocation2 + $0x128] sm:$0x1] %v1655_v50  ;;  %v486_v62 = vadd.f32 %v12354_v6, %v485_v25  ;;  %v11334_v41 = vld [vmem:[%s15760_s3 + $0x150] sm:$0xff]  ;;  %v1657_v14 = vld [vmem:[#allocation2 + $0x12c] sm:$0xf] }
 0x206   :  { %v1236_v18 = vshrl.u32 %v628_v17, 16  ;;  %v1239_v35 = vshll.u32 %v628_v17, 16  ;;  %v2670_v0 = vunpack.c.l.b16 %v2369_v27  ;;  %v472_v49 = vpop.f32.mrf.mxu0  ;;  %v1275_v10 = vor.u32 %v1273_v38, %v1272_v2  ;;  %837 = vst [vmem:[#allocation2 + $0x14c] sm:$0x1] %v836_v5  ;;  %v740_v17 = vld [vmem:[#allocation2 + $0x150] sm:$0x1]  ;;  %6524 = vmatpush.bf16.msrb.mxu2 %v11334_v41 }
 0x207   :  { %v2877_v4 = vpop.f32.mrf.mxu1  ;;  %v1276_v57 = vrot.slane %v1272_v2, 4  ;;  %v1278_v11 = vshrl.u32 %v633_v26, 16  ;;  %v1281_v46 = vshll.u32 %v633_v26, 16  ;;  %v473_v29 = vadd.f32 %v12354_v6, %v472_v49  ;;  %v11328_v38 = vld [vmem:[%s15760_s3 + $0x120] sm:$0xff]  ;;  %v3288_v5 = vpop.f32.mrf.mxu2 }
 0x208   :  { %v12593_v15 = vrot.slane %v1236_v18, 7  ;;  %v12596_v7 = vadd.f32 %v3286_v44, %v2877_v4  ;;  %v2712_v50 = vpack.c.b16 %v2670_v0, %v2669_v60  ;;  %v1671_v52 = vld [vmem:[#allocation2 + $0x144] sm:$0xf]  ;;  %v2373_v2 = vrot.slane %v2371_v12, 4  ;;  %v838_v44 = vld [vmem:[#allocation2 + $0x158] sm:$0x1]  ;;  %5744 = vmatpush.bf16.msrb.mxu1 %v11328_v38 }
 0x209   :  { %v1280_v27 = vrot.slane %v1278_v11, 7  ;;  %v2374_v26 = vshll.u32 %v1771_v33, 16  ;;  %v570_v25 = vmax.f32 %v486_v62, 0.0  ;;  %v565_v54 = vmax.f32 %v473_v29, 0.0  ;;  %v11333_v33 = vld [vmem:[%s15760_s3 + $0x148] sm:$0xff]  ;;  %v11327_v12 = vld [vmem:[%s15760_s3 + $0x118] sm:$0xff] }
 0x20a   :  { %15791 = vst [vmem:[#allocation12_spill] sm:$0xff] %v12596_v7  ;;  %v1241_v31 = vor.u32 %v1239_v35, %v12593_v15  ;;  %v1242_v18 = vrot.slane %v12593_v15, 4  ;;  %2916 = vmatmul.bf16.gmra.mxu1 %v2712_v50  ;;  %v1672_v60 = vsel %vm11926_vm9, %v1275_v10, %v1671_v52  ;;  %v839_v41 = vsel %vm11877_vm4, 0, %v838_v44  ;;  %6525 = vmatpush.bf16.msrb.mxu2 %v11333_v33 }
 0x20b   :  { %1673 = vst [vmem:[#allocation2 + $0x144] sm:$0xf] %v1672_v60  ;;  %v1283_v0 = vor.u32 %v1281_v46, %v1280_v27  ;;  %v1285_v49 = vrot.slane %v1280_v27, 4  ;;  %v2376_v4 = vrot.slane %v2374_v26, 5  ;;  %v12605_v7 = vpack.c.bf16 %v570_v25, %v570_v25  ;;  %v11250_v10 = vld [vmem:[#allocation2 + $0x120] sm:$0xff]  ;;  %v487_v26 = vpop.f32.mrf.mxu3 }
 0x20c   :  { %v1658_v35 = vsel %vm11926_vm9, %v1241_v31, %v1657_v14  ;;  %v629_v62 = vpack.c.bf16 %v565_v54, %v565_v54  ;;  %v1772_v11 = vld [vmem:[#allocation2 + $0x124] sm:$0xf]  ;;  %v741_v46 = vsel %vm11863_vm2, 0, %v740_v17  ;;  %v1829_v50 = vld [vmem:[#allocation2 + $0x128] sm:$0x1]  ;;  %3330 = vmatmul.bf16.gmra.mxu2 %v11250_v10  ;;  %v488_v31 = vadd.f32 %v12354_v6, %v487_v26  ;;  %5745 = vmatpush.bf16.msrb.mxu1 %v11327_v12 }
 0x20d   :  { %1659 = vst [vmem:[#allocation2 + $0x12c] sm:$0xf] %v1658_v35  ;;  %v1284_v29 = vsel %vm11939_vm11, %v1276_v57, %v1283_v0  ;;  %v2377_v38 = vor.u32 %v2376_v4, %v2373_v2  ;;  %v2380_v52 = vshll.u32 %v1772_v11, 16  ;;  %v2384_v27 = vshrl.u32 %v1772_v11, 16  ;;  %v1675_v54 = vld [vmem:[#allocation2 + $0x14c] sm:$0x1] }
 0x20e   :  { %v1244_v25 = vshrl.u32 %v629_v62, 16  ;;  %v1247_v14 = vshll.u32 %v629_v62, 16  ;;  %1674 = vst [vmem:[#allocation2 + $0x148] sm:$0xf] %v1284_v29  ;;  %v6345_v17 = vunpack.c.l.b16 %v12558_v36  ;;  %v1661_v60 = vld [vmem:[#allocation2 + $0x134] sm:$0x1]  ;;  %v475_v44 = vpop.f32.mrf.mxu0  ;;  %v1676_v57 = vsel %vm11863_vm2, %v1285_v49, %v1675_v54 }
 0x20f   :  { %v2879_v35 = vpop.f32.mrf.mxu1  ;;  %v2378_v0 = vrot.slane %v2377_v38, 4  ;;  %v2382_v2 = vrot.slane %v2380_v52, 5  ;;  %v2386_v4 = vrot.slane %v2384_v27, 4  ;;  %742 = vst [vmem:[#allocation2 + $0x150] sm:$0x1] %v741_v46  ;;  %v11332_v62 = vld [vmem:[%s15760_s3 + $0x140] sm:$0xff]  ;;  %v476_v11 = vadd.f32 %v12354_v6, %v475_v44  ;;  %v3291_v38 = vpop.f32.mrf.mxu2 }
 0x210   :  { %v1246_v10 = vrot.slane %v1244_v25, 7  ;;  %v12629_v36 = vadd.f32 %v3288_v5, %v2879_v35  ;;  %v11291_v29 = vld [vmem:[#allocation2 + $0x60] sm:$0xff]  ;;  %1677 = vst [vmem:[#allocation2 + $0x14c] sm:$0x1] %v1676_v57  ;;  %v2390_v26 = vshll.u32 %v1829_v50, 16  ;;  %v11326_v49 = vld [vmem:[%s15760_s3 + $0x110] sm:$0xff]  ;;  %v15793_v27 = vunpack.c.l.b16 %v12538_v13  ;;  %6526 = vmatpush.bf16.msrb.mxu2 %v11332_v62 }
 0x211   :  { %v2387_v46 = vor.u32 %v2386_v4, %v2382_v2  ;;  %v1287_v33 = vshrl.u32 %v12605_v7, 16  ;;  %v1290_v12 = vshll.u32 %v12605_v7, 16  ;;  %840 = vst [vmem:[#allocation2 + $0x158] sm:$0x1] %v839_v41  ;;  %v743_v52 = vld [vmem:[#allocation2 + $0x15c] sm:$0x1]  ;;  %4494 = vmatmul.bf16.gmra.mxu0 %v11291_v29  ;;  %v2383_v50 = vsel %vm11900_vm7, %v2378_v0, %v2382_v2  ;;  %5746 = vmatpush.bf16.msrb.mxu1 %v11326_v49 }
 0x212   :  { %15792 = vst [vmem:[#allocation13_spill] sm:$0xff] %v12629_v36  ;;  %v12638_v6 = vpack.c.b16 %v15793_v27, %v6345_v17  ;;  %v1249_v5 = vor.u32 %v1247_v14, %v1246_v10  ;;  %v1251_v25 = vrot.slane %v1246_v10, 4  ;;  %v566_v54 = vmax.f32 %v476_v11, 0.0  ;;  %v11325_v13 = vld [vmem:[%s15760_s3 + $0x108] sm:$0xff] }
 0x213   :  { %v2388_v44 = vrot.slane %v2387_v46, 4  ;;  %v2392_v35 = vrot.slane %v2390_v26, 5  ;;  %v12642_v57 = vrot.slane %v1287_v33, 7  ;;  %v571_v4 = vmax.f32 %v488_v31, 0.0  ;;  %v490_v15 = vpop.f32.mrf.mxu3 }
 0x214   :  { %v1250_v7 = vsel %vm11939_vm11, %v1242_v18, %v1249_v5  ;;  %v1662_v41 = vsel %vm11863_vm2, %v1251_v25, %v1661_v60  ;;  %v630_v14 = vpack.c.bf16 %v566_v54, %v566_v54  ;;  %v1773_v17 = vld [vmem:[#allocation2 + $0x12c] sm:$0xf]  ;;  %v744_v0 = vsel %vm11863_vm2, 0, %v743_v52  ;;  %v12661_v60 = vld [vmem:[%s15758_s2] ss:$0 sm:$0xff] }
 0x215   :  { %1660 = vst [vmem:[#allocation2 + $0x130] sm:$0xf] %v1250_v7  ;;  %v2393_v31 = vsel %vm11900_vm7, %v2388_v44, %v2392_v35  ;;  %v2671_v2 = vunpack.c.l.b16 %v2383_v50  ;;  %v1292_v62 = vor.u32 %v1290_v12, %v12642_v57  ;;  %v635_v10 = vpack.c.bf16 %v571_v4, %v571_v4  ;;  %5747 = vmatpush.bf16.msrb.mxu1 %v11325_v13  ;;  %v1664_v54 = vld [vmem:[#allocation2 + $0x138] sm:$0xf]  ;;  %v11324_v4 = vld [vmem:[%s15760_s3 + $0x100] sm:$0xff] }
 0x216   :  { %1663 = vst [vmem:[#allocation2 + $0x134] sm:$0x1] %v1662_v41  ;;  %v1253_v11 = vshrl.u32 %v630_v14, 16  ;;  %v1256_v18 = vshll.u32 %v630_v14, 16  ;;  %v2672_v29 = vunpack.c.l.b16 %v2393_v31  ;;  %v1678_v26 = vld [vmem:[#allocation2 + $0x150] sm:$0xf]  ;;  %v491_v49 = vadd.f32 %v12661_v60, %v490_v15  ;;  %v477_v46 = vpop.f32.mrf.mxu0 }
 0x217   :  { %v2882_v33 = vpop.f32.mrf.mxu1  ;;  %v1679_v52 = vsel %vm11926_vm9, %v1292_v62, %v1678_v26  ;;  %v1295_v12 = vshrl.u32 %v635_v10, 16  ;;  %v1298_v27 = vshll.u32 %v635_v10, 16  ;;  %v2395_v5 = vshrl.u32 %v1773_v17, 16  ;;  %745 = vst [vmem:[#allocation2 + $0x15c] sm:$0x1] %v744_v0  ;;  %v3293_v7 = vpop.f32.mrf.mxu2 }
 0x218   :  { %v12666_v25 = vrot.slane %v1253_v11, 7  ;;  %v478_v50 = vadd.f32 %v12661_v60, %v477_v46  ;;  %v12669_v44 = vadd.f32 %v3291_v38, %v2882_v33  ;;  %v2713_v35 = vpack.c.b16 %v2672_v29, %v2671_v2  ;;  %1680 = vst [vmem:[#allocation2 + $0x150] sm:$0xf] %v1679_v52  ;;  %v841_v13 = vld [vmem:[#allocation2 + $0x164] sm:$0x1] }
 0x219   :  { %v1293_v41 = vrot.slane %v12642_v57, 4  ;;  %v1297_v14 = vrot.slane %v1295_v12, 7  ;;  %v2398_v31 = vshll.u32 %v1773_v17, 16  ;;  %v572_v0 = vmax.f32 %v491_v49, 0.0  ;;  %v1682_v15 = vld [vmem:[#allocation2 + $0x158] sm:$0x1]  ;;  %5748 = vmatpush.bf16.msrb.mxu1 %v11324_v4 }
 0x21a   :  { %15794 = vst [vmem:[#allocation14_spill] sm:$0xff] %v12669_v44  ;;  %v1258_v62 = vor.u32 %v1256_v18, %v12666_v25  ;;  %v567_v10 = vmax.f32 %v478_v50, 0.0  ;;  %2921 = vmatmul.bf16.gmra.mxu1 %v2713_v35  ;;  %v2397_v38 = vrot.slane %v2395_v5, 4  ;;  %v842_v2 = vsel %vm11877_vm4, 0, %v841_v13 }
 0x21b   :  { %v1300_v11 = vor.u32 %v1298_v27, %v1297_v14  ;;  %v1302_v29 = vrot.slane %v1297_v14, 4  ;;  %v2400_v26 = vrot.slane %v2398_v31, 5  ;;  %v636_v46 = vpack.c.bf16 %v572_v0, %v572_v0  ;;  %843 = vst [vmem:[#allocation2 + $0x164] sm:$0x1] %v842_v2  ;;  %v746_v14 = vld [vmem:[#allocation2 + $0x168] sm:$0x1] }
 0x21c   :  { %v1665_v57 = vsel %vm11926_vm9, %v1258_v62, %v1664_v54  ;;  %v631_v17 = vpack.c.bf16 %v567_v10, %v567_v10  ;;  %v11251_v49 = vld [vmem:[#allocation2 + $0x12c] sm:$0xff]  ;;  %v15795_v18 = vshll.u32 %v12502_v43, 16  ;;  %v15796_v12 = vshll.u32 %v12482_v22, 16  ;;  %v492_v54 = vpop.f32.mrf.mxu3 }
 0x21d   :  { %v1774_v33 = vld [vmem:[#allocation2 + $0x130] sm:$0xf]  ;;  %1666 = vst [vmem:[#allocation2 + $0x138] sm:$0xf] %v1665_v57  ;;  %v1301_v27 = vsel %vm11939_vm11, %v1293_v41, %v1300_v11  ;;  %v1683_v50 = vsel %vm11863_vm2, %v1302_v29, %v1682_v15  ;;  %v1830_v35 = vld [vmem:[#allocation2 + $0x134] sm:$0x1]  ;;  %3335 = vmatmul.bf16.gmra.mxu2 %v11251_v49  ;;  %v2401_v43 = vor.u32 %v2400_v26, %v2397_v38 }
 0x21e   :  { %v4810_v52 = vrot.slane %v15795_v18, 5  ;;  %v12684_v5 = vrot.slane %v15796_v12, 5  ;;  %v2404_v4 = vshll.u32 %v1774_v33, 16  ;;  %v1261_v31 = vshrl.u32 %v631_v17, 16  ;;  %1681 = vst [vmem:[#allocation2 + $0x154] sm:$0xf] %v1301_v27  ;;  %v12695_v2 = vpop.f32.mrf.mxu0 }
 0x21f   :  { %v2408_v0 = vshrl.u32 %v1774_v33, 16  ;;  %v15797_v13 = vshrl.u32 %v12482_v22, 16  ;;  %v2884_v10 = vpop.f32.mrf.mxu1  ;;  %15798 = vst [vmem:[#allocation15_spill] sm:$0xff] %v12695_v2  ;;  %v2414_v15 = vshll.u32 %v1830_v35, 16  ;;  %v1304_v11 = vshrl.u32 %v636_v46, 16  ;;  %v11292_v49 = vld [vmem:[#allocation2 + $0x6c] sm:$0xff]  ;;  %v3296_v22 = vpop.f32.mrf.mxu2 }
 0x220   :  { %1684 = vst [vmem:[#allocation2 + $0x158] sm:$0x1] %v1683_v50  ;;  %v2406_v41 = vrot.slane %v2404_v4, 5  ;;  %v1307_v29 = vshll.u32 %v636_v46, 16  ;;  %v1263_v57 = vrot.slane %v1261_v31, 7  ;;  %v1264_v18 = vshll.u32 %v631_v17, 16 }
 0x221   :  { %v12693_v62 = vrot.slane %v15797_v13, 4  ;;  %v12697_v12 = vadd.f32 %v3293_v7, %v2884_v10  ;;  %v2410_v27 = vrot.slane %v2408_v0, 4  ;;  %v1259_v38 = vrot.slane %v12666_v25, 4  ;;  %v1668_v26 = vld [vmem:[#allocation2 + $0x140] sm:$0x1]  ;;  %4499 = vmatmul.bf16.gmra.mxu0 %v11292_v49 }
 0x222   :  { %v12700_v33 = vrot.slane %v1304_v11, 7  ;;  %v493_v13 = vadd.f32 %v12661_v60, %v492_v54  ;;  %v4811_v50 = vor.u32 %v4810_v52, %v12541_v51  ;;  %v1266_v35 = vor.u32 %v1264_v18, %v1263_v57  ;;  %v1685_v7 = vld [vmem:[#allocation2 + $0x15c] sm:$0xf] }
 0x223   :  { %15799 = vst [vmem:[#allocation16_spill] sm:$0xff] %v12697_v12  ;;  %v1268_v4 = vrot.slane %v1263_v57, 4  ;;  %v2402_v46 = vrot.slane %v2401_v43, 4  ;;  %v2411_v17 = vor.u32 %v2410_v27, %v2406_v41  ;;  %v2416_v31 = vrot.slane %v2414_v15, 5 }
 0x224   :  { %v1309_v0 = vor.u32 %v1307_v29, %v12700_v33  ;;  %v573_v10 = vmax.f32 %v493_v13, 0.0  ;;  %v747_v25 = vsel %vm11863_vm2, 0, %v746_v14  ;;  %v1267_v11 = vsel %vm11939_vm11, %v1259_v38, %v1266_v35  ;;  %v1775_v43 = vld [vmem:[#allocation2 + $0x138] sm:$0xf]  ;;  %v495_v14 = vpop.f32.mrf.mxu3 }
 0x225   :  { %v1669_v54 = vsel %vm11863_vm2, %v1268_v4, %v1668_v26  ;;  %v2407_v51 = vsel %vm11900_vm7, %v2402_v46, %v2406_v41  ;;  %v2412_v52 = vrot.slane %v2411_v17, 4  ;;  %748 = vst [vmem:[#allocation2 + $0x168] sm:$0x1] %v747_v25  ;;  %v2419_v57 = vshrl.u32 %v1775_v43, 16  ;;  %v12722_v26 = vld [vmem:[#allocation2 + $0x24] sm:$0xe] }
 0x226   :  { %1667 = vst [vmem:[#allocation2 + $0x13c] sm:$0xf] %v1267_v11  ;;  %v1686_v15 = vsel %vm11926_vm9, %v1309_v0, %v1685_v7  ;;  %v637_v29 = vpack.c.bf16 %v573_v10, %v573_v10  ;;  %v2422_v18 = vshll.u32 %v1775_v43, 16  ;;  %v496_v27 = vadd.f32 %v12661_v60, %v495_v14  ;;  %v12724_v35 = vpop.f32.mrf.mxu0  ;;  %v12726_v0 = vld [vmem:[#allocation2 + $0x28] sm:$0xf] }
 0x227   :  { %1670 = vst [vmem:[#allocation2 + $0x140] sm:$0x1] %v1669_v54  ;;  %v2417_v49 = vsel %vm11900_vm7, %v2412_v52, %v2416_v31  ;;  %v12718_v38 = vrot.slane %v4811_v50, 4  ;;  %v4821_v41 = vor.u32 %v12693_v62, %v12684_v5  ;;  %v2887_v13 = vpop.f32.mrf.mxu1  ;;  %v2673_v4 = vunpack.c.l.b16 %v2407_v51  ;;  %v844_v11 = vld [vmem:[#allocation2 + $0x170] sm:$0x1]  ;;  %v3298_v62 = vpop.f32.mrf.mxu2 }
 0x228   :  { %15800 = vst [vmem:[#allocation17_spill] sm:$0xff] %v12724_v35  ;;  %v2674_v46 = vunpack.c.l.b16 %v2417_v49  ;;  %v1312_v17 = vshrl.u32 %v637_v29, 16  ;;  %v1315_v7 = vshll.u32 %v637_v29, 16  ;;  %v12728_v31 = vadd.f32 %v3296_v22, %v2887_v13  ;;  %v1777_v14 = vld [vmem:[#allocation2 + $0x144] sm:$0xf] }
 0x229   :  { %1687 = vst [vmem:[#allocation2 + $0x15c] sm:$0xf] %v1686_v15  ;;  %v2421_v10 = vrot.slane %v2419_v57, 4  ;;  %v2424_v50 = vrot.slane %v2422_v18, 5  ;;  %v574_v25 = vmax.f32 %v496_v27, 0.0  ;;  %v1310_v52 = vrot.slane %v12700_v33, 4 }
 0x22a   :  { %15801 = vst [vmem:[#allocation18_spill] sm:$0xff] %v12728_v31  ;;  %v2714_v54 = vpack.c.b16 %v2674_v46, %v2673_v4  ;;  %v1314_v43 = vrot.slane %v1312_v17, 7  ;;  %v845_v51 = vsel %vm11877_vm4, 0, %v844_v11  ;;  %v1689_v15 = vld [vmem:[#allocation2 + $0x164] sm:$0x1]  ;;  %v4817_v22 = vsel %vm11900_vm7, %v12718_v38, %v12684_v5 }
 0x22b   :  { %v638_v49 = vpack.c.bf16 %v574_v25, %v574_v25  ;;  %846 = vst [vmem:[#allocation2 + $0x170] sm:$0x1] %v845_v51  ;;  %v4822_v29 = vrot.slane %v4821_v41, 4  ;;  %v15802_v57 = vshll.u32 %v12508_v56, 16  ;;  %v15766_v4 = vrot.slane %v12726_v0, 5 }
 0x22c   :  { %2926 = vmatmul.bf16.gmra.mxu1 %v2714_v54  ;;  %v1317_v27 = vor.u32 %v1315_v7, %v1314_v43  ;;  %v1319_v33 = vrot.slane %v1314_v43, 4  ;;  %v2425_v17 = vor.u32 %v2424_v50, %v2421_v10  ;;  %v2443_v51 = vshrl.u32 %v1777_v14, 16  ;;  %v12741_v35 = vld [vmem:[#allocation2 + $0x2c] sm:$0x1]  ;;  %v497_v54 = vpop.f32.mrf.mxu3  ;;  %v1778_v43 = vld [vmem:[#allocation2 + $0x148] sm:$0xf] }
 0x22d   :  { %v4826_v18 = vrot.slane %v15802_v57, 5  ;;  %v1776_v46 = vld [vmem:[#allocation2 + $0x13c] sm:$0xf]  ;;  %v1321_v25 = vshrl.u32 %v638_v49, 16  ;;  %v1324_v11 = vshll.u32 %v638_v49, 16  ;;  %6527 = vmatmul.bf16.vlgmr.msrb.gmra.mxu2 %v12487_v48  ;;  %v498_v49 = vadd.f32 %v12661_v60, %v497_v54 }
 0x22e   :  { %v1318_v5 = vsel %vm11939_vm11, %v1310_v52, %v1317_v27  ;;  %v1690_v56 = vsel %vm11863_vm2, %v1319_v33, %v1689_v15  ;;  %v1831_v38 = vld [vmem:[#allocation2 + $0x140] sm:$0x1]  ;;  %v2428_v41 = vshll.u32 %v1776_v46, 16  ;;  %v2432_v7 = vshrl.u32 %v1776_v46, 16  ;;  %v1692_v50 = vld [vmem:[#allocation2 + $0x168] sm:$0xf]  ;;  %v12753_v13 = vpop.f32.mrf.mxu0 }
 0x22f   :  { %1688 = vst [vmem:[#allocation2 + $0x160] sm:$0xf] %v1318_v5  ;;  %v12748_v10 = vrot.slane %v1321_v25, 7  ;;  %v2446_v57 = vshll.u32 %v1777_v14, 16  ;;  %v4827_v52 = vsel %vm11900_vm7, %v4822_v29, %v4826_v18  ;;  %v2889_v27 = vpop.f32.mrf.mxu1  ;;  %v2438_v46 = vshll.u32 %v1831_v38, 16  ;;  %v11293_v5 = vld [vmem:[#allocation2 + $0x78] sm:$0xff]  ;;  %v3301_v29 = vpop.f32.mrf.mxu2 }
 0x230   :  { %15803 = vst [vmem:[#allocation19_spill] sm:$0xff] %v12753_v13  ;;  %v2430_v15 = vrot.slane %v2428_v41, 5  ;;  %v2434_v33 = vrot.slane %v2432_v7, 4  ;;  %v12757_v48 = vrot.slane %v15766_v4, 4  ;;  %v12759_v25 = vadd.f32 %v3298_v62, %v2889_v27  ;;  %v749_v31 = vld [vmem:[#allocation2 + $0x174] sm:$0x1] }
 0x231   :  { %1691 = vst [vmem:[#allocation2 + $0x164] sm:$0x1] %v1690_v56  ;;  %v1326_v54 = vor.u32 %v1324_v11, %v12748_v10  ;;  %v2452_v14 = vshll.u32 %v1778_v43, 16  ;;  %v2456_v2 = vshrl.u32 %v1778_v43, 16  ;;  %v2426_v18 = vrot.slane %v2425_v17, 4  ;;  %4504 = vmatmul.bf16.gmra.mxu0 %v11293_v5 }
 0x232   :  { %15804 = vst [vmem:[#allocation20_spill] sm:$0xff] %v12759_v25  ;;  %v2435_v12 = vor.u32 %v2434_v33, %v2430_v15  ;;  %v575_v13 = vmax.f32 %v498_v49, 0.0  ;;  %v2445_v41 = vrot.slane %v2443_v51, 4  ;;  %v2448_v7 = vrot.slane %v2446_v57, 5  ;;  %v4690_v27 = vld [vmem:[#allocation2 + $0x24] sm:$0xf] }
 0x233   :  { %v1693_v38 = vsel %vm11926_vm9, %v1326_v54, %v1692_v50  ;;  %v750_v62 = vsel %vm11863_vm2, 0, %v749_v31  ;;  %v2431_v11 = vsel %vm11900_vm7, %v2426_v18, %v2430_v15  ;;  %v2440_v4 = vrot.slane %v2438_v46, 5  ;;  %v1832_v49 = vld [vmem:[#allocation2 + $0x14c] sm:$0x1] }
 0x234   :  { %v2436_v43 = vrot.slane %v2435_v12, 4  ;;  %1694 = vst [vmem:[#allocation2 + $0x168] sm:$0xf] %v1693_v38  ;;  %v639_v17 = vpack.c.bf16 %v575_v13, %v575_v13  ;;  %v12769_v33 = vrot.slane %v2452_v14, 5  ;;  %v2458_v5 = vrot.slane %v2456_v2, 4  ;;  %v500_v54 = vpop.f32.mrf.mxu3 }
 0x235   :  { %v12771_v56 = vunpack.c.l.b16 %v4817_v22  ;;  %v12773_v50 = vunpack.c.l.b16 %v4827_v52  ;;  %751 = vst [vmem:[#allocation2 + $0x174] sm:$0x1] %v750_v62  ;;  %v4829_v15 = vshrl.u32 %v4690_v27, 16  ;;  %v2675_v12 = vunpack.c.l.b16 %v2431_v11  ;;  %v847_v11 = vld [vmem:[#allocation2 + $0x17c] sm:$0x1] }
 0x236   :  { %v2441_v31 = vsel %vm11900_vm7, %v2436_v43, %v2440_v4  ;;  %v1329_v51 = vshrl.u32 %v639_v17, 16  ;;  %v1332_v57 = vshll.u32 %v639_v17, 16  ;;  %v501_v13 = vadd.f32 %v12661_v60, %v500_v54  ;;  %v12778_v38 = vpop.f32.mrf.mxu0  ;;  %v1696_v43 = vld [vmem:[#allocation2 + $0x170] sm:$0x1] }
 0x237   :  { %v2676_v46 = vunpack.c.l.b16 %v2441_v31  ;;  %v4832_v18 = vshll.u32 %v4690_v27, 16  ;;  %v2892_v14 = vpop.f32.mrf.mxu1  ;;  %15805 = vst [vmem:[#allocation21_spill] sm:$0xff] %v12778_v38  ;;  %v1327_v2 = vrot.slane %v12748_v10, 4  ;;  %v2449_v52 = vor.u32 %v2448_v7, %v2445_v41  ;;  %v3303_v31 = vpop.f32.mrf.mxu2 }
 0x238   :  { %v1331_v22 = vrot.slane %v1329_v51, 7  ;;  %v2462_v62 = vshll.u32 %v1832_v49, 16  ;;  %v12781_v25 = vadd.f32 %v3301_v29, %v2892_v14  ;;  %v2459_v17 = vor.u32 %v2458_v5, %v12769_v33  ;;  %v1779_v49 = vld [vmem:[#allocation2 + $0x150] sm:$0xf] }
 0x239   :  { %v2715_v4 = vpack.c.b16 %v2676_v46, %v2675_v12  ;;  %v576_v44 = vmax.f32 %v501_v13, 0.0  ;;  %v848_v27 = vsel %vm11877_vm4, 0, %v847_v11  ;;  %v12786_v38 = vrot.slane %v4829_v15, 4  ;;  %v1780_v46 = vld [vmem:[#allocation2 + $0x154] sm:$0xf] }
 0x23a   :  { %15806 = vst [vmem:[#allocation22_spill] sm:$0xff] %v12781_v25  ;;  %v1334_v36 = vor.u32 %v1332_v57, %v1331_v22  ;;  %v1336_v54 = vrot.slane %v1331_v22, 4  ;;  %v15807_v10 = vrot.slane %v12726_v0, 5  ;;  %v15808_v29 = vrot.slane %v12722_v26, 9 }
 0x23b   :  { %2931 = vmatmul.bf16.vlgmr.msrb.gmra.mxu3 %v2715_v4  ;;  %v640_v7 = vpack.c.bf16 %v576_v44, %v576_v44  ;;  %849 = vst [vmem:[#allocation2 + $0x17c] sm:$0x1] %v848_v27  ;;  %v4834_v5 = vrot.slane %v4832_v18, 5  ;;  %v4838_v51 = vshll.u32 %v12726_v0, 16  ;;  %v15809_v57 = vpack.c.b16 %v12534_v37, %v12527_v47 }
 0x23c   :  { %v12794_v41 = vsel %vm12456_vm14, %v15808_v29, %v15807_v10  ;;  %v1335_v15 = vsel %vm11939_vm11, %v1327_v2, %v1334_v36  ;;  %v1697_v26 = vsel %vm11863_vm2, %v1336_v54, %v1696_v43  ;;  %v2450_v12 = vrot.slane %v2449_v52, 4  ;;  %v502_v2 = vpop.f32.mrf.mxu3 }
 0x23d   :  { %5749 = vmatmul.bf16.vlgmr.msrb.gmra.mxu1 %v15809_v57  ;;  %v4842_v13 = vshrl.u32 %v12726_v0, 16  ;;  %1695 = vst [vmem:[#allocation2 + $0x16c] sm:$0xf] %v1335_v15  ;;  %v2460_v44 = vrot.slane %v2459_v17, 4  ;;  %v2464_v14 = vrot.slane %v2462_v62, 5  ;;  %v1338_v18 = vshrl.u32 %v640_v7, 16  ;;  %6532 = vmatmul.bf16.gmra.mxu2 %v12638_v6 }
 0x23e   :  { %v1341_v22 = vshll.u32 %v640_v7, 16  ;;  %1698 = vst [vmem:[#allocation2 + $0x170] sm:$0x1] %v1697_v26  ;;  %v15810_v37 = vrot.slane %v12741_v35, 5  ;;  %v2467_v52 = vshrl.u32 %v1779_v49, 16  ;;  %v2470_v4 = vshll.u32 %v1779_v49, 16  ;;  %v12818_v54 = vpop.f32.mrf.mxu0 }
 0x23f   :  { %v12815_v0 = vrot.slane %v1338_v18, 7  ;;  %v503_v62 = vadd.f32 %v12661_v60, %v502_v2  ;;  %v2476_v43 = vshll.u32 %v1780_v46, 16  ;;  %v2480_v17 = vshrl.u32 %v1780_v46, 16  ;;  %v2894_v11 = vpop.f32.mrf.mxu1  ;;  %15811 = vst [vmem:[#allocation23_spill] sm:$0xff] %v12818_v54  ;;  %v11294_v49 = vld [vmem:[#allocation2 + $0x84] sm:$0xff]  ;;  %v3306_v18 = vpop.f32.mrf.mxu2 }
 0x240   :  { %v12812_v36 = vsel %vm12456_vm14, %v12757_v48, %v15810_v37  ;;  %v2455_v27 = vsel %vm11900_vm7, %v2450_v12, %v12769_v33  ;;  %v1699_v48 = vld [vmem:[#allocation2 + $0x174] sm:$0xf]  ;;  %v4835_v10 = vor.u32 %v4834_v5, %v12786_v38  ;;  %v12824_v29 = vrot.slane %v4838_v51, 5  ;;  %v752_v46 = vld [vmem:[#allocation2 + $0x180] sm:$0x1] }
 0x241   :  { %v4844_v7 = vrot.slane %v4842_v13, 4  ;;  %v12826_v6 = vadd.f32 %v3303_v31, %v2894_v11  ;;  %v2465_v57 = vsel %vm11900_vm7, %v2460_v44, %v2464_v14  ;;  %v1343_v15 = vor.u32 %v1341_v22, %v12815_v0  ;;  %v12832_v12 = vld [vmem:[#allocation2 + $0x30] sm:$0xe]  ;;  %4509 = vmatmul.bf16.gmra.mxu0 %v11294_v49  ;;  %v1833_v51 = vld [vmem:[#allocation2 + $0x158] sm:$0x1] }
 0x242   :  { %v577_v26 = vmax.f32 %v503_v62, 0.0  ;;  %v2469_v37 = vrot.slane %v2467_v52, 4  ;;  %v2472_v2 = vrot.slane %v2470_v4, 5  ;;  %v4848_v33 = vshll.u32 %v12741_v35, 16  ;;  %v4693_v4 = vld [vmem:[#allocation2 + $0x30] sm:$0xf] }
 0x243   :  { %15812 = vst [vmem:[#allocation24_spill] sm:$0xff] %v12826_v6  ;;  %v753_v38 = vsel %vm11863_vm2, 0, %v752_v46  ;;  %v1700_v31 = vsel %vm11926_vm9, %v1343_v15, %v1699_v48  ;;  %v12838_v13 = vrot.slane %v2476_v43, 5  ;;  %v2482_v44 = vrot.slane %v2480_v17, 4  ;;  %v12845_v48 = vld [vmem:[#allocation2 + $0x34] sm:$0xf] }
 0x244   :  { %v641_v5 = vpack.c.bf16 %v577_v26, %v577_v26  ;;  %754 = vst [vmem:[#allocation2 + $0x180] sm:$0x1] %v753_v38  ;;  %v2677_v14 = vunpack.c.l.b16 %v2455_v27  ;;  %v2678_v22 = vunpack.c.l.b16 %v2465_v57  ;;  %v6347_v52 = vunpack.c.l.b16 %v12794_v41  ;;  %v505_v57 = vpop.f32.mrf.mxu3 }
 0x245   :  { %1701 = vst [vmem:[#allocation2 + $0x174] sm:$0xf] %v1700_v31  ;;  %v4845_v35 = vor.u32 %v4844_v7, %v12824_v29  ;;  %v6348_v62 = vunpack.c.l.b16 %v12812_v36  ;;  %v12843_v46 = vrot.slane %v4835_v10, 4  ;;  %v2473_v43 = vor.u32 %v2472_v2, %v2469_v37 }
 0x246   :  { %v1346_v11 = vshrl.u32 %v641_v5, 16  ;;  %v1349_v49 = vshll.u32 %v641_v5, 16  ;;  %v2486_v15 = vshll.u32 %v1833_v51, 16  ;;  %v12847_v17 = vrot.slane %v4848_v33, 5  ;;  %v12853_v31 = vpop.f32.mrf.mxu0  ;;  %v1703_v5 = vld [vmem:[#allocation2 + $0x17c] sm:$0x1] }
 0x247   :  { %v1344_v41 = vrot.slane %v12815_v0, 4  ;;  %v2483_v7 = vor.u32 %v2482_v44, %v12838_v13  ;;  %v506_v36 = vadd.f32 %v12661_v60, %v505_v57  ;;  %v2897_v38 = vpop.f32.mrf.mxu1  ;;  %15813 = vst [vmem:[#allocation25_spill] sm:$0xff] %v12853_v31  ;;  %v2716_v10 = vpack.c.b16 %v2678_v22, %v2677_v14  ;;  %v12860_v0 = vld [vmem:[#allocation2 + $0x38] sm:$0x1]  ;;  %v850_v44 = vld [vmem:[#allocation2 + $0x188] sm:$0x1]  ;;  %v3308_v54 = vpop.f32.mrf.mxu2 }
 0x248   :  { %v1348_v26 = vrot.slane %v1346_v11, 7  ;;  %v12855_v47 = vrot.slane %v4845_v35, 4  ;;  %v15767_v37 = vrot.slane %v12845_v48, 5  ;;  %v4853_v2 = vshrl.u32 %v4693_v4, 16  ;;  %v1834_v31 = vld [vmem:[#allocation2 + $0x164] sm:$0x1] }
 0x249   :  { %v12858_v33 = vadd.f32 %v3306_v18, %v2897_v38  ;;  %v578_v11 = vmax.f32 %v506_v36, 0.0  ;;  %v2474_v57 = vrot.slane %v2473_v43, 4  ;;  %v2488_v6 = vrot.slane %v2486_v15, 5  ;;  %v1781_v38 = vld [vmem:[#allocation2 + $0x15c] sm:$0xf] }
 0x24a   :  { %v1351_v51 = vor.u32 %v1349_v49, %v1348_v26  ;;  %v1353_v27 = vrot.slane %v1348_v26, 4  ;;  %v851_v14 = vsel %vm11877_vm4, 0, %v850_v44  ;;  %v4856_v22 = vshll.u32 %v4693_v4, 16 }
 0x24b   :  { %15814 = vst [vmem:[#allocation26_spill] sm:$0xff] %v12858_v33  ;;  %2936 = vmatmul.bf16.gmra.mxu3 %v2716_v10  ;;  %v2484_v49 = vrot.slane %v2483_v7, 4  ;;  %v642_v26 = vpack.c.bf16 %v578_v11, %v578_v11  ;;  %v15815_v36 = vpack.c.b16 %v12773_v50, %v12771_v56  ;;  %v6409_v43 = vpack.c.b16 %v6348_v62, %v6347_v52  ;;  %v1782_v62 = vld [vmem:[#allocation2 + $0x160] sm:$0xf] }
 0x24c   :  { %v1352_v35 = vsel %vm11939_vm11, %v1344_v41, %v1351_v51  ;;  %v1704_v18 = vsel %vm11863_vm2, %v1353_v27, %v1703_v5  ;;  %852 = vst [vmem:[#allocation2 + $0x188] sm:$0x1] %v851_v14  ;;  %v6127_v15 = vrot.slane %v15767_v37, 4  ;;  %v6128_v4 = vrot.slane %v12860_v0, 5  ;;  %v507_v41 = vpop.f32.mrf.mxu3 }
 0x24d   :  { %5754 = vmatmul.bf16.gmra.mxu1 %v15815_v36  ;;  %1702 = vst [vmem:[#allocation2 + $0x178] sm:$0xf] %v1352_v35  ;;  %v4841_v27 = vsel %vm11900_vm7, %v12843_v46, %v12824_v29  ;;  %v4851_v56 = vsel %vm11900_vm7, %v12855_v47, %v12847_v17  ;;  %v1355_v50 = vshrl.u32 %v642_v26, 16  ;;  %v1358_v52 = vshll.u32 %v642_v26, 16  ;;  %6537 = vmatmul.bf16.gmra.mxu2 %v6409_v43  ;;  %v11295_v36 = vld [vmem:[#allocation2 + $0x90] sm:$0xff] }
 0x24e   :  { %1705 = vst [vmem:[#allocation2 + $0x17c] sm:$0x1] %v1704_v18  ;;  %v4855_v7 = vrot.slane %v4853_v2, 4  ;;  %v4858_v10 = vrot.slane %v4856_v22, 5  ;;  %v4862_v5 = vshll.u32 %v12845_v48, 16  ;;  %v4866_v51 = vshrl.u32 %v12845_v48, 16  ;;  %v12892_v44 = vpop.f32.mrf.mxu0 }
 0x24f   :  { %v2479_v29 = vsel %vm11900_vm7, %v2474_v57, %v12838_v13  ;;  %v2489_v46 = vsel %vm11900_vm7, %v2484_v49, %v2488_v6  ;;  %v12889_v11 = vrot.slane %v1355_v50, 7  ;;  %v508_v47 = vadd.f32 %v12661_v60, %v507_v41  ;;  %v2899_v17 = vpop.f32.mrf.mxu1  ;;  %15816 = vst [vmem:[#allocation27_spill] sm:$0xff] %v12892_v44  ;;  %v1706_v2 = vld [vmem:[#allocation2 + $0x180] sm:$0xf]  ;;  %v755_v49 = vld [vmem:[#allocation2 + $0x18c] sm:$0x1]  ;;  %v3311_v43 = vpop.f32.mrf.mxu2 }
 0x250   :  { %v2491_v14 = vshrl.u32 %v1781_v38, 16  ;;  %v2494_v22 = vshll.u32 %v1781_v38, 16  ;;  %v2500_v35 = vshll.u32 %v1782_v62, 16  ;;  %v2504_v18 = vshrl.u32 %v1782_v62, 16 }
 0x251   :  { %v12894_v26 = vadd.f32 %v3308_v54, %v2899_v17  ;;  %v12898_v13 = vsel %vm12456_vm14, %v6127_v15, %v6128_v4  ;;  %v1360_v6 = vor.u32 %v1358_v52, %v12889_v11  ;;  %v579_v57 = vmax.f32 %v508_v47, 0.0  ;;  %4514 = vmatmul.bf16.gmra.mxu0 %v11295_v36 }
 0x252   :  { %v4859_v50 = vor.u32 %v4858_v10, %v4855_v7  ;;  %v12901_v41 = vrot.slane %v4862_v5, 5  ;;  %v4868_v37 = vrot.slane %v4866_v51, 4  ;;  %v756_v38 = vsel %vm11863_vm2, 0, %v755_v49 }
 0x253   :  { %15817 = vst [vmem:[#allocation28_spill] sm:$0xff] %v12894_v26  ;;  %v2679_v54 = vunpack.c.l.b16 %v2479_v29  ;;  %v2680_v62 = vunpack.c.l.b16 %v2489_v46  ;;  %v1707_v17 = vsel %vm11926_vm9, %v1360_v6, %v1706_v2  ;;  %v643_v15 = vpack.c.bf16 %v579_v57, %v579_v57  ;;  %v1710_v49 = vld [vmem:[#allocation2 + $0x188] sm:$0x1] }
 0x254   :  { %757 = vst [vmem:[#allocation2 + $0x18c] sm:$0x1] %v756_v38  ;;  %v2493_v4 = vrot.slane %v2491_v14, 4  ;;  %v2496_v52 = vrot.slane %v2494_v22, 5  ;;  %v12907_v47 = vrot.slane %v2500_v35, 5  ;;  %v2506_v7 = vrot.slane %v2504_v18, 4  ;;  %v510_v22 = vpop.f32.mrf.mxu3 }
 0x255   :  { %1708 = vst [vmem:[#allocation2 + $0x180] sm:$0xf] %v1707_v17  ;;  %v5569_v10 = vunpack.c.l.b16 %v4841_v27  ;;  %v5570_v5 = vunpack.c.l.b16 %v4851_v56  ;;  %v1363_v51 = vshrl.u32 %v643_v15, 16  ;;  %v1366_v44 = vshll.u32 %v643_v15, 16 }
 0x256   :  { %v15818_v36 = vrot.slane %v12845_v48, 5  ;;  %v15819_v29 = vrot.slane %v12832_v12, 9  ;;  %v6350_v2 = vunpack.c.l.b16 %v12898_v13  ;;  %v4860_v6 = vrot.slane %v4859_v50, 4  ;;  %v12920_v48 = vpop.f32.mrf.mxu0 }
 0x257   :  { %v4872_v14 = vshll.u32 %v12860_v0, 16  ;;  %v1361_v35 = vrot.slane %v12889_v11, 4  ;;  %v1365_v27 = vrot.slane %v1363_v51, 7  ;;  %v4869_v56 = vor.u32 %v4868_v37, %v12901_v41  ;;  %v2902_v57 = vpop.f32.mrf.mxu1  ;;  %15820 = vst [vmem:[#allocation29_spill] sm:$0xff] %v12920_v48  ;;  %v853_v51 = vld [vmem:[#allocation2 + $0x194] sm:$0x1]  ;;  %v3313_v37 = vpop.f32.mrf.mxu2 }
 0x258   :  { %v6126_v46 = vsel %vm12456_vm14, %v15819_v29, %v15818_v36  ;;  %v511_v18 = vadd.f32 %v12661_v60, %v510_v22  ;;  %v2717_v12 = vpack.c.b16 %v2680_v62, %v2679_v54  ;;  %v2497_v38 = vor.u32 %v2496_v52, %v2493_v4  ;;  %v12925_v36 = vld [vmem:[#allocation2 + $0x40] sm:$0xf]  ;;  %v5978_v62 = vld [vmem:[#allocation2 + $0x3c] sm:$0xe] }
 0x259   :  { %v2507_v17 = vor.u32 %v2506_v7, %v12907_v47  ;;  %v2510_v13 = vshll.u32 %v1834_v31, 16  ;;  %v12923_v50 = vadd.f32 %v3311_v43, %v2902_v57  ;;  %v1368_v0 = vor.u32 %v1366_v44, %v1365_v27  ;;  %v4696_v31 = vld [vmem:[#allocation2 + $0x3c] sm:$0xf]  ;;  %v12936_v7 = vld [vmem:[#allocation2 + $0x44] sm:$0x1] }
 0x25a   :  { %v1370_v15 = vrot.slane %v1365_v27, 4  ;;  %v580_v11 = vmax.f32 %v511_v18, 0.0  ;;  %v5631_v29 = vpack.c.b16 %v5570_v5, %v5569_v10  ;;  %v6349_v22 = vunpack.c.l.b16 %v6126_v46 }
 0x25b   :  { %15821 = vst [vmem:[#allocation30_spill] sm:$0xff] %v12923_v50  ;;  %v4865_v54 = vsel %vm11900_vm7, %v4860_v6, %v12901_v41  ;;  %v854_v4 = vsel %vm11877_vm4, 0, %v853_v51  ;;  %2941 = vmatmul.bf16.gmra.mxu3 %v2717_v12  ;;  %v1369_v44 = vsel %vm11939_vm11, %v1361_v35, %v1368_v0  ;;  %v4870_v52 = vrot.slane %v4869_v56, 4  ;;  %v4742_v50 = vld [vmem:[#allocation2 + $0x10c] sm:$0xf] }
 0x25c   :  { %v1711_v43 = vsel %vm11863_vm2, %v1370_v15, %v1710_v49  ;;  %v644_v10 = vpack.c.bf16 %v580_v11, %v580_v11  ;;  %855 = vst [vmem:[#allocation2 + $0x194] sm:$0x1] %v854_v4  ;;  %v6410_v5 = vpack.c.b16 %v6350_v2, %v6349_v22  ;;  %v2498_v41 = vrot.slane %v2497_v38, 4  ;;  %v512_v0 = vpop.f32.mrf.mxu3  ;;  %v1783_v38 = vld [vmem:[#allocation2 + $0x168] sm:$0xf] }
 0x25d   :  { %5759 = vmatmul.bf16.gmra.mxu1 %v5631_v29  ;;  %1709 = vst [vmem:[#allocation2 + $0x184] sm:$0xf] %v1369_v44  ;;  %v4874_v46 = vrot.slane %v4872_v14, 5  ;;  %v6132_v6 = vrot.slane %v12925_v36, 5  ;;  %v2508_v27 = vrot.slane %v2507_v17, 4  ;;  %v2512_v18 = vrot.slane %v2510_v13, 5 }
 0x25e   :  { %1712 = vst [vmem:[#allocation2 + $0x188] sm:$0x1] %v1711_v43  ;;  %v1372_v57 = vshrl.u32 %v644_v10, 16  ;;  %v1375_v35 = vshll.u32 %v644_v10, 16  ;;  %v12939_v12 = vunpack.c.l.b16 %v4865_v54  ;;  %v10776_v49 = vrot.slane %v5978_v62, 9  ;;  %6542 = vmatmul.bf16.gmra.mxu2 %v6410_v5  ;;  %v12947_v51 = vpop.f32.mrf.mxu0 }
 0x25f   :  { %v6135_v56 = vrot.slane %v12936_v7, 5  ;;  %v4875_v2 = vsel %vm11900_vm7, %v4870_v52, %v4874_v46  ;;  %v513_v14 = vadd.f32 %v12661_v60, %v512_v0  ;;  %v1784_v11 = vld [vmem:[#allocation2 + $0x16c] sm:$0xf]  ;;  %v4877_v17 = vshrl.u32 %v4696_v31, 16  ;;  %v2904_v13 = vpop.f32.mrf.mxu1  ;;  %15822 = vst [vmem:[#allocation31_spill] sm:$0xff] %v12947_v51  ;;  %v11296_v60 = vld [vmem:[#allocation2 + $0x9c] sm:$0xff]  ;;  %v3316_v5 = vpop.f32.mrf.mxu2 }
 0x260   :  { %v12944_v15 = vrot.slane %v1372_v57, 7  ;;  %v2503_v29 = vsel %vm11900_vm7, %v2498_v41, %v12907_v47  ;;  %v12954_v22 = vsel %vm12456_vm14, %v10776_v49, %v6132_v6  ;;  %v6134_v54 = vrot.slane %v6132_v6, 4  ;;  %v1713_v62 = vld [vmem:[#allocation2 + $0x18c] sm:$0xf] }
 0x261   :  { %v4880_v4 = vshll.u32 %v4696_v31, 16  ;;  %v12956_v44 = vadd.f32 %v3313_v37, %v2904_v13  ;;  %v2513_v43 = vsel %vm11900_vm7, %v2508_v27, %v2512_v18  ;;  %v581_v10 = vmax.f32 %v513_v14, 0.0  ;;  %4519 = vmatmul.bf16.gmra.mxu0 %v11296_v60 }
 0x262   :  { %v1377_v52 = vor.u32 %v1375_v35, %v12944_v15  ;;  %v2515_v46 = vshrl.u32 %v1783_v38, 16  ;;  %v2518_v57 = vshll.u32 %v1783_v38, 16  ;;  %v2524_v47 = vshll.u32 %v1784_v11, 16 }
 0x263   :  { %15823 = vst [vmem:[#allocation32_spill] sm:$0xff] %v12956_v44  ;;  %v2528_v41 = vshrl.u32 %v1784_v11, 16  ;;  %v645_v49 = vpack.c.bf16 %v581_v10, %v581_v10  ;;  %v4886_v37 = vshll.u32 %v12925_v36, 16  ;;  %v4890_v31 = vshrl.u32 %v12925_v36, 16  ;;  %v1835_v36 = vld [vmem:[#allocation2 + $0x170] sm:$0x1] }
 0x264   :  { %v1714_v6 = vsel %vm11926_vm9, %v1377_v52, %v1713_v62  ;;  %v5572_v0 = vunpack.c.l.b16 %v4875_v2  ;;  %v6136_v27 = vsel %vm12456_vm14, %v6134_v54, %v6135_v56  ;;  %v4879_v18 = vrot.slane %v4877_v17, 4 }
 0x265   :  { %1715 = vst [vmem:[#allocation2 + $0x18c] sm:$0xf] %v1714_v6  ;;  %v4882_v35 = vrot.slane %v4880_v4, 5  ;;  %v2681_v14 = vunpack.c.l.b16 %v2503_v29  ;;  %v2682_v38 = vunpack.c.l.b16 %v2513_v43  ;;  %v1380_v13 = vshrl.u32 %v645_v49, 16  ;;  %v1717_v43 = vld [vmem:[#allocation2 + $0x194] sm:$0x1] }
 0x266   :  { %v1383_v11 = vshll.u32 %v645_v49, 16  ;;  %v2517_v60 = vrot.slane %v2515_v46, 4  ;;  %v2520_v51 = vrot.slane %v2518_v57, 5  ;;  %v12967_v48 = vrot.slane %v2524_v47, 5  ;;  %v12972_v54 = vpop.f32.mrf.mxu0  ;;  %v12976_v57 = vld [vmem:[#allocation2 + $0x4c] sm:$0xf] }
 0x267   :  { %v2530_v62 = vrot.slane %v2528_v41, 4  ;;  %v1378_v52 = vrot.slane %v12944_v15, 4  ;;  %v1382_v10 = vrot.slane %v1380_v13, 7  ;;  %v12970_v2 = vrot.slane %v4886_v37, 5  ;;  %v2907_v56 = vpop.f32.mrf.mxu1  ;;  %15824 = vst [vmem:[#allocation33_spill] sm:$0xff] %v12972_v54  ;;  %v3318_v49 = vpop.f32.mrf.mxu2 }
 0x268   :  { %v4892_v44 = vrot.slane %v4890_v31, 4  ;;  %v5632_v17 = vpack.c.b16 %v5572_v0, %v12939_v12  ;;  %v6351_v29 = vunpack.c.l.b16 %v12954_v22  ;;  %v6352_v4 = vunpack.c.l.b16 %v6136_v27  ;;  %v12988_v27 = vld [vmem:[#allocation2 + $0x50] sm:$0x1] }
 0x269   :  { %v4883_v46 = vor.u32 %v4882_v35, %v4879_v18  ;;  %v12978_v47 = vadd.f32 %v3316_v5, %v2907_v56  ;;  %v2718_v15 = vpack.c.b16 %v2682_v38, %v2681_v14  ;;  %v1385_v41 = vor.u32 %v1383_v11, %v1382_v10 }
 0x26a   :  { %v1387_v6 = vrot.slane %v1382_v10, 4  ;;  %v2521_v37 = vor.u32 %v2520_v51, %v2517_v60  ;;  %v2531_v31 = vor.u32 %v2530_v62, %v12967_v48  ;;  %v2534_v13 = vshll.u32 %v1835_v36, 16  ;;  %v4699_v51 = vld [vmem:[#allocation2 + $0x48] sm:$0xf]  ;;  %v1786_v62 = vld [vmem:[#allocation2 + $0x178] sm:$0xf] }
 0x26b   :  { %15825 = vst [vmem:[#allocation34_spill] sm:$0xff] %v12978_v47  ;;  %v4896_v54 = vshll.u32 %v12936_v7, 16  ;;  %2946 = vmatmul.bf16.gmra.mxu3 %v2718_v15  ;;  %v1386_v12 = vsel %vm11939_vm11, %v1378_v52, %v1385_v41  ;;  %v4893_v5 = vor.u32 %v4892_v44, %v12970_v2  ;;  %v6139_v0 = vrot.slane %v12976_v57, 5  ;;  %v1785_v7 = vld [vmem:[#allocation2 + $0x174] sm:$0xf] }
 0x26c   :  { %v1718_v22 = vsel %vm11863_vm2, %v1387_v6, %v1717_v43  ;;  %1716 = vst [vmem:[#allocation2 + $0x190] sm:$0xf] %v1386_v12  ;;  %v6411_v18 = vpack.c.b16 %v6352_v4, %v6351_v29  ;;  %v4884_v35 = vrot.slane %v4883_v46, 4  ;;  %v2522_v14 = vrot.slane %v2521_v37, 4  ;;  %v5979_v10 = vld [vmem:[#allocation2 + $0x48] sm:$0xe] }
 0x26d   :  { %5764 = vmatmul.bf16.gmra.mxu1 %v5632_v17  ;;  %1719 = vst [vmem:[#allocation2 + $0x194] sm:$0x1] %v1718_v22  ;;  %v2532_v38 = vrot.slane %v2531_v31, 4  ;;  %v2536_v11 = vrot.slane %v2534_v13, 5  ;;  %v4898_v60 = vrot.slane %v4896_v54, 5  ;;  %v4894_v52 = vrot.slane %v4893_v5, 4 }
 0x26e   :  { %6547 = vmatmul.bf16.gmra.mxu2 %v6411_v18  ;;  %v6141_v44 = vrot.slane %v6139_v0, 4  ;;  %v4901_v36 = vshrl.u32 %v4699_v51, 16  ;;  %v4904_v56 = vshll.u32 %v4699_v51, 16  ;;  %v12990_v43 = vpop.f32.mrf.mxu0  ;;  %v2539_v15 = vshrl.u32 %v1785_v7, 16  ;;  %v11297_v6 = vld [vmem:[#allocation2 + $0xa8] sm:$0xff] }
 0x26f   :  { %v2909_v17 = vpop.f32.mrf.mxu1  ;;  %15826 = vst [vmem:[#allocation35_spill] sm:$0xff] %v12990_v43  ;;  %v2542_v41 = vshll.u32 %v1785_v7, 16  ;;  %v4910_v29 = vshll.u32 %v12976_v57, 16  ;;  %v4914_v4 = vshrl.u32 %v12976_v57, 16  ;;  %v6142_v54 = vrot.slane %v12988_v27, 5  ;;  %v3321_v13 = vpop.f32.mrf.mxu2 }
 0x270   :  { %v12994_v46 = vadd.f32 %v3318_v49, %v2909_v17  ;;  %v2548_v37 = vshll.u32 %v1786_v62, 16  ;;  %v2552_v31 = vshrl.u32 %v1786_v62, 16  ;;  %v2527_v12 = vsel %vm11900_vm7, %v2522_v14, %v12967_v48 }
 0x271   :  { %v2537_v22 = vsel %vm11900_vm7, %v2532_v38, %v2536_v11  ;;  %v4889_v5 = vsel %vm11900_vm7, %v4884_v35, %v12970_v2  ;;  %v10777_v57 = vrot.slane %v5979_v10, 9  ;;  %4524 = vmatmul.bf16.gmra.mxu0 %v11297_v6  ;;  %v4899_v49 = vsel %vm11900_vm7, %v4894_v52, %v4898_v60  ;;  %v1836_v10 = vld [vmem:[#allocation2 + $0x17c] sm:$0x1] }
 0x272   :  { %15827 = vst [vmem:[#allocation36_spill] sm:$0xff] %v12994_v46  ;;  %v6143_v51 = vsel %vm12456_vm14, %v6141_v44, %v6142_v54  ;;  %v4903_v18 = vrot.slane %v4901_v36, 4  ;;  %v4906_v7 = vrot.slane %v4904_v56, 5  ;;  %v2541_v62 = vrot.slane %v2539_v15, 4  ;;  %v13015_v44 = vld [vmem:[#allocation2 + $0x58] sm:$0xf] }
 0x273   :  { %v2544_v17 = vrot.slane %v2542_v41, 5  ;;  %v13009_v48 = vrot.slane %v4910_v29, 5  ;;  %v4916_v14 = vrot.slane %v4914_v4, 4  ;;  %v2683_v38 = vunpack.c.l.b16 %v2527_v12  ;;  %v13110_v46 = vld [vmem:[#allocation2 + $0x70] sm:$0xf] }
 0x274   :  { %v2684_v11 = vunpack.c.l.b16 %v2537_v22  ;;  %v13011_v43 = vrot.slane %v2548_v37, 5  ;;  %v2554_v2 = vrot.slane %v2552_v31, 4  ;;  %v5574_v35 = vunpack.c.l.b16 %v4899_v49  ;;  %v13025_v49 = vld [vmem:[#allocation2 + $0x5c] sm:$0x1]  ;;  %v1838_v16 = vld [vmem:[#allocation2 + $0x194] sm:$0x1] }
 0x275   :  { %v5573_v6 = vunpack.c.l.b16 %v4889_v5  ;;  %v6140_v60 = vsel %vm12456_vm14, %v10777_v57, %v6139_v0  ;;  %v6354_v52 = vunpack.c.l.b16 %v6143_v51  ;;  %v2545_v15 = vor.u32 %v2544_v17, %v2541_v62  ;;  %v4702_v51 = vld [vmem:[#allocation2 + $0x54] sm:$0xf] }
 0x276   :  { %v13017_v56 = vpop.f32.mrf.mxu0  ;;  %v4907_v41 = vor.u32 %v4906_v7, %v4903_v18  ;;  %v4917_v29 = vor.u32 %v4916_v14, %v13009_v48  ;;  %v4920_v4 = vshll.u32 %v12988_v27, 16  ;;  %v2719_v37 = vpack.c.b16 %v2684_v11, %v2683_v38  ;;  %v758_v14 = vld [vmem:[#allocation2 + $0x198] sm:$0x1] }
 0x277   :  { %v2912_v36 = vpop.f32.mrf.mxu1  ;;  %15828 = vst [vmem:[#allocation37_spill] sm:$0xff] %v13017_v56  ;;  %v2555_v31 = vor.u32 %v2554_v2, %v13011_v43  ;;  %v2558_v12 = vshll.u32 %v1836_v10, 16  ;;  %v3323_v22 = vpop.f32.mrf.mxu2  ;;  %v5633_v0 = vpack.c.b16 %v5574_v35, %v5573_v6  ;;  %v6353_v5 = vunpack.c.l.b16 %v6140_v60  ;;  %v1787_v35 = vld [vmem:[#allocation2 + $0x180] sm:$0xf]  ;;  %v1788_v60 = vld [vmem:[#allocation2 + $0x184] sm:$0xf] }
 0x278   :  { %v13021_v54 = vadd.f32 %v3321_v13, %v2912_v36  ;;  %v6146_v57 = vrot.slane %v13015_v44, 5  ;;  %v4934_v18 = vshll.u32 %v13015_v44, 16  ;;  %v4938_v7 = vshrl.u32 %v13015_v44, 16  ;;  %v5980_v44 = vld [vmem:[#allocation2 + $0x54] sm:$0xe] }
 0x279   :  { %v6412_v27 = vpack.c.b16 %v6354_v52, %v6353_v5  ;;  %v2546_v13 = vrot.slane %v2545_v15, 4  ;;  %v4908_v62 = vrot.slane %v4907_v41, 4  ;;  %v4918_v17 = vrot.slane %v4917_v29, 4  ;;  %v856_v56 = vld [vmem:[#allocation2 + $0x1a0] sm:$0x1] }
 0x27a   :  { %15829 = vst [vmem:[#allocation38_spill] sm:$0xff] %v13021_v54  ;;  %v2556_v38 = vrot.slane %v2555_v31, 4  ;;  %v2560_v11 = vrot.slane %v2558_v12, 5  ;;  %v4922_v2 = vrot.slane %v4920_v4, 5  ;;  %v759_v10 = vsel %vm11863_vm2, 0, %v758_v14  ;;  %v11298_v14 = vld [vmem:[#allocation2 + $0xb4] sm:$0xff] }
 0x27b   :  { %2951 = vmatmul.bf16.gmra.mxu3 %v2719_v37  ;;  %v6148_v6 = vrot.slane %v6146_v57, 4  ;;  %v4925_v36 = vshrl.u32 %v4702_v51, 16  ;;  %760 = vst [vmem:[#allocation2 + $0x198] sm:$0x1] %v759_v10  ;;  %v4913_v52 = vsel %vm11900_vm7, %v4908_v62, %v13009_v48  ;;  %v4928_v15 = vshll.u32 %v4702_v51, 16 }
 0x27c   :  { %v13034_v41 = vrot.slane %v4934_v18, 5  ;;  %v4940_v29 = vrot.slane %v4938_v7, 4  ;;  %v2551_v31 = vsel %vm11900_vm7, %v2546_v13, %v13011_v43  ;;  %v6149_v12 = vrot.slane %v13025_v49, 5 }
 0x27d   :  { %5769 = vmatmul.bf16.gmra.mxu1 %v5633_v0  ;;  %v2563_v0 = vshrl.u32 %v1787_v35, 16  ;;  %v2566_v5 = vshll.u32 %v1787_v35, 16  ;;  %v2561_v48 = vsel %vm11900_vm7, %v2556_v38, %v2560_v11  ;;  %v2572_v51 = vshll.u32 %v1788_v60, 16 }
 0x27e   :  { %6552 = vmatmul.bf16.gmra.mxu2 %v6412_v27  ;;  %v13036_v4 = vpop.f32.mrf.mxu0  ;;  %v2576_v18 = vshrl.u32 %v1788_v60, 16  ;;  %v4923_v62 = vsel %vm11900_vm7, %v4918_v17, %v4922_v2  ;;  %v10778_v10 = vrot.slane %v5980_v44, 9  ;;  %v6150_v43 = vsel %vm12456_vm14, %v6148_v6, %v6149_v12 }
 0x27f   :  { %v2914_v37 = vpop.f32.mrf.mxu1  ;;  %15830 = vst [vmem:[#allocation39_spill] sm:$0xff] %v13036_v4  ;;  %v3326_v7 = vpop.f32.mrf.mxu2  ;;  %v4927_v13 = vrot.slane %v4925_v36, 4  ;;  %v2685_v4 = vunpack.c.l.b16 %v2551_v31  ;;  %v4930_v35 = vrot.slane %v4928_v15, 5  ;;  %v2686_v38 = vunpack.c.l.b16 %v2561_v48  ;;  %v1837_v15 = vld [vmem:[#allocation2 + $0x188] sm:$0x1] }
 0x280   :  { %v13042_v27 = vadd.f32 %v3323_v22, %v2914_v37  ;;  %v4941_v22 = vor.u32 %v4940_v29, %v13034_v41  ;;  %v4944_v37 = vshll.u32 %v13025_v49, 16  ;;  %v2565_v11 = vrot.slane %v2563_v0, 4  ;;  %v11634_v0 = vld [vmem:[%s15758_s2] ss:$0 sm:$0xff] }
 0x281   :  { %4529 = vmatmul.bf16.gmra.mxu0 %v11298_v14  ;;  %v2568_v60 = vrot.slane %v2566_v5, 5  ;;  %v6147_v17 = vsel %vm12456_vm14, %v10778_v10, %v6146_v57  ;;  %v13056_v2 = vrot.slane %v2572_v51, 5  ;;  %v2578_v6 = vrot.slane %v2576_v18, 4  ;;  %v4706_v10 = vld [vmem:[#allocation2 + $0x64] sm:$0xf] }
 0x282   :  { %15831 = vst [vmem:[#allocation40_spill] sm:$0xff] %v13042_v27  ;;  %v857_v27 = vsel %vm11877_vm4, 0, %v856_v56  ;;  %v5575_v36 = vunpack.c.l.b16 %v4913_v52  ;;  %v5576_v44 = vunpack.c.l.b16 %v4923_v62  ;;  %v515_v29 = vpop.f32.mrf.mxu3  ;;  %v6356_v31 = vunpack.c.l.b16 %v6150_v43 }
 0x283   :  { %858 = vst [vmem:[#allocation2 + $0x1a0] sm:$0x1] %v857_v27  ;;  %v4931_v49 = vor.u32 %v4930_v35, %v4927_v13  ;;  %v4942_v12 = vrot.slane %v4941_v22, 4  ;;  %v516_v30 = vadd.f32 %v11634_v0, %v515_v29  ;;  %v2720_v57 = vpack.c.b16 %v2686_v38, %v2685_v4  ;;  %v5981_v38 = vld [vmem:[#allocation2 + $0x60] sm:$0xe] }
 0x284   :  { %v6355_v14 = vunpack.c.l.b16 %v6147_v17  ;;  %v2569_v48 = vor.u32 %v2568_v60, %v2565_v11  ;;  %v4946_v51 = vrot.slane %v4944_v37, 5  ;;  %v2579_v52 = vor.u32 %v2578_v6, %v13056_v2  ;;  %v4705_v11 = vld [vmem:[#allocation2 + $0x60] sm:$0xf] }
 0x285   :  { %v2582_v18 = vshll.u32 %v1837_v15, 16  ;;  %v582_v62 = vmax.f32 %v516_v30, 0.0  ;;  %v5634_v13 = vpack.c.b16 %v5576_v44, %v5575_v36  ;;  %v13066_v22 = vrot.slane %v4931_v49, 4  ;;  %v13074_v44 = vld [vmem:[#allocation2 + $0x68] sm:$0x1] }
 0x286   :  { %v13061_v5 = vpop.f32.mrf.mxu0  ;;  %v6413_v35 = vpack.c.b16 %v6356_v31, %v6355_v14  ;;  %v4947_v29 = vsel %vm11900_vm7, %v4942_v12, %v4946_v51  ;;  %v2570_v37 = vrot.slane %v2569_v48, 4  ;;  %v4958_v60 = vshll.u32 %v4706_v10, 16  ;;  %v1789_v48 = vld [vmem:[#allocation2 + $0x18c] sm:$0xf]  ;;  %v1790_v51 = vld [vmem:[#allocation2 + $0x190] sm:$0xf] }
 0x287   :  { %v2917_v56 = vpop.f32.mrf.mxu1  ;;  %15832 = vst [vmem:[#allocation41_spill] sm:$0xff] %v13061_v5  ;;  %v3328_v43 = vpop.f32.mrf.mxu2  ;;  %v646_v4 = vpack.c.bf16 %v582_v62, %v582_v62  ;;  %v4962_v17 = vshrl.u32 %v4706_v10, 16  ;;  %v2580_v6 = vrot.slane %v2579_v52, 4  ;;  %v2584_v15 = vrot.slane %v2582_v18, 5 }
 0x288   :  { %v13063_v27 = vadd.f32 %v3326_v7, %v2917_v56  ;;  %v6153_v7 = vrot.slane %v4706_v10, 5  ;;  %v4937_v36 = vsel %vm11900_vm7, %v13066_v22, %v13034_v41  ;;  %v10779_v31 = vrot.slane %v5981_v38, 9  ;;  %v1720_v10 = vld [vmem:[#allocation2 + $0x198] sm:$0xf] }
 0x289   :  { %v1389_v30 = vshrl.u32 %v646_v4, 16  ;;  %v1392_v56 = vshll.u32 %v646_v4, 16  ;;  %v13076_v12 = vunpack.c.l.b16 %v4947_v29  ;;  %v4949_v52 = vshrl.u32 %v4705_v11, 16  ;;  %v11299_v4 = vld [vmem:[#allocation2 + $0xc0] sm:$0xff] }
 0x28a   :  { %15833 = vst [vmem:[#allocation42_spill] sm:$0xff] %v13063_v27  ;;  %v517_v49 = vpop.f32.mrf.mxu3  ;;  %v2575_v41 = vsel %vm11900_vm7, %v2570_v37, %v13056_v2  ;;  %v13085_v22 = vrot.slane %v4958_v60, 5  ;;  %v2590_v5 = vshll.u32 %v1789_v48, 16  ;;  %v2596_v27 = vshll.u32 %v1790_v51, 16 }
 0x28b   :  { %2956 = vmatmul.bf16.gmra.mxu3 %v2720_v57  ;;  %v13078_v57 = vrot.slane %v1389_v30, 7  ;;  %v518_v14 = vadd.f32 %v11634_v0, %v517_v49  ;;  %v2585_v0 = vsel %vm11900_vm7, %v2580_v6, %v2584_v15  ;;  %v2600_v54 = vshrl.u32 %v1790_v51, 16 }
 0x28c   :  { %v6156_v37 = vrot.slane %v13074_v44, 5  ;;  %v4952_v60 = vshll.u32 %v4705_v11, 16  ;;  %v6154_v6 = vsel %vm12456_vm14, %v10779_v31, %v6153_v7  ;;  %v4951_v51 = vrot.slane %v4949_v52, 4 }
 0x28d   :  { %5774 = vmatmul.bf16.gmra.mxu1 %v5634_v13  ;;  %v6155_v13 = vrot.slane %v6153_v7, 4  ;;  %v1394_v38 = vor.u32 %v1392_v56, %v13078_v57  ;;  %v583_v30 = vmax.f32 %v518_v14, 0.0  ;;  %v2602_v11 = vrot.slane %v2600_v54, 4 }
 0x28e   :  { %6557 = vmatmul.bf16.gmra.mxu2 %v6413_v35  ;;  %v13080_v62 = vpop.f32.mrf.mxu0  ;;  %v4964_v35 = vrot.slane %v4962_v17, 4  ;;  %v2687_v17 = vunpack.c.l.b16 %v2575_v41  ;;  %v1395_v41 = vrot.slane %v13078_v57, 4  ;;  %v4968_v7 = vshll.u32 %v13074_v44, 16 }
 0x28f   :  { %v2919_v18 = vpop.f32.mrf.mxu1  ;;  %15834 = vst [vmem:[#allocation43_spill] sm:$0xff] %v13080_v62  ;;  %v3331_v49 = vpop.f32.mrf.mxu2  ;;  %v2587_v62 = vshrl.u32 %v1789_v48, 16  ;;  %v1721_v2 = vsel %vm11926_vm9, %v1394_v38, %v1720_v10  ;;  %v6157_v56 = vsel %vm12456_vm14, %v6155_v13, %v6156_v37  ;;  %v13100_v38 = vrot.slane %v2596_v27, 5 }
 0x290   :  { %v13087_v29 = vadd.f32 %v3328_v43, %v2919_v18  ;;  %v647_v43 = vpack.c.bf16 %v583_v30, %v583_v30  ;;  %v2688_v18 = vunpack.c.l.b16 %v2585_v0  ;;  %1722 = vst [vmem:[#allocation2 + $0x198] sm:$0xf] %v1721_v2  ;;  %v4965_v15 = vor.u32 %v4964_v35, %v13085_v22 }
 0x291   :  { %4534 = vmatmul.bf16.gmra.mxu0 %v11299_v4  ;;  %v2589_v10 = vrot.slane %v2587_v62, 4  ;;  %v2592_v4 = vrot.slane %v2590_v5, 5  ;;  %v4954_v30 = vrot.slane %v4952_v60, 5  ;;  %v5577_v13 = vunpack.c.l.b16 %v4937_v36 }
 0x292   :  { %15835 = vst [vmem:[#allocation44_spill] sm:$0xff] %v13087_v29  ;;  %v1397_v14 = vshrl.u32 %v647_v43, 16  ;;  %v1400_v48 = vshll.u32 %v647_v43, 16  ;;  %v2721_v2 = vpack.c.b16 %v2688_v18, %v2687_v17  ;;  %v6358_v37 = vunpack.c.l.b16 %v6157_v56  ;;  %v1724_v43 = vld [vmem:[#allocation2 + $0x1a0] sm:$0x1] }
 0x293   :  { %v4966_v52 = vrot.slane %v4965_v15, 4  ;;  %v2606_v62 = vshll.u32 %v1838_v16, 16  ;;  %v5635_v57 = vpack.c.b16 %v13076_v12, %v5577_v13  ;;  %v2593_v60 = vor.u32 %v2592_v4, %v2589_v10  ;;  %v11283_v15 = vld [vmem:[%s15760_s3 + $0xb8] sm:$0xff]  ;;  %v5982_v4 = vld [vmem:[#allocation2 + $0x6c] sm:$0xe] }
 0x294   :  { %v1399_v0 = vrot.slane %v1397_v14, 7  ;;  %v6357_v14 = vunpack.c.l.b16 %v6154_v6  ;;  %v2603_v44 = vor.u32 %v2602_v11, %v13100_v38  ;;  %v4955_v17 = vor.u32 %v4954_v30, %v4951_v51  ;;  %v7308_v12 = vld [vmem:[#allocation2 + $0x1c] sm:$0xf]  ;;  %v8597_v6 = vld [vmem:[#allocation2 + $0x18] sm:$0xe]  ;;  %3897 = vmatpush.bf16.msrb.mxu3 %v11283_v15 }
 0x295   :  { %v4970_v18 = vrot.slane %v4968_v7, 5  ;;  %v6160_v16 = vrot.slane %v13110_v46, 5  ;;  %v2594_v51 = vrot.slane %v2593_v60, 4  ;;  %v11076_v11 = vrot.slane %v8597_v6, 9  ;;  %v8598_v6 = vld [vmem:[#allocation2 + $0x24] sm:$0xe] }
 0x296   :  { %v13104_v35 = vpop.f32.mrf.mxu0  ;;  %v1402_v5 = vor.u32 %v1400_v48, %v1399_v0  ;;  %v1404_v27 = vrot.slane %v1399_v0, 4  ;;  %v6414_v56 = vpack.c.b16 %v6358_v37, %v6357_v14  ;;  %v2608_v48 = vrot.slane %v2606_v62, 5 }
 0x297   :  { %v2922_v31 = vpop.f32.mrf.mxu1  ;;  %15836 = vst [vmem:[#allocation45_spill] sm:$0xff] %v13104_v35  ;;  %v3333_v54 = vpop.f32.mrf.mxu2  ;;  %v4971_v32 = vsel %vm11900_vm7, %v4966_v52, %v4970_v18  ;;  %v2604_v10 = vrot.slane %v2603_v44, 4  ;;  %v4956_v0 = vrot.slane %v4955_v17, 4  ;;  %v8730_v13 = vrot.slane %v7309_v24, 5  ;;  %v7314_v18 = vld [vmem:[#allocation2 + $0x34] sm:$0xf] }
 0x298   :  { %v13106_v29 = vadd.f32 %v3331_v49, %v2922_v31  ;;  %v1403_v36 = vsel %vm11939_vm11, %v1395_v41, %v1402_v5  ;;  %v1725_v49 = vsel %vm11863_vm2, %v1404_v27, %v1724_v43  ;;  %v8727_v41 = vrot.slane %v7308_v12, 5  ;;  %v11300_v43 = vld [vmem:[#allocation2 + $0xe4] sm:$0xff]  ;;  %v13131_v27 = vld [vmem:[#allocation2 + $0x74] sm:$0x1] }
 0x299   :  { %1723 = vst [vmem:[#allocation2 + $0x19c] sm:$0xf] %v1403_v36  ;;  %v4961_v52 = vsel %vm11900_vm7, %v4956_v0, %v13085_v22  ;;  %v5580_v5 = vunpack.c.l.b16 %v4971_v32  ;;  %v10780_v62 = vrot.slane %v5982_v4, 9  ;;  %v2599_v60 = vsel %vm11900_vm7, %v2594_v51, %v13100_v38  ;;  %v7311_v36 = vld [vmem:[#allocation2 + $0x28] sm:$0xf] }
 0x29a   :  { %15837 = vst [vmem:[#allocation46_spill] sm:$0xff] %v13106_v29  ;;  %v8728_v31 = vsel %vm12456_vm14, %v11076_v11, %v8727_v41  ;;  %v2609_v44 = vsel %vm11900_vm7, %v2604_v10, %v2608_v48  ;;  %v4982_v22 = vshll.u32 %v13110_v46, 16  ;;  %v4986_v17 = vshrl.u32 %v13110_v46, 16  ;;  %v7312_v10 = vld [vmem:[#allocation2 + $0x2c] sm:$0x1] }
 0x29b   :  { %2961 = vmatmul.bf16.gmra.mxu3 %v2721_v2  ;;  %1726 = vst [vmem:[#allocation2 + $0x1a0] sm:$0x1] %v1725_v49  ;;  %v8729_v2 = vrot.slane %v8727_v41, 4  ;;  %v8966_v15 = vunpack.c.l.b16 %v8728_v31  ;;  %v6161_v38 = vsel %vm12456_vm14, %v10780_v62, %v6160_v16  ;;  %v6163_v48 = vrot.slane %v13131_v27, 5 }
 0x29c   :  { %v2689_v24 = vunpack.c.l.b16 %v2599_v60  ;;  %v2690_v51 = vunpack.c.l.b16 %v2609_v44  ;;  %v8734_v11 = vrot.slane %v7311_v36, 5  ;;  %v11077_v0 = vrot.slane %v8598_v6, 9 }
 0x29d   :  { %5779 = vmatmul.bf16.gmra.mxu1 %v5635_v57  ;;  %v4708_v57 = vld [vmem:[#allocation2 + $0x6c] sm:$0xf]  ;;  %v8731_v49 = vsel %vm12456_vm14, %v8729_v2, %v8730_v13  ;;  %v8741_v31 = vrot.slane %v7314_v18, 5  ;;  %v13149_v13 = vrot.slane %v4982_v22, 5  ;;  %v6359_v60 = vunpack.c.l.b16 %v6161_v38 }
 0x29e   :  { %6562 = vmatmul.bf16.gmra.mxu2 %v6414_v56  ;;  %v13122_v7 = vpop.f32.mrf.mxu0  ;;  %v8967_v12 = vunpack.c.l.b16 %v8731_v49  ;;  %v5579_v56 = vunpack.c.l.b16 %v4961_v52  ;;  %v4973_v32 = vshrl.u32 %v4708_v57, 16  ;;  %v4976_v41 = vshll.u32 %v4708_v57, 16 }
 0x29f   :  { %v2924_v30 = vpop.f32.mrf.mxu1  ;;  %15838 = vst [vmem:[#allocation47_spill] sm:$0xff] %v13122_v7  ;;  %v8736_v52 = vrot.slane %v8734_v11, 4  ;;  %v8735_v44 = vsel %vm12456_vm14, %v11077_v0, %v8734_v11  ;;  %v8737_v36 = vrot.slane %v7312_v10, 5  ;;  %v8743_v49 = vrot.slane %v8741_v31, 4  ;;  %v11282_v10 = vld [vmem:[%s15760_s3 + $0xb0] sm:$0xff] }
 0x2a0   :  { %v13126_v37 = vadd.f32 %v3333_v54, %v2924_v30  ;;  %v3336_v14 = vpop.f32.mrf.mxu2  ;;  %v6162_v54 = vrot.slane %v6160_v16, 4  ;;  %v13145_v4 = vpack.c.b16 %v8967_v12, %v8966_v15  ;;  %v8599_v30 = vld [vmem:[#allocation2 + $0x30] sm:$0xe]  ;;  %v5636_v2 = vpack.c.b16 %v5580_v5, %v5579_v56  ;;  %3898 = vmatpush.bf16.msrb.mxu3 %v11282_v10 }
 0x2a1   :  { %4539 = vmatmul.bf16.gmra.mxu0 %v11300_v43  ;;  %v4988_v16 = vrot.slane %v4986_v17, 4  ;;  %v7315_v43 = vld [vmem:[#allocation2 + $0x38] sm:$0x1]  ;;  %v4975_v12 = vrot.slane %v4973_v32, 4  ;;  %v11078_v6 = vrot.slane %v8599_v30, 9  ;;  %v4978_v22 = vrot.slane %v4976_v41, 5 }
 0x2a2   :  { %15839 = vst [vmem:[#allocation48_spill] sm:$0xff] %v13126_v37  ;;  %v6164_v46 = vsel %vm12456_vm14, %v6162_v54, %v6163_v48  ;;  %v2722_v54 = vpack.c.b16 %v2690_v51, %v2689_v24  ;;  %v8738_v17 = vsel %vm12456_vm14, %v8736_v52, %v8737_v36  ;;  %v8744_v56 = vrot.slane %v7315_v43, 5  ;;  %v4712_v48 = vld [vmem:[#allocation2 + $0x7c] sm:$0xf] }
 0x2a3   :  { %v6360_v57 = vunpack.c.l.b16 %v6164_v46  ;;  %v4989_v38 = vor.u32 %v4988_v16, %v13149_v13  ;;  %v8968_v24 = vunpack.c.l.b16 %v8735_v44  ;;  %v8969_v51 = vunpack.c.l.b16 %v8738_v17 }
 0x2a4   :  { %v8745_v32 = vsel %vm12456_vm14, %v8743_v49, %v8744_v56  ;;  %v4992_v46 = vshll.u32 %v13131_v27, 16  ;;  %v6167_v0 = vrot.slane %v4712_v48, 5  ;;  %v4979_v43 = vor.u32 %v4978_v22, %v4975_v12  ;;  %v4713_v49 = vld [vmem:[#allocation2 + $0x80] sm:$0x1] }
 0x2a5   :  { %v6415_v11 = vpack.c.b16 %v6360_v57, %v6359_v60  ;;  %v13168_v41 = vpack.c.b16 %v8969_v51, %v8968_v24  ;;  %v8971_v16 = vunpack.c.l.b16 %v8745_v32  ;;  %v4990_v52 = vrot.slane %v4989_v38, 4  ;;  %v7317_v38 = vld [vmem:[#allocation2 + $0x40] sm:$0xf]  ;;  %v8600_v24 = vld [vmem:[#allocation2 + $0x3c] sm:$0xe] }
 0x2a6   :  { %v13151_v62 = vpop.f32.mrf.mxu0  ;;  %v6169_v57 = vrot.slane %v6167_v0, 4  ;;  %v4980_v17 = vrot.slane %v4979_v43, 4  ;;  %v5006_v22 = vshll.u32 %v4712_v48, 16  ;;  %v5010_v56 = vshrl.u32 %v4712_v48, 16 }
 0x2a7   :  { %15840 = vst [vmem:[#allocation49_spill] sm:$0xff] %v13151_v62  ;;  %v6170_v10 = vrot.slane %v4713_v49, 5  ;;  %v11079_v48 = vrot.slane %v8600_v24, 9 }
 0x2a8   :  { %v3338_v5 = vpop.f32.mrf.mxu2  ;;  %v13185_v43 = vrot.slane %v5006_v22, 5 }
 0x2a9   :  { %v2927_v15 = vpop.f32.mrf.mxu1 }
 0x2aa   :  { %v13155_v18 = vadd.f32 %v3336_v14, %v2927_v15  ;;  %v8742_v14 = vsel %vm12456_vm14, %v11078_v6, %v8741_v31  ;;  %v4994_v15 = vrot.slane %v4992_v46, 5  ;;  %v4711_v6 = vld [vmem:[#allocation2 + $0x78] sm:$0xf] }
 0x2ab   :  { %2966 = vmatmul.bf16.gmra.mxu3 %v2722_v54  ;;  %v8970_v30 = vunpack.c.l.b16 %v8742_v14  ;;  %v5983_v54 = vld [vmem:[#allocation2 + $0x78] sm:$0xe]  ;;  %v7318_v14 = vld [vmem:[#allocation2 + $0x44] sm:$0x1]  ;;  %v4997_v46 = vshrl.u32 %v4711_v6, 16 }
 0x2ac   :  { %15841 = vst [vmem:[#allocation50_spill] sm:$0xff] %v13155_v18  ;;  %v4995_v12 = vsel %vm11900_vm7, %v4990_v52, %v4994_v15  ;;  %v10781_v51 = vrot.slane %v5983_v54, 9  ;;  %v5012_v52 = vrot.slane %v5010_v56, 4  ;;  %v8751_v54 = vrot.slane %v7318_v14, 5 }
 0x2ad   :  { %5784 = vmatmul.bf16.gmra.mxu1 %v5636_v2  ;;  %v13172_v36 = vpack.c.b16 %v8971_v16, %v8970_v30  ;;  %v11301_v2 = vld [vmem:[#allocation2 + $0xf0] sm:$0xff]  ;;  %v5582_v32 = vunpack.c.l.b16 %v4995_v12  ;;  %v8748_v30 = vrot.slane %v7317_v38, 5  ;;  %v5000_v16 = vshll.u32 %v4711_v6, 16  ;;  %v11252_v12 = vld [vmem:[#allocation2 + $0x138] sm:$0xff] }
 0x2ae   :  { %6567 = vmatmul.bf16.gmra.mxu2 %v6415_v11  ;;  %v13170_v44 = vpop.f32.mrf.mxu0  ;;  %v6171_v11 = vsel %vm12456_vm14, %v6169_v57, %v6170_v10  ;;  %v6168_v15 = vsel %vm12456_vm14, %v10781_v51, %v6167_v0  ;;  %v4999_v10 = vrot.slane %v4997_v46, 4  ;;  %v5013_v0 = vor.u32 %v5012_v52, %v13185_v43  ;;  %v11281_v51 = vld [vmem:[%s15760_s3 + $0xa8] sm:$0xff] }
 0x2af   :  { %15842 = vst [vmem:[#allocation51_spill] sm:$0xff] %v13170_v44  ;;  %v6362_v44 = vunpack.c.l.b16 %v6171_v11  ;;  %v8749_v57 = vsel %vm12456_vm14, %v11079_v48, %v8748_v30  ;;  %v6361_v38 = vunpack.c.l.b16 %v6168_v15  ;;  %v5002_v24 = vrot.slane %v5000_v16, 5  ;;  %3899 = vmatpush.bf16.msrb.mxu3 %v11281_v51 }
 0x2b0   :  { %v13176_v27 = vpop.f32.mrf.mxu2  ;;  %v8972_v14 = vunpack.c.l.b16 %v8749_v57  ;;  %v5014_v16 = vrot.slane %v5013_v0, 4 }
 0x2b1   :  { %v2929_v31 = vpop.f32.mrf.mxu1  ;;  %15844 = vst [vmem:[#allocation53_spill] sm:$0xff] %v13176_v27  ;;  %4544 = vmatmul.bf16.gmra.mxu0 %v11301_v2  ;;  %v5003_v46 = vor.u32 %v5002_v24, %v4999_v10  ;;  %v7320_v24 = vld [vmem:[#allocation2 + $0x4c] sm:$0xf] }
 0x2b2   :  { %v13174_v60 = vadd.f32 %v3338_v5, %v2929_v31  ;;  %v4985_v5 = vsel %vm11900_vm7, %v4980_v17, %v13149_v13  ;;  %v8750_v13 = vrot.slane %v8748_v30, 4  ;;  %v5016_v30 = vshll.u32 %v4713_v49, 16 }
 0x2b3   :  { %v5581_v2 = vunpack.c.l.b16 %v4985_v5  ;;  %v4715_v5 = vld [vmem:[#allocation2 + $0x88] sm:$0xf]  ;;  %v8755_v7 = vrot.slane %v7320_v24, 5 }
 0x2b4   :  { %15843 = vst [vmem:[#allocation52_spill] sm:$0xff] %v13174_v60  ;;  %v8752_v56 = vsel %vm12456_vm14, %v8750_v13, %v8751_v54  ;;  %v11302_v54 = vld [vmem:[#allocation2 + $0xfc] sm:$0xff]  ;;  %v5034_v10 = vshrl.u32 %v4715_v5, 16 }
 0x2b5   :  { %v5637_v6 = vpack.c.b16 %v5582_v32, %v5581_v2  ;;  %v8973_v11 = vunpack.c.l.b16 %v8752_v56  ;;  %v6416_v32 = vpack.c.b16 %v6362_v44, %v6361_v38  ;;  %v6174_v2 = vrot.slane %v4715_v5, 5  ;;  %v5984_v44 = vld [vmem:[#allocation2 + $0x84] sm:$0xe] }
 0x2b6   :  { %v13187_v31 = vpop.f32.mrf.mxu0  ;;  %v4714_v56 = vld [vmem:[#allocation2 + $0x84] sm:$0xf]  ;;  %v5004_v38 = vrot.slane %v5003_v46, 4 }
 0x2b7   :  { %15845 = vst [vmem:[#allocation54_spill] sm:$0xff] %v13187_v31  ;;  %v13205_v13 = vpack.c.b16 %v8973_v11, %v8972_v14  ;;  %v6176_v49 = vrot.slane %v6174_v2, 4  ;;  %v5030_v14 = vshll.u32 %v4715_v5, 16  ;;  %v8601_v11 = vld [vmem:[#allocation2 + $0x48] sm:$0xe]  ;;  %v5036_v5 = vrot.slane %v5034_v10, 4 }
 0x2b8   :  { %v13195_v22 = vpop.f32.mrf.mxu2  ;;  %v11080_v35 = vrot.slane %v8601_v11, 9  ;;  %v4718_v10 = vld [vmem:[#allocation2 + $0x94] sm:$0xf] }
 0x2b9   :  { %15847 = vst [vmem:[#allocation56_spill] sm:$0xff] %v13195_v22 }
 0x2ba   :  { %v13191_v17 = vpop.f32.mrf.mxu1 }
 0x2bb   :  { %15846 = vst [vmem:[#allocation55_spill] sm:$0xff] %v13191_v17  ;;  %3340 = vmatmul.bf16.vlgmr.msra.gmra.mxu3 %v11252_v12  ;;  %v5018_v12 = vrot.slane %v5016_v30, 5  ;;  %v10782_v30 = vrot.slane %v5984_v44, 9  ;;  %v8757_v44 = vrot.slane %v8755_v7, 4 }
 0x2bd   :  { %5789 = vmatmul.bf16.gmra.mxu1 %v5637_v6  ;;  %v4716_v6 = vld [vmem:[#allocation2 + $0x8c] sm:$0x1]  ;;  %v5019_v51 = vsel %vm11900_vm7, %v5014_v16, %v5018_v12  ;;  %v5024_v16 = vshll.u32 %v4714_v56, 16  ;;  %v13222_v12 = vrot.slane %v5030_v14, 5 }
 0x2be   :  { %v13203_v48 = vpop.f32.mrf.mxu3  ;;  %6572 = vmatmul.bf16.gmra.mxu2 %v6416_v32  ;;  %v13207_v52 = vpop.f32.mrf.mxu0  ;;  %v6177_v0 = vrot.slane %v4716_v6, 5  ;;  %v5009_v32 = vsel %vm11900_vm7, %v5004_v38, %v13185_v43  ;;  %v5584_v62 = vunpack.c.l.b16 %v5019_v51  ;;  %v6175_v43 = vsel %vm12456_vm14, %v10782_v30, %v6174_v2  ;;  %v11253_v51 = vld [vmem:[#allocation2 + $0x144] sm:$0xff] }
 0x2bf   :  { %15848 = vst [vmem:[#allocation57_spill] sm:$0xff] %v13203_v48  ;;  %v5583_v22 = vunpack.c.l.b16 %v5009_v32  ;;  %v5026_v2 = vrot.slane %v5024_v16, 5  ;;  %v11280_v32 = vld [vmem:[%s15760_s3 + $0xa0] sm:$0xff] }
 0x2c0   :  { %15849 = vst [vmem:[#allocation58_spill] sm:$0xff] %v13207_v52  ;;  %v13211_v57 = vpop.f32.mrf.mxu2  ;;  %v7321_v52 = vld [vmem:[#allocation2 + $0x50] sm:$0x1]  ;;  %v6178_v46 = vsel %vm12456_vm14, %v6176_v49, %v6177_v0  ;;  %v8756_v49 = vsel %vm12456_vm14, %v11080_v35, %v8755_v7  ;;  %v6363_v0 = vunpack.c.l.b16 %v6175_v43  ;;  %3900 = vmatpush.bf16.msrb.mxu3 %v11280_v32  ;;  %v5058_v32 = vshrl.u32 %v4718_v10, 16 }
 0x2c1   :  { %15851 = vst [vmem:[#allocation60_spill] sm:$0xff] %v13211_v57  ;;  %4549 = vmatmul.bf16.gmra.mxu0 %v11302_v54  ;;  %v5021_v54 = vshrl.u32 %v4714_v56, 16  ;;  %v8758_v38 = vrot.slane %v7321_v52, 5  ;;  %v6364_v27 = vunpack.c.l.b16 %v6178_v46  ;;  %v5638_v56 = vpack.c.b16 %v5584_v62, %v5583_v22 }
 0x2c2   :  { %v13209_v15 = vpop.f32.mrf.mxu1  ;;  %v5037_v52 = vor.u32 %v5036_v5, %v13222_v12  ;;  %v8974_v30 = vunpack.c.l.b16 %v8756_v49  ;;  %v5040_v62 = vshll.u32 %v4716_v6, 16  ;;  %v6181_v22 = vrot.slane %v4718_v10, 5  ;;  %v4719_v5 = vld [vmem:[#allocation2 + $0x98] sm:$0x1]  ;;  %v5985_v49 = vld [vmem:[#allocation2 + $0x90] sm:$0xe] }
 0x2c3   :  { %15850 = vst [vmem:[#allocation59_spill] sm:$0xff] %v13209_v15  ;;  %v8759_v24 = vsel %vm12456_vm14, %v8757_v44, %v8758_v38  ;;  %v5023_v11 = vrot.slane %v5021_v54, 4  ;;  %v6417_v7 = vpack.c.b16 %v6364_v27, %v6363_v0  ;;  %v4717_v6 = vld [vmem:[#allocation2 + $0x90] sm:$0xf]  ;;  %v5054_v0 = vshll.u32 %v4718_v10, 16 }
 0x2c4   :  { %v8975_v35 = vunpack.c.l.b16 %v8759_v24  ;;  %v5038_v16 = vrot.slane %v5037_v52, 4  ;;  %v6183_v24 = vrot.slane %v6181_v22, 4  ;;  %v7323_v52 = vld [vmem:[#allocation2 + $0x58] sm:$0xf] }
 0x2c5   :  { %v5027_v54 = vor.u32 %v5026_v2, %v5023_v11  ;;  %v6184_v2 = vrot.slane %v4719_v5, 5 }
 0x2c6   :  { %v13218_v31 = vpop.f32.mrf.mxu3  ;;  %v13224_v57 = vpop.f32.mrf.mxu0  ;;  %v13242_v44 = vpack.c.b16 %v8975_v35, %v8974_v30  ;;  %v10783_v35 = vrot.slane %v5985_v49, 9 }
 0x2c7   :  { %15852 = vst [vmem:[#allocation61_spill] sm:$0xff] %v13218_v31  ;;  %v5028_v30 = vrot.slane %v5027_v54, 4 }
 0x2c8   :  { %15853 = vst [vmem:[#allocation62_spill] sm:$0xff] %v13224_v57  ;;  %v13232_v14 = vpop.f32.mrf.mxu2  ;;  %v5045_v57 = vshrl.u32 %v4717_v6, 16 }
 0x2c9   :  { %15855 = vst [vmem:[#allocation64_spill] sm:$0xff] %v13232_v14  ;;  %v7324_v14 = vld [vmem:[#allocation2 + $0x5c] sm:$0x1] }
 0x2ca   :  { %v13228_v15 = vpop.f32.mrf.mxu1  ;;  %v8765_v17 = vrot.slane %v7324_v14, 5 }
 0x2cb   :  { %15854 = vst [vmem:[#allocation63_spill] sm:$0xff] %v13228_v15  ;;  %3345 = vmatmul.bf16.gmra.mxu3 %v11253_v51  ;;  %v11303_v51 = vld [vmem:[#allocation2 + $0x108] sm:$0xff] }
 0x2cd   :  { %5794 = vmatmul.bf16.gmra.mxu1 %v5638_v56  ;;  %v5042_v56 = vrot.slane %v5040_v62, 5  ;;  %v5033_v62 = vsel %vm11900_vm7, %v5028_v30, %v13222_v12  ;;  %v6182_v12 = vsel %vm12456_vm14, %v10783_v35, %v6181_v22 }
 0x2ce   :  { %v13240_v46 = vpop.f32.mrf.mxu3  ;;  %6577 = vmatmul.bf16.gmra.mxu2 %v6417_v7  ;;  %v13244_v43 = vpop.f32.mrf.mxu0  ;;  %v8602_v7 = vld [vmem:[#allocation2 + $0x54] sm:$0xe]  ;;  %v5585_v15 = vunpack.c.l.b16 %v5033_v62  ;;  %v4721_v62 = vld [vmem:[#allocation2 + $0xa0] sm:$0xf]  ;;  %v6365_v14 = vunpack.c.l.b16 %v6182_v12 }
 0x2cf   :  { %15856 = vst [vmem:[#allocation65_spill] sm:$0xff] %v13240_v46  ;;  %v5043_v11 = vsel %vm11900_vm7, %v5038_v16, %v5042_v56  ;;  %v5060_v16 = vrot.slane %v5058_v32, 4  ;;  %v8762_v56 = vrot.slane %v7323_v52, 5  ;;  %v5047_v46 = vrot.slane %v5045_v57, 4 }
 0x2d0   :  { %15857 = vst [vmem:[#allocation66_spill] sm:$0xff] %v13244_v43  ;;  %v13248_v27 = vpop.f32.mrf.mxu2  ;;  %v6185_v43 = vsel %vm12456_vm14, %v6183_v24, %v6184_v2  ;;  %v5586_v54 = vunpack.c.l.b16 %v5043_v11  ;;  %v5064_v57 = vshll.u32 %v4719_v5, 16  ;;  %v5986_v5 = vld [vmem:[#allocation2 + $0x9c] sm:$0xe] }
 0x2d1   :  { %15859 = vst [vmem:[#allocation68_spill] sm:$0xff] %v13248_v27  ;;  %4554 = vmatmul.bf16.gmra.mxu0 %v11303_v51  ;;  %v5048_v27 = vshll.u32 %v4717_v6, 16  ;;  %v13259_v51 = vrot.slane %v5054_v0, 5  ;;  %v8764_v30 = vrot.slane %v8762_v56, 4  ;;  %v11254_v6 = vld [vmem:[#allocation2 + $0x150] sm:$0xff]  ;;  %v6366_v2 = vunpack.c.l.b16 %v6185_v43  ;;  %v11279_v43 = vld [vmem:[%s15760_s3 + $0x98] sm:$0xff] }
 0x2d2   :  { %v13246_v38 = vpop.f32.mrf.mxu1  ;;  %v5639_v11 = vpack.c.b16 %v5586_v54, %v5585_v15  ;;  %v6188_v54 = vrot.slane %v4721_v62, 5  ;;  %3901 = vmatpush.bf16.msrb.mxu3 %v11279_v43  ;;  %v5066_v12 = vrot.slane %v5064_v57, 5 }
 0x2d3   :  { %15858 = vst [vmem:[#allocation67_spill] sm:$0xff] %v13246_v38  ;;  %v11081_v38 = vrot.slane %v8602_v7, 9  ;;  %v5050_v52 = vrot.slane %v5048_v27, 5  ;;  %v5061_v7 = vor.u32 %v5060_v16, %v13259_v51  ;;  %v8766_v22 = vsel %vm12456_vm14, %v8764_v30, %v8765_v17  ;;  %v4722_v30 = vld [vmem:[#allocation2 + $0xa4] sm:$0x1] }
 0x2d4   :  { %v6418_v15 = vpack.c.b16 %v6366_v2, %v6365_v14  ;;  %v6191_v43 = vrot.slane %v4722_v30, 5 }
 0x2d5   :  { %v8763_v0 = vsel %vm12456_vm14, %v11081_v38, %v8762_v56  ;;  %v8977_v38 = vunpack.c.l.b16 %v8766_v22  ;;  %v5051_v16 = vor.u32 %v5050_v52, %v5047_v46  ;;  %v5062_v56 = vrot.slane %v5061_v7, 4  ;;  %v4720_v46 = vld [vmem:[#allocation2 + $0x9c] sm:$0xf] }
 0x2d6   :  { %v13257_v10 = vpop.f32.mrf.mxu3  ;;  %v13261_v49 = vpop.f32.mrf.mxu0  ;;  %v8976_v35 = vunpack.c.l.b16 %v8763_v0  ;;  %v6190_v0 = vrot.slane %v6188_v54, 4  ;;  %v5078_v52 = vshll.u32 %v4721_v62, 16  ;;  %v5082_v7 = vshrl.u32 %v4721_v62, 16 }
 0x2d7   :  { %15860 = vst [vmem:[#allocation69_spill] sm:$0xff] %v13257_v10  ;;  %v5052_v2 = vrot.slane %v5051_v16, 4  ;;  %v5067_v14 = vsel %vm11900_vm7, %v5062_v56, %v5066_v12  ;;  %v5069_v16 = vshrl.u32 %v4720_v46, 16  ;;  %v5072_v56 = vshll.u32 %v4720_v46, 16 }
 0x2d8   :  { %15861 = vst [vmem:[#allocation70_spill] sm:$0xff] %v13261_v49  ;;  %v13269_v32 = vpop.f32.mrf.mxu2  ;;  %v13279_v49 = vpack.c.b16 %v8977_v38, %v8976_v35  ;;  %v7326_v35 = vld [vmem:[#allocation2 + $0x64] sm:$0xf]  ;;  %v8603_v38 = vld [vmem:[#allocation2 + $0x60] sm:$0xe]  ;;  %v13296_v12 = vrot.slane %v5078_v52, 5 }
 0x2d9   :  { %15863 = vst [vmem:[#allocation72_spill] sm:$0xff] %v13269_v32  ;;  %v5057_v57 = vsel %vm11900_vm7, %v5052_v2, %v13259_v51  ;;  %v7327_v32 = vld [vmem:[#allocation2 + $0x68] sm:$0x1]  ;;  %v5084_v62 = vrot.slane %v5082_v7, 4  ;;  %v5071_v7 = vrot.slane %v5069_v16, 4 }
 0x2da   :  { %v13265_v24 = vpop.f32.mrf.mxu1  ;;  %v8772_v2 = vrot.slane %v7327_v32, 5 }
 0x2db   :  { %15862 = vst [vmem:[#allocation71_spill] sm:$0xff] %v13265_v24  ;;  %3350 = vmatmul.bf16.gmra.mxu3 %v11254_v6  ;;  %v5587_v24 = vunpack.c.l.b16 %v5057_v57  ;;  %v5085_v57 = vor.u32 %v5084_v62, %v13296_v12 }
 0x2dd   :  { %5799 = vmatmul.bf16.gmra.mxu1 %v5639_v11  ;;  %v11304_v11 = vld [vmem:[#allocation2 + $0x114] sm:$0xff]  ;;  %v5086_v62 = vrot.slane %v5085_v57, 4 }
 0x2de   :  { %v13277_v27 = vpop.f32.mrf.mxu3  ;;  %6582 = vmatmul.bf16.gmra.mxu2 %v6418_v15  ;;  %v13281_v17 = vpop.f32.mrf.mxu0  ;;  %v5588_v15 = vunpack.c.l.b16 %v5067_v14 }
 0x2df   :  { %15864 = vst [vmem:[#allocation73_spill] sm:$0xff] %v13277_v27  ;;  %v11082_v27 = vrot.slane %v8603_v38, 9  ;;  %v4724_v38 = vld [vmem:[#allocation2 + $0xac] sm:$0xf] }
 0x2e0   :  { %15865 = vst [vmem:[#allocation74_spill] sm:$0xff] %v13281_v17  ;;  %v10784_v17 = vrot.slane %v5986_v5, 9 }
 0x2e1   :  { %v13285_v22 = vpop.f32.mrf.mxu2  ;;  %4559 = vmatmul.bf16.gmra.mxu0 %v11304_v11  ;;  %v8769_v11 = vrot.slane %v7326_v35, 5  ;;  %v5074_v35 = vrot.slane %v5072_v56, 5 }
 0x2e2   :  { %v13283_v6 = vpop.f32.mrf.mxu1  ;;  %15867 = vst [vmem:[#allocation76_spill] sm:$0xff] %v13285_v22  ;;  %v6192_v22 = vsel %vm12456_vm14, %v6190_v0, %v6191_v43  ;;  %v6189_v51 = vsel %vm12456_vm14, %v10784_v17, %v6188_v54  ;;  %v11255_v0 = vld [vmem:[#allocation2 + $0x15c] sm:$0xff]  ;;  %v5640_v43 = vpack.c.b16 %v5588_v15, %v5587_v24  ;;  %v11278_v24 = vld [vmem:[%s15760_s3 + $0x90] sm:$0xff]  ;;  %v5088_v17 = vshll.u32 %v4722_v30, 16  ;;  %v5987_v30 = vld [vmem:[#allocation2 + $0xa8] sm:$0xe] }
 0x2e3   :  { %15866 = vst [vmem:[#allocation75_spill] sm:$0xff] %v13283_v6  ;;  %v8771_v5 = vrot.slane %v8769_v11, 4  ;;  %v6368_v31 = vunpack.c.l.b16 %v6192_v22  ;;  %v8770_v46 = vsel %vm12456_vm14, %v11082_v27, %v8769_v11  ;;  %v6367_v32 = vunpack.c.l.b16 %v6189_v51  ;;  %3902 = vmatpush.bf16.msrb.mxu3 %v11278_v24 }
 0x2e4   :  { %v8978_v22 = vunpack.c.l.b16 %v8770_v46  ;;  %v6195_v11 = vrot.slane %v4724_v38, 5  ;;  %v5075_v56 = vor.u32 %v5074_v35, %v5071_v7  ;;  %v5090_v51 = vrot.slane %v5088_v17, 5  ;;  %v4723_v35 = vld [vmem:[#allocation2 + $0xa8] sm:$0xf] }
 0x2e5   :  { %v8773_v54 = vsel %vm12456_vm14, %v8771_v5, %v8772_v2  ;;  %v6419_v15 = vpack.c.b16 %v6368_v31, %v6367_v32  ;;  %v4725_v2 = vld [vmem:[#allocation2 + $0xb0] sm:$0x1]  ;;  %v5106_v31 = vshrl.u32 %v4724_v38, 16 }
 0x2e6   :  { %v13294_v6 = vpop.f32.mrf.mxu3  ;;  %v13298_v10 = vpop.f32.mrf.mxu0  ;;  %v8979_v27 = vunpack.c.l.b16 %v8773_v54  ;;  %v6197_v46 = vrot.slane %v6195_v11, 4  ;;  %v5102_v54 = vshll.u32 %v4724_v38, 16  ;;  %v5076_v24 = vrot.slane %v5075_v56, 4 }
 0x2e7   :  { %15868 = vst [vmem:[#allocation77_spill] sm:$0xff] %v13294_v6  ;;  %v5091_v7 = vsel %vm11900_vm7, %v5086_v62, %v5090_v51  ;;  %v6198_v57 = vrot.slane %v4725_v2, 5  ;;  %v5108_v56 = vrot.slane %v5106_v31, 4  ;;  %v5093_v62 = vshrl.u32 %v4723_v35, 16  ;;  %v11256_v31 = vld [vmem:[#allocation2 + $0x168] sm:$0xff] }
 0x2e8   :  { %15869 = vst [vmem:[#allocation78_spill] sm:$0xff] %v13298_v10  ;;  %v13316_v10 = vpack.c.b16 %v8979_v27, %v8978_v22  ;;  %v7329_v22 = vld [vmem:[#allocation2 + $0x70] sm:$0xf]  ;;  %v8604_v27 = vld [vmem:[#allocation2 + $0x6c] sm:$0xe]  ;;  %v5081_v17 = vsel %vm11900_vm7, %v5076_v24, %v13296_v12  ;;  %v5096_v51 = vshll.u32 %v4723_v35, 16 }
 0x2e9   :  { %v13306_v52 = vpop.f32.mrf.mxu2  ;;  %v6199_v38 = vsel %vm12456_vm14, %v6197_v46, %v6198_v57 }
 0x2ea   :  { %v13302_v14 = vpop.f32.mrf.mxu1  ;;  %15871 = vst [vmem:[#allocation80_spill] sm:$0xff] %v13306_v52  ;;  %v13331_v52 = vrot.slane %v5102_v54, 5 }
 0x2eb   :  { %15870 = vst [vmem:[#allocation79_spill] sm:$0xff] %v13302_v14  ;;  %3355 = vmatmul.bf16.gmra.mxu3 %v11255_v0  ;;  %v8776_v14 = vrot.slane %v7329_v22, 5  ;;  %v5095_v22 = vrot.slane %v5093_v62, 4 }
 0x2ec   :  { %v5109_v57 = vor.u32 %v5108_v56, %v13331_v52 }
 0x2ed   :  { %5804 = vmatmul.bf16.gmra.mxu1 %v5640_v43  ;;  %v11305_v43 = vld [vmem:[#allocation2 + $0x120] sm:$0xff]  ;;  %v8778_v46 = vrot.slane %v8776_v14, 4 }
 0x2ee   :  { %v13314_v16 = vpop.f32.mrf.mxu3  ;;  %6587 = vmatmul.bf16.gmra.mxu2 %v6419_v15  ;;  %v13318_v5 = vpop.f32.mrf.mxu0  ;;  %v10785_v15 = vrot.slane %v5987_v30, 9 }
 0x2ef   :  { %15872 = vst [vmem:[#allocation81_spill] sm:$0xff] %v13314_v16  ;;  %v5589_v16 = vunpack.c.l.b16 %v5081_v17  ;;  %v5098_v17 = vrot.slane %v5096_v51, 5 }
 0x2f0   :  { %15873 = vst [vmem:[#allocation82_spill] sm:$0xff] %v13318_v5  ;;  %v5590_v5 = vunpack.c.l.b16 %v5091_v7  ;;  %v6196_v12 = vsel %vm12456_vm14, %v10785_v15, %v6195_v11  ;;  %v6370_v7 = vunpack.c.l.b16 %v6199_v38 }
 0x2f1   :  { %v13322_v32 = vpop.f32.mrf.mxu2  ;;  %4564 = vmatmul.bf16.gmra.mxu0 %v11305_v43  ;;  %v11083_v43 = vrot.slane %v8604_v27, 9  ;;  %v6369_v15 = vunpack.c.l.b16 %v6196_v12 }
 0x2f2   :  { %v13320_v0 = vpop.f32.mrf.mxu1  ;;  %15875 = vst [vmem:[#allocation84_spill] sm:$0xff] %v13322_v32  ;;  %v7330_v32 = vld [vmem:[#allocation2 + $0x74] sm:$0x1]  ;;  %v5641_v35 = vpack.c.b16 %v5590_v5, %v5589_v16  ;;  %v5110_v16 = vrot.slane %v5109_v57, 4 }
 0x2f3   :  { %15874 = vst [vmem:[#allocation83_spill] sm:$0xff] %v13320_v0  ;;  %v8777_v30 = vsel %vm12456_vm14, %v11083_v43, %v8776_v14  ;;  %v8779_v54 = vrot.slane %v7330_v32, 5  ;;  %v5112_v43 = vshll.u32 %v4725_v2, 16  ;;  %v11277_v14 = vld [vmem:[%s15760_s3 + $0x88] sm:$0xff]  ;;  %v6420_v56 = vpack.c.b16 %v6370_v7, %v6369_v15  ;;  %v4728_v2 = vld [vmem:[#allocation2 + $0xbc] sm:$0x1] }
 0x2f4   :  { %v8980_v32 = vunpack.c.l.b16 %v8777_v30  ;;  %3903 = vmatpush.bf16.msrb.mxu3 %v11277_v14  ;;  %v5988_v7 = vld [vmem:[#allocation2 + $0xb4] sm:$0xe] }
 0x2f5   :  { %v8780_v11 = vsel %vm12456_vm14, %v8778_v46, %v8779_v54  ;;  %v5114_v46 = vrot.slane %v5112_v43, 5  ;;  %v4726_v15 = vld [vmem:[#allocation2 + $0xb4] sm:$0xf]  ;;  %v8605_v43 = vld [vmem:[#allocation2 + $0x78] sm:$0xe] }
 0x2f6   :  { %v13333_v0 = vpop.f32.mrf.mxu3  ;;  %v13335_v6 = vpop.f32.mrf.mxu0  ;;  %v8981_v38 = vunpack.c.l.b16 %v8780_v11 }
 0x2f7   :  { %15876 = vst [vmem:[#allocation85_spill] sm:$0xff] %v13333_v0  ;;  %v5115_v30 = vsel %vm11900_vm7, %v5110_v16, %v5114_v46  ;;  %v5117_v46 = vshrl.u32 %v4726_v15, 16 }
 0x2f8   :  { %15877 = vst [vmem:[#allocation86_spill] sm:$0xff] %v13335_v6  ;;  %v4727_v6 = vld [vmem:[#allocation2 + $0xb8] sm:$0xf]  ;;  %v13351_v62 = vpack.c.b16 %v8981_v38, %v8980_v32 }
 0x2f9   :  { %v13344_v27 = vpop.f32.mrf.mxu2  ;;  %v6202_v5 = vrot.slane %v4727_v6, 5  ;;  %v5126_v14 = vshll.u32 %v4727_v6, 16  ;;  %v5130_v32 = vshrl.u32 %v4727_v6, 16 }
 0x2fa   :  { %v13341_v24 = vpop.f32.mrf.mxu1  ;;  %15879 = vst [vmem:[#allocation88_spill] sm:$0xff] %v13344_v27  ;;  %v5099_v27 = vor.u32 %v5098_v17, %v5095_v22  ;;  %v6205_v22 = vrot.slane %v4728_v2, 5  ;;  %v7332_v17 = vld [vmem:[#allocation2 + $0x7c] sm:$0xf] }
 0x2fb   :  { %15878 = vst [vmem:[#allocation87_spill] sm:$0xff] %v13341_v24  ;;  %3360 = vmatmul.bf16.gmra.mxu3 %v11256_v31  ;;  %v11306_v31 = vld [vmem:[#allocation2 + $0x12c] sm:$0xff]  ;;  %v6204_v57 = vrot.slane %v6202_v5, 4  ;;  %v13370_v24 = vrot.slane %v5126_v14, 5  ;;  %v5132_v6 = vrot.slane %v5130_v32, 4  ;;  %v5119_v32 = vrot.slane %v5117_v46, 4 }
 0x2fc   :  { %v5100_v11 = vrot.slane %v5099_v27, 4 }
 0x2fd   :  { %5809 = vmatmul.bf16.gmra.mxu1 %v5641_v35  ;;  %v6206_v16 = vsel %vm12456_vm14, %v6204_v57, %v6205_v22 }
 0x2fe   :  { %v13353_v51 = vpop.f32.mrf.mxu3  ;;  %6592 = vmatmul.bf16.gmra.mxu2 %v6420_v56  ;;  %v13355_v12 = vpop.f32.mrf.mxu0  ;;  %v5105_v38 = vsel %vm11900_vm7, %v5100_v11, %v13331_v52  ;;  %v5592_v56 = vunpack.c.l.b16 %v5115_v30  ;;  %v6372_v14 = vunpack.c.l.b16 %v6206_v16 }
 0x2ff   :  { %15880 = vst [vmem:[#allocation89_spill] sm:$0xff] %v13353_v51  ;;  %v8783_v51 = vrot.slane %v7332_v17, 5  ;;  %v5591_v0 = vunpack.c.l.b16 %v5105_v38  ;;  %v4730_v38 = vld [vmem:[#allocation2 + $0xc4] sm:$0xf] }
 0x300   :  { %15881 = vst [vmem:[#allocation90_spill] sm:$0xff] %v13355_v12  ;;  %v10786_v12 = vrot.slane %v5988_v7, 9  ;;  %v6209_v16 = vrot.slane %v4730_v38, 5 }
 0x301   :  { %v13361_v35 = vpop.f32.mrf.mxu2  ;;  %4569 = vmatmul.bf16.gmra.mxu0 %v11306_v31  ;;  %v11084_v31 = vrot.slane %v8605_v43, 9  ;;  %v8785_v7 = vrot.slane %v8783_v51, 4  ;;  %v5642_v22 = vpack.c.b16 %v5592_v56, %v5591_v0  ;;  %v5133_v43 = vor.u32 %v5132_v6, %v13370_v24 }
 0x302   :  { %v13357_v54 = vpop.f32.mrf.mxu1  ;;  %15883 = vst [vmem:[#allocation92_spill] sm:$0xff] %v13361_v35  ;;  %v7333_v35 = vld [vmem:[#allocation2 + $0x80] sm:$0x1]  ;;  %v6203_v52 = vsel %vm12456_vm14, %v10786_v12, %v6202_v5  ;;  %v5136_v0 = vshll.u32 %v4728_v2, 16  ;;  %v11307_v2 = vld [vmem:[#allocation2 + $0x138] sm:$0xff] }
 0x303   :  { %15882 = vst [vmem:[#allocation91_spill] sm:$0xff] %v13357_v54  ;;  %v5120_v54 = vshll.u32 %v4726_v15, 16  ;;  %v8784_v30 = vsel %vm12456_vm14, %v11084_v31, %v8783_v51  ;;  %v8786_v57 = vrot.slane %v7333_v35, 5  ;;  %v11257_v15 = vld [vmem:[#allocation2 + $0x174] sm:$0xff]  ;;  %v6371_v12 = vunpack.c.l.b16 %v6203_v52  ;;  %v11276_v51 = vld [vmem:[%s15760_s3 + $0x80] sm:$0xff] }
 0x304   :  { %v8982_v35 = vunpack.c.l.b16 %v8784_v30  ;;  %3904 = vmatpush.bf16.msrb.mxu3 %v11276_v51  ;;  %v5989_v52 = vld [vmem:[#allocation2 + $0xc0] sm:$0xe]  ;;  %v11635_v30 = vld [vmem:[#allocation2 + $0x4] sm:$0xf] }
 0x305   :  { %v5122_v17 = vrot.slane %v5120_v54, 5  ;;  %v8787_v5 = vsel %vm12456_vm14, %v8785_v7, %v8786_v57  ;;  %v6421_v56 = vpack.c.b16 %v6372_v14, %v6371_v12  ;;  %v13392_v7 = vld [vmem:[#allocation2 + $0xc8] sm:$0x1]  ;;  %v6211_v14 = vrot.slane %v6209_v16, 4 }
 0x306   :  { %v13368_v27 = vpop.f32.mrf.mxu3  ;;  %v13372_v48 = vpop.f32.mrf.mxu0  ;;  %v8983_v31 = vunpack.c.l.b16 %v8787_v5  ;;  %v3482_v5 = vrot.slane %v11635_v30, 5  ;;  %v11636_v30 = vld [vmem:[#allocation2 + $0x8] sm:$0x1] }
 0x307   :  { %15884 = vst [vmem:[#allocation93_spill] sm:$0xff] %v13368_v27  ;;  %v5123_v6 = vor.u32 %v5122_v17, %v5119_v32  ;;  %v10787_v17 = vrot.slane %v5989_v52, 9 }
 0x308   :  { %15885 = vst [vmem:[#allocation94_spill] sm:$0xff] %v13372_v48  ;;  %v13388_v54 = vpack.c.b16 %v8983_v31, %v8982_v35  ;;  %v5134_v48 = vrot.slane %v5133_v43, 4  ;;  %v6212_v43 = vrot.slane %v13392_v7, 5  ;;  %v4729_v35 = vld [vmem:[#allocation2 + $0xc0] sm:$0xf]  ;;  %v5150_v31 = vshll.u32 %v4730_v38, 16 }
 0x309   :  { %v13380_v27 = vpop.f32.mrf.mxu2  ;;  %v5124_v51 = vrot.slane %v5123_v6, 4 }
 0x30a   :  { %v13378_v11 = vpop.f32.mrf.mxu1  ;;  %15887 = vst [vmem:[#allocation96_spill] sm:$0xff] %v13380_v27  ;;  %v3485_v27 = vrot.slane %v11636_v30, 5  ;;  %v6213_v52 = vsel %vm12456_vm14, %v6211_v14, %v6212_v43  ;;  %v13412_v18 = vrot.slane %v5150_v31, 5  ;;  %v11258_v14 = vld [vmem:[#allocation2 + $0x180] sm:$0xff] }
 0x30b   :  { %15886 = vst [vmem:[#allocation95_spill] sm:$0xff] %v13378_v11  ;;  %3365 = vmatmul.bf16.gmra.mxu3 %v11257_v15  ;;  %v5138_v15 = vrot.slane %v5136_v0, 5  ;;  %v7335_v0 = vld [vmem:[#allocation2 + $0x88] sm:$0xf]  ;;  %v5144_v11 = vshll.u32 %v4729_v35, 16  ;;  %v6374_v29 = vunpack.c.l.b16 %v6213_v52 }
 0x30c   :  { %15888 = vst [vmem:[#allocation97_spill] sm:$0xff] %v13388_v54  ;;  %v8790_v60 = vrot.slane %v7335_v0, 5 }
 0x30d   :  { %5814 = vmatmul.bf16.gmra.mxu1 %v5642_v22  ;;  %v5139_v32 = vsel %vm11900_vm7, %v5134_v48, %v5138_v15  ;;  %v6210_v48 = vsel %vm12456_vm14, %v10787_v17, %v6209_v16  ;;  %v7336_v15 = vld [vmem:[#allocation2 + $0x8c] sm:$0x1]  ;;  %v5146_v31 = vrot.slane %v5144_v11, 5 }
 0x30e   :  { %v13390_v46 = vpop.f32.mrf.mxu3  ;;  %6597 = vmatmul.bf16.gmra.mxu2 %v6421_v56  ;;  %v13394_v57 = vpop.f32.mrf.mxu0  ;;  %v5154_v56 = vshrl.u32 %v4730_v38, 16  ;;  %v5594_v6 = vunpack.c.l.b16 %v5139_v32  ;;  %v5141_v38 = vshrl.u32 %v4729_v35, 16  ;;  %v8792_v16 = vrot.slane %v8790_v60, 4  ;;  %v3381_v35 = vld [vmem:[#allocation2] sm:$0xe] }
 0x30f   :  { %15889 = vst [vmem:[#allocation98_spill] sm:$0xff] %v13390_v46  ;;  %v8793_v32 = vrot.slane %v7336_v15, 5  ;;  %v4733_v15 = vld [vmem:[#allocation2 + $0xe8] sm:$0xf] }
 0x310   :  { %15890 = vst [vmem:[#allocation99_spill] sm:$0xff] %v13394_v57  ;;  %v8606_v57 = vld [vmem:[#allocation2 + $0x84] sm:$0xe]  ;;  %v5156_v37 = vrot.slane %v5154_v56, 4  ;;  %v10468_v56 = vrot.slane %v3381_v35, 9 }
 0x311   :  { %v13398_v12 = vpop.f32.mrf.mxu2  ;;  %4574 = vmatmul.bf16.gmra.mxu0 %v11307_v2  ;;  %v11085_v46 = vrot.slane %v8606_v57, 9  ;;  %v8794_v0 = vsel %vm12456_vm14, %v8792_v16, %v8793_v32  ;;  %v11308_v35 = vld [vmem:[#allocation2 + $0x144] sm:$0xff] }
 0x312   :  { %v13396_v22 = vpop.f32.mrf.mxu1  ;;  %15892 = vst [vmem:[#allocation101_spill] sm:$0xff] %v13398_v12  ;;  %v3484_v12 = vrot.slane %v3482_v5, 4  ;;  %v3483_v52 = vsel %vm12456_vm14, %v10468_v56, %v3482_v5 }
 0x313   :  { %15891 = vst [vmem:[#allocation100_spill] sm:$0xff] %v13396_v22  ;;  %v5129_v22 = vsel %vm11900_vm7, %v5124_v51, %v13370_v24  ;;  %v8791_v51 = vsel %vm12456_vm14, %v11085_v46, %v8790_v60  ;;  %v5157_v60 = vor.u32 %v5156_v37, %v13412_v18  ;;  %v6216_v37 = vrot.slane %v4733_v15, 5 }
 0x314   :  { %v5593_v30 = vunpack.c.l.b16 %v5129_v22  ;;  %v3486_v57 = vsel %vm12456_vm14, %v3484_v12, %v3485_v27  ;;  %v5143_v22 = vrot.slane %v5141_v38, 4  ;;  %v11379_v27 = vld [vmem:[%s15760_s3 + $0x1b8] sm:$0xff]  ;;  %v5160_v12 = vshll.u32 %v13392_v7, 16  ;;  %v5990_v7 = vld [vmem:[#allocation2 + $0xe4] sm:$0xe] }
 0x315   :  { %v3721_v38 = vunpack.c.l.b16 %v3483_v52  ;;  %7074 = vmatpush.bf16.msra.mxu3 %v11379_v27  ;;  %v5158_v32 = vrot.slane %v5157_v60, 4  ;;  %v4732_v60 = vld [vmem:[#allocation2 + $0xe4] sm:$0xf] }
 0x316   :  { %v13410_v2 = vpop.f32.mrf.mxu3  ;;  %v13414_v24 = vpop.f32.mrf.mxu0  ;;  %v5643_v43 = vpack.c.b16 %v5594_v6, %v5593_v30  ;;  %v8984_v6 = vunpack.c.l.b16 %v8791_v51  ;;  %v5147_v51 = vor.u32 %v5146_v31, %v5143_v22  ;;  %v11395_v22 = vld [vmem:[%s15760_s3 + $0x238] sm:$0xff] }
 0x317   :  { %15893 = vst [vmem:[#allocation102_spill] sm:$0xff] %v13410_v2  ;;  %v6373_v2 = vunpack.c.l.b16 %v6210_v48  ;;  %v8985_v48 = vunpack.c.l.b16 %v8794_v0  ;;  %9142 = vmatpush.bf16.msra.mxu1 %v11395_v22  ;;  %v11259_v22 = vld [vmem:[#allocation2 + $0x18c] sm:$0xff] }
 0x318   :  { %15894 = vst [vmem:[#allocation103_spill] sm:$0xff] %v13414_v24  ;;  %v3722_v24 = vunpack.c.l.b16 %v3486_v57  ;;  %v6218_v57 = vrot.slane %v6216_v37, 4  ;;  %v5148_v56 = vrot.slane %v5147_v51, 4 }
 0x319   :  { %v13424_v46 = vpop.f32.mrf.mxu2  ;;  %v6422_v11 = vpack.c.b16 %v6374_v29, %v6373_v2  ;;  %v13433_v30 = vpack.c.b16 %v8985_v48, %v8984_v6  ;;  %v5162_v29 = vrot.slane %v5160_v12, 5  ;;  %v4734_v2 = vld [vmem:[#allocation2 + $0xec] sm:$0x1]  ;;  %v5174_v6 = vshll.u32 %v4733_v15, 16 }
 0x31a   :  { %v13418_v17 = vpop.f32.mrf.mxu1  ;;  %15896 = vst [vmem:[#allocation105_spill] sm:$0xff] %v13424_v46  ;;  %v5178_v48 = vshrl.u32 %v4733_v15, 16  ;;  %v6219_v31 = vrot.slane %v4734_v2, 5  ;;  %v5153_v27 = vsel %vm11900_vm7, %v5148_v56, %v13412_v18 }
 0x31b   :  { %15895 = vst [vmem:[#allocation104_spill] sm:$0xff] %v13418_v17  ;;  %3370 = vmatmul.bf16.gmra.mxu3 %v11258_v14  ;;  %v13437_v14 = vpack.c.b16 %v3722_v24, %v3721_v38  ;;  %v5163_v0 = vsel %vm11900_vm7, %v5158_v32, %v5162_v29  ;;  %v11387_v24 = vld [vmem:[%s15760_s3 + $0x1f8] sm:$0xff]  ;;  %v10788_v38 = vrot.slane %v5990_v7, 9  ;;  %v5165_v32 = vshrl.u32 %v4732_v60, 16  ;;  %v8607_v7 = vld [vmem:[#allocation2 + $0x90] sm:$0xe] }
 0x31c   :  { %15897 = vst [vmem:[#allocation106_spill] sm:$0xff] %v13433_v30  ;;  %8364 = vmatpush.bf16.msra.mxu0 %v11387_v24  ;;  %v5596_v12 = vunpack.c.l.b16 %v5163_v0  ;;  %v6220_v51 = vsel %vm12456_vm14, %v6218_v57, %v6219_v31  ;;  %v5176_v29 = vrot.slane %v5174_v6, 5  ;;  %v4736_v6 = vld [vmem:[#allocation2 + $0xf4] sm:$0xf] }
 0x31d   :  { %5819 = vmatmul.bf16.gmra.mxu1 %v5643_v43  ;;  %v6217_v18 = vsel %vm12456_vm14, %v10788_v38, %v6216_v37  ;;  %v5167_v57 = vrot.slane %v5165_v32, 4 }
 0x31e   :  { %v13435_v16 = vpop.f32.mrf.mxu3  ;;  %6602 = vmatmul.bf16.gmra.mxu2 %v6422_v11  ;;  %v13439_v5 = vpop.f32.mrf.mxu0  ;;  %v7338_v11 = vld [vmem:[#allocation2 + $0x94] sm:$0xf]  ;;  %v6375_v17 = vunpack.c.l.b16 %v6217_v18  ;;  %v5991_v18 = vld [vmem:[#allocation2 + $0xf0] sm:$0xe] }
 0x31f   :  { %15898 = vst [vmem:[#allocation107_spill] sm:$0xff] %v13435_v16  ;;  %v8797_v56 = vrot.slane %v7338_v11, 5  ;;  %v11086_v16 = vrot.slane %v8607_v7, 9  ;;  %v6223_v11 = vrot.slane %v4736_v6, 5  ;;  %v4735_v7 = vld [vmem:[#allocation2 + $0xf0] sm:$0xf] }
 0x320   :  { %15899 = vst [vmem:[#allocation108_spill] sm:$0xff] %v13439_v5  ;;  %v5180_v5 = vrot.slane %v5178_v48, 4  ;;  %v7339_v48 = vld [vmem:[#allocation2 + $0x98] sm:$0x1] }
 0x321   :  { %4579 = vmatmul.bf16.gmra.mxu0 %v11308_v35  ;;  %v13451_v52 = vpop.f32.mrf.mxu2  ;;  %v5168_v35 = vshll.u32 %v4732_v60, 16  ;;  %v8800_v38 = vrot.slane %v7339_v48, 5  ;;  %v5198_v48 = vshll.u32 %v4736_v6, 16 }
 0x322   :  { %v13441_v43 = vpop.f32.mrf.mxu1  ;;  %15901 = vst [vmem:[#allocation110_spill] sm:$0xff] %v13451_v52  ;;  %v5595_v52 = vunpack.c.l.b16 %v5153_v27  ;;  %v5181_v60 = vor.u32 %v5180_v5, %v5176_v29 }
 0x323   :  { %15900 = vst [vmem:[#allocation109_spill] sm:$0xff] %v13441_v43  ;;  %v6376_v43 = vunpack.c.l.b16 %v6220_v51  ;;  %v5170_v31 = vrot.slane %v5168_v35, 5  ;;  %v8798_v51 = vsel %vm12456_vm14, %v11086_v16, %v8797_v56  ;;  %v4737_v35 = vld [vmem:[#allocation2 + $0xf8] sm:$0x1] }
 0x324   :  { %v5644_v0 = vpack.c.b16 %v5596_v12, %v5595_v52  ;;  %v5182_v12 = vrot.slane %v5181_v60, 4 }
 0x325   :  { %v6423_v27 = vpack.c.b16 %v6376_v43, %v6375_v17  ;;  %v5171_v52 = vor.u32 %v5170_v31, %v5167_v57  ;;  %v11309_v43 = vld [vmem:[#allocation2 + $0x150] sm:$0xff]  ;;  %v5202_v57 = vshrl.u32 %v4736_v6, 16  ;;  %v8986_v31 = vunpack.c.l.b16 %v8798_v51 }
 0x326   :  { %v13456_v15 = vpop.f32.mrf.mxu3  ;;  %v13460_v46 = vpop.f32.mrf.mxu0 }
 0x327   :  { %15902 = vst [vmem:[#allocation111_spill] sm:$0xff] %v13456_v15  ;;  %v5184_v15 = vshll.u32 %v4734_v2, 16  ;;  %v5172_v60 = vrot.slane %v5171_v52, 4  ;;  %v13488_v52 = vrot.slane %v5198_v48, 5  ;;  %v5204_v51 = vrot.slane %v5202_v57, 4 }
 0x328   :  { %15903 = vst [vmem:[#allocation112_spill] sm:$0xff] %v13460_v46  ;;  %v8799_v46 = vrot.slane %v8797_v56, 4  ;;  %v6226_v56 = vrot.slane %v4737_v35, 5  ;;  %v8608_v48 = vld [vmem:[#allocation2 + $0x9c] sm:$0xe] }
 0x329   :  { %v5186_v2 = vrot.slane %v5184_v15, 5  ;;  %v10789_v15 = vrot.slane %v5991_v18, 9  ;;  %v5205_v57 = vor.u32 %v5204_v51, %v13488_v52 }
 0x32a   :  { %v13464_v24 = vpop.f32.mrf.mxu1  ;;  %v8801_v32 = vsel %vm12456_vm14, %v8799_v46, %v8800_v38  ;;  %v5177_v46 = vsel %vm11900_vm7, %v5172_v60, %v5176_v29  ;;  %v5189_v38 = vshrl.u32 %v4735_v7, 16  ;;  %v11637_v60 = vld [vmem:[#allocation2 + $0x10] sm:$0xf] }
 0x32b   :  { %15904 = vst [vmem:[#allocation113_spill] sm:$0xff] %v13464_v24  ;;  %3375 = vmatmul.bf16.gmra.mxu3 %v11259_v22  ;;  %v13468_v24 = vpop.f32.mrf.mxu2  ;;  %v8987_v22 = vunpack.c.l.b16 %v8801_v32  ;;  %v5187_v16 = vsel %vm11900_vm7, %v5182_v12, %v5186_v2  ;;  %v7341_v32 = vld [vmem:[#allocation2 + $0xa0] sm:$0xf]  ;;  %v7342_v12 = vld [vmem:[#allocation2 + $0xa4] sm:$0x1]  ;;  %v5597_v2 = vunpack.c.l.b16 %v5177_v46  ;;  %v6224_v29 = vsel %vm12456_vm14, %v10789_v15, %v6223_v11 }
 0x32c   :  { %15906 = vst [vmem:[#allocation115_spill] sm:$0xff] %v13468_v24  ;;  %v8804_v18 = vrot.slane %v7341_v32, 5  ;;  %v6377_v46 = vunpack.c.l.b16 %v6224_v29  ;;  %v5208_v15 = vshll.u32 %v4737_v35, 16  ;;  %v11087_v32 = vrot.slane %v8608_v48, 9 }
 0x32d   :  { %5824 = vmatmul.bf16.gmra.mxu1 %v5644_v0  ;;  %v6225_v0 = vrot.slane %v6223_v11, 4  ;;  %v4739_v11 = vld [vmem:[#allocation2 + $0x100] sm:$0xf] }
 0x32e   :  { %v13466_v37 = vpop.f32.mrf.mxu3  ;;  %6607 = vmatmul.bf16.gmra.mxu2 %v6423_v27  ;;  %v13472_v5 = vpop.f32.mrf.mxu0  ;;  %v13480_v27 = vpack.c.b16 %v8987_v22, %v8986_v31  ;;  %v6230_v51 = vrot.slane %v4739_v11, 5  ;;  %v5210_v48 = vrot.slane %v5208_v15, 5 }
 0x32f   :  { %15905 = vst [vmem:[#allocation114_spill] sm:$0xff] %v13466_v37  ;;  %v6227_v6 = vsel %vm12456_vm14, %v6225_v0, %v6226_v56  ;;  %v8806_v37 = vrot.slane %v8804_v18, 4 }
 0x330   :  { %15907 = vst [vmem:[#allocation116_spill] sm:$0xff] %v13472_v5  ;;  %v5192_v5 = vshll.u32 %v4735_v7, 16  ;;  %v6378_v31 = vunpack.c.l.b16 %v6227_v6 }
 0x331   :  { %4584 = vmatmul.bf16.gmra.mxu0 %v11309_v43  ;;  %15909 = vst [vmem:[#allocation118_spill] sm:$0xff] %v13480_v27 }
 0x332   :  { %v13476_v17 = vpop.f32.mrf.mxu1  ;;  %v5194_v0 = vrot.slane %v5192_v5, 5 }
 0x333   :  { %15908 = vst [vmem:[#allocation117_spill] sm:$0xff] %v13476_v17  ;;  %v5598_v17 = vunpack.c.l.b16 %v5187_v16  ;;  %v13494_v22 = vpop.f32.mrf.mxu2  ;;  %v3489_v16 = vrot.slane %v11637_v60, 5  ;;  %v3382_v60 = vld [vmem:[#allocation2 + $0xc] sm:$0xe] }
 0x334   :  { %15912 = vst [vmem:[#allocation121_spill] sm:$0xff] %v13494_v22  ;;  %v6424_v22 = vpack.c.b16 %v6378_v31, %v6377_v46  ;;  %v10469_v35 = vrot.slane %v3382_v60, 9 }
 0x335   :  { %v5645_v56 = vpack.c.b16 %v5598_v17, %v5597_v2  ;;  %v5206_v17 = vrot.slane %v5205_v57, 4  ;;  %v5992_v57 = vld [vmem:[#allocation2 + $0xfc] sm:$0xe] }
 0x336   :  { %v13484_v24 = vpop.f32.mrf.mxu3  ;;  %v13490_v43 = vpop.f32.mrf.mxu0 }
 0x337   :  { %15910 = vst [vmem:[#allocation119_spill] sm:$0xff] %v13484_v24  ;;  %v5191_v24 = vrot.slane %v5189_v38, 4  ;;  %v3491_v38 = vrot.slane %v3489_v16, 4 }
 0x338   :  { %15911 = vst [vmem:[#allocation120_spill] sm:$0xff] %v13490_v43  ;;  %v8807_v43 = vrot.slane %v7342_v12, 5  ;;  %v8805_v12 = vsel %vm12456_vm14, %v11087_v32, %v8804_v18  ;;  %v5211_v18 = vsel %vm11900_vm7, %v5206_v17, %v5210_v48  ;;  %v4738_v32 = vld [vmem:[#allocation2 + $0xfc] sm:$0xf]  ;;  %v10790_v17 = vrot.slane %v5992_v57, 9 }
 0x339   :  { %v5195_v5 = vor.u32 %v5194_v0, %v5191_v24  ;;  %v4740_v0 = vld [vmem:[#allocation2 + $0x104] sm:$0x1]  ;;  %v8988_v46 = vunpack.c.l.b16 %v8805_v12  ;;  %v5213_v48 = vshrl.u32 %v4738_v32, 16 }
 0x33a   :  { %v13496_v7 = vpop.f32.mrf.mxu1  ;;  %v8808_v6 = vsel %vm12456_vm14, %v8806_v37, %v8807_v43  ;;  %v11310_v43 = vld [vmem:[#allocation2 + $0x15c] sm:$0xff] }
 0x33b   :  { %15913 = vst [vmem:[#allocation122_spill] sm:$0xff] %v13496_v7  ;;  %3905 = vmatmul.bf16.vlgmr.msrb.gmra.mxu3 %v13437_v14  ;;  %v11638_v14 = vld [vmem:[#allocation2 + $0x14] sm:$0x1]  ;;  %v5196_v31 = vrot.slane %v5195_v5, 4  ;;  %v13514_v60 = vpop.f32.mrf.mxu2  ;;  %v6233_v5 = vrot.slane %v4740_v0, 5 }
 0x33c   :  { %v3492_v2 = vrot.slane %v11638_v14, 5  ;;  %v5222_v14 = vshll.u32 %v4739_v11, 16  ;;  %15917 = vst [vmem:[#allocation126_spill] sm:$0xff] %v13514_v60  ;;  %v7345_v60 = vld [vmem:[#allocation2 + $0xb0] sm:$0x1] }
 0x33d   :  { %5829 = vmatmul.bf16.gmra.mxu1 %v5645_v56  ;;  %v8989_v56 = vunpack.c.l.b16 %v8808_v6  ;;  %v3490_v6 = vsel %vm12456_vm14, %v10469_v35, %v3489_v16 }
 0x33e   :  { %v13502_v7 = vpop.f32.mrf.mxu3  ;;  %6612 = vmatmul.bf16.gmra.mxu2 %v6424_v22  ;;  %v13506_v29 = vpop.f32.mrf.mxu0  ;;  %v3493_v24 = vsel %vm12456_vm14, %v3491_v38, %v3492_v2  ;;  %v6232_v22 = vrot.slane %v6230_v51, 4  ;;  %v5201_v38 = vsel %vm11900_vm7, %v5196_v31, %v13488_v52  ;;  %v5600_v2 = vunpack.c.l.b16 %v5211_v18 }
 0x33f   :  { %15914 = vst [vmem:[#allocation123_spill] sm:$0xff] %v13502_v7  ;;  %v13516_v15 = vpack.c.b16 %v8989_v56, %v8988_v46  ;;  %v3724_v12 = vunpack.c.l.b16 %v3493_v24  ;;  %v5216_v56 = vshll.u32 %v4738_v32, 16  ;;  %v3723_v16 = vunpack.c.l.b16 %v3490_v6  ;;  %v11639_v24 = vld [vmem:[#allocation2 + $0x1c] sm:$0xf] }
 0x340   :  { %15915 = vst [vmem:[#allocation124_spill] sm:$0xff] %v13506_v29  ;;  %v5226_v29 = vshrl.u32 %v4739_v11, 16  ;;  %v6234_v11 = vsel %vm12456_vm14, %v6232_v22, %v6233_v5  ;;  %v5599_v35 = vunpack.c.l.b16 %v5201_v38  ;;  %v6231_v52 = vsel %vm12456_vm14, %v10790_v17, %v6230_v51 }
 0x341   :  { %4589 = vmatmul.bf16.gmra.mxu0 %v11310_v43  ;;  %15918 = vst [vmem:[#allocation127_spill] sm:$0xff] %v13516_v15  ;;  %v13527_v43 = vrot.slane %v5222_v14, 5  ;;  %v3496_v31 = vrot.slane %v11639_v24, 5  ;;  %v6380_v22 = vunpack.c.l.b16 %v6234_v11  ;;  %v5215_v32 = vrot.slane %v5213_v48, 4  ;;  %v8609_v14 = vld [vmem:[#allocation2 + $0xa8] sm:$0xe] }
 0x342   :  { %v13508_v37 = vpop.f32.mrf.mxu1  ;;  %v5228_v46 = vrot.slane %v5226_v29, 4  ;;  %v5646_v15 = vpack.c.b16 %v5600_v2, %v5599_v35  ;;  %v5218_v5 = vrot.slane %v5216_v56, 5  ;;  %v8814_v38 = vrot.slane %v7345_v60, 5  ;;  %v3383_v11 = vld [vmem:[#allocation2 + $0x18] sm:$0xe] }
 0x343   :  { %15916 = vst [vmem:[#allocation125_spill] sm:$0xff] %v13508_v37  ;;  %v7344_v37 = vld [vmem:[#allocation2 + $0xac] sm:$0xf]  ;;  %v5232_v51 = vshll.u32 %v4740_v0, 16  ;;  %v11088_v17 = vrot.slane %v8609_v14, 9  ;;  %v13538_v24 = vpop.f32.mrf.mxu2  ;;  %v3498_v2 = vrot.slane %v3496_v31, 4 }
 0x344   :  { %v8811_v57 = vrot.slane %v7344_v37, 5  ;;  %v5229_v29 = vor.u32 %v5228_v46, %v13527_v43  ;;  %15922 = vst [vmem:[#allocation131_spill] sm:$0xff] %v13538_v24  ;;  %v5219_v56 = vor.u32 %v5218_v5, %v5215_v32  ;;  %v11640_v0 = vld [vmem:[#allocation2 + $0x20] sm:$0x1]  ;;  %v11311_v14 = vld [vmem:[#allocation2 + $0x168] sm:$0xff] }
 0x345   :  { %v5234_v35 = vrot.slane %v5232_v51, 5  ;;  %v5246_v51 = vshll.u32 %v4742_v50, 16 }
 0x346   :  { %v13523_v7 = vpop.f32.mrf.mxu3  ;;  %v13529_v47 = vpop.f32.mrf.mxu0  ;;  %v8813_v6 = vrot.slane %v8811_v57, 4  ;;  %v5230_v46 = vrot.slane %v5229_v29, 4  ;;  %v5220_v5 = vrot.slane %v5219_v56, 4 }
 0x347   :  { %15919 = vst [vmem:[#allocation128_spill] sm:$0xff] %v13523_v7  ;;  %v3786_v7 = vpack.c.b16 %v3724_v12, %v3723_v16  ;;  %v6237_v16 = vrot.slane %v4742_v50, 5 }
 0x348   :  { %15920 = vst [vmem:[#allocation129_spill] sm:$0xff] %v13529_v47  ;;  %v6379_v47 = vunpack.c.l.b16 %v6231_v52  ;;  %v8815_v37 = vsel %vm12456_vm14, %v8813_v6, %v8814_v38 }
 0x349   :  { %v8991_v38 = vunpack.c.l.b16 %v8815_v37  ;;  %v6239_v29 = vrot.slane %v6237_v16, 4  ;;  %v5225_v37 = vsel %vm11900_vm7, %v5220_v5, %v13527_v43  ;;  %v7348_v5 = vld [vmem:[#allocation2 + $0xbc] sm:$0x1] }
 0x34a   :  { %v13533_v18 = vpop.f32.mrf.mxu1  ;;  %v6425_v12 = vpack.c.b16 %v6380_v22, %v6379_v47  ;;  %v10470_v47 = vrot.slane %v3383_v11, 9  ;;  %v13548_v22 = vld [vmem:[#allocation2 + $0x110] sm:$0x1] }
 0x34b   :  { %15921 = vst [vmem:[#allocation130_spill] sm:$0xff] %v13533_v18  ;;  %3910 = vmatmul.bf16.gmra.mxu3 %v3786_v7  ;;  %v8812_v7 = vsel %vm12456_vm14, %v11088_v17, %v8811_v57  ;;  %v5235_v57 = vsel %vm11900_vm7, %v5230_v46, %v5234_v35  ;;  %v5993_v17 = vld [vmem:[#allocation2 + $0x108] sm:$0xe]  ;;  %v7347_v46 = vld [vmem:[#allocation2 + $0xb8] sm:$0xf] }
 0x34c   :  { %v8990_v6 = vunpack.c.l.b16 %v8812_v7  ;;  %v3497_v11 = vsel %vm12456_vm14, %v10470_v47, %v3496_v31  ;;  %v5602_v7 = vunpack.c.l.b16 %v5235_v57  ;;  %v10791_v35 = vrot.slane %v5993_v17, 9 }
 0x34d   :  { %5834 = vmatmul.bf16.gmra.mxu1 %v5646_v15  ;;  %v3499_v15 = vrot.slane %v11640_v0, 5  ;;  %v5250_v0 = vshrl.u32 %v4742_v50, 16  ;;  %v3725_v31 = vunpack.c.l.b16 %v3497_v11  ;;  %v5601_v47 = vunpack.c.l.b16 %v5225_v37 }
 0x34e   :  { %v13540_v48 = vpop.f32.mrf.mxu3  ;;  %6617 = vmatmul.bf16.gmra.mxu2 %v6425_v12  ;;  %v13544_v60 = vpop.f32.mrf.mxu0  ;;  %v4741_v12 = vld [vmem:[#allocation2 + $0x108] sm:$0xf]  ;;  %v8818_v57 = vrot.slane %v7347_v46, 5 }
 0x34f   :  { %15923 = vst [vmem:[#allocation132_spill] sm:$0xff] %v13540_v48  ;;  %v3500_v32 = vsel %vm12456_vm14, %v3498_v2, %v3499_v15  ;;  %v6240_v2 = vrot.slane %v13548_v22, 5  ;;  %v5252_v43 = vrot.slane %v5250_v0, 4  ;;  %v8821_v48 = vrot.slane %v7348_v5, 5 }
 0x350   :  { %15924 = vst [vmem:[#allocation133_spill] sm:$0xff] %v13544_v60  ;;  %v13554_v60 = vpack.c.b16 %v8991_v38, %v8990_v6  ;;  %v3726_v56 = vunpack.c.l.b16 %v3500_v32  ;;  %v5240_v6 = vshll.u32 %v4741_v12, 16  ;;  %v13566_v38 = vpop.f32.mrf.mxu2  ;;  %v6238_v32 = vsel %vm12456_vm14, %v10791_v35, %v6237_v16  ;;  %v11378_v16 = vld [vmem:[%s15760_s3 + $0x1b0] sm:$0xff] }
 0x351   :  { %4594 = vmatmul.bf16.gmra.mxu0 %v11311_v14  ;;  %v6241_v50 = vsel %vm12456_vm14, %v6239_v29, %v6240_v2  ;;  %v5237_v14 = vshrl.u32 %v4741_v12, 16  ;;  %15928 = vst [vmem:[#allocation137_spill] sm:$0xff] %v13566_v38  ;;  %v5647_v29 = vpack.c.b16 %v5602_v7, %v5601_v47  ;;  %v11641_v12 = vld [vmem:[#allocation2 + $0x28] sm:$0xf]  ;;  %v8610_v38 = vld [vmem:[#allocation2 + $0xb4] sm:$0xe]  ;;  %v6381_v0 = vunpack.c.l.b16 %v6238_v32  ;;  %7075 = vmatpush.bf16.msra.mxu3 %v11378_v16 }
 0x352   :  { %v13546_v52 = vpop.f32.mrf.mxu1  ;;  %15926 = vst [vmem:[#allocation135_spill] sm:$0xff] %v13554_v60  ;;  %v3787_v18 = vpack.c.b16 %v3726_v56, %v3725_v31  ;;  %v6382_v2 = vunpack.c.l.b16 %v6241_v50  ;;  %v5242_v37 = vrot.slane %v5240_v6, 5  ;;  %v4745_v60 = vld [vmem:[#allocation2 + $0x118] sm:$0xf]  ;;  %v11089_v56 = vrot.slane %v8610_v38, 9 }
 0x353   :  { %15925 = vst [vmem:[#allocation134_spill] sm:$0xff] %v13546_v52  ;;  %v13568_v52 = vrot.slane %v5246_v51, 5  ;;  %v5239_v11 = vrot.slane %v5237_v14, 4  ;;  %v8820_v51 = vrot.slane %v8818_v57, 4  ;;  %v5256_v35 = vshll.u32 %v13548_v22, 16 }
 0x354   :  { %v6426_v46 = vpack.c.b16 %v6382_v2, %v6381_v0  ;;  %v6244_v6 = vrot.slane %v4745_v60, 5  ;;  %v8819_v31 = vsel %vm12456_vm14, %v11089_v56, %v8818_v57  ;;  %v3384_v47 = vld [vmem:[#allocation2 + $0x24] sm:$0xe]  ;;  %v11642_v38 = vld [vmem:[#allocation2 + $0x2c] sm:$0x1]  ;;  %v11312_v2 = vld [vmem:[#allocation2 + $0x174] sm:$0xff] }
 0x355   :  { %v8822_v7 = vsel %vm12456_vm14, %v8820_v51, %v8821_v48  ;;  %v3506_v32 = vrot.slane %v11642_v38, 5  ;;  %v10471_v51 = vrot.slane %v3384_v47, 9  ;;  %v5274_v38 = vshrl.u32 %v4745_v60, 16 }
 0x356   :  { %v13562_v15 = vpop.f32.mrf.mxu3  ;;  %v13570_v24 = vpop.f32.mrf.mxu0  ;;  %v8993_v48 = vunpack.c.l.b16 %v8822_v7  ;;  %v6246_v16 = vrot.slane %v6244_v6, 4  ;;  %v4744_v7 = vld [vmem:[#allocation2 + $0x114] sm:$0xf] }
 0x357   :  { %15927 = vst [vmem:[#allocation136_spill] sm:$0xff] %v13562_v15  ;;  %v3503_v15 = vrot.slane %v11641_v12, 5  ;;  %v5258_v12 = vrot.slane %v5256_v35, 5  ;;  %v11386_v35 = vld [vmem:[%s15760_s3 + $0x1f0] sm:$0xff] }
 0x358   :  { %15929 = vst [vmem:[#allocation138_spill] sm:$0xff] %v13570_v24  ;;  %v5253_v24 = vor.u32 %v5252_v43, %v13568_v52  ;;  %8365 = vmatpush.bf16.msra.mxu0 %v11386_v35 }
 0x359   :  { %v3505_v14 = vrot.slane %v3503_v15, 4 }
 0x35a   :  { %v13574_v17 = vpop.f32.mrf.mxu1  ;;  %v5254_v43 = vrot.slane %v5253_v24, 4  ;;  %v5994_v24 = vld [vmem:[#allocation2 + $0x114] sm:$0xe] }
 0x35b   :  { %15930 = vst [vmem:[#allocation139_spill] sm:$0xff] %v13574_v17  ;;  %3915 = vmatmul.bf16.gmra.mxu3 %v3787_v18  ;;  %v5243_v18 = vor.u32 %v5242_v37, %v5239_v11  ;;  %v13593_v11 = vld [vmem:[#allocation2 + $0x11c] sm:$0x1]  ;;  %v8992_v37 = vunpack.c.l.b16 %v8819_v31  ;;  %v3507_v57 = vsel %vm12456_vm14, %v3505_v14, %v3506_v32  ;;  %v11394_v31 = vld [vmem:[%s15760_s3 + $0x230] sm:$0xff]  ;;  %v3504_v14 = vsel %vm12456_vm14, %v10471_v51, %v3503_v15  ;;  %v8611_v17 = vld [vmem:[#allocation2 + $0xc0] sm:$0xe] }
 0x35c   :  { %v5259_v56 = vsel %vm11900_vm7, %v5254_v43, %v5258_v12  ;;  %v3728_v32 = vunpack.c.l.b16 %v3507_v57  ;;  %v10792_v43 = vrot.slane %v5994_v24, 9  ;;  %9143 = vmatpush.bf16.msra.mxu1 %v11394_v31  ;;  %v3727_v15 = vunpack.c.l.b16 %v3504_v14 }
 0x35d   :  { %5839 = vmatmul.bf16.gmra.mxu1 %v5647_v29  ;;  %v13589_v29 = vpop.f32.mrf.mxu2  ;;  %v5244_v0 = vrot.slane %v5243_v18, 4  ;;  %v13605_v47 = vpack.c.b16 %v8993_v48, %v8992_v37  ;;  %v6247_v18 = vrot.slane %v13593_v11, 5  ;;  %v5261_v37 = vshrl.u32 %v4744_v7, 16 }
 0x35e   :  { %v13583_v50 = vpop.f32.mrf.mxu3  ;;  %6622 = vmatmul.bf16.gmra.mxu2 %v6426_v46  ;;  %v13587_v5 = vpop.f32.mrf.mxu0  ;;  %15933 = vst [vmem:[#allocation142_spill] sm:$0xff] %v13589_v29  ;;  %v5270_v46 = vshll.u32 %v4745_v60, 16  ;;  %v5276_v57 = vrot.slane %v5274_v38, 4  ;;  %v7351_v29 = vld [vmem:[#allocation2 + $0xc8] sm:$0x1]  ;;  %v11090_v14 = vrot.slane %v8611_v17, 9 }
 0x35f   :  { %15931 = vst [vmem:[#allocation140_spill] sm:$0xff] %v13583_v50  ;;  %v5249_v60 = vsel %vm11900_vm7, %v5244_v0, %v13568_v52  ;;  %v6248_v48 = vsel %vm12456_vm14, %v6246_v16, %v6247_v18  ;;  %v6245_v0 = vsel %vm12456_vm14, %v10792_v43, %v6244_v6  ;;  %v11643_v16 = vld [vmem:[#allocation2 + $0x34] sm:$0xf]  ;;  %v4748_v6 = vld [vmem:[#allocation2 + $0x124] sm:$0xf] }
 0x360   :  { %15932 = vst [vmem:[#allocation141_spill] sm:$0xff] %v13587_v5  ;;  %v5604_v5 = vunpack.c.l.b16 %v5259_v56  ;;  %v13617_v51 = vrot.slane %v5270_v46, 5  ;;  %v5603_v52 = vunpack.c.l.b16 %v5249_v60  ;;  %v3788_v56 = vpack.c.b16 %v3728_v32, %v3727_v15  ;;  %v11385_v32 = vld [vmem:[%s15760_s3 + $0x1e8] sm:$0xff]  ;;  %v3385_v43 = vld [vmem:[#allocation2 + $0x30] sm:$0xe] }
 0x361   :  { %4599 = vmatmul.bf16.gmra.mxu0 %v11312_v2  ;;  %15935 = vst [vmem:[#allocation144_spill] sm:$0xff] %v13605_v47  ;;  %v7350_v2 = vld [vmem:[#allocation2 + $0xc4] sm:$0xf]  ;;  %v6384_v31 = vunpack.c.l.b16 %v6248_v48  ;;  %v3510_v18 = vrot.slane %v11643_v16, 5  ;;  %v6383_v47 = vunpack.c.l.b16 %v6245_v0  ;;  %v11644_v16 = vld [vmem:[#allocation2 + $0x38] sm:$0x1] }
 0x362   :  { %v13591_v22 = vpop.f32.mrf.mxu1  ;;  %v8825_v24 = vrot.slane %v7350_v2, 5  ;;  %v5277_v27 = vor.u32 %v5276_v57, %v13617_v51  ;;  %v5280_v2 = vshll.u32 %v13593_v11, 16  ;;  %8366 = vmatpush.bf16.msra.mxu0 %v11385_v32  ;;  %v13642_v11 = vld [vmem:[#allocation2 + $0x128] sm:$0x1] }
 0x363   :  { %15934 = vst [vmem:[#allocation143_spill] sm:$0xff] %v13591_v22  ;;  %v5264_v22 = vshll.u32 %v4744_v7, 16  ;;  %v5648_v7 = vpack.c.b16 %v5604_v5, %v5603_v52 }
 0x364   :  { %v8827_v46 = vrot.slane %v8825_v24, 4  ;;  %v8826_v5 = vsel %vm12456_vm14, %v11090_v14, %v8825_v24  ;;  %v5278_v57 = vrot.slane %v5277_v27, 4  ;;  %v10472_v24 = vrot.slane %v3385_v43, 9  ;;  %v11384_v14 = vld [vmem:[%s15760_s3 + $0x1e0] sm:$0xff] }
 0x365   :  { %v13625_v38 = vpop.f32.mrf.mxu2  ;;  %v5266_v60 = vrot.slane %v5264_v22, 5  ;;  %v3512_v22 = vrot.slane %v3510_v18, 4  ;;  %v8994_v52 = vunpack.c.l.b16 %v8826_v5  ;;  %v5298_v43 = vshrl.u32 %v4748_v6, 16 }
 0x366   :  { %v13613_v12 = vpop.f32.mrf.mxu3  ;;  %v13619_v50 = vpop.f32.mrf.mxu0  ;;  %15939 = vst [vmem:[#allocation148_spill] sm:$0xff] %v13625_v38  ;;  %v3511_v27 = vsel %vm12456_vm14, %v10472_v24, %v3510_v18  ;;  %8367 = vmatpush.bf16.msra.mxu0 %v11384_v14  ;;  %v11383_v18 = vld [vmem:[%s15760_s3 + $0x1d8] sm:$0xff] }
 0x367   :  { %15936 = vst [vmem:[#allocation145_spill] sm:$0xff] %v13613_v12  ;;  %v8828_v12 = vrot.slane %v7351_v29, 5  ;;  %v6427_v29 = vpack.c.b16 %v6384_v31, %v6383_v47  ;;  %v11313_v47 = vld [vmem:[#allocation2 + $0x180] sm:$0xff]  ;;  %v5282_v31 = vrot.slane %v5280_v2, 5  ;;  %v6254_v2 = vrot.slane %v13642_v11, 5 }
 0x368   :  { %15937 = vst [vmem:[#allocation146_spill] sm:$0xff] %v13619_v50  ;;  %v5263_v50 = vrot.slane %v5261_v37, 4  ;;  %v6251_v37 = vrot.slane %v4748_v6, 5  ;;  %v11647_v38 = vld [vmem:[#allocation2 + $0x1c] sm:$0xf] }
 0x369   :  { %v8829_v17 = vsel %vm12456_vm14, %v8827_v46, %v8828_v12  ;;  %v5283_v5 = vsel %vm11900_vm7, %v5278_v57, %v5282_v31  ;;  %v3729_v57 = vunpack.c.l.b16 %v3511_v27 }
 0x36a   :  { %v13623_v35 = vpop.f32.mrf.mxu1  ;;  %v5267_v15 = vor.u32 %v5266_v60, %v5263_v50  ;;  %v8995_v0 = vunpack.c.l.b16 %v8829_v17  ;;  %v6253_v60 = vrot.slane %v6251_v37, 4  ;;  %v5995_v17 = vld [vmem:[#allocation2 + $0x120] sm:$0xe]  ;;  %v5606_v24 = vunpack.c.l.b16 %v5283_v5  ;;  %8368 = vmatpush.bf16.msra.mxu0 %v11383_v18 }
 0x36b   :  { %15938 = vst [vmem:[#allocation147_spill] sm:$0xff] %v13623_v35  ;;  %3920 = vmatmul.bf16.gmra.mxu3 %v3788_v56  ;;  %v4750_v35 = vld [vmem:[#allocation2 + $0x12c] sm:$0xf] }
 0x36c   :  { %v13647_v46 = vpack.c.b16 %v8995_v0, %v8994_v52  ;;  %v5268_v32 = vrot.slane %v5267_v15, 4 }
 0x36d   :  { %5844 = vmatmul.bf16.gmra.mxu1 %v5648_v7  ;;  %v3513_v7 = vrot.slane %v11644_v16, 5  ;;  %v4747_v16 = vld [vmem:[#allocation2 + $0x120] sm:$0xf]  ;;  %v13659_v52 = vpop.f32.mrf.mxu2 }
 0x36e   :  { %v13636_v48 = vpop.f32.mrf.mxu3  ;;  %6627 = vmatmul.bf16.gmra.mxu2 %v6427_v29  ;;  %v13638_v56 = vpop.f32.mrf.mxu0  ;;  %15943 = vst [vmem:[#allocation152_spill] sm:$0xff] %v13647_v46  ;;  %v5294_v29 = vshll.u32 %v4748_v6, 16  ;;  %v5273_v15 = vsel %vm11900_vm7, %v5268_v32, %v13617_v51  ;;  %v10793_v6 = vrot.slane %v5995_v17, 9  ;;  %v5288_v31 = vshll.u32 %v4747_v16, 16  ;;  %v11645_v17 = vld [vmem:[#allocation2 + $0x40] sm:$0xf] }
 0x36f   :  { %15940 = vst [vmem:[#allocation149_spill] sm:$0xff] %v13636_v48  ;;  %v3514_v50 = vsel %vm12456_vm14, %v3512_v22, %v3513_v7  ;;  %v6255_v7 = vsel %vm12456_vm14, %v6253_v60, %v6254_v2  ;;  %v11382_v60 = vld [vmem:[%s15760_s3 + $0x1d0] sm:$0xff] }
 0x370   :  { %15941 = vst [vmem:[#allocation150_spill] sm:$0xff] %v13638_v56  ;;  %v3730_v22 = vunpack.c.l.b16 %v3514_v50  ;;  %v13668_v14 = vrot.slane %v5294_v29, 5  ;;  %v5300_v56 = vrot.slane %v5298_v43, 4  ;;  %v5605_v50 = vunpack.c.l.b16 %v5273_v15  ;;  %8369 = vmatpush.bf16.msra.mxu0 %v11382_v60  ;;  %v11646_v60 = vld [vmem:[#allocation2 + $0x44] sm:$0x1] }
 0x371   :  { %4604 = vmatmul.bf16.gmra.mxu0 %v11313_v47  ;;  %15944 = vst [vmem:[#allocation153_spill] sm:$0xff] %v13659_v52  ;;  %v5285_v47 = vshrl.u32 %v4747_v16, 16  ;;  %v6252_v52 = vsel %vm12456_vm14, %v10793_v6, %v6251_v37  ;;  %v6386_v32 = vunpack.c.l.b16 %v6255_v7  ;;  %v3517_v29 = vrot.slane %v11645_v17, 5  ;;  %v11381_v37 = vld [vmem:[%s15760_s3 + $0x1c8] sm:$0xff] }
 0x372   :  { %v13640_v12 = vpop.f32.mrf.mxu1  ;;  %v3789_v27 = vpack.c.b16 %v3730_v22, %v3729_v57  ;;  %v5649_v5 = vpack.c.b16 %v5606_v24, %v5605_v50  ;;  %v6385_v43 = vunpack.c.l.b16 %v6252_v52  ;;  %v5290_v16 = vrot.slane %v5288_v31, 5  ;;  %v3386_v22 = vld [vmem:[#allocation2 + $0x3c] sm:$0xe]  ;;  %v7307_v24 = vld [vmem:[#allocation2 + $0x18] sm:$0xf] }
 0x373   :  { %15942 = vst [vmem:[#allocation151_spill] sm:$0xff] %v13640_v12  ;;  %v5287_v2 = vrot.slane %v5285_v47, 4  ;;  %v5301_v15 = vor.u32 %v5300_v56, %v13668_v14  ;;  %v5304_v57 = vshll.u32 %v13642_v11, 16  ;;  %v3519_v7 = vrot.slane %v3517_v29, 4  ;;  %v11314_v11 = vld [vmem:[#allocation2 + $0x18c] sm:$0xff] }
 0x374   :  { %v6428_v18 = vpack.c.b16 %v6386_v32, %v6385_v43  ;;  %8370 = vmatpush.bf16.msra.mxu0 %v11381_v37  ;;  %v7404_v32 = vshrl.u32 %v7307_v24, 16 }
 0x375   :  { %v13686_v47 = vpop.f32.mrf.mxu2  ;;  %v5291_v56 = vor.u32 %v5290_v16, %v5287_v2  ;;  %v5302_v31 = vrot.slane %v5301_v15, 4  ;;  %v5306_v43 = vrot.slane %v5304_v57, 5  ;;  %v5996_v57 = vld [vmem:[#allocation2 + $0x12c] sm:$0xe] }
 0x376   :  { %v13664_v0 = vpop.f32.mrf.mxu3  ;;  %v13670_v12 = vpop.f32.mrf.mxu0  ;;  %15949 = vst [vmem:[#allocation158_spill] sm:$0xff] %v13686_v47  ;;  %v11380_v47 = vld [vmem:[%s15760_s3 + $0x1c0] sm:$0xff] }
 0x377   :  { %15945 = vst [vmem:[#allocation154_spill] sm:$0xff] %v13664_v0  ;;  %v5292_v37 = vrot.slane %v5291_v56, 4  ;;  %v7417_v56 = vshrl.u32 %v11647_v38, 16  ;;  %v5309_v0 = vshrl.u32 %v4750_v35, 16 }
 0x378   :  { %15946 = vst [vmem:[#allocation155_spill] sm:$0xff] %v13670_v12  ;;  %v4751_v12 = vld [vmem:[#allocation2 + $0x130] sm:$0xf]  ;;  %8371 = vmatpush.bf16.msra.mxu0 %v11380_v47  ;;  %v5312_v47 = vshll.u32 %v4750_v35, 16  ;;  %v7310_v35 = vld [vmem:[#allocation2 + $0x24] sm:$0xf] }
 0x379   :  { %v6258_v52 = vrot.slane %v4751_v12, 5 }
 0x37a   :  { %v13674_v51 = vpop.f32.mrf.mxu1 }
 0x37b   :  { %15947 = vst [vmem:[#allocation156_spill] sm:$0xff] %v13674_v51  ;;  %3925 = vmatmul.bf16.gmra.mxu3 %v3789_v27  ;;  %v10473_v27 = vrot.slane %v3386_v22, 9  ;;  %v13692_v51 = vld [vmem:[#allocation2 + $0x134] sm:$0x1]  ;;  %v6260_v15 = vrot.slane %v6258_v52, 4  ;;  %v5307_v22 = vsel %vm11900_vm7, %v5302_v31, %v5306_v43  ;;  %v10794_v43 = vrot.slane %v5996_v57, 9 }
 0x37d   :  { %5849 = vmatmul.bf16.gmra.mxu1 %v5649_v5  ;;  %v3520_v5 = vrot.slane %v11646_v60, 5  ;;  %v3518_v2 = vsel %vm12456_vm14, %v10473_v27, %v3517_v29  ;;  %v5318_v60 = vshll.u32 %v4751_v12, 16 }
 0x37e   :  { %v13684_v6 = vpop.f32.mrf.mxu3  ;;  %6632 = vmatmul.bf16.gmra.mxu2 %v6428_v18  ;;  %v13688_v50 = vpop.f32.mrf.mxu0  ;;  %v7407_v18 = vshll.u32 %v7307_v24, 16  ;;  %v7406_v24 = vrot.slane %v7404_v32, 4  ;;  %v3731_v31 = vunpack.c.l.b16 %v3518_v2 }
 0x37f   :  { %15948 = vst [vmem:[#allocation157_spill] sm:$0xff] %v13684_v6  ;;  %v3521_v16 = vsel %vm12456_vm14, %v3519_v7, %v3520_v5  ;;  %v7413_v6 = vshll.u32 %v11647_v38, 16  ;;  %v5297_v7 = vsel %vm11900_vm7, %v5292_v37, %v13668_v14  ;;  %v13711_v32 = vrot.slane %v5318_v60, 5  ;;  %v13717_v38 = vpop.f32.mrf.mxu2 }
 0x380   :  { %15950 = vst [vmem:[#allocation159_spill] sm:$0xff] %v13688_v50  ;;  %v5322_v50 = vshrl.u32 %v4751_v12, 16  ;;  %v3732_v29 = vunpack.c.l.b16 %v3521_v16  ;;  %v7409_v27 = vrot.slane %v7407_v18, 5  ;;  %v5607_v46 = vunpack.c.l.b16 %v5297_v7  ;;  %v13723_v7 = vld [vmem:[#allocation2 + $0xf4] sm:$0xf] }
 0x381   :  { %4609 = vmatmul.bf16.gmra.mxu0 %v11314_v11  ;;  %v5608_v11 = vunpack.c.l.b16 %v5307_v22  ;;  %v6259_v14 = vsel %vm12456_vm14, %v10794_v43, %v6258_v52  ;;  %15954 = vst [vmem:[#allocation163_spill] sm:$0xff] %v13717_v38  ;;  %v11648_v22 = vld [vmem:[#allocation2 + $0x4c] sm:$0xf]  ;;  %v5311_v43 = vrot.slane %v5309_v0, 4  ;;  %v5314_v38 = vrot.slane %v5312_v47, 5 }
 0x382   :  { %v13690_v17 = vpop.f32.mrf.mxu1  ;;  %v5324_v48 = vrot.slane %v5322_v50, 4  ;;  %v3790_v2 = vpack.c.b16 %v3732_v29, %v3731_v31  ;;  %v3524_v57 = vrot.slane %v11648_v22, 5  ;;  %v7410_v60 = vor.u32 %v7409_v27, %v7406_v24  ;;  %v13726_v29 = vld [vmem:[#allocation2 + $0x13c] sm:$0xf]  ;;  %v3387_v31 = vld [vmem:[#allocation2 + $0x48] sm:$0xe] }
 0x383   :  { %15951 = vst [vmem:[#allocation160_spill] sm:$0xff] %v13690_v17  ;;  %v6261_v17 = vrot.slane %v13692_v51, 5  ;;  %v7419_v50 = vrot.slane %v7417_v56, 4  ;;  %v6387_v52 = vunpack.c.l.b16 %v6259_v14  ;;  %v5328_v24 = vshll.u32 %v13692_v51, 16  ;;  %v11650_v14 = vld [vmem:[#allocation2 + $0x50] sm:$0x1] }
 0x384   :  { %v13733_v0 = vrot.slane %v7410_v60, 4  ;;  %v10474_v47 = vrot.slane %v3387_v31, 9  ;;  %v11315_v51 = vld [vmem:[#allocation2 + $0x198] sm:$0xff]  ;;  %v5342_v26 = vshll.u32 %v13726_v29, 16 }
 0x385   :  { %v6262_v12 = vsel %vm12456_vm14, %v6260_v15, %v6261_v17  ;;  %v13721_v17 = vrot.slane %v7413_v6, 5  ;;  %v5650_v15 = vpack.c.b16 %v5608_v11, %v5607_v46  ;;  %v7428_v6 = vshrl.u32 %v7310_v35, 16 }
 0x386   :  { %v13707_v5 = vpop.f32.mrf.mxu3  ;;  %v13713_v16 = vpop.f32.mrf.mxu0  ;;  %v6388_v37 = vunpack.c.l.b16 %v6262_v12  ;;  %v7431_v12 = vshll.u32 %v7310_v35, 16  ;;  %v3526_v46 = vrot.slane %v3524_v57, 4 }
 0x387   :  { %15952 = vst [vmem:[#allocation161_spill] sm:$0xff] %v13707_v5  ;;  %v11649_v5 = vld [vmem:[#allocation2 + $0x20] sm:$0x1]  ;;  %v13744_v60 = vrot.slane %v7428_v6, 4  ;;  %v13760_v33 = vpop.f32.mrf.mxu2 }
 0x388   :  { %15953 = vst [vmem:[#allocation162_spill] sm:$0xff] %v13713_v16  ;;  %v7423_v16 = vshll.u32 %v11649_v5, 16  ;;  %v6429_v22 = vpack.c.b16 %v6388_v37, %v6387_v52  ;;  %v6265_v5 = vrot.slane %v13726_v29, 5  ;;  %v5315_v37 = vor.u32 %v5314_v38, %v5311_v43 }
 0x389   :  { %v7416_v52 = vsel %vm11900_vm7, %v13733_v0, %v13721_v17  ;;  %v13746_v27 = vrot.slane %v7431_v12, 5  ;;  %v3525_v38 = vsel %vm12456_vm14, %v10474_v47, %v3524_v57  ;;  %v5330_v43 = vrot.slane %v5328_v24, 5  ;;  %15960 = vst [vmem:[#allocation168_spill] sm:$0xff] %v13760_v33 }
 0x38a   :  { %v13719_v18 = vpop.f32.mrf.mxu1  ;;  %v13736_v11 = vrot.slane %v7423_v16, 5  ;;  %v11651_v16 = vld [vmem:[#allocation2 + $0x28] sm:$0xf]  ;;  %v6267_v12 = vrot.slane %v6265_v5, 4  ;;  %v5316_v57 = vrot.slane %v5315_v37, 4 }
 0x38b   :  { %15955 = vst [vmem:[#allocation164_spill] sm:$0xff] %v13719_v18  ;;  %3930 = vmatmul.bf16.gmra.mxu3 %v3790_v2  ;;  %v5325_v18 = vor.u32 %v5324_v48, %v13711_v32  ;;  %v7420_v48 = vor.u32 %v7419_v50, %v13721_v17  ;;  %v3527_v2 = vrot.slane %v11650_v14, 5  ;;  %v7437_v50 = vshll.u32 %v11651_v16, 16  ;;  %v13754_v14 = vld [vmem:[#allocation2 + $0x140] sm:$0x1] }
 0x38c   :  { %v15959_v17 = vrot.slane %v13723_v7, 5  ;;  %v7441_v24 = vshrl.u32 %v11651_v16, 16 }
 0x38d   :  { %5854 = vmatmul.bf16.gmra.mxu1 %v5650_v15  ;;  %v5326_v35 = vrot.slane %v5325_v18, 4  ;;  %v3528_v18 = vsel %vm12456_vm14, %v3526_v46, %v3527_v2  ;;  %v7421_v0 = vrot.slane %v7420_v48, 4  ;;  %v3733_v2 = vunpack.c.l.b16 %v3525_v38  ;;  %v8613_v38 = vld [vmem:[#allocation2 + $0xf0] sm:$0xe] }
 0x38e   :  { %v13730_v56 = vpop.f32.mrf.mxu3  ;;  %6637 = vmatmul.bf16.gmra.mxu2 %v6429_v22  ;;  %v13738_v15 = vpop.f32.mrf.mxu0  ;;  %v7357_v22 = vld [vmem:[#allocation2 + $0xf8] sm:$0x1]  ;;  %v8841_v6 = vrot.slane %v15959_v17, 4  ;;  %v3734_v30 = vunpack.c.l.b16 %v3528_v18  ;;  %v6268_v17 = vrot.slane %v13754_v14, 5  ;;  %v5321_v48 = vsel %vm11900_vm7, %v5316_v57, %v13711_v32 }
 0x38f   :  { %15956 = vst [vmem:[#allocation165_spill] sm:$0xff] %v13730_v56  ;;  %v4753_v56 = vld [vmem:[#allocation2 + $0x138] sm:$0xf]  ;;  %v5331_v46 = vsel %vm11900_vm7, %v5326_v35, %v5330_v43  ;;  %v8842_v47 = vrot.slane %v7357_v22, 5  ;;  %v13776_v22 = vrot.slane %v5342_v26, 5  ;;  %v7426_v32 = vsel %vm11900_vm7, %v7421_v0, %v13736_v11 }
 0x390   :  { %15957 = vst [vmem:[#allocation166_spill] sm:$0xff] %v13738_v15  ;;  %v5997_v15 = vld [vmem:[#allocation2 + $0x138] sm:$0xe]  ;;  %v5333_v54 = vshrl.u32 %v4753_v56, 16  ;;  %v5610_v35 = vunpack.c.l.b16 %v5331_v46  ;;  %v6269_v16 = vsel %vm12456_vm14, %v6267_v12, %v6268_v17  ;;  %v13783_v18 = vrot.slane %v7437_v50, 5 }
 0x391   :  { %4614 = vmatmul.bf16.gmra.mxu0 %v11315_v51  ;;  %v10795_v25 = vrot.slane %v5997_v15, 9  ;;  %v13770_v51 = vsel %vm12456_vm14, %v8841_v6, %v8842_v47  ;;  %v7443_v43 = vrot.slane %v7441_v24, 4  ;;  %v3791_v57 = vpack.c.b16 %v3734_v30, %v3733_v2  ;;  %v11652_v12 = vld [vmem:[#allocation2 + $0x58] sm:$0xf]  ;;  %v7313_v47 = vld [vmem:[#allocation2 + $0x30] sm:$0xf] }
 0x392   :  { %v13748_v31 = vpop.f32.mrf.mxu1  ;;  %v5609_v46 = vunpack.c.l.b16 %v5321_v48  ;;  %v6390_v33 = vunpack.c.l.b16 %v6269_v16  ;;  %v5335_v11 = vrot.slane %v5333_v54, 4  ;;  %v11653_v24 = vld [vmem:[#allocation2 + $0x2c] sm:$0x1]  ;;  %v8189_v2 = vunpack.c.l.b16 %v7426_v32  ;;  %v3388_v16 = vld [vmem:[#allocation2 + $0x54] sm:$0xe] }
 0x393   :  { %15958 = vst [vmem:[#allocation167_spill] sm:$0xff] %v13748_v31  ;;  %v5346_v31 = vshrl.u32 %v13726_v29, 16  ;;  %v5336_v29 = vshll.u32 %v4753_v56, 16  ;;  %v7434_v56 = vor.u32 %v13746_v27, %v13744_v60  ;;  %v6266_v26 = vsel %vm12456_vm14, %v10795_v25, %v6265_v5 }
 0x394   :  { %v5651_v27 = vpack.c.b16 %v5610_v35, %v5609_v46  ;;  %v8188_v60 = vunpack.c.l.b16 %v7416_v52  ;;  %v6389_v30 = vunpack.c.l.b16 %v6266_v26  ;;  %v7452_v48 = vshrl.u32 %v7313_v47, 16  ;;  %v11377_v52 = vld [vmem:[%s15760_s3 + $0x1a8] sm:$0xff] }
 0x395   :  { %v5348_v15 = vrot.slane %v5346_v31, 4  ;;  %v3531_v31 = vrot.slane %v11652_v12, 5  ;;  %v5338_v0 = vrot.slane %v5336_v29, 5  ;;  %v15964_v25 = vrot.slane %v13723_v7, 5  ;;  %v4757_v46 = vld [vmem:[#allocation2 + $0x148] sm:$0xf]  ;;  %7076 = vmatpush.bf16.msra.mxu3 %v11377_v52 }
 0x396   :  { %v13772_v37 = vpop.f32.mrf.mxu3  ;;  %v13785_v6 = vpop.f32.mrf.mxu0  ;;  %v5352_v54 = vshll.u32 %v13754_v14, 16  ;;  %v13797_v29 = vrot.slane %v7434_v56, 4  ;;  %v7455_v35 = vshll.u32 %v7313_v47, 16  ;;  %v6430_v32 = vpack.c.b16 %v6390_v33, %v6389_v30  ;;  %v5998_v33 = vld [vmem:[#allocation2 + $0x144] sm:$0xe] }
 0x397   :  { %15961 = vst [vmem:[#allocation169_spill] sm:$0xff] %v13772_v37  ;;  %v11092_v37 = vrot.slane %v8613_v38, 9  ;;  %v5349_v50 = vor.u32 %v5348_v15, %v13776_v22  ;;  %v8999_v15 = vunpack.c.l.b16 %v13770_v51  ;;  %v13803_v38 = vpop.f32.mrf.mxu2  ;;  %v3533_v7 = vrot.slane %v3531_v31, 4 }
 0x398   :  { %15962 = vst [vmem:[#allocation170_spill] sm:$0xff] %v13785_v6  ;;  %v7447_v6 = vshll.u32 %v11653_v24, 16  ;;  %v6272_v56 = vrot.slane %v4757_v46, 5  ;;  %v8252_v24 = vpack.c.b16 %v8189_v2, %v8188_v60  ;;  %v10475_v47 = vrot.slane %v3388_v16, 9 }
 0x399   :  { %v8840_v5 = vsel %vm12456_vm14, %v11092_v37, %v15964_v25  ;;  %15965 = vst [vmem:[#allocation172_spill] sm:$0xff] %v13803_v38  ;;  %v7444_v37 = vor.u32 %v7443_v43, %v13783_v18  ;;  %v5350_v14 = vrot.slane %v5349_v50, 4  ;;  %v11654_v25 = vld [vmem:[#allocation2 + $0x5c] sm:$0x1]  ;;  %v7454_v43 = vrot.slane %v7452_v48, 4 }
 0x39a   :  { %v13789_v17 = vpop.f32.mrf.mxu1  ;;  %v7449_v12 = vrot.slane %v7447_v6, 5  ;;  %v3534_v51 = vrot.slane %v11654_v25, 5  ;;  %v7457_v38 = vrot.slane %v7455_v35, 5  ;;  %v3532_v6 = vsel %vm12456_vm14, %v10475_v47, %v3531_v31  ;;  %v11393_v31 = vld [vmem:[%s15760_s3 + $0x228] sm:$0xff] }
 0x39b   :  { %15963 = vst [vmem:[#allocation171_spill] sm:$0xff] %v13789_v17  ;;  %3935 = vmatmul.bf16.gmra.mxu3 %v3791_v57  ;;  %v5339_v57 = vor.u32 %v5338_v0, %v5335_v11  ;;  %v13808_v17 = vld [vmem:[#allocation2 + $0x14c] sm:$0x1]  ;;  %v5354_v11 = vrot.slane %v5352_v54, 5  ;;  %v4756_v0 = vld [vmem:[#allocation2 + $0x144] sm:$0xf]  ;;  %v3735_v25 = vunpack.c.l.b16 %v3532_v6  ;;  %9144 = vmatpush.bf16.msra.mxu1 %v11393_v31 }
 0x39c   :  { %v3535_v60 = vsel %vm12456_vm14, %v3533_v7, %v3534_v51  ;;  %v10796_v52 = vrot.slane %v5998_v33, 9  ;;  %v6274_v54 = vrot.slane %v6272_v56, 4  ;;  %v6275_v48 = vrot.slane %v13808_v17, 5  ;;  %v7359_v33 = vld [vmem:[#allocation2 + $0x100] sm:$0xf] }
 0x39d   :  { %5859 = vmatmul.bf16.gmra.mxu1 %v5651_v27  ;;  %v8998_v27 = vunpack.c.l.b16 %v8840_v5  ;;  %v5340_v2 = vrot.slane %v5339_v57, 4  ;;  %v7445_v5 = vrot.slane %v7444_v37, 4  ;;  %v5355_v16 = vsel %vm11900_vm7, %v5350_v14, %v5354_v11  ;;  %v11655_v37 = vld [vmem:[#allocation2 + $0x34] sm:$0xf] }
 0x39e   :  { %v13806_v26 = vpop.f32.mrf.mxu3  ;;  %6642 = vmatmul.bf16.gmra.mxu2 %v6430_v32  ;;  %v13810_v30 = vpop.f32.mrf.mxu0  ;;  %v5357_v35 = vshrl.u32 %v4756_v0, 16  ;;  %v5366_v32 = vshll.u32 %v4757_v46, 16  ;;  %v7440_v7 = vsel %vm11900_vm7, %v13797_v29, %v13783_v18  ;;  %v7458_v57 = vor.u32 %v7457_v38, %v7454_v43  ;;  %v13841_v38 = vld [vmem:[#allocation2 + $0x64] sm:$0xf] }
 0x39f   :  { %15966 = vst [vmem:[#allocation173_spill] sm:$0xff] %v13806_v26  ;;  %v13812_v26 = vpack.c.b16 %v8999_v15, %v8998_v27  ;;  %v5360_v15 = vshll.u32 %v4756_v0, 16  ;;  %v5370_v27 = vshrl.u32 %v4757_v46, 16  ;;  %v7461_v14 = vshll.u32 %v11655_v37, 16  ;;  %v13844_v6 = vpop.f32.mrf.mxu2 }
 0x3a0   :  { %15967 = vst [vmem:[#allocation174_spill] sm:$0xff] %v13810_v30  ;;  %v7465_v47 = vshrl.u32 %v11655_v37, 16  ;;  %v3736_v51 = vunpack.c.l.b16 %v3535_v60  ;;  %v7450_v46 = vsel %vm11900_vm7, %v7445_v5, %v7449_v12  ;;  %v5612_v0 = vunpack.c.l.b16 %v5355_v16 }
 0x3a1   :  { %8372 = vmatmul.bf16.vlgmr.msra.gmra.mxu0 %v8252_v24  ;;  %v5345_v24 = vsel %vm11900_vm7, %v5340_v2, %v13776_v22  ;;  %v6273_v18 = vsel %vm12456_vm14, %v10796_v52, %v6272_v56  ;;  %v6276_v29 = vsel %vm12456_vm14, %v6274_v54, %v6275_v48  ;;  %15970 = vst [vmem:[#allocation177_spill] sm:$0xff] %v13844_v6  ;;  %v5359_v22 = vrot.slane %v5357_v35, 4  ;;  %v3389_v35 = vld [vmem:[#allocation2 + $0x60] sm:$0xe] }
 0x3a2   :  { %v13814_v50 = vpop.f32.mrf.mxu1  ;;  %v5362_v60 = vrot.slane %v5360_v15, 5  ;;  %v13846_v12 = vrot.slane %v5366_v32, 5  ;;  %v5372_v2 = vrot.slane %v5370_v27, 4  ;;  %v5611_v16 = vunpack.c.l.b16 %v5345_v24 }
 0x3a3   :  { %15968 = vst [vmem:[#allocation175_spill] sm:$0xff] %v13814_v50  ;;  %v8191_v31 = vunpack.c.l.b16 %v7450_v46  ;;  %v13850_v37 = vrot.slane %v7461_v14, 5  ;;  %v8846_v56 = vrot.slane %v7359_v33, 5  ;;  %v3792_v54 = vpack.c.b16 %v3736_v51, %v3735_v25  ;;  %v7360_v46 = vld [vmem:[#allocation2 + $0x104] sm:$0x1] }
 0x3a4   :  { %v6391_v48 = vunpack.c.l.b16 %v6273_v18  ;;  %v6392_v30 = vunpack.c.l.b16 %v6276_v29  ;;  %v7467_v43 = vrot.slane %v7465_v47, 4  ;;  %v5652_v50 = vpack.c.b16 %v5612_v0, %v5611_v16  ;;  %v8614_v33 = vld [vmem:[#allocation2 + $0xfc] sm:$0xe]  ;;  %v11657_v25 = vld [vmem:[#allocation2 + $0x38] sm:$0x1] }
 0x3a5   :  { %v8190_v6 = vunpack.c.l.b16 %v7440_v7  ;;  %v15973_v15 = vrot.slane %v13841_v38, 5  ;;  %v5363_v27 = vor.u32 %v5362_v60, %v5359_v22  ;;  %v5373_v24 = vor.u32 %v5372_v2, %v13846_v12  ;;  %v11658_v18 = vld [vmem:[#allocation2 + $0x68] sm:$0x1]  ;;  %v4760_v16 = vld [vmem:[#allocation2 + $0x154] sm:$0xf] }
 0x3a6   :  { %v13835_v11 = vpop.f32.mrf.mxu3  ;;  %v13848_v5 = vpop.f32.mrf.mxu0  ;;  %v5376_v14 = vshll.u32 %v13808_v17, 16  ;;  %v7471_v51 = vshll.u32 %v11657_v25, 16  ;;  %v8848_v47 = vrot.slane %v8846_v56, 4  ;;  %v6431_v0 = vpack.c.b16 %v6392_v30, %v6391_v48 }
 0x3a7   :  { %15969 = vst [vmem:[#allocation176_spill] sm:$0xff] %v13835_v11  ;;  %v3540_v32 = vrot.slane %v15973_v15, 4  ;;  %v8253_v7 = vpack.c.b16 %v8191_v31, %v8190_v6  ;;  %v3541_v29 = vrot.slane %v11658_v18, 5  ;;  %v7468_v22 = vor.u32 %v7467_v43, %v13850_v37  ;;  %v4759_v15 = vld [vmem:[#allocation2 + $0x150] sm:$0xf] }
 0x3a8   :  { %15971 = vst [vmem:[#allocation178_spill] sm:$0xff] %v13848_v5  ;;  %v13858_v5 = vrot.slane %v7458_v57, 4  ;;  %v10476_v2 = vrot.slane %v3389_v35, 9  ;;  %v6279_v17 = vrot.slane %v4760_v16, 5  ;;  %v5364_v25 = vrot.slane %v5363_v27, 4 }
 0x3a9   :  { %v3542_v57 = vsel %vm12456_vm14, %v3540_v32, %v3541_v29  ;;  %v5374_v30 = vrot.slane %v5373_v24, 4  ;;  %v5378_v6 = vrot.slane %v5376_v14, 5  ;;  %v13865_v31 = vld [vmem:[#allocation2 + $0x158] sm:$0x1]  ;;  %v5390_v43 = vshll.u32 %v4760_v16, 16 }
 0x3aa   :  { %v13852_v52 = vpop.f32.mrf.mxu1  ;;  %v5381_v32 = vshrl.u32 %v4759_v15, 16  ;;  %v5384_v27 = vshll.u32 %v4759_v15, 16  ;;  %v5394_v24 = vshrl.u32 %v4760_v16, 16  ;;  %v7316_v14 = vld [vmem:[#allocation2 + $0x3c] sm:$0xf]  ;;  %v7473_v11 = vrot.slane %v7471_v51, 5 }
 0x3ab   :  { %15972 = vst [vmem:[#allocation179_spill] sm:$0xff] %v13852_v52  ;;  %3940 = vmatmul.bf16.gmra.mxu3 %v3792_v54  ;;  %v5999_v54 = vld [vmem:[#allocation2 + $0x150] sm:$0xe]  ;;  %v11093_v52 = vrot.slane %v8614_v33, 9  ;;  %v5379_v16 = vsel %vm11900_vm7, %v5374_v30, %v5378_v6  ;;  %v11403_v15 = vld [vmem:[%s15761_s5 + $0x38] sm:$0xff] }
 0x3ac   :  { %v10797_v18 = vrot.slane %v5999_v54, 9  ;;  %v7469_v54 = vrot.slane %v7468_v22, 4  ;;  %v3738_v22 = vunpack.c.l.b16 %v3542_v57  ;;  %9607 = vmatpush.bf16.msra.mxu2 %v11403_v15 }
 0x3ad   :  { %5864 = vmatmul.bf16.gmra.mxu1 %v5652_v50  ;;  %v8849_v50 = vrot.slane %v7360_v46, 5  ;;  %v8847_v35 = vsel %vm12456_vm14, %v11093_v52, %v8846_v56  ;;  %v13873_v46 = vpop.f32.mrf.mxu2  ;;  %v15978_v56 = vrot.slane %v13841_v38, 5  ;;  %v13892_v38 = vrot.slane %v5390_v43, 5  ;;  %v11659_v43 = vld [vmem:[#allocation2 + $0x40] sm:$0xf] }
 0x3ae   :  { %v13861_v60 = vpop.f32.mrf.mxu3  ;;  %6647 = vmatmul.bf16.gmra.mxu2 %v6431_v0  ;;  %v13867_v48 = vpop.f32.mrf.mxu0  ;;  %15976 = vst [vmem:[#allocation182_spill] sm:$0xff] %v13873_v46  ;;  %v6280_v51 = vsel %vm12456_vm14, %v10797_v18, %v6279_v17  ;;  %v7479_v18 = vshll.u32 %v7316_v14, 16 }
 0x3af   :  { %15974 = vst [vmem:[#allocation180_spill] sm:$0xff] %v13861_v60  ;;  %v8850_v33 = vsel %vm12456_vm14, %v8848_v47, %v8849_v50  ;;  %v6281_v60 = vrot.slane %v6279_v17, 4  ;;  %v3539_v52 = vsel %vm12456_vm14, %v10476_v2, %v15978_v56  ;;  %v5369_v47 = vsel %vm11900_vm7, %v5364_v25, %v13846_v12 }
 0x3b0   :  { %15975 = vst [vmem:[#allocation181_spill] sm:$0xff] %v13867_v48  ;;  %v9001_v29 = vunpack.c.l.b16 %v8850_v33  ;;  %v6282_v48 = vrot.slane %v13865_v31, 5  ;;  %v9000_v50 = vunpack.c.l.b16 %v8847_v35  ;;  %v5383_v2 = vrot.slane %v5381_v32, 4 }
 0x3b1   :  { %8377 = vmatmul.bf16.gmra.mxu0 %v8253_v7  ;;  %v7476_v7 = vshrl.u32 %v7316_v14, 16  ;;  %v5386_v33 = vrot.slane %v5384_v27, 5  ;;  %v5396_v56 = vrot.slane %v5394_v24, 4  ;;  %v3737_v30 = vunpack.c.l.b16 %v3539_v52 }
 0x3b2   :  { %v13875_v0 = vpop.f32.mrf.mxu1  ;;  %v13894_v12 = vpack.c.b16 %v9001_v29, %v9000_v50  ;;  %v5613_v6 = vunpack.c.l.b16 %v5369_v47  ;;  %v6283_v57 = vsel %vm12456_vm14, %v6281_v60, %v6282_v48  ;;  %v7474_v17 = vsel %vm11900_vm7, %v7469_v54, %v7473_v11  ;;  %v11660_v47 = vld [vmem:[#allocation2 + $0x70] sm:$0xf] }
 0x3b3   :  { %15977 = vst [vmem:[#allocation183_spill] sm:$0xff] %v13875_v0  ;;  %v5614_v0 = vunpack.c.l.b16 %v5379_v16  ;;  %v7485_v35 = vshll.u32 %v11659_v43, 16  ;;  %v7489_v32 = vshrl.u32 %v11659_v43, 16  ;;  %v3793_v24 = vpack.c.b16 %v3738_v22, %v3737_v30 }
 0x3b4   :  { %15979 = vst [vmem:[#allocation184_spill] sm:$0xff] %v13894_v12  ;;  %v6393_v29 = vunpack.c.l.b16 %v6280_v51  ;;  %v7464_v52 = vsel %vm11900_vm7, %v13858_v5, %v13850_v37  ;;  %v3545_v16 = vrot.slane %v11660_v47, 5  ;;  %v6394_v60 = vunpack.c.l.b16 %v6283_v57  ;;  %v3390_v47 = vld [vmem:[#allocation2 + $0x6c] sm:$0xe] }
 0x3b5   :  { %v5387_v48 = vor.u32 %v5386_v33, %v5383_v2  ;;  %v5397_v11 = vor.u32 %v5396_v56, %v13892_v38  ;;  %v5400_v14 = vshll.u32 %v13865_v31, 16  ;;  %v5653_v54 = vpack.c.b16 %v5614_v0, %v5613_v6  ;;  %v13912_v43 = vpop.f32.mrf.mxu2  ;;  %v11661_v6 = vld [vmem:[#allocation2 + $0x74] sm:$0x1] }
 0x3b6   :  { %v13896_v25 = vpop.f32.mrf.mxu3  ;;  %v13902_v27 = vpop.f32.mrf.mxu0  ;;  %v8193_v50 = vunpack.c.l.b16 %v7474_v17  ;;  %15983 = vst [vmem:[#allocation188_spill] sm:$0xff] %v13912_v43  ;;  %v7478_v22 = vrot.slane %v7476_v7, 4  ;;  %v7481_v51 = vrot.slane %v7479_v18, 5  ;;  %v13914_v30 = vrot.slane %v7485_v35, 5  ;;  %v13916_v43 = vld [vmem:[#allocation2 + $0x164] sm:$0x1] }
 0x3b7   :  { %15980 = vst [vmem:[#allocation185_spill] sm:$0xff] %v13896_v25  ;;  %v7491_v5 = vrot.slane %v7489_v32, 4  ;;  %v8192_v37 = vunpack.c.l.b16 %v7464_v52  ;;  %v6432_v57 = vpack.c.b16 %v6394_v60, %v6393_v29  ;;  %v5388_v2 = vrot.slane %v5387_v48, 4  ;;  %v6000_v7 = vld [vmem:[#allocation2 + $0x15c] sm:$0xe] }
 0x3b8   :  { %15981 = vst [vmem:[#allocation186_spill] sm:$0xff] %v13902_v27  ;;  %v3547_v27 = vrot.slane %v3545_v16, 4  ;;  %v5398_v33 = vrot.slane %v5397_v11, 4  ;;  %v5402_v56 = vrot.slane %v5400_v14, 5  ;;  %v3548_v17 = vrot.slane %v11661_v6, 5 }
 0x3b9   :  { %v8254_v0 = vpack.c.b16 %v8193_v50, %v8192_v37  ;;  %v7482_v32 = vor.u32 %v7481_v51, %v7478_v22  ;;  %v11662_v29 = vld [vmem:[#allocation2 + $0x44] sm:$0x1]  ;;  %v4762_v60 = vld [vmem:[#allocation2 + $0x15c] sm:$0xf]  ;;  %v13922_v48 = vld [vmem:[#allocation2 + $0x10c] sm:$0xf]  ;;  %v5393_v22 = vsel %vm11900_vm7, %v5388_v2, %v13892_v38 }
 0x3ba   :  { %v13908_v15 = vpop.f32.mrf.mxu1  ;;  %v7495_v52 = vshll.u32 %v11662_v29, 16  ;;  %v10477_v14 = vrot.slane %v3390_v47, 9  ;;  %v7319_v6 = vld [vmem:[#allocation2 + $0x48] sm:$0xf]  ;;  %v5403_v51 = vsel %vm11900_vm7, %v5398_v33, %v5402_v56  ;;  %v5405_v47 = vshrl.u32 %v4762_v60, 16 }
 0x3bb   :  { %15982 = vst [vmem:[#allocation187_spill] sm:$0xff] %v13908_v15  ;;  %3945 = vmatmul.bf16.gmra.mxu3 %v3793_v24  ;;  %v4763_v15 = vld [vmem:[#allocation2 + $0x160] sm:$0xf]  ;;  %v7492_v24 = vor.u32 %v7491_v5, %v13914_v30  ;;  %v10798_v5 = vrot.slane %v6000_v7, 9  ;;  %v5408_v29 = vshll.u32 %v4762_v60, 16  ;;  %v7503_v33 = vshll.u32 %v7319_v6, 16 }
 0x3bc   :  { %v6286_v18 = vrot.slane %v4763_v15, 5  ;;  %v5414_v50 = vshll.u32 %v4763_v15, 16  ;;  %v5418_v37 = vshrl.u32 %v4763_v15, 16  ;;  %v7483_v15 = vrot.slane %v7482_v32, 4 }
 0x3bd   :  { %5869 = vmatmul.bf16.gmra.mxu1 %v5653_v54  ;;  %v3549_v54 = vsel %vm12456_vm14, %v3547_v27, %v3548_v17  ;;  %v15768_v27 = vrot.slane %v13922_v48, 5  ;;  %v7493_v17 = vrot.slane %v7492_v24, 4  ;;  %v3546_v46 = vsel %vm12456_vm14, %v10477_v14, %v3545_v16  ;;  %v13941_v56 = vpop.f32.mrf.mxu2 }
 0x3be   :  { %v3906_v31 = vpop.f32.mrf.mxu3  ;;  %6652 = vmatmul.bf16.gmra.mxu2 %v6432_v57  ;;  %v13924_v11 = vpop.f32.mrf.mxu0  ;;  %v6289_v57 = vrot.slane %v13916_v43, 5  ;;  %v13939_v38 = vrot.slane %v5414_v50, 5  ;;  %v5420_v2 = vrot.slane %v5418_v37, 4  ;;  %15987 = vst [vmem:[#allocation192_spill] sm:$0xff] %v13941_v56  ;;  %v3740_v7 = vunpack.c.l.b16 %v3549_v54  ;;  %v11663_v37 = vld [vmem:[#allocation2 + $0x4c] sm:$0xf] }
 0x3bf   :  { %v13919_v35 = vadd.f32 %v3906_v31, %v12082_v58  ;;  %15985 = vst [vmem:[#allocation190_spill] sm:$0xff] %v13924_v11  ;;  %v6288_v31 = vrot.slane %v6286_v18, 4  ;;  %v7497_v11 = vrot.slane %v7495_v52, 5  ;;  %v5616_v25 = vunpack.c.l.b16 %v5403_v51 }
 0x3c0   :  { %v6287_v60 = vsel %vm12456_vm14, %v10798_v5, %v6286_v18  ;;  %v5407_v52 = vrot.slane %v5405_v47, 4  ;;  %v5410_v16 = vrot.slane %v5408_v29, 5  ;;  %v8855_v14 = vrot.slane %v15768_v27, 4  ;;  %v11664_v18 = vld [vmem:[#allocation2 + $0x7c] sm:$0xf] }
 0x3c1   :  { %15984 = vst [vmem:[#allocation189_spill] sm:$0xff] %v13919_v35  ;;  %8382 = vmatmul.bf16.gmra.mxu0 %v8254_v0  ;;  %v5615_v35 = vunpack.c.l.b16 %v5393_v22  ;;  %v7363_v0 = vld [vmem:[#allocation2 + $0x110] sm:$0x1]  ;;  %v6290_v24 = vsel %vm12456_vm14, %v6288_v31, %v6289_v57  ;;  %v3739_v50 = vunpack.c.l.b16 %v3546_v46  ;;  %v7498_v54 = vsel %vm11900_vm7, %v7493_v17, %v7497_v11  ;;  %v3391_v17 = vld [vmem:[#allocation2 + $0x78] sm:$0xe] }
 0x3c2   :  { %v13928_v58 = vpop.f32.mrf.mxu1  ;;  %v7513_v22 = vshrl.u32 %v11663_v37, 16  ;;  %v3552_v5 = vrot.slane %v11664_v18, 5  ;;  %v5421_v56 = vor.u32 %v5420_v2, %v13939_v38  ;;  %v5424_v57 = vshll.u32 %v13916_v43, 16 }
 0x3c3   :  { %15986 = vst [vmem:[#allocation191_spill] sm:$0xff] %v13928_v58  ;;  %v7500_v58 = vshrl.u32 %v7319_v6, 16  ;;  %v7509_v6 = vshll.u32 %v11663_v37, 16  ;;  %v8856_v31 = vrot.slane %v7363_v0, 5  ;;  %v3794_v29 = vpack.c.b16 %v3740_v7, %v3739_v50  ;;  %v8615_v7 = vld [vmem:[#allocation2 + $0x108] sm:$0xe] }
 0x3c4   :  { %v6395_v27 = vunpack.c.l.b16 %v6287_v60  ;;  %v6396_v46 = vunpack.c.l.b16 %v6290_v24  ;;  %v7488_v11 = vsel %vm11900_vm7, %v7483_v15, %v13914_v30  ;;  %v5411_v37 = vor.u32 %v5410_v16, %v5407_v52  ;;  %v4766_v52 = vld [vmem:[#allocation2 + $0x16c] sm:$0xf]  ;;  %v13968_v16 = vld [vmem:[#allocation2 + $0x170] sm:$0x1] }
 0x3c5   :  { %v8857_v18 = vsel %vm12456_vm14, %v8855_v14, %v8856_v31  ;;  %v8195_v2 = vunpack.c.l.b16 %v7498_v54  ;;  %v13966_v43 = vrot.slane %v7509_v6, 5  ;;  %v7515_v0 = vrot.slane %v7513_v22, 4  ;;  %v11665_v14 = vld [vmem:[#allocation2 + $0x50] sm:$0x1] }
 0x3c6   :  { %v13945_v32 = vpop.f32.mrf.mxu3  ;;  %v13953_v51 = vpop.f32.mrf.mxu0  ;;  %v3554_v60 = vrot.slane %v3552_v5, 4  ;;  %v7505_v24 = vrot.slane %v7503_v33, 5  ;;  %v6433_v50 = vpack.c.b16 %v6396_v46, %v6395_v27  ;;  %v8194_v30 = vunpack.c.l.b16 %v7488_v11  ;;  %v4765_v46 = vld [vmem:[#allocation2 + $0x168] sm:$0xf] }
 0x3c7   :  { %15988 = vst [vmem:[#allocation193_spill] sm:$0xff] %v13945_v32  ;;  %v5654_v32 = vpack.c.b16 %v5616_v25, %v5615_v35  ;;  %v5422_v25 = vrot.slane %v5421_v56, 4  ;;  %v5426_v35 = vrot.slane %v5424_v57, 5  ;;  %v10478_v15 = vrot.slane %v3391_v17, 9 }
 0x3c8   :  { %15989 = vst [vmem:[#allocation194_spill] sm:$0xff] %v13953_v51  ;;  %v13964_v51 = vrot.slane %v7500_v58, 4  ;;  %v7519_v31 = vshll.u32 %v11665_v14, 16  ;;  %v11666_v58 = vld [vmem:[#allocation2 + $0x80] sm:$0x1]  ;;  %v5412_v6 = vrot.slane %v5411_v37, 4  ;;  %v8255_v27 = vpack.c.b16 %v8195_v2, %v8194_v30 }
 0x3c9   :  { %v6293_v22 = vrot.slane %v4766_v52, 5  ;;  %v11094_v12 = vrot.slane %v8615_v7, 9  ;;  %v3553_v33 = vsel %vm12456_vm14, %v10478_v15, %v3552_v5  ;;  %v7516_v57 = vor.u32 %v7515_v0, %v13966_v43 }
 0x3ca   :  { %v13957_v47 = vpop.f32.mrf.mxu1  ;;  %v5427_v37 = vsel %vm11900_vm7, %v5422_v25, %v5426_v35  ;;  %v6296_v7 = vrot.slane %v13968_v16, 5  ;;  %v5438_v0 = vshll.u32 %v4766_v52, 16  ;;  %v5442_v30 = vshrl.u32 %v4766_v52, 16 }
 0x3cb   :  { %15990 = vst [vmem:[#allocation195_spill] sm:$0xff] %v13957_v47  ;;  %3950 = vmatmul.bf16.gmra.mxu3 %v3794_v29  ;;  %v3555_v29 = vrot.slane %v11666_v58, 5  ;;  %v6001_v47 = vld [vmem:[#allocation2 + $0x168] sm:$0xe]  ;;  %v9003_v15 = vunpack.c.l.b16 %v8857_v18  ;;  %v6295_v14 = vrot.slane %v6293_v22, 4  ;;  %v5432_v25 = vshll.u32 %v4765_v46, 16 }
 0x3cc   :  { %v10799_v5 = vrot.slane %v6001_v47, 9  ;;  %v7506_v35 = vor.u32 %v7505_v24, %v13964_v51  ;;  %v7322_v47 = vld [vmem:[#allocation2 + $0x54] sm:$0xf]  ;;  %v13995_v52 = vrot.slane %v5438_v0, 5  ;;  %v5444_v18 = vrot.slane %v5442_v30, 4 }
 0x3cd   :  { %5874 = vmatmul.bf16.gmra.mxu1 %v5654_v32  ;;  %v13970_v32 = vpop.f32.mrf.mxu2  ;;  %v3556_v17 = vsel %vm12456_vm14, %v3554_v60, %v3555_v29  ;;  %v5417_v60 = vsel %vm11900_vm7, %v5412_v6, %v13939_v38  ;;  %v3741_v29 = vunpack.c.l.b16 %v3553_v33  ;;  %v6297_v51 = vsel %vm12456_vm14, %v6295_v14, %v6296_v7  ;;  %v11668_v30 = vld [vmem:[#allocation2 + $0x58] sm:$0xf] }
 0x3ce   :  { %v3911_v54 = vpop.f32.mrf.mxu3  ;;  %15991 = vst [vmem:[#allocation196_spill] sm:$0xff] %v13970_v32  ;;  %6657 = vmatmul.bf16.gmra.mxu2 %v6433_v50  ;;  %v13978_v11 = vpop.f32.mrf.mxu0  ;;  %v6294_v6 = vsel %vm12456_vm14, %v10799_v5, %v6293_v22  ;;  %v7533_v22 = vshll.u32 %v11668_v30, 16  ;;  %v7537_v5 = vshrl.u32 %v11668_v30, 16  ;;  %v5445_v14 = vor.u32 %v5444_v18, %v13995_v52 }
 0x3cf   :  { %v13973_v56 = vadd.f32 %v3911_v54, %v12132_v53  ;;  %15992 = vst [vmem:[#allocation197_spill] sm:$0xff] %v13978_v11  ;;  %v15993_v53 = vrot.slane %v13922_v48, 5  ;;  %v5429_v54 = vshrl.u32 %v4765_v46, 16  ;;  %v7517_v48 = vrot.slane %v7516_v57, 4 }
 0x3d0   :  { %v7521_v11 = vrot.slane %v7519_v31, 5  ;;  %v7507_v31 = vrot.slane %v7506_v35, 4  ;;  %v7524_v46 = vshrl.u32 %v7322_v47, 16  ;;  %v5446_v18 = vrot.slane %v5445_v14, 4 }
 0x3d1   :  { %v8854_v2 = vsel %vm12456_vm14, %v11094_v12, %v15993_v53  ;;  %8387 = vmatmul.bf16.gmra.mxu0 %v8255_v27  ;;  %v3742_v12 = vunpack.c.l.b16 %v3556_v17  ;;  %v5618_v53 = vunpack.c.l.b16 %v5427_v37  ;;  %v5431_v24 = vrot.slane %v5429_v54, 4 }
 0x3d2   :  { %v13989_v50 = vpop.f32.mrf.mxu1  ;;  %v9002_v58 = vunpack.c.l.b16 %v8854_v2  ;;  %v5434_v27 = vrot.slane %v5432_v25, 5  ;;  %v7522_v57 = vsel %vm11900_vm7, %v7517_v48, %v7521_v11  ;;  %v11667_v2 = vld [vmem:[#allocation2 + $0x88] sm:$0xf]  ;;  %v5448_v54 = vshll.u32 %v13968_v16, 16  ;;  %v11376_v16 = vld [vmem:[%s15760_s3 + $0x1a0] sm:$0xff] }
 0x3d3   :  { %15994 = vst [vmem:[#allocation198_spill] sm:$0xff] %v13989_v50  ;;  %v5617_v50 = vunpack.c.l.b16 %v5417_v60  ;;  %v3795_v37 = vpack.c.b16 %v3742_v12, %v3741_v29  ;;  %v3559_v0 = vrot.slane %v11667_v2, 5  ;;  %v6397_v60 = vunpack.c.l.b16 %v6294_v6  ;;  %7077 = vmatpush.bf16.msra.mxu3 %v11376_v16 }
 0x3d4   :  { %v13997_v32 = vpack.c.b16 %v9003_v15, %v9002_v58  ;;  %v7512_v25 = vsel %vm11900_vm7, %v7507_v31, %v13966_v43  ;;  %v5435_v35 = vor.u32 %v5434_v27, %v5431_v24  ;;  %v8197_v48 = vunpack.c.l.b16 %v7522_v57  ;;  %v3392_v58 = vld [vmem:[#allocation2 + $0x84] sm:$0xe]  ;;  %v4769_v43 = vld [vmem:[#allocation2 + $0x178] sm:$0xf]  ;;  %v14024_v24 = vld [vmem:[#allocation2 + $0x17c] sm:$0x1] }
 0x3d5   :  { %v14010_v15 = vpop.f32.mrf.mxu2  ;;  %v5655_v11 = vpack.c.b16 %v5618_v53, %v5617_v50  ;;  %v7527_v29 = vshll.u32 %v7322_v47, 16  ;;  %v3561_v12 = vrot.slane %v3559_v0, 4  ;;  %v14019_v2 = vrot.slane %v7533_v22, 5  ;;  %v11669_v47 = vld [vmem:[#allocation2 + $0x8c] sm:$0x1] }
 0x3d6   :  { %v3913_v38 = vpop.f32.mrf.mxu3  ;;  %v14008_v17 = vpop.f32.mrf.mxu0  ;;  %15996 = vst [vmem:[#allocation200_spill] sm:$0xff] %v14010_v15  ;;  %v7539_v6 = vrot.slane %v7537_v5, 4  ;;  %v8196_v53 = vunpack.c.l.b16 %v7512_v25  ;;  %v10479_v31 = vrot.slane %v3392_v58, 9  ;;  %v3562_v57 = vrot.slane %v11669_v47, 5  ;;  %v16048_v15 = vld [vmem:[#allocation7_spill] sm:$0xff] }
 0x3d7   :  { %v14004_v33 = vadd.f32 %v3913_v38, %v12142_v23  ;;  %15995 = vst [vmem:[#allocation199_spill] sm:$0xff] %v14008_v17  ;;  %v6398_v23 = vunpack.c.l.b16 %v6297_v51  ;;  %v7526_v38 = vrot.slane %v7524_v46, 4  ;;  %v5450_v51 = vrot.slane %v5448_v54, 5  ;;  %v6002_v46 = vld [vmem:[#allocation2 + $0x174] sm:$0xe] }
 0x3d8   :  { %v6300_v30 = vrot.slane %v4769_v43, 5  ;;  %v8256_v5 = vpack.c.b16 %v8197_v48, %v8196_v53  ;;  %v4768_v54 = vld [vmem:[#allocation2 + $0x174] sm:$0xf]  ;;  %v3560_v25 = vsel %vm12456_vm14, %v10479_v31, %v3559_v0  ;;  %v6303_v58 = vrot.slane %v14024_v24, 5 }
 0x3d9   :  { %v6434_v50 = vpack.c.b16 %v6398_v23, %v6397_v60  ;;  %v7529_v60 = vrot.slane %v7527_v29, 5  ;;  %v11670_v23 = vld [vmem:[#allocation2 + $0x5c] sm:$0x1]  ;;  %v7540_v16 = vor.u32 %v7539_v6, %v14019_v2  ;;  %v5451_v48 = vsel %vm11900_vm7, %v5446_v18, %v5450_v51  ;;  %v11392_v6 = vld [vmem:[%s15760_s3 + $0x220] sm:$0xff] }
 0x3da   :  { %v14012_v7 = vpop.f32.mrf.mxu1  ;;  %v7543_v14 = vshll.u32 %v11670_v23, 16  ;;  %v10800_v29 = vrot.slane %v6002_v46, 9  ;;  %v5466_v53 = vshrl.u32 %v4769_v43, 16  ;;  %v6302_v0 = vrot.slane %v6300_v30, 4  ;;  %9145 = vmatpush.bf16.msra.mxu1 %v11392_v6  ;;  %v11672_v6 = vld [vmem:[#allocation2 + $0x94] sm:$0xf] }
 0x3db   :  { %15997 = vst [vmem:[#allocation201_spill] sm:$0xff] %v14012_v7  ;;  %3955 = vmatmul.bf16.gmra.mxu3 %v3795_v37  ;;  %v5436_v37 = vrot.slane %v5435_v35, 4  ;;  %v3563_v35 = vsel %vm12456_vm14, %v3561_v12, %v3562_v57  ;;  %v5453_v31 = vshrl.u32 %v4768_v54, 16  ;;  %v5456_v47 = vshll.u32 %v4768_v54, 16 }
 0x3dc   :  { %v7530_v57 = vor.u32 %v7529_v60, %v7526_v38  ;;  %v3743_v23 = vunpack.c.l.b16 %v3560_v25  ;;  %v3744_v18 = vunpack.c.l.b16 %v3563_v35  ;;  %v7541_v51 = vrot.slane %v7540_v16, 4  ;;  %v11671_v35 = vld [vmem:[#allocation2 + $0x64] sm:$0xf] }
 0x3dd   :  { %5879 = vmatmul.bf16.gmra.mxu1 %v5655_v11  ;;  %v14044_v12 = vpop.f32.mrf.mxu2  ;;  %v7545_v46 = vrot.slane %v7543_v14, 5  ;;  %v6304_v38 = vsel %vm12456_vm14, %v6302_v0, %v6303_v58  ;;  %v5455_v60 = vrot.slane %v5453_v31, 4  ;;  %v7557_v16 = vshll.u32 %v11671_v35, 16 }
 0x3de   :  { %v3916_v27 = vpop.f32.mrf.mxu3  ;;  %6662 = vmatmul.bf16.gmra.mxu2 %v6434_v50  ;;  %v14029_v11 = vpop.f32.mrf.mxu0  ;;  %v5462_v50 = vshll.u32 %v4769_v43, 16  ;;  %16000 = vst [vmem:[#allocation204_spill] sm:$0xff] %v14044_v12  ;;  %v7531_v14 = vrot.slane %v7530_v57, 4  ;;  %v6400_v0 = vunpack.c.l.b16 %v6304_v38  ;;  %v5472_v31 = vshll.u32 %v14024_v24, 16 }
 0x3df   :  { %v14027_v22 = vadd.f32 %v3916_v27, %v12155_v59  ;;  %15998 = vst [vmem:[#allocation202_spill] sm:$0xff] %v14029_v11  ;;  %v5441_v27 = vsel %vm11900_vm7, %v5436_v37, %v13995_v52  ;;  %v5620_v11 = vunpack.c.l.b16 %v5451_v48  ;;  %v5468_v52 = vrot.slane %v5466_v53, 4  ;;  %v7325_v37 = vld [vmem:[#allocation2 + $0x60] sm:$0xf] }
 0x3e0   :  { %v5619_v43 = vunpack.c.l.b16 %v5441_v27  ;;  %v14049_v17 = vrot.slane %v5462_v50, 5  ;;  %v7561_v48 = vshrl.u32 %v11671_v35, 16  ;;  %v3796_v53 = vpack.c.b16 %v3744_v18, %v3743_v23 }
 0x3e1   :  { %8392 = vmatmul.bf16.gmra.mxu0 %v8256_v5  ;;  %v6301_v5 = vsel %vm12456_vm14, %v10800_v29, %v6300_v30  ;;  %v7546_v27 = vsel %vm11900_vm7, %v7541_v51, %v7545_v46  ;;  %v3566_v30 = vrot.slane %v11672_v6, 5  ;;  %v7548_v29 = vshrl.u32 %v7325_v37, 16  ;;  %v3393_v51 = vld [vmem:[#allocation2 + $0x90] sm:$0xe] }
 0x3e2   :  { %v14037_v59 = vpop.f32.mrf.mxu1  ;;  %v6399_v58 = vunpack.c.l.b16 %v6301_v5  ;;  %v7536_v57 = vsel %vm11900_vm7, %v7531_v14, %v14019_v2  ;;  %v8199_v18 = vunpack.c.l.b16 %v7546_v27  ;;  %v7551_v46 = vshll.u32 %v7325_v37, 16 }
 0x3e3   :  { %15999 = vst [vmem:[#allocation203_spill] sm:$0xff] %v14037_v59  ;;  %v5458_v59 = vrot.slane %v5456_v47, 5  ;;  %v5656_v47 = vpack.c.b16 %v5620_v11, %v5619_v43  ;;  %v7563_v35 = vrot.slane %v7561_v48, 4  ;;  %v3568_v5 = vrot.slane %v3566_v30, 4 }
 0x3e4   :  { %v7550_v38 = vrot.slane %v7548_v29, 4  ;;  %v8198_v24 = vunpack.c.l.b16 %v7536_v57  ;;  %v5474_v43 = vrot.slane %v5472_v31, 5  ;;  %v7553_v29 = vrot.slane %v7551_v46, 5 }
 0x3e5   :  { %v5459_v23 = vor.u32 %v5458_v59, %v5455_v60  ;;  %v14071_v6 = vpop.f32.mrf.mxu2  ;;  %v10480_v59 = vrot.slane %v3393_v51, 9  ;;  %v11673_v60 = vld [vmem:[#allocation2 + $0x98] sm:$0x1] }
 0x3e6   :  { %v3918_v54 = vpop.f32.mrf.mxu3  ;;  %v14058_v50 = vpop.f32.mrf.mxu0  ;;  %16003 = vst [vmem:[#allocation207_spill] sm:$0xff] %v14071_v6  ;;  %v3569_v14 = vrot.slane %v11673_v60, 5  ;;  %v8257_v27 = vpack.c.b16 %v8199_v18, %v8198_v24 }
 0x3e7   :  { %v14056_v25 = vadd.f32 %v3918_v54, %v12165_v28  ;;  %16001 = vst [vmem:[#allocation205_spill] sm:$0xff] %v14058_v50  ;;  %v5469_v28 = vor.u32 %v5468_v52, %v14049_v17  ;;  %v14069_v54 = vrot.slane %v7557_v16, 5  ;;  %v6435_v52 = vpack.c.b16 %v6400_v0, %v6399_v58  ;;  %v4772_v50 = vld [vmem:[#allocation2 + $0x184] sm:$0xf]  ;;  %v6003_v16 = vld [vmem:[#allocation2 + $0x180] sm:$0xe] }
 0x3e8   :  { %v5460_v37 = vrot.slane %v5459_v23, 4  ;;  %v4771_v0 = vld [vmem:[#allocation2 + $0x180] sm:$0xf]  ;;  %v3567_v31 = vsel %vm12456_vm14, %v10480_v59, %v3566_v30  ;;  %v11674_v23 = vld [vmem:[#allocation2 + $0x68] sm:$0x1]  ;;  %v10801_v46 = vrot.slane %v6003_v16, 9 }
 0x3e9   :  { %v5470_v11 = vrot.slane %v5469_v28, 4  ;;  %v7564_v58 = vor.u32 %v7563_v35, %v14069_v54  ;;  %v7567_v51 = vshll.u32 %v11674_v23, 16  ;;  %v5486_v35 = vshll.u32 %v4772_v50, 16 }
 0x3ea   :  { %v14062_v7 = vpop.f32.mrf.mxu1  ;;  %v5465_v24 = vsel %vm11900_vm7, %v5460_v37, %v14049_v17  ;;  %v5480_v59 = vshll.u32 %v4771_v0, 16  ;;  %v3745_v23 = vunpack.c.l.b16 %v3567_v31 }
 0x3eb   :  { %16002 = vst [vmem:[#allocation206_spill] sm:$0xff] %v14062_v7  ;;  %3960 = vmatmul.bf16.gmra.mxu3 %v3796_v53  ;;  %v14073_v7 = vld [vmem:[#allocation2 + $0x188] sm:$0x1]  ;;  %v6307_v53 = vrot.slane %v4772_v50, 5  ;;  %v5475_v18 = vsel %vm11900_vm7, %v5470_v11, %v5474_v43  ;;  %v7565_v60 = vrot.slane %v7564_v58, 4  ;;  %v7569_v11 = vrot.slane %v7567_v51, 5 }
 0x3ec   :  { %v6310_v57 = vrot.slane %v14073_v7, 5  ;;  %v5621_v43 = vunpack.c.l.b16 %v5465_v24  ;;  %v5622_v16 = vunpack.c.l.b16 %v5475_v18 }
 0x3ed   :  { %5884 = vmatmul.bf16.gmra.mxu1 %v5656_v47  ;;  %v3570_v47 = vsel %vm12456_vm14, %v3568_v5, %v3569_v14  ;;  %v6309_v30 = vrot.slane %v6307_v53, 4  ;;  %v7554_v5 = vor.u32 %v7553_v29, %v7550_v38  ;;  %v11402_v14 = vld [vmem:[%s15761_s5 + $0x30] sm:$0xff]  ;;  %v6308_v37 = vsel %vm12456_vm14, %v10801_v46, %v6307_v53  ;;  %v14102_v58 = vpop.f32.mrf.mxu2  ;;  %v7328_v53 = vld [vmem:[#allocation2 + $0x6c] sm:$0xf] }
 0x3ee   :  { %v3921_v2 = vpop.f32.mrf.mxu3  ;;  %6667 = vmatmul.bf16.gmra.mxu2 %v6435_v52  ;;  %v14079_v28 = vpop.f32.mrf.mxu0  ;;  %v5490_v52 = vshrl.u32 %v4772_v50, 16  ;;  %v14096_v50 = vrot.slane %v5486_v35, 5  ;;  %v5482_v29 = vrot.slane %v5480_v59, 5  ;;  %16006 = vst [vmem:[#allocation210_spill] sm:$0xff] %v14102_v58  ;;  %v11675_v35 = vld [vmem:[#allocation2 + $0xa0] sm:$0xf] }
 0x3ef   :  { %v14076_v48 = vadd.f32 %v3921_v2, %v12184_v3  ;;  %16004 = vst [vmem:[#allocation208_spill] sm:$0xff] %v14079_v28  ;;  %v5477_v2 = vshrl.u32 %v4771_v0, 16  ;;  %v3746_v28 = vunpack.c.l.b16 %v3570_v47  ;;  %9608 = vmatpush.bf16.msra.mxu2 %v11402_v14  ;;  %v6311_v38 = vsel %vm12456_vm14, %v6309_v30, %v6310_v57  ;;  %v11676_v46 = vld [vmem:[#allocation2 + $0x70] sm:$0xf] }
 0x3f0   :  { %v7555_v31 = vrot.slane %v7554_v5, 4  ;;  %v7570_v47 = vsel %vm11900_vm7, %v7565_v60, %v7569_v11  ;;  %v7581_v24 = vshll.u32 %v11676_v46, 16  ;;  %v7585_v57 = vshrl.u32 %v11676_v46, 16 }
 0x3f1   :  { %8397 = vmatmul.bf16.gmra.mxu0 %v8257_v27  ;;  %v5479_v27 = vrot.slane %v5477_v2, 4  ;;  %v3797_v18 = vpack.c.b16 %v3746_v28, %v3745_v23  ;;  %v6401_v2 = vunpack.c.l.b16 %v6308_v37  ;;  %v6402_v59 = vunpack.c.l.b16 %v6311_v38 }
 0x3f2   :  { %v14086_v3 = vpop.f32.mrf.mxu1  ;;  %v5496_v5 = vshll.u32 %v14073_v7, 16  ;;  %v5657_v14 = vpack.c.b16 %v5622_v16, %v5621_v43  ;;  %v7560_v28 = vsel %vm11900_vm7, %v7555_v31, %v14069_v54  ;;  %v7572_v60 = vshrl.u32 %v7328_v53, 16  ;;  %v4775_v7 = vld [vmem:[#allocation2 + $0x190] sm:$0xf] }
 0x3f3   :  { %16005 = vst [vmem:[#allocation209_spill] sm:$0xff] %v14086_v3  ;;  %v5492_v3 = vrot.slane %v5490_v52, 4  ;;  %v3573_v52 = vrot.slane %v11675_v35, 5  ;;  %v7575_v23 = vshll.u32 %v7328_v53, 16  ;;  %v8201_v11 = vunpack.c.l.b16 %v7570_v47  ;;  %v3394_v35 = vld [vmem:[#allocation2 + $0x9c] sm:$0xe] }
 0x3f4   :  { %v14118_v46 = vrot.slane %v7581_v24, 5  ;;  %v7587_v37 = vrot.slane %v7585_v57, 4  ;;  %v6436_v38 = vpack.c.b16 %v6402_v59, %v6401_v2  ;;  %v8200_v16 = vunpack.c.l.b16 %v7560_v28  ;;  %v11677_v47 = vld [vmem:[#allocation2 + $0xa4] sm:$0x1]  ;;  %v4774_v28 = vld [vmem:[#allocation2 + $0x18c] sm:$0xf] }
 0x3f5   :  { %v6314_v54 = vrot.slane %v4775_v7, 5  ;;  %v3576_v53 = vrot.slane %v11677_v47, 5  ;;  %v7574_v24 = vrot.slane %v7572_v60, 4  ;;  %v7577_v57 = vrot.slane %v7575_v23, 5  ;;  %v14128_v58 = vpop.f32.mrf.mxu2 }
 0x3f6   :  { %v3923_v17 = vpop.f32.mrf.mxu3  ;;  %v14109_v51 = vpop.f32.mrf.mxu0  ;;  %v8258_v59 = vpack.c.b16 %v8201_v11, %v8200_v16  ;;  %16011 = vst [vmem:[#allocation215_spill] sm:$0xff] %v14128_v58  ;;  %v5501_v16 = vshrl.u32 %v4774_v28, 16  ;;  %v5504_v47 = vshll.u32 %v4774_v28, 16  ;;  %v11679_v28 = vld [vmem:[#allocation2 + $0x7c] sm:$0xf] }
 0x3f7   :  { %v14105_v0 = vadd.f32 %v3923_v17, %v12203_v1  ;;  %16007 = vst [vmem:[#allocation211_spill] sm:$0xff] %v14109_v51  ;;  %v5493_v1 = vor.u32 %v5492_v3, %v14096_v50  ;;  %v5483_v17 = vor.u32 %v5482_v29, %v5479_v27  ;;  %v3575_v51 = vrot.slane %v3573_v52, 4  ;;  %v14120_v29 = vld [vmem:[#allocation2 + $0x194] sm:$0x1] }
 0x3f9   :  { %v5494_v3 = vrot.slane %v5493_v1, 4  ;;  %v5484_v27 = vrot.slane %v5483_v17, 4  ;;  %v10481_v1 = vrot.slane %v3394_v35, 9  ;;  %v6316_v35 = vrot.slane %v6314_v54, 4 }
 0x3fa   :  { %v14111_v30 = vpop.f32.mrf.mxu1 }
 0x3fb   :  { %16008 = vst [vmem:[#allocation212_spill] sm:$0xff] %v14111_v30  ;;  %3965 = vmatmul.bf16.gmra.mxu3 %v3797_v18  ;;  %v5498_v30 = vrot.slane %v5496_v5, 5  ;;  %v6004_v18 = vld [vmem:[#allocation2 + $0x18c] sm:$0xe]  ;;  %v7588_v5 = vor.u32 %v7587_v37, %v14118_v46  ;;  %v5489_v11 = vsel %vm11900_vm7, %v5484_v27, %v14096_v50  ;;  %v5510_v37 = vshll.u32 %v4775_v7, 16 }
 0x3fc   :  { %v10802_v23 = vrot.slane %v6004_v18, 9 }
 0x3fd   :  { %5889 = vmatmul.bf16.gmra.mxu1 %v5657_v14  ;;  %v11678_v14 = vld [vmem:[#allocation2 + $0x74] sm:$0x1]  ;;  %v5499_v60 = vsel %vm11900_vm7, %v5494_v3, %v5498_v30  ;;  %v5623_v30 = vunpack.c.l.b16 %v5489_v11 }
 0x3fe   :  { %v3926_v43 = vpop.f32.mrf.mxu3  ;;  %6672 = vmatmul.bf16.gmra.mxu2 %v6436_v38  ;;  %v14125_v2 = vpop.f32.mrf.mxu0  ;;  %v7591_v17 = vshll.u32 %v11678_v14, 16  ;;  %v6317_v38 = vrot.slane %v14120_v29, 5  ;;  %v3574_v14 = vsel %vm12456_vm14, %v10481_v1, %v3573_v52  ;;  %v5624_v3 = vunpack.c.l.b16 %v5499_v60 }
 0x3ff   :  { %v14123_v31 = vadd.f32 %v3926_v43, %v12230_v19  ;;  %16010 = vst [vmem:[#allocation214_spill] sm:$0xff] %v14125_v2  ;;  %v3577_v19 = vsel %vm12456_vm14, %v3575_v51, %v3576_v53  ;;  %v5514_v43 = vshrl.u32 %v4775_v7, 16  ;;  %v7578_v51 = vor.u32 %v7577_v57, %v7574_v24 }
 0x400   :  { %v7589_v53 = vrot.slane %v7588_v5, 4  ;;  %v3748_v2 = vunpack.c.l.b16 %v3577_v19  ;;  %v7593_v18 = vrot.slane %v7591_v17, 5  ;;  %v6315_v58 = vsel %vm12456_vm14, %v10802_v23, %v6314_v54 }
 0x401   :  { %16009 = vst [vmem:[#allocation213_spill] sm:$0xff] %v14123_v31  ;;  %8402 = vmatmul.bf16.gmra.mxu0 %v8258_v59  ;;  %v6318_v50 = vsel %vm12456_vm14, %v6316_v35, %v6317_v38  ;;  %v14146_v7 = vrot.slane %v5510_v37, 5  ;;  %v5516_v27 = vrot.slane %v5514_v43, 4  ;;  %v3747_v52 = vunpack.c.l.b16 %v3574_v14  ;;  %v11680_v35 = vld [vmem:[#allocation2 + $0xac] sm:$0xf] }
 0x402   :  { %v14130_v6 = vpop.f32.mrf.mxu1  ;;  %v5503_v24 = vrot.slane %v5501_v16, 4  ;;  %v5506_v57 = vrot.slane %v5504_v47, 5  ;;  %v7579_v5 = vrot.slane %v7578_v51, 4  ;;  %v7594_v17 = vsel %vm11900_vm7, %v7589_v53, %v7593_v18  ;;  %v14159_v47 = vpop.f32.mrf.mxu2  ;;  %v11732_v31 = vld [vmem:[#allocation2 + $0x14c] sm:$0x1] }
 0x403   :  { %16012 = vst [vmem:[#allocation216_spill] sm:$0xff] %v14130_v6  ;;  %v7605_v54 = vshll.u32 %v11679_v28, 16  ;;  %v7609_v19 = vshrl.u32 %v11679_v28, 16  ;;  %v3798_v23 = vpack.c.b16 %v3748_v2, %v3747_v52  ;;  %v6403_v38 = vunpack.c.l.b16 %v6315_v58  ;;  %v3395_v58 = vld [vmem:[#allocation2 + $0xa8] sm:$0xe] }
 0x404   :  { %v6404_v11 = vunpack.c.l.b16 %v6318_v50  ;;  %v5658_v37 = vpack.c.b16 %v5624_v3, %v5623_v30  ;;  %v5517_v43 = vor.u32 %v5516_v27, %v14146_v7  ;;  %v5520_v16 = vshll.u32 %v14120_v29, 16  ;;  %16016 = vst [vmem:[#allocation220_spill] sm:$0xff] %v14159_v47  ;;  %v11391_v30 = vld [vmem:[%s15760_s3 + $0x218] sm:$0xff] }
 0x405   :  { %v7584_v14 = vsel %vm11900_vm7, %v7579_v5, %v14118_v46  ;;  %v5507_v51 = vor.u32 %v5506_v57, %v5503_v24  ;;  %v8203_v2 = vunpack.c.l.b16 %v7594_v17  ;;  %v4778_v29 = vld [vmem:[#allocation2 + $0x19c] sm:$0xf]  ;;  %v14167_v27 = vrot.slane %v7605_v54, 5  ;;  %v14169_v24 = vld [vmem:[#allocation2 + $0x1a0] sm:$0x1]  ;;  %9146 = vmatpush.bf16.msra.mxu1 %v11391_v30 }
 0x406   :  { %v3928_v6 = vpop.f32.mrf.mxu3  ;;  %v14151_v1 = vpop.f32.mrf.mxu0  ;;  %v6437_v3 = vpack.c.b16 %v6404_v11, %v6403_v38  ;;  %v7611_v52 = vrot.slane %v7609_v19, 4  ;;  %v5522_v46 = vrot.slane %v5520_v16, 5  ;;  %v6321_v57 = vrot.slane %v4778_v29, 5 }
 0x407   :  { %v14149_v59 = vadd.f32 %v3928_v6, %v12256_v63  ;;  %16014 = vst [vmem:[#allocation218_spill] sm:$0xff] %v14151_v1  ;;  %v3580_v63 = vrot.slane %v11680_v35, 5  ;;  %v7331_v6 = vld [vmem:[#allocation2 + $0x78] sm:$0xf]  ;;  %v5518_v35 = vrot.slane %v5517_v43, 4  ;;  %v10482_v17 = vrot.slane %v3395_v58, 9 }
 0x408   :  { %v7596_v53 = vshrl.u32 %v7331_v6, 16  ;;  %v7599_v18 = vshll.u32 %v7331_v6, 16  ;;  %v11681_v6 = vld [vmem:[#allocation2 + $0xb0] sm:$0x1]  ;;  %v5508_v11 = vrot.slane %v5507_v51, 4  ;;  %v6324_v30 = vrot.slane %v14169_v24, 5 }
 0x409   :  { %16013 = vst [vmem:[#allocation217_spill] sm:$0xff] %v14149_v59  ;;  %v3582_v50 = vrot.slane %v3580_v63, 4  ;;  %v3583_v38 = vrot.slane %v11681_v6, 5  ;;  %v11682_v43 = vld [vmem:[#allocation2 + $0x80] sm:$0x1]  ;;  %v7612_v51 = vor.u32 %v7611_v52, %v14167_v27  ;;  %v11389_v52 = vld [vmem:[%s15760_s3 + $0x208] sm:$0xff] }
 0x40a   :  { %v14155_v60 = vpop.f32.mrf.mxu1  ;;  %v7598_v1 = vrot.slane %v7596_v53, 4  ;;  %v7615_v16 = vshll.u32 %v11682_v43, 16  ;;  %v5523_v53 = vsel %vm11900_vm7, %v5518_v35, %v5522_v46  ;;  %v14195_v43 = vpop.f32.mrf.mxu2  ;;  %v16114_v59 = vld [vmem:[#allocation34_spill] sm:$0xff] }
 0x40b   :  { %16015 = vst [vmem:[#allocation219_spill] sm:$0xff] %v14155_v60  ;;  %3970 = vmatmul.bf16.gmra.mxu3 %v3798_v23  ;;  %v8202_v23 = vunpack.c.l.b16 %v7584_v14  ;;  %v7601_v14 = vrot.slane %v7599_v18, 5  ;;  %v4777_v60 = vld [vmem:[#allocation2 + $0x198] sm:$0xf]  ;;  %v3584_v58 = vsel %vm12456_vm14, %v3582_v50, %v3583_v38 }
 0x40c   :  { %v5525_v50 = vshrl.u32 %v4777_v60, 16  ;;  %v7617_v38 = vrot.slane %v7615_v16, 5  ;;  %16020 = vst [vmem:[#allocation224_spill] sm:$0xff] %v14195_v43  ;;  %v3750_v46 = vunpack.c.l.b16 %v3584_v58 }
 0x40d   :  { %5894 = vmatmul.bf16.gmra.mxu1 %v5658_v37  ;;  %v6005_v37 = vld [vmem:[#allocation2 + $0x198] sm:$0xe]  ;;  %v8259_v19 = vpack.c.b16 %v8203_v2, %v8202_v23  ;;  %v11390_v2 = vld [vmem:[%s15760_s3 + $0x210] sm:$0xff]  ;;  %v5528_v23 = vshll.u32 %v4777_v60, 16  ;;  %v7602_v6 = vor.u32 %v7601_v14, %v7598_v1 }
 0x40e   :  { %v3931_v28 = vpop.f32.mrf.mxu3  ;;  %6677 = vmatmul.bf16.gmra.mxu2 %v6437_v3  ;;  %v14174_v54 = vpop.f32.mrf.mxu0  ;;  %v10803_v18 = vrot.slane %v6005_v37, 9  ;;  %v6323_v3 = vrot.slane %v6321_v57, 4  ;;  %9147 = vmatpush.bf16.msra.mxu1 %v11390_v2  ;;  %v5626_v37 = vunpack.c.l.b16 %v5523_v53  ;;  %v5527_v1 = vrot.slane %v5525_v50, 4 }
 0x40f   :  { %v14172_v5 = vadd.f32 %v3931_v28, %v12276_v40  ;;  %16018 = vst [vmem:[#allocation222_spill] sm:$0xff] %v14174_v54  ;;  %v3581_v40 = vsel %vm12456_vm14, %v10482_v17, %v3580_v63  ;;  %v5534_v28 = vshll.u32 %v4778_v29, 16  ;;  %v5513_v63 = vsel %vm11900_vm7, %v5508_v11, %v14146_v7 }
 0x410   :  { %v5538_v17 = vshrl.u32 %v4778_v29, 16  ;;  %v3749_v35 = vunpack.c.l.b16 %v3581_v40  ;;  %v6322_v7 = vsel %vm12456_vm14, %v10803_v18, %v6321_v57  ;;  %v6325_v60 = vsel %vm12456_vm14, %v6323_v3, %v6324_v30  ;;  %v11683_v18 = vld [vmem:[#allocation2 + $0xb8] sm:$0xf] }
 0x411   :  { %16017 = vst [vmem:[#allocation221_spill] sm:$0xff] %v14172_v5  ;;  %8407 = vmatmul.bf16.gmra.mxu0 %v8259_v19  ;;  %v7613_v19 = vrot.slane %v7612_v51, 4  ;;  %v14201_v29 = vrot.slane %v5534_v28, 5  ;;  %v5530_v14 = vrot.slane %v5528_v23, 5  ;;  %v7603_v58 = vrot.slane %v7602_v6, 4 }
 0x412   :  { %v14176_v47 = vpop.f32.mrf.mxu1  ;;  %v5540_v16 = vrot.slane %v5538_v17, 4  ;;  %9148 = vmatpush.bf16.msra.mxu1 %v11389_v52  ;;  %v3799_v2 = vpack.c.b16 %v3750_v46, %v3749_v35  ;;  %v6405_v53 = vunpack.c.l.b16 %v6322_v7  ;;  %v6406_v57 = vunpack.c.l.b16 %v6325_v60  ;;  %v7334_v28 = vld [vmem:[#allocation2 + $0x84] sm:$0xf] }
 0x413   :  { %16019 = vst [vmem:[#allocation223_spill] sm:$0xff] %v14176_v47  ;;  %v5625_v47 = vunpack.c.l.b16 %v5513_v63  ;;  %v7618_v30 = vsel %vm11900_vm7, %v7613_v19, %v7617_v38  ;;  %v3587_v3 = vrot.slane %v11683_v18, 5  ;;  %v11684_v63 = vld [vmem:[#allocation2 + $0x88] sm:$0xf]  ;;  %v7608_v17 = vsel %vm11900_vm7, %v7603_v58, %v14167_v27 }
 0x414   :  { %v7629_v50 = vshll.u32 %v11684_v63, 16  ;;  %v7633_v23 = vshrl.u32 %v11684_v63, 16  ;;  %v5531_v52 = vor.u32 %v5530_v14, %v5527_v1  ;;  %v5541_v6 = vor.u32 %v5540_v16, %v14201_v29  ;;  %v14223_v14 = vpop.f32.mrf.mxu2  ;;  %v3396_v16 = vld [vmem:[#allocation2 + $0xb4] sm:$0xe] }
 0x415   :  { %v5544_v38 = vshll.u32 %v14169_v24, 16  ;;  %v6438_v35 = vpack.c.b16 %v6406_v57, %v6405_v53  ;;  %v8205_v46 = vunpack.c.l.b16 %v7618_v30  ;;  %v7623_v19 = vshll.u32 %v7334_v28, 16  ;;  %16024 = vst [vmem:[#allocation228_spill] sm:$0xff] %v14223_v14  ;;  %v11685_v57 = vld [vmem:[#allocation2 + $0xbc] sm:$0x1] }
 0x416   :  { %v3933_v54 = vpop.f32.mrf.mxu3  ;;  %v14206_v40 = vpop.f32.mrf.mxu0  ;;  %v8204_v60 = vunpack.c.l.b16 %v7608_v17  ;;  %v7631_v27 = vrot.slane %v7629_v50, 5  ;;  %v7635_v1 = vrot.slane %v7633_v23, 4  ;;  %v5532_v58 = vrot.slane %v5531_v52, 4 }
 0x417   :  { %v14204_v11 = vadd.f32 %v3933_v54, %v12295_v20  ;;  %16022 = vst [vmem:[#allocation226_spill] sm:$0xff] %v14206_v40  ;;  %v11388_v20 = vld [vmem:[%s15760_s3 + $0x200] sm:$0xff]  ;;  %v5659_v54 = vpack.c.b16 %v5626_v37, %v5625_v47  ;;  %v11375_v47 = vld [vmem:[%s15760_s3 + $0x198] sm:$0xff]  ;;  %v7620_v37 = vshrl.u32 %v7334_v28, 16  ;;  %v3590_v30 = vrot.slane %v11685_v57, 5 }
 0x418   :  { %9149 = vmatpush.bf16.msra.mxu1 %v11388_v20  ;;  %7078 = vmatpush.bf16.msra.mxu3 %v11375_v47  ;;  %v5542_v20 = vrot.slane %v5541_v6, 4  ;;  %v8260_v28 = vpack.c.b16 %v8205_v46, %v8204_v60  ;;  %v7625_v50 = vrot.slane %v7623_v19, 5  ;;  %v10483_v23 = vrot.slane %v3396_v16, 9  ;;  %v11686_v47 = vld [vmem:[#allocation2 + $0x8c] sm:$0x1] }
 0x419   :  { %16021 = vst [vmem:[#allocation225_spill] sm:$0xff] %v14204_v11  ;;  %v7622_v63 = vrot.slane %v7620_v37, 4  ;;  %v5537_v52 = vsel %vm11900_vm7, %v5532_v58, %v14201_v29  ;;  %v11687_v58 = vld [vmem:[#allocation2 + $0xdc] sm:$0xf]  ;;  %v16106_v11 = vld [vmem:[#allocation30_spill] sm:$0xff] }
 0x41a   :  { %v14208_v51 = vpop.f32.mrf.mxu1 }
 0x41b   :  { %16023 = vst [vmem:[#allocation227_spill] sm:$0xff] %v14208_v51  ;;  %3975 = vmatmul.bf16.gmra.mxu3 %v3799_v2  ;;  %v3589_v2 = vrot.slane %v3587_v3, 4  ;;  %v7626_v37 = vor.u32 %v7625_v50, %v7622_v63  ;;  %v7337_v50 = vld [vmem:[#allocation2 + $0x90] sm:$0xf]  ;;  %v11694_v51 = vld [vmem:[#allocation2 + $0xa4] sm:$0x1] }
 0x41c   :  { %v7687_v14 = vshll.u32 %v11694_v51, 16 }
 0x41d   :  { %5899 = vmatmul.bf16.gmra.mxu1 %v5659_v54  ;;  %v5546_v54 = vrot.slane %v5544_v38, 5  ;;  %v3591_v17 = vsel %vm12456_vm14, %v3589_v2, %v3590_v30  ;;  %v3588_v38 = vsel %vm12456_vm14, %v10483_v23, %v3587_v3  ;;  %v7627_v30 = vrot.slane %v7626_v37, 4 }
 0x41e   :  { %v3936_v7 = vpop.f32.mrf.mxu3  ;;  %6682 = vmatmul.bf16.gmra.mxu2 %v6438_v35  ;;  %v14228_v53 = vpop.f32.mrf.mxu0  ;;  %v7639_v35 = vshll.u32 %v11686_v47, 16  ;;  %v3752_v46 = vunpack.c.l.b16 %v3591_v17  ;;  %v3751_v16 = vunpack.c.l.b16 %v3588_v38  ;;  %v11688_v17 = vld [vmem:[#allocation2 + $0x94] sm:$0xf]  ;;  %v11689_v47 = vld [vmem:[#allocation2 + $0xe0] sm:$0x1]  ;;  %v7644_v37 = vshrl.u32 %v7337_v50, 16 }
 0x41f   :  { %v14226_v24 = vadd.f32 %v3936_v7, %v12308_v61  ;;  %v7636_v61 = vor.u32 %v7635_v1, %v7631_v27  ;;  %v5547_v6 = vsel %vm11900_vm7, %v5542_v20, %v5546_v54  ;;  %v5627_v7 = vunpack.c.l.b16 %v5537_v52 }
 0x420   :  { %v5628_v60 = vunpack.c.l.b16 %v5547_v6  ;;  %v7641_v29 = vrot.slane %v7639_v35, 5  ;;  %v3594_v20 = vrot.slane %v11687_v58, 5  ;;  %v3800_v3 = vpack.c.b16 %v3752_v46, %v3751_v16 }
 0x421   :  { %16025 = vst [vmem:[#allocation229_spill] sm:$0xff] %v14226_v24  ;;  %8412 = vmatmul.bf16.gmra.mxu0 %v8260_v28  ;;  %v7637_v2 = vrot.slane %v7636_v61, 4  ;;  %v3397_v28 = vld [vmem:[#allocation2 + $0xd8] sm:$0xe]  ;;  %v7653_v61 = vshll.u32 %v11688_v17, 16  ;;  %v7632_v52 = vsel %vm11900_vm7, %v7627_v30, %v7631_v27  ;;  %v3597_v35 = vrot.slane %v11689_v47, 5 }
 0x422   :  { %v14230_v18 = vpop.f32.mrf.mxu1  ;;  %v5660_v23 = vpack.c.b16 %v5628_v60, %v5627_v7  ;;  %v10484_v6 = vrot.slane %v3397_v28, 9  ;;  %v3596_v38 = vrot.slane %v3594_v20, 4  ;;  %v7378_v30 = vld [vmem:[#allocation2 + $0x14c] sm:$0x1] }
 0x423   :  { %16026 = vst [vmem:[#allocation230_spill] sm:$0xff] %v14230_v18  ;;  %v7642_v63 = vsel %vm11900_vm7, %v7637_v2, %v7641_v29  ;;  %v7655_v60 = vrot.slane %v7653_v61, 5  ;;  %v8206_v29 = vunpack.c.l.b16 %v7632_v52  ;;  %v8620_v61 = vld [vmem:[#allocation2 + $0x144] sm:$0xe] }
 0x424   :  { %v8207_v46 = vunpack.c.l.b16 %v7642_v63  ;;  %v3598_v27 = vsel %vm12456_vm14, %v3596_v38, %v3597_v35  ;;  %v7646_v63 = vrot.slane %v7644_v37, 4  ;;  %v11690_v38 = vld [vmem:[#allocation2 + $0x98] sm:$0x1] }
 0x425   :  { %v7663_v35 = vshll.u32 %v11690_v38, 16 }
 0x426   :  { %v3938_v19 = vpop.f32.mrf.mxu3  ;;  %v14244_v57 = vpop.f32.mrf.mxu0 }
 0x427   :  { %v14242_v1 = vadd.f32 %v3938_v19, %v12318_v45  ;;  %v7657_v45 = vshrl.u32 %v11688_v17, 16  ;;  %v7647_v19 = vshll.u32 %v7337_v50, 16  ;;  %v7377_v17 = vld [vmem:[#allocation2 + $0x148] sm:$0xf]  ;;  %v7665_v38 = vrot.slane %v7663_v35, 5 }
 0x428   :  { %v8888_v47 = vrot.slane %v7377_v17, 5 }
 0x429   :  { %16027 = vst [vmem:[#allocation231_spill] sm:$0xff] %v14242_v1  ;;  %v7659_v16 = vrot.slane %v7657_v45, 4  ;;  %v7649_v50 = vrot.slane %v7647_v19, 5 }
 0x42a   :  { %v14246_v54 = vpop.f32.mrf.mxu1  ;;  %v8890_v37 = vrot.slane %v8888_v47, 4 }
 0x42b   :  { %16028 = vst [vmem:[#allocation232_spill] sm:$0xff] %v14246_v54  ;;  %3980 = vmatmul.bf16.gmra.mxu3 %v3800_v3  ;;  %v3595_v3 = vsel %vm12456_vm14, %v10484_v6, %v3594_v20  ;;  %v7660_v45 = vor.u32 %v7659_v16, %v7655_v60  ;;  %v11401_v20 = vld [vmem:[%s15761_s5 + $0x28] sm:$0xff]  ;;  %v8891_v6 = vrot.slane %v7378_v30, 5  ;;  %v7650_v19 = vor.u32 %v7649_v50, %v7646_v63 }
 0x42c   :  { %v3753_v52 = vunpack.c.l.b16 %v3595_v3  ;;  %9609 = vmatpush.bf16.msra.mxu2 %v11401_v20  ;;  %v11691_v50 = vld [vmem:[#allocation2 + $0xe8] sm:$0xf]  ;;  %v7340_v20 = vld [vmem:[#allocation2 + $0x9c] sm:$0xf] }
 0x42d   :  { %5904 = vmatmul.bf16.gmra.mxu1 %v5660_v23  ;;  %v8261_v23 = vpack.c.b16 %v8207_v46, %v8206_v29  ;;  %v8892_v3 = vsel %vm12456_vm14, %v8890_v37, %v8891_v6  ;;  %v11692_v6 = vld [vmem:[#allocation2 + $0xa0] sm:$0xf]  ;;  %v7668_v35 = vshrl.u32 %v7340_v20, 16 }
 0x42e   :  { %v3941_v7 = vpop.f32.mrf.mxu3  ;;  %v14255_v58 = vpop.f32.mrf.mxu0  ;;  %v9013_v17 = vunpack.c.l.b16 %v8892_v3 }
 0x42f   :  { %v14253_v2 = vadd.f32 %v3941_v7, %v12334_v34  ;;  %v11099_v34 = vrot.slane %v8620_v61, 9  ;;  %v3754_v7 = vunpack.c.l.b16 %v3598_v27  ;;  %v7661_v61 = vrot.slane %v7660_v45, 4 }
 0x430   :  { %v3601_v45 = vrot.slane %v11691_v50, 5 }
 0x431   :  { %16029 = vst [vmem:[#allocation233_spill] sm:$0xff] %v14253_v2  ;;  %8417 = vmatmul.bf16.gmra.mxu0 %v8261_v23  ;;  %v8889_v46 = vsel %vm12456_vm14, %v11099_v34, %v8888_v47  ;;  %v3801_v23 = vpack.c.b16 %v3754_v7, %v3753_v52  ;;  %v7651_v34 = vrot.slane %v7650_v19, 4  ;;  %v7666_v63 = vsel %vm11900_vm7, %v7661_v61, %v7665_v38  ;;  %v3398_v38 = vld [vmem:[#allocation2 + $0xe4] sm:$0xe] }
 0x432   :  { %v14261_v28 = vpop.f32.mrf.mxu1  ;;  %v9012_v29 = vunpack.c.l.b16 %v8889_v46  ;;  %v7677_v46 = vshll.u32 %v11692_v6, 16  ;;  %v8209_v7 = vunpack.c.l.b16 %v7666_v63  ;;  %v3603_v19 = vrot.slane %v3601_v45, 4  ;;  %v8621_v63 = vld [vmem:[#allocation2 + $0x150] sm:$0xe] }
 0x433   :  { %16030 = vst [vmem:[#allocation234_spill] sm:$0xff] %v14261_v28  ;;  %v7656_v52 = vsel %vm11900_vm7, %v7651_v34, %v7655_v60  ;;  %v7670_v34 = vrot.slane %v7668_v35, 4 }
 0x434   :  { %v14277_v47 = vpack.c.b16 %v9013_v17, %v9012_v29  ;;  %v7671_v29 = vshll.u32 %v7340_v20, 16  ;;  %v8208_v17 = vunpack.c.l.b16 %v7656_v52  ;;  %v10485_v20 = vrot.slane %v3398_v38, 9 }
 0x435   :  { %v11100_v52 = vrot.slane %v8621_v63, 9  ;;  %v7343_v63 = vld [vmem:[#allocation2 + $0xa8] sm:$0xf] }
 0x436   :  { %v3943_v16 = vpop.f32.mrf.mxu3  ;;  %v14273_v30 = vpop.f32.mrf.mxu0  ;;  %v8262_v60 = vpack.c.b16 %v8209_v7, %v8208_v17 }
 0x437   :  { %v14271_v27 = vadd.f32 %v3943_v16, %v12357_v8  ;;  %v7681_v8 = vshrl.u32 %v11692_v6, 16  ;;  %v7679_v16 = vrot.slane %v7677_v46, 5 }
 0x439   :  { %16031 = vst [vmem:[#allocation235_spill] sm:$0xff] %v14271_v27  ;;  %v7683_v3 = vrot.slane %v7681_v8, 4 }
 0x43a   :  { %v14275_v40 = vpop.f32.mrf.mxu1 }
 0x43b   :  { %16032 = vst [vmem:[#allocation236_spill] sm:$0xff] %v14275_v40  ;;  %3985 = vmatmul.bf16.gmra.mxu3 %v3801_v23  ;;  %v11693_v23 = vld [vmem:[#allocation2 + $0xec] sm:$0x1]  ;;  %v7381_v40 = vld [vmem:[#allocation2 + $0x158] sm:$0x1]  ;;  %v7684_v8 = vor.u32 %v7683_v3, %v7679_v16 }
 0x43c   :  { %v3604_v6 = vrot.slane %v11693_v23, 5  ;;  %v8898_v18 = vrot.slane %v7381_v40, 5  ;;  %v3602_v23 = vsel %vm12456_vm14, %v10485_v20, %v3601_v45  ;;  %v7689_v45 = vrot.slane %v7687_v14, 5 }
 0x43d   :  { %9150 = vmatmul.bf16.vlgmr.msra.gmra.mxu1 %v13145_v4  ;;  %v7380_v4 = vld [vmem:[#allocation2 + $0x154] sm:$0xf]  ;;  %v3755_v40 = vunpack.c.l.b16 %v3602_v23 }
 0x43e   :  { %v3946_v37 = vpop.f32.mrf.mxu3  ;;  %v14287_v50 = vpop.f32.mrf.mxu0  ;;  %v8895_v54 = vrot.slane %v7380_v4, 5  ;;  %v3605_v46 = vsel %vm12456_vm14, %v3603_v19, %v3604_v6 }
 0x43f   :  { %v14285_v61 = vadd.f32 %v3946_v37, %v12366_v42  ;;  %v7673_v42 = vrot.slane %v7671_v29, 5  ;;  %v7685_v29 = vrot.slane %v7684_v8, 4 }
 0x440   :  { %v8897_v37 = vrot.slane %v8895_v54, 4  ;;  %v8896_v7 = vsel %vm12456_vm14, %v11100_v52, %v8895_v54  ;;  %v11695_v54 = vld [vmem:[#allocation2 + $0xac] sm:$0xf]  ;;  %v7692_v52 = vshrl.u32 %v7343_v63, 16 }
 0x441   :  { %16033 = vst [vmem:[#allocation237_spill] sm:$0xff] %v14285_v61  ;;  %8422 = vmatmul.bf16.gmra.mxu0 %v8262_v60  ;;  %v7674_v19 = vor.u32 %v7673_v42, %v7670_v34  ;;  %v9014_v3 = vunpack.c.l.b16 %v8896_v7  ;;  %v7701_v20 = vshll.u32 %v11695_v54, 16  ;;  %v7690_v42 = vsel %vm11900_vm7, %v7685_v29, %v7689_v45 }
 0x442   :  { %v14289_v28 = vpop.f32.mrf.mxu1  ;;  %v8899_v35 = vsel %vm12456_vm14, %v8897_v37, %v8898_v18  ;;  %v7695_v37 = vshll.u32 %v7343_v63, 16 }
 0x443   :  { %16034 = vst [vmem:[#allocation238_spill] sm:$0xff] %v14289_v28  ;;  %v3756_v28 = vunpack.c.l.b16 %v3605_v46  ;;  %v9015_v6 = vunpack.c.l.b16 %v8899_v35  ;;  %v7705_v46 = vshrl.u32 %v11695_v54, 16  ;;  %v7675_v34 = vrot.slane %v7674_v19, 4 }
 0x444   :  { %v14313_v23 = vrot.slane %v7701_v20, 5 }
 0x445   :  { %v3802_v60 = vpack.c.b16 %v3756_v28, %v3755_v40  ;;  %v14306_v18 = vpack.c.b16 %v9015_v6, %v9014_v3  ;;  %v7680_v14 = vsel %vm11900_vm7, %v7675_v34, %v7679_v16  ;;  %v8211_v28 = vunpack.c.l.b16 %v7690_v42  ;;  %v7383_v40 = vld [vmem:[#allocation2 + $0x160] sm:$0xf]  ;;  %v7384_v6 = vld [vmem:[#allocation2 + $0x164] sm:$0x1] }
 0x446   :  { %v3948_v17 = vpop.f32.mrf.mxu3  ;;  %v14302_v4 = vpop.f32.mrf.mxu0  ;;  %v7707_v7 = vrot.slane %v7705_v46, 4  ;;  %v8210_v29 = vunpack.c.l.b16 %v7680_v14  ;;  %v7694_v16 = vrot.slane %v7692_v52, 4  ;;  %v8902_v54 = vrot.slane %v7383_v40, 5  ;;  %v11698_v52 = vld [vmem:[#allocation2 + $0xb0] sm:$0x1] }
 0x447   :  { %v14300_v38 = vadd.f32 %v3948_v17, %v12376_v21  ;;  %v11696_v21 = vld [vmem:[#allocation2 + $0xf4] sm:$0xf]  ;;  %v3399_v17 = vld [vmem:[#allocation2 + $0xf0] sm:$0xe]  ;;  %v7697_v46 = vrot.slane %v7695_v37, 5  ;;  %v7711_v40 = vshll.u32 %v11698_v52, 16 }
 0x448   :  { %v3608_v8 = vrot.slane %v11696_v21, 5  ;;  %v8263_v63 = vpack.c.b16 %v8211_v28, %v8210_v29  ;;  %v10486_v20 = vrot.slane %v3399_v17, 9  ;;  %v7708_v42 = vor.u32 %v7707_v7, %v14313_v23  ;;  %v8622_v21 = vld [vmem:[#allocation2 + $0x15c] sm:$0xe] }
 0x449   :  { %16035 = vst [vmem:[#allocation239_spill] sm:$0xff] %v14300_v38  ;;  %v11101_v14 = vrot.slane %v8622_v21, 9  ;;  %v7698_v17 = vor.u32 %v7697_v46, %v7694_v16  ;;  %v16040_v21 = vld [vmem:[#allocation5_spill] sm:$0xff] }
 0x44a   :  { %v14304_v51 = vpop.f32.mrf.mxu1  ;;  %v3610_v19 = vrot.slane %v3608_v8, 4  ;;  %v11699_v16 = vld [vmem:[#allocation2 + $0x100] sm:$0xf] }
 0x44b   :  { %16036 = vst [vmem:[#allocation240_spill] sm:$0xff] %v14304_v51  ;;  %3990 = vmatmul.bf16.gmra.mxu3 %v3802_v60  ;;  %v8905_v51 = vrot.slane %v7384_v6, 5  ;;  %v8903_v28 = vsel %vm12456_vm14, %v11101_v14, %v8902_v54  ;;  %v7699_v14 = vrot.slane %v7698_v17, 4  ;;  %v3615_v46 = vrot.slane %v11699_v16, 5  ;;  %v11701_v16 = vld [vmem:[#allocation2 + $0x104] sm:$0x1] }
 0x44c   :  { %v9016_v29 = vunpack.c.l.b16 %v8903_v28  ;;  %v8625_v38 = vld [vmem:[#allocation2 + $0x180] sm:$0xe] }
 0x44d   :  { %9155 = vmatmul.bf16.gmra.mxu1 %v13168_v41  ;;  %v11697_v41 = vld [vmem:[#allocation2 + $0xf8] sm:$0x1] }
 0x44e   :  { %v3951_v35 = vpop.f32.mrf.mxu3  ;;  %v14318_v45 = vpop.f32.mrf.mxu0  ;;  %v3611_v60 = vrot.slane %v11697_v41, 5  ;;  %v3609_v41 = vsel %vm12456_vm14, %v10486_v20, %v3608_v8  ;;  %v7713_v20 = vrot.slane %v7711_v40, 5 }
 0x44f   :  { %v14316_v3 = vadd.f32 %v3951_v35, %v12389_v9  ;;  %16038 = vst [vmem:[#allocation242_spill] sm:$0xff] %v14318_v45  ;;  %v8904_v35 = vrot.slane %v8902_v54, 4  ;;  %v7975_v45 = vshll.u32 %v11732_v31, 16 }
 0x450   :  { %v3612_v9 = vsel %vm12456_vm14, %v3610_v19, %v3611_v60  ;;  %v7709_v60 = vrot.slane %v7708_v42, 4  ;;  %v11700_v42 = vld [vmem:[#allocation2 + $0xb8] sm:$0xf] }
 0x451   :  { %16037 = vst [vmem:[#allocation241_spill] sm:$0xff] %v14316_v3  ;;  %8427 = vmatmul.bf16.gmra.mxu0 %v8263_v63  ;;  %v8906_v37 = vsel %vm12456_vm14, %v8904_v35, %v8905_v51  ;;  %v3758_v7 = vunpack.c.l.b16 %v3612_v9  ;;  %v3757_v63 = vunpack.c.l.b16 %v3609_v41  ;;  %v7346_v9 = vld [vmem:[#allocation2 + $0xb4] sm:$0xf]  ;;  %v7725_v35 = vshll.u32 %v11700_v42, 16 }
 0x452   :  { %v14320_v34 = vpop.f32.mrf.mxu1  ;;  %v7714_v51 = vsel %vm11900_vm7, %v7709_v60, %v7713_v20  ;;  %v7729_v28 = vshrl.u32 %v11700_v42, 16  ;;  %v7704_v41 = vsel %vm11900_vm7, %v7699_v14, %v14313_v23  ;;  %v3618_v42 = vrot.slane %v11701_v16, 5 }
 0x453   :  { %16039 = vst [vmem:[#allocation243_spill] sm:$0xff] %v14320_v34  ;;  %v9017_v34 = vunpack.c.l.b16 %v8906_v37  ;;  %v3803_v54 = vpack.c.b16 %v3758_v7, %v3757_v63  ;;  %v8213_v40 = vunpack.c.l.b16 %v7714_v51  ;;  %v7716_v37 = vshrl.u32 %v7346_v9, 16 }
 0x454   :  { %v7719_v7 = vshll.u32 %v7346_v9, 16  ;;  %v7731_v60 = vrot.slane %v7729_v28, 4  ;;  %v8212_v20 = vunpack.c.l.b16 %v7704_v41  ;;  %v11702_v41 = vld [vmem:[#allocation2 + $0xbc] sm:$0x1] }
 0x455   :  { %v14334_v43 = vpack.c.b16 %v9017_v34, %v9016_v29  ;;  %v11374_v34 = vld [vmem:[%s15760_s3 + $0x190] sm:$0xff]  ;;  %v3617_v29 = vrot.slane %v3615_v46, 4  ;;  %v7718_v14 = vrot.slane %v7716_v37, 4 }
 0x456   :  { %v3953_v19 = vpop.f32.mrf.mxu3  ;;  %v14336_v8 = vpop.f32.mrf.mxu0  ;;  %7079 = vmatpush.bf16.msra.mxu3 %v11374_v34  ;;  %v8264_v23 = vpack.c.b16 %v8213_v40, %v8212_v20  ;;  %v7721_v51 = vrot.slane %v7719_v7, 5 }
 0x457   :  { %v14332_v6 = vadd.f32 %v3953_v19, %v16040_v21  ;;  %16042 = vst [vmem:[#allocation244_spill] sm:$0xff] %v14336_v8  ;;  %v7727_v19 = vrot.slane %v7725_v35, 5  ;;  %v16044_v21 = vld [vmem:[#allocation6_spill] sm:$0xff]  ;;  %v3619_v34 = vsel %vm12456_vm14, %v3617_v29, %v3618_v42  ;;  %v7349_v42 = vld [vmem:[#allocation2 + $0xc0] sm:$0xf] }
 0x458   :  { %v7722_v16 = vor.u32 %v7721_v51, %v7718_v14 }
 0x459   :  { %16041 = vst [vmem:[#allocation5_spill] sm:$0xff] %v14332_v6  ;;  %v7732_v35 = vor.u32 %v7731_v60, %v7727_v19 }
 0x45a   :  { %v14338_v52 = vpop.f32.mrf.mxu1  ;;  %v7723_v29 = vrot.slane %v7722_v16, 4 }
 0x45b   :  { %16043 = vst [vmem:[#allocation245_spill] sm:$0xff] %v14338_v52  ;;  %3995 = vmatmul.bf16.gmra.mxu3 %v3803_v54  ;;  %v3400_v54 = vld [vmem:[#allocation2 + $0xfc] sm:$0xe] }
 0x45c   :  { %v10487_v9 = vrot.slane %v3400_v54, 9  ;;  %v11703_v54 = vld [vmem:[#allocation2 + $0x10c] sm:$0xf] }
 0x45d   :  { %9160 = vmatmul.bf16.gmra.mxu1 %v13172_v36 }
 0x45e   :  { %v3956_v17 = vpop.f32.mrf.mxu3  ;;  %v14354_v52 = vpop.f32.mrf.mxu0  ;;  %v3616_v28 = vsel %vm12456_vm14, %v10487_v9, %v3615_v46  ;;  %v3622_v46 = vrot.slane %v11703_v54, 5  ;;  %v11705_v54 = vld [vmem:[#allocation2 + $0x110] sm:$0x1] }
 0x45f   :  { %v14350_v63 = vadd.f32 %v3956_v17, %v16044_v21  ;;  %16047 = vst [vmem:[#allocation247_spill] sm:$0xff] %v14354_v52  ;;  %v7735_v17 = vshll.u32 %v11702_v41, 16  ;;  %v3760_v21 = vunpack.c.l.b16 %v3619_v34  ;;  %v3759_v40 = vunpack.c.l.b16 %v3616_v28  ;;  %v14597_v52 = vld [vmem:[#allocation2 + $0x134] sm:$0x1] }
 0x460   :  { %v7740_v34 = vshrl.u32 %v7349_v42, 16  ;;  %v3624_v41 = vrot.slane %v3622_v46, 4 }
 0x461   :  { %16045 = vst [vmem:[#allocation6_spill] sm:$0xff] %v14350_v63  ;;  %8432 = vmatmul.bf16.gmra.mxu0 %v8264_v23  ;;  %v7737_v37 = vrot.slane %v7735_v17, 5  ;;  %v3804_v20 = vpack.c.b16 %v3760_v21, %v3759_v40  ;;  %v11704_v23 = vld [vmem:[#allocation2 + $0xc4] sm:$0xf]  ;;  %v16052_v21 = vld [vmem:[#allocation8_spill] sm:$0xff] }
 0x462   :  { %v14352_v36 = vpop.f32.mrf.mxu1  ;;  %v7749_v9 = vshll.u32 %v11704_v23, 16  ;;  %v7753_v14 = vshrl.u32 %v11704_v23, 16  ;;  %v3625_v23 = vrot.slane %v11705_v54, 5 }
 0x463   :  { %16046 = vst [vmem:[#allocation246_spill] sm:$0xff] %v14352_v36  ;;  %v7733_v36 = vrot.slane %v7732_v35, 4  ;;  %v7743_v35 = vshll.u32 %v7349_v42, 16  ;;  %v11706_v42 = vld [vmem:[#allocation2 + $0xc8] sm:$0x1] }
 0x464   :  { %v7755_v17 = vrot.slane %v7753_v14, 4  ;;  %v11400_v14 = vld [vmem:[%s15761_s5 + $0x20] sm:$0xff] }
 0x465   :  { %v7738_v60 = vsel %vm11900_vm7, %v7733_v36, %v7737_v37  ;;  %v7751_v36 = vrot.slane %v7749_v9, 5  ;;  %v3401_v37 = vld [vmem:[#allocation2 + $0x108] sm:$0xe]  ;;  %v7759_v9 = vshll.u32 %v11706_v42, 16  ;;  %9610 = vmatpush.bf16.msra.mxu2 %v11400_v14  ;;  %v11707_v14 = vld [vmem:[#allocation2 + $0x118] sm:$0xf] }
 0x466   :  { %v3958_v12 = vpop.f32.mrf.mxu3  ;;  %v14367_v51 = vpop.f32.mrf.mxu0 }
 0x467   :  { %v14361_v63 = vadd.f32 %v3958_v12, %v16048_v15  ;;  %16051 = vst [vmem:[#allocation249_spill] sm:$0xff] %v14367_v51  ;;  %v7728_v15 = vsel %vm11900_vm7, %v7723_v29, %v7727_v19  ;;  %v8215_v12 = vunpack.c.l.b16 %v7738_v60  ;;  %v10488_v19 = vrot.slane %v3401_v37, 9 }
 0x468   :  { %v8214_v40 = vunpack.c.l.b16 %v7728_v15  ;;  %v3626_v29 = vsel %vm12456_vm14, %v3624_v41, %v3625_v23  ;;  %v7756_v60 = vor.u32 %v7755_v17, %v7751_v36  ;;  %v7761_v23 = vrot.slane %v7759_v9, 5  ;;  %v14400_v9 = vld [vmem:[#allocation2 + $0xd4] sm:$0x1] }
 0x469   :  { %16049 = vst [vmem:[#allocation7_spill] sm:$0xff] %v14361_v63  ;;  %v7745_v63 = vrot.slane %v7743_v35, 5  ;;  %v3623_v15 = vsel %vm12456_vm14, %v10488_v19, %v3622_v46  ;;  %v7352_v35 = vld [vmem:[#allocation2 + $0xcc] sm:$0xf] }
 0x46a   :  { %v14363_v7 = vpop.f32.mrf.mxu1  ;;  %v7757_v17 = vrot.slane %v7756_v60, 4  ;;  %v3761_v54 = vunpack.c.l.b16 %v3623_v15  ;;  %v7767_v42 = vshll.u32 %v7352_v35, 16  ;;  %v3629_v60 = vrot.slane %v11707_v14, 5  ;;  %v11708_v14 = vld [vmem:[#allocation2 + $0x11c] sm:$0x1] }
 0x46b   :  { %16050 = vst [vmem:[#allocation248_spill] sm:$0xff] %v14363_v7  ;;  %4000 = vmatmul.bf16.gmra.mxu3 %v3804_v20  ;;  %v7742_v7 = vrot.slane %v7740_v34, 4  ;;  %v3632_v6 = vrot.slane %v11708_v14, 5 }
 0x46d   :  { %9165 = vmatmul.bf16.gmra.mxu1 %v13205_v13  ;;  %v8265_v13 = vpack.c.b16 %v8215_v12, %v8214_v40  ;;  %v3762_v12 = vunpack.c.l.b16 %v3626_v29  ;;  %v7746_v34 = vor.u32 %v7745_v63, %v7742_v7  ;;  %v16056_v40 = vld [vmem:[#allocation9_spill] sm:$0xff]  ;;  %v7762_v29 = vsel %vm11900_vm7, %v7757_v17, %v7761_v23  ;;  %v16060_v17 = vld [vmem:[#allocation10_spill] sm:$0xff] }
 0x46e   :  { %v3961_v28 = vpop.f32.mrf.mxu3 }
 0x46f   :  { %v14373_v16 = vadd.f32 %v3961_v28, %v16052_v21  ;;  %v14384_v28 = vpop.f32.mrf.mxu0  ;;  %v14386_v21 = vld [vmem:[#allocation2 + $0xd0] sm:$0xf]  ;;  %v3805_v63 = vpack.c.b16 %v3762_v12, %v3761_v54  ;;  %v7747_v7 = vrot.slane %v7746_v34, 4  ;;  %v3402_v34 = vld [vmem:[#allocation2 + $0x114] sm:$0xe]  ;;  %v3631_v54 = vrot.slane %v3629_v60, 4 }
 0x470   :  { %16055 = vst [vmem:[#allocation251_spill] sm:$0xff] %v14384_v28  ;;  %v7777_v46 = vshrl.u32 %v14386_v21, 16  ;;  %v10489_v3 = vrot.slane %v3402_v34, 9 }
 0x471   :  { %16053 = vst [vmem:[#allocation8_spill] sm:$0xff] %v14373_v16  ;;  %8437 = vmatmul.bf16.gmra.mxu0 %v8265_v13  ;;  %v7764_v13 = vshrl.u32 %v7352_v35, 16  ;;  %v7752_v15 = vsel %vm11900_vm7, %v7747_v7, %v7751_v36  ;;  %v7783_v36 = vshll.u32 %v14400_v9, 16  ;;  %v7392_v7 = vld [vmem:[#allocation2 + $0x184] sm:$0xf]  ;;  %v3633_v61 = vsel %vm12456_vm14, %v3631_v54, %v3632_v6 }
 0x472   :  { %v14375_v20 = vpop.f32.mrf.mxu1 }
 0x473   :  { %16054 = vst [vmem:[#allocation250_spill] sm:$0xff] %v14375_v20  ;;  %v7773_v20 = vshll.u32 %v14386_v21, 16  ;;  %v7766_v35 = vrot.slane %v7764_v13, 4  ;;  %v7785_v27 = vrot.slane %v7783_v36, 5 }
 0x476   :  { %v3963_v41 = vpop.f32.mrf.mxu3 }
 0x477   :  { %v14389_v37 = vadd.f32 %v3963_v41, %v16056_v40  ;;  %v7769_v41 = vrot.slane %v7767_v42, 5  ;;  %v7775_v40 = vrot.slane %v7773_v20, 5  ;;  %v14402_v16 = vpop.f32.mrf.mxu0  ;;  %v8923_v20 = vrot.slane %v7392_v7, 5 }
 0x478   :  { %16059 = vst [vmem:[#allocation253_spill] sm:$0xff] %v14402_v16 }
 0x479   :  { %16057 = vst [vmem:[#allocation9_spill] sm:$0xff] %v14389_v37  ;;  %v7779_v37 = vrot.slane %v7777_v46, 4  ;;  %v7770_v13 = vor.u32 %v7769_v41, %v7766_v35  ;;  %v3764_v41 = vunpack.c.l.b16 %v3633_v61 }
 0x47a   :  { %v14393_v19 = vpop.f32.mrf.mxu1 }
 0x47b   :  { %16058 = vst [vmem:[#allocation252_spill] sm:$0xff] %v14393_v19  ;;  %4005 = vmatmul.bf16.gmra.mxu3 %v3805_v63  ;;  %v8217_v19 = vunpack.c.l.b16 %v7762_v29  ;;  %v8216_v63 = vunpack.c.l.b16 %v7752_v15  ;;  %v7780_v42 = vor.u32 %v7779_v37, %v7775_v40  ;;  %v7771_v14 = vrot.slane %v7770_v13, 4 }
 0x47d   :  { %9170 = vmatmul.bf16.gmra.mxu1 %v13242_v44  ;;  %v7393_v44 = vld [vmem:[#allocation2 + $0x188] sm:$0x1]  ;;  %v8266_v29 = vpack.c.b16 %v8217_v19, %v8216_v63  ;;  %v7781_v35 = vrot.slane %v7780_v42, 4  ;;  %v7355_v42 = vld [vmem:[#allocation2 + $0xf0] sm:$0xf] }
 0x47e   :  { %v3966_v12 = vpop.f32.mrf.mxu3  ;;  %v8926_v15 = vrot.slane %v7393_v44, 5 }
 0x47f   :  { %v14405_v23 = vadd.f32 %v3966_v12, %v16060_v17  ;;  %v11104_v12 = vrot.slane %v8625_v38, 9  ;;  %v8925_v17 = vrot.slane %v8923_v20, 4  ;;  %v16063_v38 = vld [vmem:[#allocation11_spill] sm:$0xff]  ;;  %v14427_v36 = vpop.f32.mrf.mxu0 }
 0x480   :  { %16066 = vst [vmem:[#allocation256_spill] sm:$0xff] %v14427_v36 }
 0x481   :  { %16061 = vst [vmem:[#allocation10_spill] sm:$0xff] %v14405_v23  ;;  %8442 = vmatmul.bf16.gmra.mxu0 %v8266_v29  ;;  %v3630_v23 = vsel %vm12456_vm14, %v10489_v3, %v3629_v60  ;;  %v8924_v37 = vsel %vm12456_vm14, %v11104_v12, %v8923_v20  ;;  %v8927_v19 = vsel %vm12456_vm14, %v8925_v17, %v8926_v15  ;;  %v11709_v20 = vld [vmem:[#allocation2 + $0x124] sm:$0xf]  ;;  %v11710_v12 = vld [vmem:[#allocation2 + $0xf4] sm:$0xf] }
 0x482   :  { %v14408_v46 = vpop.f32.mrf.mxu1  ;;  %v9022_v34 = vunpack.c.l.b16 %v8924_v37  ;;  %v9023_v63 = vunpack.c.l.b16 %v8927_v19  ;;  %v3763_v7 = vunpack.c.l.b16 %v3630_v23  ;;  %v7776_v3 = vsel %vm11900_vm7, %v7771_v14, %v7775_v40 }
 0x483   :  { %16062 = vst [vmem:[#allocation254_spill] sm:$0xff] %v14408_v46  ;;  %v7786_v60 = vsel %vm11900_vm7, %v7781_v35, %v7785_v27  ;;  %v3636_v29 = vrot.slane %v11709_v20, 5  ;;  %v7797_v17 = vshll.u32 %v11710_v12, 16  ;;  %v7801_v15 = vshrl.u32 %v11710_v12, 16  ;;  %v7395_v12 = vld [vmem:[#allocation2 + $0x190] sm:$0xf] }
 0x484   :  { %v14421_v44 = vpack.c.b16 %v9023_v63, %v9022_v34  ;;  %v3806_v61 = vpack.c.b16 %v3764_v41, %v3763_v7  ;;  %v8218_v23 = vunpack.c.l.b16 %v7776_v3  ;;  %v8219_v37 = vunpack.c.l.b16 %v7786_v60  ;;  %v16068_v63 = vld [vmem:[#allocation12_spill] sm:$0xff]  ;;  %v11711_v7 = vld [vmem:[#allocation2 + $0x128] sm:$0x1]  ;;  %v7396_v60 = vld [vmem:[#allocation2 + $0x194] sm:$0x1] }
 0x485   :  { %v7788_v40 = vshrl.u32 %v7355_v42, 16  ;;  %v7791_v14 = vshll.u32 %v7355_v42, 16  ;;  %v3638_v27 = vrot.slane %v3636_v29, 4  ;;  %v7799_v35 = vrot.slane %v7797_v17, 5 }
 0x486   :  { %v3968_v6 = vpop.f32.mrf.mxu3  ;;  %16065 = vst [vmem:[#allocation255_spill] sm:$0xff] %v14421_v44  ;;  %v7803_v34 = vrot.slane %v7801_v15, 4  ;;  %v8267_v41 = vpack.c.b16 %v8219_v37, %v8218_v23  ;;  %v3639_v20 = vrot.slane %v11711_v7, 5  ;;  %v8930_v46 = vrot.slane %v7395_v12, 5 }
 0x487   :  { %v14419_v54 = vadd.f32 %v3968_v6, %v16063_v38  ;;  %v3403_v38 = vld [vmem:[#allocation2 + $0x120] sm:$0xe]  ;;  %v7793_v3 = vrot.slane %v7791_v14, 5  ;;  %v8933_v37 = vrot.slane %v7396_v60, 5 }
 0x488   :  { %v10490_v42 = vrot.slane %v3403_v38, 9  ;;  %v3640_v17 = vsel %vm12456_vm14, %v3638_v27, %v3639_v20  ;;  %v7804_v15 = vor.u32 %v7803_v34, %v7799_v35  ;;  %v8932_v23 = vrot.slane %v8930_v46, 4 }
 0x489   :  { %16064 = vst [vmem:[#allocation11_spill] sm:$0xff] %v14419_v54  ;;  %v3766_v12 = vunpack.c.l.b16 %v3640_v17  ;;  %v7358_v17 = vld [vmem:[#allocation2 + $0xfc] sm:$0xf] }
 0x48a   :  { %v14429_v13 = vpop.f32.mrf.mxu1  ;;  %v8934_v27 = vsel %vm12456_vm14, %v8932_v23, %v8933_v37  ;;  %v11714_v23 = vld [vmem:[#allocation2 + $0x100] sm:$0xf] }
 0x48b   :  { %16067 = vst [vmem:[#allocation257_spill] sm:$0xff] %v14429_v13  ;;  %4010 = vmatmul.bf16.gmra.mxu3 %v3806_v61  ;;  %v7790_v13 = vrot.slane %v7788_v40, 4  ;;  %v3637_v40 = vsel %vm12456_vm14, %v10490_v42, %v3636_v29  ;;  %v7825_v37 = vshrl.u32 %v11714_v23, 16 }
 0x48c   :  { %v3765_v60 = vunpack.c.l.b16 %v3637_v40  ;;  %v11373_v40 = vld [vmem:[%s15760_s3 + $0x188] sm:$0xff] }
 0x48d   :  { %9175 = vmatmul.bf16.gmra.mxu1 %v13279_v49  ;;  %v8626_v49 = vld [vmem:[#allocation2 + $0x18c] sm:$0xe]  ;;  %v7794_v38 = vor.u32 %v7793_v3, %v7790_v13  ;;  %v11713_v13 = vld [vmem:[#allocation2 + $0x130] sm:$0xf]  ;;  %7080 = vmatpush.bf16.msra.mxu3 %v11373_v40 }
 0x48e   :  { %v3971_v19 = vpop.f32.mrf.mxu3  ;;  %v11105_v54 = vrot.slane %v8626_v49, 9  ;;  %v7805_v49 = vrot.slane %v7804_v15, 4  ;;  %v3643_v3 = vrot.slane %v11713_v13, 5  ;;  %v7821_v15 = vshll.u32 %v11714_v23, 16  ;;  %v11715_v13 = vld [vmem:[#allocation2 + $0x134] sm:$0x1] }
 0x48f   :  { %v14433_v6 = vadd.f32 %v3971_v19, %v16068_v63  ;;  %v14439_v19 = vpop.f32.mrf.mxu0  ;;  %v11712_v63 = vld [vmem:[#allocation2 + $0xf8] sm:$0x1] }
 0x490   :  { %16071 = vst [vmem:[#allocation259_spill] sm:$0xff] %v14439_v19  ;;  %v7807_v7 = vshll.u32 %v11712_v63, 16  ;;  %v8931_v14 = vsel %vm12456_vm14, %v11105_v54, %v8930_v46  ;;  %v3807_v63 = vpack.c.b16 %v3766_v12, %v3765_v60  ;;  %v7795_v46 = vrot.slane %v7794_v38, 4 }
 0x491   :  { %16069 = vst [vmem:[#allocation12_spill] sm:$0xff] %v14433_v6  ;;  %8447 = vmatmul.bf16.gmra.mxu0 %v8267_v41  ;;  %v9024_v34 = vunpack.c.l.b16 %v8931_v14  ;;  %v16072_v41 = vld [vmem:[#allocation13_spill] sm:$0xff]  ;;  %v7815_v12 = vshll.u32 %v7358_v17, 16 }
 0x492   :  { %v14435_v61 = vpop.f32.mrf.mxu1  ;;  %v7809_v19 = vrot.slane %v7807_v7, 5 }
 0x493   :  { %16070 = vst [vmem:[#allocation258_spill] sm:$0xff] %v14435_v61  ;;  %v9025_v61 = vunpack.c.l.b16 %v8934_v27  ;;  %v3645_v27 = vrot.slane %v3643_v3, 4 }
 0x494   :  { %v7810_v54 = vsel %vm11900_vm7, %v7805_v49, %v7809_v19  ;;  %v7812_v19 = vshrl.u32 %v7358_v17, 16  ;;  %v16077_v49 = vld [vmem:[#allocation14_spill] sm:$0xff] }
 0x495   :  { %v14450_v29 = vpack.c.b16 %v9025_v61, %v9024_v34  ;;  %v7800_v61 = vsel %vm11900_vm7, %v7795_v46, %v7799_v35  ;;  %v8221_v14 = vunpack.c.l.b16 %v7810_v54  ;;  %v7823_v34 = vrot.slane %v7821_v15, 5 }
 0x496   :  { %v3973_v20 = vpop.f32.mrf.mxu3  ;;  %v8220_v60 = vunpack.c.l.b16 %v7800_v61  ;;  %v7814_v46 = vrot.slane %v7812_v19, 4 }
 0x497   :  { %v14448_v6 = vadd.f32 %v3973_v20, %v16072_v41  ;;  %16074 = vst [vmem:[#allocation260_spill] sm:$0xff] %v14450_v29  ;;  %v14462_v7 = vpop.f32.mrf.mxu0  ;;  %v7827_v20 = vrot.slane %v7825_v37, 4  ;;  %v11716_v37 = vld [vmem:[#allocation2 + $0x104] sm:$0x1] }
 0x498   :  { %16076 = vst [vmem:[#allocation262_spill] sm:$0xff] %v14462_v7  ;;  %v8268_v35 = vpack.c.b16 %v8221_v14, %v8220_v60  ;;  %v16081_v14 = vld [vmem:[#allocation16_spill] sm:$0xff] }
 0x499   :  { %16073 = vst [vmem:[#allocation13_spill] sm:$0xff] %v14448_v6  ;;  %v7828_v40 = vor.u32 %v7827_v20, %v7823_v34  ;;  %v14527_v7 = vld [vmem:[#allocation2 + $0x11c] sm:$0x1] }
 0x49a   :  { %v14452_v42 = vpop.f32.mrf.mxu1 }
 0x49b   :  { %16075 = vst [vmem:[#allocation261_spill] sm:$0xff] %v14452_v42  ;;  %4015 = vmatmul.bf16.gmra.mxu3 %v3807_v63  ;;  %v3404_v63 = vld [vmem:[#allocation2 + $0x12c] sm:$0xe]  ;;  %v7817_v42 = vrot.slane %v7815_v12, 5 }
 0x49c   :  { %v10491_v54 = vrot.slane %v3404_v63, 9 }
 0x49d   :  { %9180 = vmatmul.bf16.gmra.mxu1 %v13316_v10  ;;  %v3646_v10 = vrot.slane %v11715_v13, 5  ;;  %v7829_v13 = vrot.slane %v7828_v40, 4 }
 0x49e   :  { %v3976_v38 = vpop.f32.mrf.mxu3  ;;  %v3644_v15 = vsel %vm12456_vm14, %v10491_v54, %v3643_v3  ;;  %v7361_v54 = vld [vmem:[#allocation2 + $0x108] sm:$0xf] }
 0x49f   :  { %v14465_v41 = vadd.f32 %v3976_v38, %v16077_v49  ;;  %v3647_v17 = vsel %vm12456_vm14, %v3645_v27, %v3646_v10  ;;  %v7831_v38 = vshll.u32 %v11716_v37, 16  ;;  %v7818_v49 = vor.u32 %v7817_v42, %v7814_v46  ;;  %v14473_v6 = vpop.f32.mrf.mxu0  ;;  %v11717_v10 = vld [vmem:[#allocation2 + $0x13c] sm:$0xf]  ;;  %v11718_v42 = vld [vmem:[#allocation2 + $0x10c] sm:$0xf] }
 0x4a0   :  { %v3768_v61 = vunpack.c.l.b16 %v3647_v17  ;;  %16080 = vst [vmem:[#allocation264_spill] sm:$0xff] %v14473_v6  ;;  %v3767_v12 = vunpack.c.l.b16 %v3644_v15  ;;  %v7845_v46 = vshll.u32 %v11718_v42, 16  ;;  %v7849_v17 = vshrl.u32 %v11718_v42, 16  ;;  %v14522_v6 = vld [vmem:[#allocation2 + $0x1a0] sm:$0x1] }
 0x4a1   :  { %16078 = vst [vmem:[#allocation14_spill] sm:$0xff] %v14465_v41  ;;  %8452 = vmatmul.bf16.gmra.mxu0 %v8268_v35  ;;  %v7833_v60 = vrot.slane %v7831_v38, 5  ;;  %v7819_v20 = vrot.slane %v7818_v49, 4  ;;  %v3650_v35 = vrot.slane %v11717_v10, 5  ;;  %v7836_v15 = vshrl.u32 %v7361_v54, 16 }
 0x4a2   :  { %v14467_v23 = vpop.f32.mrf.mxu1  ;;  %v3808_v27 = vpack.c.b16 %v3768_v61, %v3767_v12  ;;  %v7839_v61 = vshll.u32 %v7361_v54, 16  ;;  %v7847_v49 = vrot.slane %v7845_v46, 5  ;;  %v3405_v10 = vld [vmem:[#allocation2 + $0x138] sm:$0xe]  ;;  %v8940_v2 = vrot.slane %v14522_v6, 5 }
 0x4a3   :  { %16079 = vst [vmem:[#allocation263_spill] sm:$0xff] %v14467_v23  ;;  %v7834_v3 = vsel %vm11900_vm7, %v7829_v13, %v7833_v60  ;;  %v3652_v38 = vrot.slane %v3650_v35, 4  ;;  %v16084_v13 = vld [vmem:[#allocation18_spill] sm:$0xff] }
 0x4a4   :  { %v8223_v40 = vunpack.c.l.b16 %v7834_v3  ;;  %v7841_v54 = vrot.slane %v7839_v61, 5 }
 0x4a6   :  { %v3978_v41 = vpop.f32.mrf.mxu3 }
 0x4a7   :  { %v14476_v19 = vadd.f32 %v3978_v41, %v16081_v14  ;;  %v7824_v41 = vsel %vm11900_vm7, %v7819_v20, %v7823_v34  ;;  %v7851_v14 = vrot.slane %v7849_v17, 4  ;;  %v7838_v34 = vrot.slane %v7836_v15, 4  ;;  %v11399_v17 = vld [vmem:[%s15761_s5 + $0x18] sm:$0xff] }
 0x4a8   :  { %v8222_v60 = vunpack.c.l.b16 %v7824_v41  ;;  %v10492_v20 = vrot.slane %v3405_v10, 9  ;;  %v11720_v41 = vld [vmem:[#allocation2 + $0x110] sm:$0x1]  ;;  %9611 = vmatpush.bf16.msra.mxu2 %v11399_v17  ;;  %v14499_v10 = vld [vmem:[#allocation2 + $0x118] sm:$0xf] }
 0x4a9   :  { %16082 = vst [vmem:[#allocation16_spill] sm:$0xff] %v14476_v19  ;;  %v7852_v46 = vor.u32 %v7851_v14, %v7847_v49  ;;  %v7842_v15 = vor.u32 %v7841_v54, %v7838_v34  ;;  %v11721_v17 = vld [vmem:[#allocation2 + $0x148] sm:$0xf]  ;;  %v7873_v54 = vshrl.u32 %v14499_v10, 16 }
 0x4aa   :  { %v14478_v63 = vpop.f32.mrf.mxu1  ;;  %v8269_v23 = vpack.c.b16 %v8223_v40, %v8222_v60  ;;  %v3657_v34 = vrot.slane %v11721_v17, 5  ;;  %v11722_v17 = vld [vmem:[#allocation2 + $0x14c] sm:$0x1] }
 0x4ab   :  { %16083 = vst [vmem:[#allocation265_spill] sm:$0xff] %v14478_v63  ;;  %4020 = vmatmul.bf16.gmra.mxu3 %v3808_v27  ;;  %v11719_v63 = vld [vmem:[#allocation2 + $0x140] sm:$0x1]  ;;  %v14488_v27 = vpop.f32.mrf.mxu0  ;;  %v7853_v60 = vrot.slane %v7852_v46, 4  ;;  %v7875_v19 = vrot.slane %v7873_v54, 4 }
 0x4ac   :  { %v3653_v42 = vrot.slane %v11719_v63, 5  ;;  %16086 = vst [vmem:[#allocation266_spill] sm:$0xff] %v14488_v27  ;;  %v3651_v63 = vsel %vm12456_vm14, %v10492_v20, %v3650_v35  ;;  %v7869_v35 = vshll.u32 %v14499_v10, 16  ;;  %v7843_v20 = vrot.slane %v7842_v15, 4  ;;  %v14517_v27 = vld [vmem:[#allocation2 + $0x19c] sm:$0xf] }
 0x4ad   :  { %9185 = vmatmul.bf16.gmra.mxu1 %v13351_v62 }
 0x4ae   :  { %v3981_v37 = vpop.f32.mrf.mxu3  ;;  %v3654_v3 = vsel %vm12456_vm14, %v3652_v38, %v3653_v42  ;;  %v16088_v38 = vld [vmem:[#allocation20_spill] sm:$0xff]  ;;  %v14515_v15 = vrot.slane %v7869_v35, 5 }
 0x4af   :  { %v14486_v12 = vadd.f32 %v3981_v37, %v16084_v13  ;;  %v7855_v37 = vshll.u32 %v11720_v41, 16  ;;  %v3770_v13 = vunpack.c.l.b16 %v3654_v3  ;;  %v3406_v41 = vld [vmem:[#allocation2 + $0x144] sm:$0xe] }
 0x4b1   :  { %16085 = vst [vmem:[#allocation18_spill] sm:$0xff] %v14486_v12  ;;  %8457 = vmatmul.bf16.gmra.mxu0 %v8269_v23  ;;  %v3769_v23 = vunpack.c.l.b16 %v3651_v63  ;;  %v7857_v14 = vrot.slane %v7855_v37, 5  ;;  %v7364_v12 = vld [vmem:[#allocation2 + $0x114] sm:$0xf]  ;;  %v16091_v63 = vld [vmem:[#allocation97_spill] sm:$0xff]  ;;  %v7848_v37 = vsel %vm11900_vm7, %v7843_v20, %v7847_v49  ;;  %v8937_v20 = vrot.slane %v14517_v27, 5 }
 0x4b2   :  { %v14490_v62 = vpop.f32.mrf.mxu1  ;;  %v8627_v49 = vld [vmem:[#allocation2 + $0x198] sm:$0xe] }
 0x4b3   :  { %16087 = vst [vmem:[#allocation267_spill] sm:$0xff] %v14490_v62  ;;  %v3809_v62 = vpack.c.b16 %v3770_v13, %v3769_v23  ;;  %v7858_v3 = vsel %vm11900_vm7, %v7853_v60, %v7857_v14  ;;  %v14510_v46 = vpop.f32.mrf.mxu0  ;;  %v7860_v13 = vshrl.u32 %v7364_v12, 16  ;;  %v10493_v60 = vrot.slane %v3406_v41, 9 }
 0x4b4   :  { %16090 = vst [vmem:[#allocation268_spill] sm:$0xff] %v14510_v46  ;;  %v3659_v14 = vrot.slane %v3657_v34, 4  ;;  %v11106_v35 = vrot.slane %v8627_v49, 9  ;;  %v8939_v54 = vrot.slane %v8937_v20, 4 }
 0x4b6   :  { %v3983_v40 = vpop.f32.mrf.mxu3 }
 0x4b7   :  { %v14502_v61 = vadd.f32 %v3983_v40, %v16088_v38  ;;  %v8225_v40 = vunpack.c.l.b16 %v7858_v3  ;;  %v7863_v38 = vshll.u32 %v7364_v12, 16  ;;  %v7862_v12 = vrot.slane %v7860_v13, 4 }
 0x4b8   :  { %v8938_v13 = vsel %vm12456_vm14, %v11106_v35, %v8937_v20  ;;  %v16096_v20 = vld [vmem:[#allocation24_spill] sm:$0xff] }
 0x4b9   :  { %16089 = vst [vmem:[#allocation20_spill] sm:$0xff] %v14502_v61  ;;  %v3660_v61 = vrot.slane %v11722_v17, 5  ;;  %v7865_v17 = vrot.slane %v7863_v38, 5  ;;  %v7879_v38 = vshll.u32 %v14527_v7, 16 }
 0x4ba   :  { %v14504_v42 = vpop.f32.mrf.mxu1 }
 0x4bb   :  { %4025 = vmatmul.bf16.gmra.mxu3 %v3809_v62  ;;  %v16092_v62 = vld [vmem:[#allocation22_spill] sm:$0xff]  ;;  %v7866_v1 = vor.u32 %v7865_v17, %v7862_v12  ;;  %v7367_v17 = vld [vmem:[#allocation2 + $0x120] sm:$0xf] }
 0x4bd   :  { %9190 = vmatmul.bf16.gmra.mxu1 %v16091_v63  ;;  %v8224_v63 = vunpack.c.l.b16 %v7848_v37  ;;  %v3661_v37 = vsel %vm12456_vm14, %v3659_v14, %v3660_v61  ;;  %v14542_v14 = vld [vmem:[#allocation2 + $0x124] sm:$0xf] }
 0x4be   :  { %v3986_v23 = vpop.f32.mrf.mxu3 }
 0x4bf   :  { %v14520_v46 = vadd.f32 %v3986_v23, %v16092_v62  ;;  %v8270_v41 = vpack.c.b16 %v8225_v40, %v8224_v63  ;;  %v3658_v23 = vsel %vm12456_vm14, %v10493_v60, %v3657_v34  ;;  %v7876_v62 = vor.u32 %v7875_v19, %v14515_v15 }
 0x4c0   :  { %v8941_v40 = vsel %vm12456_vm14, %v8939_v54, %v8940_v2  ;;  %v9026_v63 = vunpack.c.l.b16 %v8938_v13  ;;  %v3771_v36 = vunpack.c.l.b16 %v3658_v23  ;;  %v3772_v34 = vunpack.c.l.b16 %v3661_v37  ;;  %v11723_v37 = vld [vmem:[#allocation2 + $0x154] sm:$0xf] }
 0x4c1   :  { %16093 = vst [vmem:[#allocation97_spill] sm:$0xff] %v14520_v46  ;;  %8462 = vmatmul.bf16.gmra.mxu0 %v8270_v41  ;;  %v9027_v49 = vunpack.c.l.b16 %v8941_v40  ;;  %v14540_v46 = vpop.f32.mrf.mxu0  ;;  %v7877_v61 = vrot.slane %v7876_v62, 4  ;;  %v7881_v41 = vrot.slane %v7879_v38, 5  ;;  %v7893_v13 = vshll.u32 %v14542_v14, 16 }
 0x4c2   :  { %v14525_v3 = vpop.f32.mrf.mxu1  ;;  %16094 = vst [vmem:[#allocation22_spill] sm:$0xff] %v14540_v46  ;;  %v3810_v54 = vpack.c.b16 %v3772_v34, %v3771_v36  ;;  %v7867_v40 = vrot.slane %v7866_v1, 4  ;;  %v3664_v12 = vrot.slane %v11723_v37, 5  ;;  %v7897_v62 = vshrl.u32 %v14542_v14, 16 }
 0x4c3   :  { %v14544_v19 = vpack.c.b16 %v9027_v49, %v9026_v63  ;;  %v7882_v23 = vsel %vm11900_vm7, %v7877_v61, %v7881_v41  ;;  %v3407_v63 = vld [vmem:[#allocation2 + $0x150] sm:$0xe]  ;;  %v16098_v49 = vld [vmem:[#allocation106_spill] sm:$0xff]  ;;  %v7884_v34 = vshrl.u32 %v7367_v17, 16  ;;  %v7895_v1 = vrot.slane %v7893_v13, 5 }
 0x4c4   :  { %v7872_v38 = vsel %vm11900_vm7, %v7867_v40, %v14515_v15  ;;  %v8227_v36 = vunpack.c.l.b16 %v7882_v23  ;;  %v3666_v61 = vrot.slane %v3664_v12, 4  ;;  %v11724_v41 = vld [vmem:[#allocation2 + $0x158] sm:$0x1]  ;;  %v7899_v46 = vrot.slane %v7897_v62, 4  ;;  %v14566_v15 = vld [vmem:[#allocation2 + $0x128] sm:$0x1] }
 0x4c5   :  { %16095 = vst [vmem:[#allocation269_spill] sm:$0xff] %v14544_v19  ;;  %v3667_v37 = vrot.slane %v11724_v41, 5  ;;  %v7886_v40 = vrot.slane %v7884_v34, 4 }
 0x4c6   :  { %v3988_v60 = vpop.f32.mrf.mxu3  ;;  %v7900_v62 = vor.u32 %v7899_v46, %v7895_v1 }
 0x4c7   :  { %v14547_v35 = vadd.f32 %v3988_v60, %v16096_v20  ;;  %v7887_v60 = vshll.u32 %v7367_v17, 16  ;;  %v3668_v23 = vsel %vm12456_vm14, %v3666_v61, %v3667_v37  ;;  %v11725_v37 = vld [vmem:[#allocation2 + $0x160] sm:$0xf] }
 0x4c8   :  { %v3774_v41 = vunpack.c.l.b16 %v3668_v23 }
 0x4c9   :  { %16097 = vst [vmem:[#allocation24_spill] sm:$0xff] %v14547_v35  ;;  %v10494_v35 = vrot.slane %v3407_v63, 9  ;;  %v14559_v19 = vpop.f32.mrf.mxu0  ;;  %v7889_v17 = vrot.slane %v7887_v60, 5  ;;  %v7903_v63 = vshll.u32 %v14566_v15, 16 }
 0x4ca   :  { %v14549_v2 = vpop.f32.mrf.mxu1  ;;  %16099 = vst [vmem:[#allocation106_spill] sm:$0xff] %v14559_v19 }
 0x4cb   :  { %4030 = vmatmul.bf16.gmra.mxu3 %v3810_v54  ;;  %v16100_v54 = vld [vmem:[#allocation26_spill] sm:$0xff]  ;;  %v3665_v13 = vsel %vm12456_vm14, %v10494_v35, %v3664_v12  ;;  %v7905_v19 = vrot.slane %v7903_v63, 5 }
 0x4cc   :  { %v16105_v63 = vld [vmem:[#allocation118_spill] sm:$0xff] }
 0x4cd   :  { %9195 = vmatmul.bf16.gmra.mxu1 %v16098_v49  ;;  %v8226_v49 = vunpack.c.l.b16 %v7872_v38 }
 0x4ce   :  { %v3991_v20 = vpop.f32.mrf.mxu3 }
 0x4cf   :  { %v14562_v16 = vadd.f32 %v3991_v20, %v16100_v54  ;;  %v8271_v28 = vpack.c.b16 %v8227_v36, %v8226_v49  ;;  %v3773_v20 = vunpack.c.l.b16 %v3665_v13  ;;  %v7890_v54 = vor.u32 %v7889_v17, %v7886_v40  ;;  %v14573_v36 = vld [vmem:[#allocation2 + $0x130] sm:$0xf]  ;;  %v16102_v49 = vld [vmem:[#allocation28_spill] sm:$0xff]  ;;  %v7370_v13 = vld [vmem:[#allocation2 + $0x12c] sm:$0xf] }
 0x4d0   :  { %v3671_v40 = vrot.slane %v11725_v37, 5  ;;  %v7921_v23 = vshrl.u32 %v14573_v36, 16  ;;  %v3408_v17 = vld [vmem:[#allocation2 + $0x15c] sm:$0xe] }
 0x4d1   :  { %16101 = vst [vmem:[#allocation26_spill] sm:$0xff] %v14562_v16  ;;  %8467 = vmatmul.bf16.gmra.mxu0 %v8271_v28  ;;  %v7901_v16 = vrot.slane %v7900_v62, 4  ;;  %v14578_v35 = vpop.f32.mrf.mxu0  ;;  %v3811_v60 = vpack.c.b16 %v3774_v41, %v3773_v20  ;;  %v7917_v28 = vshll.u32 %v14573_v36, 16  ;;  %v7891_v46 = vrot.slane %v7890_v54, 4  ;;  %v11372_v62 = vld [vmem:[%s15760_s3 + $0x180] sm:$0xff] }
 0x4d2   :  { %v14564_v24 = vpop.f32.mrf.mxu1  ;;  %16104 = vst [vmem:[#allocation270_spill] sm:$0xff] %v14578_v35  ;;  %v7911_v54 = vshll.u32 %v7370_v13, 16  ;;  %7081 = vmatpush.bf16.msra.mxu3 %v11372_v62  ;;  %v3673_v37 = vrot.slane %v3671_v40, 4  ;;  %v7923_v35 = vrot.slane %v7921_v23, 4 }
 0x4d3   :  { %v7906_v61 = vsel %vm11900_vm7, %v7901_v16, %v7905_v19  ;;  %v7896_v20 = vsel %vm11900_vm7, %v7891_v46, %v7895_v1  ;;  %v7919_v16 = vrot.slane %v7917_v28, 5 }
 0x4d4   :  { %v8229_v41 = vunpack.c.l.b16 %v7906_v61  ;;  %v8228_v51 = vunpack.c.l.b16 %v7896_v20  ;;  %v7913_v61 = vrot.slane %v7911_v54, 5 }
 0x4d6   :  { %v3993_v38 = vpop.f32.mrf.mxu3 }
 0x4d7   :  { %v14576_v34 = vadd.f32 %v3993_v38, %v16102_v49  ;;  %v7908_v38 = vshrl.u32 %v7370_v13, 16  ;;  %v10495_v49 = vrot.slane %v3408_v17, 9  ;;  %v7924_v13 = vor.u32 %v7923_v35, %v7919_v16 }
 0x4d9   :  { %16103 = vst [vmem:[#allocation28_spill] sm:$0xff] %v14576_v34  ;;  %v11726_v34 = vld [vmem:[#allocation2 + $0x164] sm:$0x1]  ;;  %v7910_v1 = vrot.slane %v7908_v38, 4  ;;  %v3672_v28 = vsel %vm12456_vm14, %v10495_v49, %v3671_v40  ;;  %v7925_v20 = vrot.slane %v7924_v13, 4  ;;  %v16109_v38 = vld [vmem:[#allocation32_spill] sm:$0xff] }
 0x4da   :  { %v14580_v12 = vpop.f32.mrf.mxu1  ;;  %v3775_v23 = vunpack.c.l.b16 %v3672_v28  ;;  %v16112_v13 = vld [vmem:[#allocation127_spill] sm:$0xff] }
 0x4db   :  { %4035 = vmatmul.bf16.gmra.mxu3 %v3811_v60  ;;  %v3674_v60 = vrot.slane %v11726_v34, 5  ;;  %v14603_v34 = vpop.f32.mrf.mxu0 }
 0x4dc   :  { %16108 = vst [vmem:[#allocation30_spill] sm:$0xff] %v14603_v34 }
 0x4dd   :  { %9200 = vmatmul.bf16.gmra.mxu1 %v16105_v63  ;;  %v8272_v63 = vpack.c.b16 %v8229_v41, %v8228_v51  ;;  %v3675_v46 = vsel %vm12456_vm14, %v3673_v37, %v3674_v60  ;;  %v7914_v51 = vor.u32 %v7913_v61, %v7910_v1  ;;  %v14606_v41 = vld [vmem:[#allocation2 + $0x13c] sm:$0xf]  ;;  %v3409_v61 = vld [vmem:[#allocation2 + $0x168] sm:$0xe] }
 0x4de   :  { %v3996_v19 = vpop.f32.mrf.mxu3  ;;  %v3776_v17 = vunpack.c.l.b16 %v3675_v46  ;;  %v7941_v35 = vshll.u32 %v14606_v41, 16  ;;  %v7373_v46 = vld [vmem:[#allocation2 + $0x138] sm:$0xf]  ;;  %v7945_v1 = vshrl.u32 %v14606_v41, 16 }
 0x4df   :  { %v14593_v29 = vadd.f32 %v3996_v19, %v16106_v11  ;;  %v7927_v11 = vshll.u32 %v14597_v52, 16  ;;  %v7915_v37 = vrot.slane %v7914_v51, 4  ;;  %v7935_v51 = vshll.u32 %v7373_v46, 16 }
 0x4e0   :  { %v3812_v54 = vpack.c.b16 %v3776_v17, %v3775_v23  ;;  %v7932_v17 = vshrl.u32 %v7373_v46, 16  ;;  %v7947_v34 = vrot.slane %v7945_v1, 4 }
 0x4e1   :  { %16107 = vst [vmem:[#allocation118_spill] sm:$0xff] %v14593_v29  ;;  %8472 = vmatmul.bf16.gmra.mxu0 %v8272_v63  ;;  %v7929_v40 = vrot.slane %v7927_v11, 5  ;;  %v11727_v63 = vld [vmem:[#allocation2 + $0x16c] sm:$0xf]  ;;  %v7920_v11 = vsel %vm11900_vm7, %v7915_v37, %v7919_v16  ;;  %v14627_v16 = vld [vmem:[#allocation2 + $0x140] sm:$0x1] }
 0x4e2   :  { %v14595_v5 = vpop.f32.mrf.mxu1  ;;  %v3678_v28 = vrot.slane %v11727_v63, 5  ;;  %v11728_v63 = vld [vmem:[#allocation2 + $0x170] sm:$0x1]  ;;  %v8230_v44 = vunpack.c.l.b16 %v7920_v11  ;;  %v7934_v37 = vrot.slane %v7932_v17, 4  ;;  %v7937_v46 = vrot.slane %v7935_v51, 5 }
 0x4e3   :  { %v7930_v60 = vsel %vm11900_vm7, %v7925_v20, %v7929_v40  ;;  %v10496_v20 = vrot.slane %v3409_v61, 9  ;;  %v3681_v29 = vrot.slane %v11728_v63, 5  ;;  %v7376_v63 = vld [vmem:[#allocation2 + $0x144] sm:$0xf] }
 0x4e4   :  { %v8231_v23 = vunpack.c.l.b16 %v7930_v60  ;;  %v3680_v40 = vrot.slane %v3678_v28, 4  ;;  %v7956_v51 = vshrl.u32 %v7376_v63, 16 }
 0x4e5   :  { %v3679_v60 = vsel %vm12456_vm14, %v10496_v20, %v3678_v28  ;;  %v16118_v20 = vld [vmem:[#allocation36_spill] sm:$0xff] }
 0x4e6   :  { %v3998_v62 = vpop.f32.mrf.mxu3  ;;  %v8273_v8 = vpack.c.b16 %v8231_v23, %v8230_v44  ;;  %v3777_v1 = vunpack.c.l.b16 %v3679_v60  ;;  %v7938_v23 = vor.u32 %v7937_v46, %v7934_v37  ;;  %v11730_v37 = vld [vmem:[#allocation2 + $0x178] sm:$0xf] }
 0x4e7   :  { %v14609_v19 = vadd.f32 %v3998_v62, %v16109_v38  ;;  %v14620_v62 = vpop.f32.mrf.mxu0  ;;  %v7943_v38 = vrot.slane %v7941_v35, 5  ;;  %v3682_v35 = vsel %vm12456_vm14, %v3680_v40, %v3681_v29  ;;  %v7959_v40 = vshll.u32 %v7376_v63, 16 }
 0x4e8   :  { %16113 = vst [vmem:[#allocation127_spill] sm:$0xff] %v14620_v62  ;;  %v3778_v44 = vunpack.c.l.b16 %v3682_v35  ;;  %v7939_v60 = vrot.slane %v7938_v23, 4  ;;  %v3685_v46 = vrot.slane %v11730_v37, 5 }
 0x4e9   :  { %16110 = vst [vmem:[#allocation32_spill] sm:$0xff] %v14609_v19  ;;  %v7948_v61 = vor.u32 %v7947_v34, %v7943_v38 }
 0x4ea   :  { %v14611_v49 = vpop.f32.mrf.mxu1  ;;  %v3687_v23 = vrot.slane %v3685_v46, 4 }
 0x4eb   :  { %16111 = vst [vmem:[#allocation271_spill] sm:$0xff] %v14611_v49  ;;  %4040 = vmatmul.bf16.gmra.mxu3 %v3812_v54  ;;  %v7949_v17 = vrot.slane %v7948_v61, 4 }
 0x4ed   :  { %9205 = vmatmul.bf16.gmra.mxu1 %v16112_v13 }
 0x4ee   :  { %v4001_v19 = vpop.f32.mrf.mxu3 }
 0x4ef   :  { %v14623_v54 = vadd.f32 %v4001_v19, %v16114_v59  ;;  %v11398_v59 = vld [vmem:[%s15761_s5 + $0x10] sm:$0xff]  ;;  %v7951_v19 = vshll.u32 %v14627_v16, 16  ;;  %v14637_v28 = vpop.f32.mrf.mxu0 }
 0x4f0   :  { %9612 = vmatpush.bf16.msra.mxu2 %v11398_v59  ;;  %16117 = vst [vmem:[#allocation273_spill] sm:$0xff] %v14637_v28  ;;  %v3410_v59 = vld [vmem:[#allocation2 + $0x174] sm:$0xe] }
 0x4f1   :  { %16115 = vst [vmem:[#allocation34_spill] sm:$0xff] %v14623_v54  ;;  %8477 = vmatmul.bf16.gmra.mxu0 %v8273_v8  ;;  %v7953_v34 = vrot.slane %v7951_v19, 5  ;;  %v3813_v8 = vpack.c.b16 %v3778_v44, %v3777_v1  ;;  %v11729_v54 = vld [vmem:[#allocation2 + $0x148] sm:$0xf]  ;;  %v16121_v28 = vld [vmem:[#allocation135_spill] sm:$0xff]  ;;  %v7944_v19 = vsel %vm11900_vm7, %v7939_v60, %v7943_v38  ;;  %v7958_v44 = vrot.slane %v7956_v51, 4 }
 0x4f2   :  { %v14625_v13 = vpop.f32.mrf.mxu1  ;;  %v7965_v62 = vshll.u32 %v11729_v54, 16  ;;  %v7969_v61 = vshrl.u32 %v11729_v54, 16  ;;  %v8232_v54 = vunpack.c.l.b16 %v7944_v19 }
 0x4f3   :  { %16116 = vst [vmem:[#allocation272_spill] sm:$0xff] %v14625_v13  ;;  %v7954_v35 = vsel %vm11900_vm7, %v7949_v17, %v7953_v34  ;;  %v16122_v34 = vld [vmem:[#allocation38_spill] sm:$0xff] }
 0x4f4   :  { %v8233_v1 = vunpack.c.l.b16 %v7954_v35  ;;  %v7967_v63 = vrot.slane %v7965_v62, 5  ;;  %v7971_v17 = vrot.slane %v7969_v61, 4  ;;  %v7379_v61 = vld [vmem:[#allocation2 + $0x150] sm:$0xf] }
 0x4f6   :  { %v4003_v11 = vpop.f32.mrf.mxu3 }
 0x4f7   :  { %v14640_v29 = vadd.f32 %v4003_v11, %v16118_v20  ;;  %v7961_v11 = vrot.slane %v7959_v40, 5  ;;  %v7972_v40 = vor.u32 %v7971_v17, %v7967_v63  ;;  %v11734_v17 = vld [vmem:[#allocation2 + $0x184] sm:$0xf] }
 0x4f9   :  { %16119 = vst [vmem:[#allocation36_spill] sm:$0xff] %v14640_v29  ;;  %v10497_v29 = vrot.slane %v3410_v59, 9  ;;  %v7962_v51 = vor.u32 %v7961_v11, %v7958_v44 }
 0x4fa   :  { %v14642_v13 = vpop.f32.mrf.mxu1 }
 0x4fb   :  { %16120 = vst [vmem:[#allocation274_spill] sm:$0xff] %v14642_v13  ;;  %4045 = vmatmul.bf16.gmra.mxu3 %v3813_v8  ;;  %v11731_v13 = vld [vmem:[#allocation2 + $0x17c] sm:$0x1]  ;;  %v14652_v8 = vpop.f32.mrf.mxu0  ;;  %v3686_v38 = vsel %vm12456_vm14, %v10497_v29, %v3685_v46  ;;  %v7963_v19 = vrot.slane %v7962_v51, 4  ;;  %v7983_v29 = vshll.u32 %v7379_v61, 16 }
 0x4fc   :  { %v3688_v49 = vrot.slane %v11731_v13, 5  ;;  %16124 = vst [vmem:[#allocation38_spill] sm:$0xff] %v14652_v8  ;;  %v3779_v60 = vunpack.c.l.b16 %v3686_v38 }
 0x4fd   :  { %9210 = vmatmul.bf16.gmra.mxu1 %v16121_v28  ;;  %v8274_v28 = vpack.c.b16 %v8233_v1, %v8232_v54  ;;  %v7977_v1 = vrot.slane %v7975_v45, 5  ;;  %v7980_v54 = vshrl.u32 %v7379_v61, 16  ;;  %v7968_v11 = vsel %vm11900_vm7, %v7963_v19, %v7967_v63  ;;  %v3411_v45 = vld [vmem:[#allocation2 + $0x180] sm:$0xe] }
 0x4fe   :  { %v4006_v20 = vpop.f32.mrf.mxu3  ;;  %v3689_v62 = vsel %vm12456_vm14, %v3687_v23, %v3688_v49  ;;  %v10498_v19 = vrot.slane %v3411_v45, 9 }
 0x4ff   :  { %v14650_v37 = vadd.f32 %v4006_v20, %v16122_v34  ;;  %v3780_v35 = vunpack.c.l.b16 %v3689_v62  ;;  %v7973_v20 = vrot.slane %v7972_v40, 4  ;;  %v16126_v34 = vld [vmem:[#allocation40_spill] sm:$0xff]  ;;  %v7982_v51 = vrot.slane %v7980_v54, 4 }
 0x500   :  { %v16129_v62 = vld [vmem:[#allocation144_spill] sm:$0xff]  ;;  %v7985_v40 = vrot.slane %v7983_v29, 5 }
 0x501   :  { %16123 = vst [vmem:[#allocation135_spill] sm:$0xff] %v14650_v37  ;;  %8482 = vmatmul.bf16.gmra.mxu0 %v8274_v28  ;;  %v3814_v46 = vpack.c.b16 %v3780_v35, %v3779_v60  ;;  %v11733_v37 = vld [vmem:[#allocation2 + $0x154] sm:$0xf]  ;;  %v7978_v23 = vsel %vm11900_vm7, %v7973_v20, %v7977_v1  ;;  %v3692_v28 = vrot.slane %v11734_v17, 5  ;;  %v8234_v60 = vunpack.c.l.b16 %v7968_v11  ;;  %v11735_v20 = vld [vmem:[#allocation2 + $0x188] sm:$0x1] }
 0x502   :  { %v14658_v13 = vpop.f32.mrf.mxu1  ;;  %v7989_v49 = vshll.u32 %v11733_v37, 16  ;;  %v7993_v44 = vshrl.u32 %v11733_v37, 16  ;;  %v8235_v35 = vunpack.c.l.b16 %v7978_v23  ;;  %v3695_v1 = vrot.slane %v11735_v20, 5  ;;  %v16131_v17 = vld [vmem:[#allocation42_spill] sm:$0xff] }
 0x503   :  { %16125 = vst [vmem:[#allocation275_spill] sm:$0xff] %v14658_v13  ;;  %v14667_v38 = vpop.f32.mrf.mxu0  ;;  %v3693_v29 = vsel %vm12456_vm14, %v10498_v19, %v3692_v28 }
 0x504   :  { %16128 = vst [vmem:[#allocation276_spill] sm:$0xff] %v14667_v38  ;;  %v7991_v61 = vrot.slane %v7989_v49, 5  ;;  %v7995_v37 = vrot.slane %v7993_v44, 4  ;;  %v8275_v38 = vpack.c.b16 %v8235_v35, %v8234_v60  ;;  %v3781_v23 = vunpack.c.l.b16 %v3693_v29  ;;  %v8612_v29 = vld [vmem:[#allocation2 + $0xcc] sm:$0xe] }
 0x506   :  { %v4008_v59 = vpop.f32.mrf.mxu3  ;;  %v7996_v8 = vor.u32 %v7995_v37, %v7991_v61 }
 0x507   :  { %v14661_v31 = vadd.f32 %v4008_v59, %v16126_v34  ;;  %v3694_v34 = vrot.slane %v3692_v28, 4 }
 0x508   :  { %v7997_v20 = vrot.slane %v7996_v8, 4  ;;  %v11737_v8 = vld [vmem:[#allocation2 + $0x160] sm:$0xf] }
 0x509   :  { %16127 = vst [vmem:[#allocation40_spill] sm:$0xff] %v14661_v31  ;;  %v3696_v49 = vsel %vm12456_vm14, %v3694_v34, %v3695_v1  ;;  %v8832_v1 = vrot.slane %v14386_v21, 5 }
 0x50a   :  { %v14670_v59 = vpop.f32.mrf.mxu1  ;;  %v3782_v45 = vunpack.c.l.b16 %v3696_v49  ;;  %v8017_v49 = vshrl.u32 %v11737_v8, 16 }
 0x50b   :  { %4050 = vmatmul.bf16.gmra.mxu3 %v3814_v46  ;;  %16130 = vst [vmem:[#allocation144_spill] sm:$0xff] %v14670_v59  ;;  %v7986_v46 = vor.u32 %v7985_v40, %v7982_v51  ;;  %v14679_v11 = vpop.f32.mrf.mxu0  ;;  %v16134_v40 = vld [vmem:[#allocation44_spill] sm:$0xff] }
 0x50c   :  { %16133 = vst [vmem:[#allocation277_spill] sm:$0xff] %v14679_v11  ;;  %v8019_v59 = vrot.slane %v8017_v49, 4  ;;  %v11740_v49 = vld [vmem:[#allocation2 + $0x164] sm:$0x1] }
 0x50d   :  { %9215 = vmatmul.bf16.gmra.mxu1 %v16129_v62  ;;  %v11736_v62 = vld [vmem:[#allocation2 + $0x158] sm:$0x1]  ;;  %v7987_v44 = vrot.slane %v7986_v46, 4  ;;  %v8013_v46 = vshll.u32 %v11737_v8, 16 }
 0x50e   :  { %v4011_v63 = vpop.f32.mrf.mxu3  ;;  %v7999_v54 = vshll.u32 %v11736_v62, 16  ;;  %v11738_v62 = vld [vmem:[#allocation2 + $0x190] sm:$0xf] }
 0x50f   :  { %v14673_v31 = vadd.f32 %v4011_v63, %v16131_v17  ;;  %v7382_v17 = vld [vmem:[#allocation2 + $0x15c] sm:$0xf]  ;;  %v7992_v28 = vsel %vm11900_vm7, %v7987_v44, %v7991_v61 }
 0x510   :  { %v8001_v63 = vrot.slane %v7999_v54, 5  ;;  %v8004_v37 = vshrl.u32 %v7382_v17, 16  ;;  %v8007_v19 = vshll.u32 %v7382_v17, 16  ;;  %v3699_v54 = vrot.slane %v11738_v62, 5 }
 0x511   :  { %16132 = vst [vmem:[#allocation42_spill] sm:$0xff] %v14673_v31  ;;  %8487 = vmatmul.bf16.gmra.mxu0 %v8275_v38  ;;  %v3815_v38 = vpack.c.b16 %v3782_v45, %v3781_v23  ;;  %v11091_v23 = vrot.slane %v8612_v29, 9  ;;  %v8834_v45 = vrot.slane %v8832_v1, 4 }
 0x512   :  { %v14684_v35 = vpop.f32.mrf.mxu1  ;;  %v8002_v34 = vsel %vm11900_vm7, %v7997_v20, %v8001_v63  ;;  %v8006_v44 = vrot.slane %v8004_v37, 4  ;;  %v8009_v17 = vrot.slane %v8007_v19, 5  ;;  %v8835_v20 = vrot.slane %v14400_v9, 5 }
 0x513   :  { %16136 = vst [vmem:[#allocation278_spill] sm:$0xff] %v14684_v35  ;;  %v8237_v61 = vunpack.c.l.b16 %v8002_v34  ;;  %v8015_v63 = vrot.slane %v8013_v46, 5  ;;  %v3701_v11 = vrot.slane %v3699_v54, 4  ;;  %v11739_v35 = vld [vmem:[#allocation2 + $0x194] sm:$0x1]  ;;  %v14693_v8 = vpop.f32.mrf.mxu0  ;;  %v8833_v37 = vsel %vm12456_vm14, %v11091_v23, %v8832_v1 }
 0x514   :  { %v3702_v62 = vrot.slane %v11739_v35, 5  ;;  %v8836_v9 = vsel %vm12456_vm14, %v8834_v45, %v8835_v20 }
 0x515   :  { %v8020_v29 = vor.u32 %v8019_v59, %v8015_v63 }
 0x516   :  { %v4013_v51 = vpop.f32.mrf.mxu3  ;;  %v3703_v35 = vsel %vm12456_vm14, %v3701_v11, %v3702_v62 }
 0x517   :  { %v14682_v60 = vadd.f32 %v4013_v51, %v16134_v40  ;;  %v3412_v51 = vld [vmem:[#allocation2 + $0x18c] sm:$0xe]  ;;  %v16137_v40 = vld [vmem:[#allocation152_spill] sm:$0xff]  ;;  %v3784_v1 = vunpack.c.l.b16 %v3703_v35  ;;  %v8021_v45 = vrot.slane %v8020_v29, 4 }
 0x518   :  { %v10499_v31 = vrot.slane %v3412_v51, 9  ;;  %16138 = vst [vmem:[#allocation152_spill] sm:$0xff] %v14693_v8  ;;  %v8023_v51 = vshll.u32 %v11740_v49, 16 }
 0x519   :  { %16135 = vst [vmem:[#allocation44_spill] sm:$0xff] %v14682_v60  ;;  %v8236_v60 = vunpack.c.l.b16 %v7992_v28  ;;  %v8010_v28 = vor.u32 %v8009_v17, %v8006_v44  ;;  %v7385_v17 = vld [vmem:[#allocation2 + $0x168] sm:$0xf] }
 0x51a   :  { %v14702_v19 = vpop.f32.mrf.mxu1  ;;  %v3700_v46 = vsel %vm12456_vm14, %v10499_v31, %v3699_v54  ;;  %v8025_v20 = vrot.slane %v8023_v51, 5  ;;  %v8028_v11 = vshrl.u32 %v7385_v17, 16 }
 0x51b   :  { %4055 = vmatmul.bf16.gmra.mxu3 %v3815_v38  ;;  %v16139_v38 = vld [vmem:[#allocation46_spill] sm:$0xff]  ;;  %v8276_v34 = vpack.c.b16 %v8237_v61, %v8236_v60  ;;  %v8997_v60 = vunpack.c.l.b16 %v8836_v9  ;;  %v8011_v61 = vrot.slane %v8010_v28, 4  ;;  %v3783_v44 = vunpack.c.l.b16 %v3700_v46  ;;  %v14715_v62 = vpop.f32.mrf.mxu0 }
 0x51c   :  { %16143 = vst [vmem:[#allocation279_spill] sm:$0xff] %v14715_v62  ;;  %v8031_v28 = vshll.u32 %v7385_v17, 16  ;;  %v8026_v46 = vsel %vm11900_vm7, %v8021_v45, %v8025_v20  ;;  %v8030_v49 = vrot.slane %v8028_v11, 4 }
 0x51d   :  { %9220 = vmatmul.bf16.gmra.mxu1 %v16137_v40  ;;  %v8996_v40 = vunpack.c.l.b16 %v8833_v37  ;;  %v8016_v59 = vsel %vm11900_vm7, %v8011_v61, %v8015_v63  ;;  %v8239_v51 = vunpack.c.l.b16 %v8026_v46 }
 0x51e   :  { %v4016_v21 = vpop.f32.mrf.mxu3  ;;  %v8238_v29 = vunpack.c.l.b16 %v8016_v59  ;;  %v8033_v63 = vrot.slane %v8031_v28, 5 }
 0x51f   :  { %v14696_v13 = vadd.f32 %v4016_v21, %v16139_v38  ;;  %v14708_v21 = vld [vmem:[#allocation2 + $0x16c] sm:$0xf]  ;;  %v16141_v38 = vld [vmem:[#allocation48_spill] sm:$0xff]  ;;  %v9045_v54 = vpack.c.b16 %v8997_v60, %v8996_v40 }
 0x520   :  { %v8037_v37 = vshll.u32 %v14708_v21, 16  ;;  %v8041_v9 = vshrl.u32 %v14708_v21, 16 }
 0x521   :  { %16140 = vst [vmem:[#allocation46_spill] sm:$0xff] %v14696_v13  ;;  %8492 = vmatmul.bf16.gmra.mxu0 %v8276_v34  ;;  %v3816_v34 = vpack.c.b16 %v3784_v1, %v3783_v44  ;;  %v14723_v44 = vld [vmem:[#allocation2 + $0x170] sm:$0x1]  ;;  %v16145_v1 = vld [vmem:[#allocation50_spill] sm:$0xff]  ;;  %v14754_v13 = vld [vmem:[#allocation2 + $0x17c] sm:$0x1] }
 0x522   :  { %v14721_v35 = vpop.f32.mrf.mxu1  ;;  %v8039_v40 = vrot.slane %v8037_v37, 5  ;;  %v8043_v60 = vrot.slane %v8041_v9, 4  ;;  %v8047_v45 = vshll.u32 %v14723_v44, 16  ;;  %v16149_v9 = vld [vmem:[#allocation52_spill] sm:$0xff] }
 0x523   :  { %16144 = vst [vmem:[#allocation280_spill] sm:$0xff] %v14721_v35  ;;  %v14729_v20 = vpop.f32.mrf.mxu0 }
 0x524   :  { %16147 = vst [vmem:[#allocation281_spill] sm:$0xff] %v14729_v20 }
 0x526   :  { %v4018_v23 = vpop.f32.mrf.mxu3 }
 0x527   :  { %v14711_v31 = vadd.f32 %v4018_v23, %v16141_v38  ;;  %v8277_v23 = vpack.c.b16 %v8239_v51, %v8238_v29  ;;  %v8034_v38 = vor.u32 %v8033_v63, %v8030_v49  ;;  %v7388_v29 = vld [vmem:[#allocation2 + $0x174] sm:$0xf]  ;;  %v14739_v49 = vld [vmem:[#allocation2 + $0x178] sm:$0xf] }
 0x528   :  { %v11340_v51 = vld [vmem:[#allocation2 + $0x18] sm:$0xff] }
 0x529   :  { %16142 = vst [vmem:[#allocation48_spill] sm:$0xff] %v14711_v31  ;;  %v8044_v31 = vor.u32 %v8043_v60, %v8039_v40  ;;  %v8035_v59 = vrot.slane %v8034_v38, 4  ;;  %v16151_v38 = vld [vmem:[#allocation57_spill] sm:$0xff] }
 0x52a   :  { %v14734_v28 = vpop.f32.mrf.mxu1 }
 0x52b   :  { %4060 = vmatmul.bf16.gmra.mxu3 %v3816_v34  ;;  %v8045_v11 = vrot.slane %v8044_v31, 4  ;;  %v8049_v34 = vrot.slane %v8047_v45, 5  ;;  %16148 = vst [vmem:[#allocation282_spill] sm:$0xff] %v14734_v28  ;;  %v8040_v63 = vsel %vm11900_vm7, %v8035_v59, %v8039_v40  ;;  %v8055_v31 = vshll.u32 %v7388_v29, 16  ;;  %v16152_v45 = vld [vmem:[#allocation123_spill] sm:$0xff] }
 0x52d   :  { %9225 = vmatmul.bf16.gmra.mxu1 %v9045_v54  ;;  %v11397_v54 = vld [vmem:[%s15761_s5 + $0x8] sm:$0xff]  ;;  %v8050_v60 = vsel %vm11900_vm7, %v8045_v11, %v8049_v34 }
 0x52e   :  { %v4021_v61 = vpop.f32.mrf.mxu3  ;;  %9613 = vmatpush.bf16.msra.mxu2 %v11397_v54  ;;  %v3342_v54 = vadd.f32 %v16152_v45, %v16151_v38  ;;  %v8071_v38 = vshll.u32 %v14754_v13, 16  ;;  %v16156_v45 = vld [vmem:[#allocation61_spill] sm:$0xff] }
 0x52f   :  { %v14726_v17 = vadd.f32 %v4021_v61, %v16145_v1  ;;  %v8052_v61 = vshrl.u32 %v7388_v29, 16  ;;  %v8061_v1 = vshll.u32 %v14739_v49, 16 }
 0x531   :  { %16146 = vst [vmem:[#allocation50_spill] sm:$0xff] %v14726_v17  ;;  %8497 = vmatmul.bf16.gmra.mxu0 %v8277_v23  ;;  %v8065_v23 = vshrl.u32 %v14739_v49, 16  ;;  %v8054_v59 = vrot.slane %v8052_v61, 4  ;;  %v8057_v17 = vrot.slane %v8055_v31, 5  ;;  %v8063_v11 = vrot.slane %v8061_v1, 5 }
 0x532   :  { %v14756_v20 = vpop.f32.mrf.mxu1 }
 0x533   :  { %v8067_v34 = vrot.slane %v8065_v23, 4  ;;  %16155 = vst [vmem:[#allocation283_spill] sm:$0xff] %v14756_v20  ;;  %v8073_v23 = vrot.slane %v8071_v38, 5 }
 0x535   :  { %v8068_v62 = vor.u32 %v8067_v34, %v8063_v11 }
 0x536   :  { %v4023_v37 = vpop.f32.mrf.mxu3 }
 0x537   :  { %v14737_v46 = vadd.f32 %v4023_v37, %v16149_v9  ;;  %v14750_v37 = vpop.f32.mrf.mxu0  ;;  %v8240_v9 = vunpack.c.l.b16 %v8040_v63  ;;  %v16157_v63 = vld [vmem:[#allocation128_spill] sm:$0xff]  ;;  %v8069_v1 = vrot.slane %v8068_v62, 4 }
 0x538   :  { %16153 = vst [vmem:[#allocation57_spill] sm:$0xff] %v14750_v37  ;;  %v7391_v37 = vld [vmem:[#allocation2 + $0x180] sm:$0xf]  ;;  %v16161_v62 = vld [vmem:[#allocation184_spill] sm:$0xff] }
 0x539   :  { %16150 = vst [vmem:[#allocation52_spill] sm:$0xff] %v14737_v46  ;;  %v8241_v46 = vunpack.c.l.b16 %v8050_v60  ;;  %v3344_v60 = vadd.f32 %v16157_v63, %v16156_v45  ;;  %v8079_v8 = vshll.u32 %v7391_v37, 16 }
 0x53a   :  { %v14765_v34 = vpop.f32.mrf.mxu1 }
 0x53b   :  { %7082 = vmatmul.bf16.vlgmr.msra.gmra.mxu3 %v11340_v51  ;;  %v8278_v51 = vpack.c.b16 %v8241_v46, %v8240_v9  ;;  %v11741_v46 = vld [vmem:[#allocation2 + $0x184] sm:$0xf]  ;;  %16160 = vst [vmem:[#allocation284_spill] sm:$0xff] %v14765_v34  ;;  %v8081_v45 = vrot.slane %v8079_v8, 5 }
 0x53c   :  { %v8089_v9 = vshrl.u32 %v11741_v46, 16 }
 0x53d   :  { %9230 = vmatmul.bf16.gmra.mxu1 %v13812_v26  ;;  %v8058_v26 = vor.u32 %v8057_v17, %v8054_v59  ;;  %v8085_v17 = vshll.u32 %v11741_v46, 16  ;;  %v11341_v59 = vld [vmem:[#allocation2 + $0x24] sm:$0xff] }
 0x53e   :  { %v4026_v40 = vpop.f32.mrf.mxu3 }
 0x53f   :  { %v14752_v29 = vadd.f32 %v4026_v40, %v3342_v54  ;;  %v8059_v31 = vrot.slane %v8058_v26, 4  ;;  %v14761_v54 = vpop.f32.mrf.mxu0  ;;  %v8074_v26 = vsel %vm11900_vm7, %v8069_v1, %v8073_v23  ;;  %v8087_v63 = vrot.slane %v8085_v17, 5 }
 0x540   :  { %16158 = vst [vmem:[#allocation61_spill] sm:$0xff] %v14761_v54  ;;  %v8243_v54 = vunpack.c.l.b16 %v8074_v26 }
 0x541   :  { %16154 = vst [vmem:[#allocation123_spill] sm:$0xff] %v14752_v29  ;;  %8502 = vmatmul.bf16.gmra.mxu0 %v8278_v51  ;;  %v8076_v29 = vshrl.u32 %v7391_v37, 16  ;;  %v8064_v51 = vsel %vm11900_vm7, %v8059_v31, %v8063_v11  ;;  %v16162_v37 = vld [vmem:[#allocation65_spill] sm:$0xff]  ;;  %v11742_v31 = vld [vmem:[#allocation2 + $0x188] sm:$0x1] }
 0x542   :  { %v8242_v46 = vunpack.c.l.b16 %v8064_v51  ;;  %v8095_v35 = vshll.u32 %v11742_v31, 16  ;;  %v16169_v31 = vld [vmem:[#allocation73_spill] sm:$0xff] }
 0x543   :  { %v8078_v38 = vrot.slane %v8076_v29, 4  ;;  %v14778_v29 = vpop.f32.mrf.mxu1 }
 0x544   :  { %v8279_v23 = vpack.c.b16 %v8243_v54, %v8242_v46  ;;  %v11342_v54 = vld [vmem:[#allocation2 + $0x30] sm:$0xff] }
 0x545   :  { %v8082_v28 = vor.u32 %v8081_v45, %v8078_v38 }
 0x546   :  { %v4028_v61 = vpop.f32.mrf.mxu3 }
 0x547   :  { %v14763_v40 = vadd.f32 %v4028_v61, %v3344_v60  ;;  %v8091_v60 = vrot.slane %v8089_v9, 4  ;;  %v16163_v61 = vld [vmem:[#allocation132_spill] sm:$0xff]  ;;  %v14776_v1 = vpop.f32.mrf.mxu0  ;;  %v8083_v8 = vrot.slane %v8082_v28, 4  ;;  %v8097_v9 = vrot.slane %v8095_v35, 5 }
 0x548   :  { %v8860_v35 = vrot.slane %v14499_v10, 5  ;;  %v8616_v10 = vld [vmem:[#allocation2 + $0x114] sm:$0xe] }
 0x549   :  { %16159 = vst [vmem:[#allocation128_spill] sm:$0xff] %v14763_v40  ;;  %v3347_v40 = vadd.f32 %v16163_v61, %v16162_v37  ;;  %v8092_v11 = vor.u32 %v8091_v60, %v8087_v63  ;;  %v7394_v37 = vld [vmem:[#allocation2 + $0x18c] sm:$0xf]  ;;  %v11743_v61 = vld [vmem:[#allocation2 + $0x190] sm:$0xf] }
 0x54a   :  { %v8100_v45 = vshrl.u32 %v7394_v37, 16  ;;  %v8103_v60 = vshll.u32 %v7394_v37, 16  ;;  %v8109_v28 = vshll.u32 %v11743_v61, 16  ;;  %v8113_v46 = vshrl.u32 %v11743_v61, 16 }
 0x54b   :  { %7087 = vmatmul.bf16.gmra.mxu3 %v11341_v59  ;;  %v8093_v17 = vrot.slane %v8092_v11, 4  ;;  %v16165_v59 = vld [vmem:[#allocation69_spill] sm:$0xff]  ;;  %v8862_v61 = vrot.slane %v8860_v35, 4 }
 0x54d   :  { %9235 = vmatmul.bf16.gmra.mxu1 %v16161_v62  ;;  %v16166_v62 = vld [vmem:[#allocation136_spill] sm:$0xff]  ;;  %v8098_v38 = vsel %vm11900_vm7, %v8093_v17, %v8097_v9  ;;  %v8105_v17 = vrot.slane %v8103_v60, 5  ;;  %v8111_v9 = vrot.slane %v8109_v28, 5  ;;  %v16173_v60 = vld [vmem:[#allocation145_spill] sm:$0xff] }
 0x54e   :  { %v4031_v20 = vpop.f32.mrf.mxu3  ;;  %v3349_v51 = vadd.f32 %v16166_v62, %v16165_v59  ;;  %v8102_v62 = vrot.slane %v8100_v45, 4  ;;  %v16172_v45 = vld [vmem:[#allocation77_spill] sm:$0xff] }
 0x54f   :  { %v14774_v34 = vadd.f32 %v4031_v20, %v3347_v40  ;;  %v8088_v40 = vsel %vm11900_vm7, %v8083_v8, %v8087_v63  ;;  %v14789_v11 = vpop.f32.mrf.mxu0  ;;  %v8245_v8 = vunpack.c.l.b16 %v8098_v38  ;;  %v3354_v28 = vadd.f32 %v16173_v60, %v16172_v45  ;;  %v16175_v60 = vld [vmem:[#allocation81_spill] sm:$0xff] }
 0x550   :  { %16168 = vst [vmem:[#allocation132_spill] sm:$0xff] %v14789_v11  ;;  %v8244_v63 = vunpack.c.l.b16 %v8088_v40  ;;  %v8106_v11 = vor.u32 %v8105_v17, %v8102_v62  ;;  %v11095_v40 = vrot.slane %v8616_v10, 9  ;;  %v14807_v17 = vpop.f32.mrf.mxu2  ;;  %v8867_v45 = vrot.slane %v14542_v14, 5 }
 0x551   :  { %16164 = vst [vmem:[#allocation184_spill] sm:$0xff] %v14774_v34  ;;  %8507 = vmatmul.bf16.gmra.mxu0 %v8279_v23  ;;  %v16170_v23 = vld [vmem:[#allocation140_spill] sm:$0xff] }
 0x552   :  { %v3352_v59 = vadd.f32 %v16170_v23, %v16169_v31  ;;  %v8280_v34 = vpack.c.b16 %v8245_v8, %v8244_v63  ;;  %v11744_v23 = vld [vmem:[#allocation2 + $0x194] sm:$0x1] }
 0x556   :  { %v4033_v26 = vpop.f32.mrf.mxu3 }
 0x557   :  { %v14782_v20 = vadd.f32 %v4033_v26, %v3349_v51  ;;  %v8115_v51 = vrot.slane %v8113_v46, 4  ;;  %v14794_v26 = vpop.f32.mrf.mxu1  ;;  %v8861_v46 = vsel %vm12456_vm14, %v11095_v40, %v8860_v35 }
 0x558   :  { %v9004_v10 = vunpack.c.l.b16 %v8861_v46 }
 0x559   :  { %16167 = vst [vmem:[#allocation65_spill] sm:$0xff] %v14782_v20  ;;  %v8116_v31 = vor.u32 %v8115_v51, %v8111_v9 }
 0x55b   :  { %7092 = vmatmul.bf16.gmra.mxu3 %v11342_v54  ;;  %v8863_v54 = vrot.slane %v14527_v7, 5  ;;  %v8107_v7 = vrot.slane %v8106_v11, 4  ;;  %v8117_v63 = vrot.slane %v8116_v31, 4 }
 0x55d   :  { %9240 = vmatmul.bf16.gmra.mxu1 %v13997_v32  ;;  %v8119_v32 = vshll.u32 %v11744_v23, 16  ;;  %v8864_v38 = vsel %vm12456_vm14, %v8862_v61, %v8863_v54  ;;  %v7397_v61 = vld [vmem:[#allocation2 + $0x198] sm:$0xf]  ;;  %v11343_v54 = vld [vmem:[#allocation2 + $0x3c] sm:$0xff]  ;;  %v8112_v35 = vsel %vm11900_vm7, %v8107_v7, %v8111_v9 }
 0x55e   :  { %v4036_v37 = vpop.f32.mrf.mxu3  ;;  %v8124_v11 = vshrl.u32 %v7397_v61, 16  ;;  %v8127_v31 = vshll.u32 %v7397_v61, 16 }
 0x55f   :  { %v14796_v20 = vadd.f32 %v4036_v37, %v3352_v59  ;;  %v14805_v59 = vpop.f32.mrf.mxu0  ;;  %v9005_v37 = vunpack.c.l.b16 %v8864_v38  ;;  %v8121_v8 = vrot.slane %v8119_v32, 5  ;;  %v8133_v32 = vshll.u32 %v14517_v27, 16 }
 0x560   :  { %v8137_v38 = vshrl.u32 %v14517_v27, 16  ;;  %v8126_v9 = vrot.slane %v8124_v11, 4  ;;  %v8129_v7 = vrot.slane %v8127_v31, 5  ;;  %v8617_v27 = vld [vmem:[#allocation2 + $0x120] sm:$0xe] }
 0x561   :  { %16171 = vst [vmem:[#allocation69_spill] sm:$0xff] %v14796_v20  ;;  %8512 = vmatmul.bf16.gmra.mxu0 %v8280_v34  ;;  %v14811_v34 = vpop.f32.mrf.mxu1  ;;  %v9049_v23 = vpack.c.b16 %v9005_v37, %v9004_v10  ;;  %v8122_v40 = vsel %vm11900_vm7, %v8117_v63, %v8121_v8  ;;  %v8246_v37 = vunpack.c.l.b16 %v8112_v35  ;;  %v8869_v20 = vrot.slane %v8867_v45, 4  ;;  %v11396_v35 = vld [vmem:[%s15761_s5] sm:$0xff] }
 0x562   :  { %v8139_v63 = vrot.slane %v8137_v38, 4  ;;  %v8130_v11 = vor.u32 %v8129_v7, %v8126_v9  ;;  %v11096_v38 = vrot.slane %v8617_v27, 9  ;;  %9614 = vmatpush.bf16.msra.mxu2 %v11396_v35  ;;  %v11344_v27 = vld [vmem:[#allocation2 + $0x48] sm:$0xff] }
 0x566   :  { %v4038_v62 = vpop.f32.mrf.mxu3 }
 0x567   :  { %v14809_v51 = vadd.f32 %v4038_v62, %v3354_v28  ;;  %v16176_v28 = vld [vmem:[#allocation149_spill] sm:$0xff]  ;;  %v8247_v62 = vunpack.c.l.b16 %v8122_v40  ;;  %v14822_v8 = vpop.f32.mrf.mxu0 }
 0x568   :  { %v3357_v46 = vadd.f32 %v16176_v28, %v16175_v60  ;;  %v16179_v28 = vld [vmem:[#allocation85_spill] sm:$0xff] }
 0x569   :  { %16174 = vst [vmem:[#allocation136_spill] sm:$0xff] %v14809_v51  ;;  %v8135_v51 = vrot.slane %v8133_v32, 5  ;;  %v8281_v14 = vpack.c.b16 %v8247_v62, %v8246_v37  ;;  %v14832_v40 = vpop.f32.mrf.mxu1  ;;  %v8143_v32 = vshll.u32 %v14522_v6, 16 }
 0x56b   :  { %7097 = vmatmul.bf16.gmra.mxu3 %v11343_v54  ;;  %v14826_v54 = vpop.f32.mrf.mxu2  ;;  %v8140_v31 = vor.u32 %v8139_v63, %v8135_v51  ;;  %v8145_v9 = vrot.slane %v8143_v32, 5  ;;  %v16183_v32 = vld [vmem:[#allocation157_spill] sm:$0xff] }
 0x56c   :  { %16178 = vst [vmem:[#allocation140_spill] sm:$0xff] %v14826_v54 }
 0x56d   :  { %9245 = vmatmul.bf16.gmra.mxu1 %v9049_v23  ;;  %v8870_v23 = vrot.slane %v14566_v15, 5  ;;  %v8868_v15 = vsel %vm12456_vm14, %v11096_v38, %v8867_v45  ;;  %v8141_v54 = vrot.slane %v8140_v31, 4  ;;  %v8874_v45 = vrot.slane %v14573_v36, 5  ;;  %v16182_v31 = vld [vmem:[#allocation89_spill] sm:$0xff] }
 0x56e   :  { %v4041_v10 = vpop.f32.mrf.mxu3  ;;  %v9006_v6 = vunpack.c.l.b16 %v8868_v15  ;;  %v3362_v38 = vadd.f32 %v16183_v32, %v16182_v31 }
 0x56f   :  { %v14824_v61 = vadd.f32 %v4041_v10, %v3357_v46  ;;  %v8871_v60 = vsel %vm12456_vm14, %v8869_v20, %v8870_v23  ;;  %v16180_v46 = vld [vmem:[#allocation154_spill] sm:$0xff]  ;;  %v14843_v63 = vpop.f32.mrf.mxu0  ;;  %v8146_v23 = vsel %vm11900_vm7, %v8141_v54, %v8145_v9  ;;  %v8877_v54 = vrot.slane %v14597_v52, 5  ;;  %v16185_v9 = vld [vmem:[#allocation93_spill] sm:$0xff] }
 0x570   :  { %v3359_v37 = vadd.f32 %v16180_v46, %v16179_v28  ;;  %v9007_v10 = vunpack.c.l.b16 %v8871_v60  ;;  %v8249_v28 = vunpack.c.l.b16 %v8146_v23 }
 0x571   :  { %16177 = vst [vmem:[#allocation73_spill] sm:$0xff] %v14824_v61  ;;  %8517 = vmatmul.bf16.gmra.mxu0 %v8281_v14  ;;  %v8131_v61 = vrot.slane %v8130_v11, 4  ;;  %v14852_v11 = vpop.f32.mrf.mxu1 }
 0x572   :  { %v9050_v14 = vpack.c.b16 %v9007_v10, %v9006_v6  ;;  %v16186_v6 = vld [vmem:[#allocation161_spill] sm:$0xff] }
 0x573   :  { %v8136_v20 = vsel %vm11900_vm7, %v8131_v61, %v8135_v51  ;;  %v14849_v35 = vpop.f32.mrf.mxu2  ;;  %v8876_v51 = vrot.slane %v8874_v45, 4  ;;  %v8618_v61 = vld [vmem:[#allocation2 + $0x12c] sm:$0xe] }
 0x574   :  { %v8248_v60 = vunpack.c.l.b16 %v8136_v20  ;;  %v11097_v36 = vrot.slane %v8618_v61, 9  ;;  %v16189_v61 = vld [vmem:[#allocation165_spill] sm:$0xff] }
 0x575   :  { %v8878_v10 = vsel %vm12456_vm14, %v8876_v51, %v8877_v54  ;;  %v16188_v51 = vld [vmem:[#allocation98_spill] sm:$0xff] }
 0x576   :  { %v4043_v62 = vpop.f32.mrf.mxu3  ;;  %v8282_v15 = vpack.c.b16 %v8249_v28, %v8248_v60  ;;  %v8875_v20 = vsel %vm12456_vm14, %v11097_v36, %v8874_v45  ;;  %v9009_v32 = vunpack.c.l.b16 %v8878_v10  ;;  %v11345_v60 = vld [vmem:[#allocation2 + $0x54] sm:$0xff] }
 0x577   :  { %v14841_v7 = vadd.f32 %v4043_v62, %v3359_v37  ;;  %v14859_v62 = vpop.f32.mrf.mxu0  ;;  %v8619_v10 = vld [vmem:[#allocation2 + $0x138] sm:$0xe] }
 0x579   :  { %16181 = vst [vmem:[#allocation77_spill] sm:$0xff] %v14841_v7  ;;  %v14869_v23 = vpop.f32.mrf.mxu1  ;;  %v16212_v7 = vld [vmem:[#allocation3_spill] sm:$0xff] }
 0x57b   :  { %7102 = vmatmul.bf16.gmra.mxu3 %v11344_v27  ;;  %v3364_v27 = vadd.f32 %v16186_v6, %v16185_v9 }
 0x57d   :  { %9250 = vmatmul.bf16.gmra.mxu1 %v9050_v14  ;;  %v14865_v14 = vpop.f32.mrf.mxu2 }
 0x57e   :  { %v4046_v46 = vpop.f32.mrf.mxu3 }
 0x57f   :  { %v14856_v37 = vadd.f32 %v4046_v46, %v3362_v38  ;;  %v9008_v38 = vunpack.c.l.b16 %v8875_v20  ;;  %v8881_v46 = vrot.slane %v14606_v41, 5  ;;  %v11098_v20 = vrot.slane %v8619_v10, 9  ;;  %v16192_v41 = vld [vmem:[#allocation102_spill] sm:$0xff]  ;;  %v16197_v10 = vld [vmem:[#allocation173_spill] sm:$0xff] }
 0x581   :  { %16184 = vst [vmem:[#allocation145_spill] sm:$0xff] %v14856_v37  ;;  %8522 = vmatmul.bf16.gmra.mxu0 %v8282_v15  ;;  %v9051_v28 = vpack.c.b16 %v9009_v32, %v9008_v38  ;;  %v3367_v15 = vadd.f32 %v16189_v61, %v16188_v51  ;;  %v8883_v36 = vrot.slane %v8881_v46, 4  ;;  %v14880_v6 = vpop.f32.mrf.mxu1  ;;  %v16193_v32 = vld [vmem:[#allocation169_spill] sm:$0xff]  ;;  %v11347_v37 = vld [vmem:[#allocation2 + $0x6c] sm:$0xff] }
 0x582   :  { %v3369_v38 = vadd.f32 %v16193_v32, %v16192_v41 }
 0x585   :  { %v14876_v9 = vpop.f32.mrf.mxu2 }
 0x586   :  { %v4048_v31 = vpop.f32.mrf.mxu3  ;;  %16190 = vst [vmem:[#allocation149_spill] sm:$0xff] %v14876_v9 }
 0x587   :  { %v14871_v52 = vadd.f32 %v4048_v31, %v3364_v27  ;;  %v8884_v27 = vrot.slane %v14627_v16, 5 }
 0x589   :  { %16187 = vst [vmem:[#allocation81_spill] sm:$0xff] %v14871_v52  ;;  %v8885_v31 = vsel %vm12456_vm14, %v8883_v36, %v8884_v27  ;;  %v14893_v52 = vpop.f32.mrf.mxu1  ;;  %v16196_v36 = vld [vmem:[#allocation107_spill] sm:$0xff] }
 0x58a   :  { %v9011_v51 = vunpack.c.l.b16 %v8885_v31  ;;  %v3372_v27 = vadd.f32 %v16197_v10, %v16196_v36  ;;  %v16200_v31 = vld [vmem:[#allocation111_spill] sm:$0xff] }
 0x58b   :  { %7107 = vmatmul.bf16.gmra.mxu3 %v11345_v60  ;;  %v8882_v60 = vsel %vm12456_vm14, %v11098_v20, %v8881_v46 }
 0x58d   :  { %9255 = vmatmul.bf16.gmra.mxu1 %v9051_v28 }
 0x58e   :  { %v4051_v54 = vpop.f32.mrf.mxu3 }
 0x58f   :  { %v14878_v45 = vadd.f32 %v4051_v54, %v3367_v15  ;;  %v9010_v15 = vunpack.c.l.b16 %v8882_v60  ;;  %v14891_v54 = vpop.f32.mrf.mxu2 }
 0x590   :  { %16195 = vst [vmem:[#allocation89_spill] sm:$0xff] %v14891_v54 }
 0x591   :  { %16191 = vst [vmem:[#allocation85_spill] sm:$0xff] %v14878_v45  ;;  %v11346_v45 = vld [vmem:[#allocation2 + $0x60] sm:$0xff]  ;;  %v9052_v16 = vpack.c.b16 %v9011_v51, %v9010_v15  ;;  %v14901_v20 = vpop.f32.mrf.mxu1  ;;  %v16204_v51 = vld [vmem:[#allocation180_spill] sm:$0xff] }
 0x596   :  { %v4053_v28 = vpop.f32.mrf.mxu3 }
 0x597   :  { %v14889_v61 = vadd.f32 %v4053_v28, %v3369_v38  ;;  %v14899_v46 = vpop.f32.mrf.mxu2  ;;  %v16201_v38 = vld [vmem:[#allocation176_spill] sm:$0xff] }
 0x598   :  { %16199 = vst [vmem:[#allocation93_spill] sm:$0xff] %v14899_v46  ;;  %v3374_v60 = vadd.f32 %v16201_v38, %v16200_v31  ;;  %v16209_v38 = vld [vmem:[#allocation189_spill] sm:$0xff] }
 0x599   :  { %16194 = vst [vmem:[#allocation154_spill] sm:$0xff] %v14889_v61  ;;  %v14912_v36 = vpop.f32.mrf.mxu1 }
 0x59b   :  { %7112 = vmatmul.bf16.gmra.mxu3 %v11346_v45  ;;  %v16203_v45 = vld [vmem:[#allocation114_spill] sm:$0xff] }
 0x59c   :  { %v3377_v15 = vadd.f32 %v16204_v51, %v16203_v45 }
 0x59d   :  { %9260 = vmatmul.bf16.gmra.mxu1 %v9052_v16 }
 0x59e   :  { %v4056_v41 = vpop.f32.mrf.mxu3 }
 0x59f   :  { %v14897_v32 = vadd.f32 %v4056_v41, %v3372_v27  ;;  %v14910_v16 = vpop.f32.mrf.mxu2  ;;  %v16207_v41 = vld [vmem:[#allocation119_spill] sm:$0xff] }
 0x5a0   :  { %16205 = vst [vmem:[#allocation98_spill] sm:$0xff] %v14910_v16  ;;  %v16214_v16 = vld [vmem:[#allocation193_spill] sm:$0xff] }
 0x5a1   :  { %16198 = vst [vmem:[#allocation157_spill] sm:$0xff] %v14897_v32  ;;  %v16208_v32 = vld [vmem:[#allocation185_spill] sm:$0xff]  ;;  %v14926_v51 = vpop.f32.mrf.mxu1 }
 0x5a2   :  { %v3379_v31 = vadd.f32 %v16208_v32, %v16207_v41  ;;  %v16216_v32 = vld [vmem:[#allocation17_spill] sm:$0xff] }
 0x5a6   :  { %v4058_v28 = vpop.f32.mrf.mxu3 }
 0x5a7   :  { %v14905_v61 = vadd.f32 %v4058_v28, %v3374_v60  ;;  %v16210_v60 = vld [vmem:[#allocation15_spill] sm:$0xff]  ;;  %v14922_v46 = vpop.f32.mrf.mxu2 }
 0x5a8   :  { %v4620_v28 = vadd.f32 %v16210_v60, %v16209_v38  ;;  %v16217_v38 = vld [vmem:[#allocation53_spill] sm:$0xff] }
 0x5a9   :  { %16202 = vst [vmem:[#allocation161_spill] sm:$0xff] %v14905_v61 }
 0x5ab   :  { %7117 = vmatmul.bf16.gmra.mxu3 %v11347_v37  ;;  %v16211_v37 = vld [vmem:[#allocation4_spill] sm:$0xff] }
 0x5ad   :  { %9265 = vmatmul.bf16.gmra.mxu1 %v14277_v47  ;;  %v3224_v47 = vadd.f32 %v16212_v7, %v16211_v37 }
 0x5ae   :  { %v4061_v10 = vpop.f32.mrf.mxu3 }
 0x5af   :  { %v14914_v27 = vadd.f32 %v4061_v10, %v3377_v15  ;;  %v4067_v54 = vadd.f32 %v16214_v16, %v3224_v47  ;;  %v11348_v15 = vld [vmem:[#allocation2 + $0x78] sm:$0xff]  ;;  %v16215_v10 = vld [vmem:[#allocation55_spill] sm:$0xff]  ;;  %v14933_v37 = vpop.f32.mrf.mxu2 }
 0x5b0   :  { %v16219_v47 = vld [vmem:[#allocation19_spill] sm:$0xff] }
 0x5b1   :  { %16206 = vst [vmem:[#allocation165_spill] sm:$0xff] %v14914_v27  ;;  %v5910_v27 = vadd.f32 %v16215_v10, %v4620_v28  ;;  %v4621_v41 = vadd.f32 %v16216_v32, %v4067_v54  ;;  %v4622_v28 = vadd.f32 %v16219_v47, %v13973_v56 }
 0x5b3   :  { %v6688_v60 = vadd.f32 %v16217_v38, %v5910_v27  ;;  %v16221_v38 = vld [vmem:[#allocation63_spill] sm:$0xff] }
 0x5b6   :  { %v4063_v61 = vpop.f32.mrf.mxu3 }
 0x5b7   :  { %v14924_v45 = vadd.f32 %v4063_v61, %v3379_v31  ;;  %v16218_v61 = vld [vmem:[#allocation59_spill] sm:$0xff] }
 0x5b8   :  { %v5911_v31 = vadd.f32 %v16218_v61, %v4621_v41  ;;  %v11349_v41 = vld [vmem:[#allocation2 + $0x84] sm:$0xff] }
 0x5b9   :  { %16213 = vst [vmem:[#allocation102_spill] sm:$0xff] %v14924_v45  ;;  %v14936_v45 = vpop.f32.mrf.mxu1 }
 0x5bb   :  { %7122 = vmatmul.bf16.gmra.mxu3 %v11348_v15  ;;  %v16220_v15 = vld [vmem:[#allocation56_spill] sm:$0xff] }
 0x5bc   :  { %v6689_v10 = vadd.f32 %v16220_v15, %v5911_v31 }
 0x5bd   :  { %9270 = vmatmul.bf16.gmra.mxu1 %v14306_v18 }
 0x5be   :  { %v7083_v9 = vpop.f32.mrf.mxu3 }
 0x5bf   :  { %v7243_v7 = vadd.f32 %v7083_v9, %v6688_v60  ;;  %v14946_v9 = vld [vmem:[%s15762_s4] ss:$0 sm:$0xff]  ;;  %v5912_v60 = vadd.f32 %v16221_v38, %v4622_v28  ;;  %v16224_v28 = vld [vmem:[#allocation60_spill] sm:$0xff] }
 0x5c1   :  { %v8533_v16 = vadd.f32 %v14228_v53, %v7243_v7  ;;  %v8909_v53 = vrot.slane %v14708_v21, 5  ;;  %v14951_v7 = vpop.f32.mrf.mxu2  ;;  %v14955_v31 = vpop.f32.mrf.mxu1  ;;  %v6690_v15 = vadd.f32 %v16224_v28, %v5912_v60 }
 0x5c2   :  { %16222 = vst [vmem:[#allocation169_spill] sm:$0xff] %v14951_v7 }
 0x5c3   :  { %v9311_v54 = vadd.f32 %v14504_v42, %v8533_v16  ;;  %v8623_v42 = vld [vmem:[#allocation2 + $0x168] sm:$0xe]  ;;  %v16223_v16 = vld [vmem:[#allocation21_spill] sm:$0xff] }
 0x5c5   :  { %v9379_v56 = vadd.f32 %v14946_v9, %v9311_v54 }
 0x5c6   :  { %v7085_v18 = vpop.f32.mrf.mxu3 }
 0x5c7   :  { %v7244_v27 = vadd.f32 %v7085_v18, %v6689_v10  ;;  %v11102_v10 = vrot.slane %v8623_v42, 9  ;;  %v8911_v18 = vrot.slane %v8909_v53, 4 }
 0x5c9   :  { %v8534_v32 = vadd.f32 %v14244_v57, %v7244_v27  ;;  %v4623_v57 = vadd.f32 %v16223_v16, %v14004_v33  ;;  %v9443_v27 = vmax.f32 %v9379_v56, 0.0  ;;  %v8910_v33 = vsel %vm12456_vm14, %v11102_v10, %v8909_v53  ;;  %v14971_v56 = vpop.f32.mrf.mxu2  ;;  %v16227_v16 = vld [vmem:[#allocation64_spill] sm:$0xff]  ;;  %v11350_v10 = vld [vmem:[#allocation2 + $0x90] sm:$0xff] }
 0x5cb   :  { %v9312_v61 = vadd.f32 %v14525_v3, %v8534_v32  ;;  %7127 = vmatmul.bf16.gmra.mxu3 %v11349_v41  ;;  %v8912_v3 = vrot.slane %v14723_v44, 5  ;;  %v16225_v41 = vld [vmem:[#allocation67_spill] sm:$0xff]  ;;  %v14974_v44 = vpop.f32.mrf.mxu1 }
 0x5cc   :  { %v5913_v7 = vadd.f32 %v16225_v41, %v4623_v57  ;;  %v9018_v57 = vunpack.c.l.b16 %v8910_v33 }
 0x5cd   :  { %9275 = vmatmul.bf16.gmra.mxu1 %v14334_v43  ;;  %v9380_v47 = vadd.f32 %v14946_v9, %v9312_v61  ;;  %v8913_v60 = vsel %vm12456_vm14, %v8911_v18, %v8912_v3  ;;  %v16226_v61 = vld [vmem:[#allocation23_spill] sm:$0xff] }
 0x5ce   :  { %v7088_v21 = vpop.f32.mrf.mxu3  ;;  %v4624_v42 = vadd.f32 %v16226_v61, %v14027_v22  ;;  %v8916_v22 = vrot.slane %v14739_v49, 5  ;;  %v8624_v3 = vld [vmem:[#allocation2 + $0x174] sm:$0xe] }
 0x5cf   :  { %v9444_v54 = vmax.f32 %v9380_v47, 0.0  ;;  %v7245_v38 = vadd.f32 %v7088_v21, %v6690_v15  ;;  %v6691_v47 = vadd.f32 %v16227_v16, %v5913_v7  ;;  %v9019_v15 = vunpack.c.l.b16 %v8913_v60 }
 0x5d0   :  { %v11103_v60 = vrot.slane %v8624_v3, 9  ;;  %v8918_v61 = vrot.slane %v8916_v22, 4 }
 0x5d1   :  { %v9507_v32 = vpack.c.bf16 %v9444_v54, %v9443_v27  ;;  %v8535_v43 = vadd.f32 %v14255_v58, %v7245_v38  ;;  %v16228_v27 = vld [vmem:[#allocation71_spill] sm:$0xff]  ;;  %v9056_v54 = vpack.c.b16 %v9019_v15, %v9018_v57 }
 0x5d2   :  { %v5914_v18 = vadd.f32 %v16228_v27, %v4624_v42  ;;  %v14986_v42 = vpop.f32.mrf.mxu2  ;;  %v16231_v15 = vld [vmem:[#allocation75_spill] sm:$0xff] }
 0x5d3   :  { %9615 = vmatmul.bf16.vlgmr.msra.gmra.mxu2 %v9507_v32  ;;  %v9313_v58 = vadd.f32 %v14549_v2, %v8535_v43  ;;  %v16229_v32 = vld [vmem:[#allocation25_spill] sm:$0xff]  ;;  %v16230_v2 = vld [vmem:[#allocation68_spill] sm:$0xff] }
 0x5d4   :  { %v4625_v41 = vadd.f32 %v16229_v32, %v14056_v25  ;;  %v6692_v43 = vadd.f32 %v16230_v2, %v5914_v18  ;;  %v16233_v18 = vld [vmem:[#allocation72_spill] sm:$0xff] }
 0x5d5   :  { %v9381_v7 = vadd.f32 %v14946_v9, %v9313_v58  ;;  %v11351_v2 = vld [vmem:[#allocation2 + $0x9c] sm:$0xff] }
 0x5d6   :  { %v7090_v28 = vpop.f32.mrf.mxu3  ;;  %v5915_v58 = vadd.f32 %v16231_v15, %v4625_v41 }
 0x5d7   :  { %v7246_v21 = vadd.f32 %v7090_v28, %v6691_v47  ;;  %v9445_v16 = vmax.f32 %v9381_v7, 0.0  ;;  %v8919_v47 = vrot.slane %v14754_v13, 5  ;;  %v14989_v28 = vpop.f32.mrf.mxu1 }
 0x5d9   :  { %v8536_v53 = vadd.f32 %v14273_v30, %v7246_v21  ;;  %v8917_v21 = vsel %vm12456_vm14, %v11103_v60, %v8916_v22  ;;  %v16234_v22 = vld [vmem:[#allocation79_spill] sm:$0xff] }
 0x5da   :  { %v15001_v41 = vpop.f32.mrf.mxu2 }
 0x5db   :  { %v9314_v38 = vadd.f32 %v14564_v24, %v8536_v53  ;;  %7132 = vmatmul.bf16.gmra.mxu3 %v11350_v10  ;;  %v8920_v53 = vsel %vm12456_vm14, %v8918_v61, %v8919_v47  ;;  %v16232_v10 = vld [vmem:[#allocation27_spill] sm:$0xff]  ;;  %v16235_v61 = vld [vmem:[#allocation29_spill] sm:$0xff] }
 0x5dc   :  { %v4626_v27 = vadd.f32 %v16232_v10, %v14076_v48  ;;  %v9021_v7 = vunpack.c.l.b16 %v8920_v53 }
 0x5dd   :  { %9280 = vmatmul.bf16.gmra.mxu1 %v9056_v54  ;;  %v9382_v30 = vadd.f32 %v14946_v9, %v9314_v38  ;;  %v6693_v54 = vadd.f32 %v16233_v18, %v5915_v58  ;;  %v9020_v38 = vunpack.c.l.b16 %v8917_v21  ;;  %v16239_v18 = vld [vmem:[#allocation213_spill] sm:$0xff] }
 0x5de   :  { %v7093_v33 = vpop.f32.mrf.mxu3 }
 0x5df   :  { %v7247_v49 = vadd.f32 %v7093_v33, %v6692_v43  ;;  %v9446_v24 = vmax.f32 %v9382_v30, 0.0  ;;  %v5916_v43 = vadd.f32 %v16234_v22, %v4626_v27  ;;  %v15005_v30 = vpop.f32.mrf.mxu1  ;;  %v9057_v33 = vpack.c.b16 %v9021_v7, %v9020_v38 }
 0x5e1   :  { %v9508_v57 = vpack.c.bf16 %v9446_v24, %v9445_v16  ;;  %v8537_v25 = vadd.f32 %v14287_v50, %v7247_v49  ;;  %v16236_v49 = vld [vmem:[#allocation76_spill] sm:$0xff] }
 0x5e2   :  { %v6694_v16 = vadd.f32 %v16236_v49, %v5916_v43  ;;  %v15014_v53 = vpop.f32.mrf.mxu2  ;;  %v11352_v43 = vld [vmem:[#allocation2 + $0xa8] sm:$0xff]  ;;  %v16246_v49 = vld [vmem:[#allocation255_spill] sm:$0xff] }
 0x5e3   :  { %9620 = vmatmul.bf16.gmra.mxu2 %v9508_v57  ;;  %v9315_v3 = vadd.f32 %v14580_v12, %v8537_v25  ;;  %v4627_v12 = vadd.f32 %v16235_v61, %v14105_v0  ;;  %v16237_v25 = vld [vmem:[#allocation83_spill] sm:$0xff] }
 0x5e4   :  { %v16240_v0 = vld [vmem:[#allocation31_spill] sm:$0xff] }
 0x5e5   :  { %v9383_v60 = vadd.f32 %v14946_v9, %v9315_v3  ;;  %v5917_v21 = vadd.f32 %v16237_v25, %v4627_v12  ;;  %v16242_v3 = vld [vmem:[#allocation271_spill] sm:$0xff] }
 0x5e6   :  { %v7095_v13 = vpop.f32.mrf.mxu3 }
 0x5e7   :  { %v7248_v32 = vadd.f32 %v7095_v13, %v6693_v54  ;;  %v9447_v57 = vmax.f32 %v9383_v60, 0.0  ;;  %v15017_v27 = vpop.f32.mrf.mxu1  ;;  %v4628_v54 = vadd.f32 %v16240_v0, %v16239_v18  ;;  %v16241_v13 = vld [vmem:[#allocation80_spill] sm:$0xff] }
 0x5e8   :  { %v6695_v38 = vadd.f32 %v16241_v13, %v5917_v21  ;;  %v16245_v60 = vld [vmem:[#allocation272_spill] sm:$0xff] }
 0x5e9   :  { %v8538_v50 = vadd.f32 %v14302_v4, %v7248_v32 }
 0x5eb   :  { %v9316_v48 = vadd.f32 %v14595_v5, %v8538_v50  ;;  %7137 = vmatmul.bf16.gmra.mxu3 %v11351_v2  ;;  %v16238_v5 = vld [vmem:[#allocation242_spill] sm:$0xff]  ;;  %v16243_v2 = vld [vmem:[#allocation244_spill] sm:$0xff] }
 0x5ed   :  { %9285 = vmatmul.bf16.gmra.mxu1 %v9057_v33  ;;  %v9384_v24 = vadd.f32 %v14946_v9, %v9316_v48  ;;  %v16244_v33 = vld [vmem:[#allocation87_spill] sm:$0xff] }
 0x5ee   :  { %v7098_v4 = vpop.f32.mrf.mxu3  ;;  %v5918_v48 = vadd.f32 %v16244_v33, %v4628_v54  ;;  %v16251_v54 = vld [vmem:[#allocation91_spill] sm:$0xff]  ;;  %v16256_v33 = vld [vmem:[#allocation274_spill] sm:$0xff] }
 0x5ef   :  { %v7249_v47 = vadd.f32 %v7098_v4, %v6694_v16  ;;  %v9448_v15 = vmax.f32 %v9384_v24, 0.0  ;;  %v16247_v16 = vld [vmem:[#allocation217_spill] sm:$0xff]  ;;  %v15034_v25 = vpop.f32.mrf.mxu1 }
 0x5f0   :  { %v16248_v24 = vld [vmem:[#allocation33_spill] sm:$0xff] }
 0x5f1   :  { %v9509_v58 = vpack.c.bf16 %v9448_v15, %v9447_v57  ;;  %v8539_v10 = vadd.f32 %v16238_v5, %v7249_v47  ;;  %v4629_v4 = vadd.f32 %v16248_v24, %v16247_v16  ;;  %v15030_v47 = vpop.f32.mrf.mxu2  ;;  %v16250_v57 = vld [vmem:[#allocation84_spill] sm:$0xff] }
 0x5f2   :  { %16249 = vst [vmem:[#allocation107_spill] sm:$0xff] %v15030_v47  ;;  %v6696_v15 = vadd.f32 %v16250_v57, %v5918_v48  ;;  %v11353_v24 = vld [vmem:[#allocation2 + $0xb4] sm:$0xff] }
 0x5f3   :  { %9625 = vmatmul.bf16.gmra.mxu2 %v9509_v58  ;;  %v9317_v32 = vadd.f32 %v16242_v3, %v8539_v10  ;;  %v5919_v13 = vadd.f32 %v16251_v54, %v4629_v4  ;;  %v16253_v3 = vld [vmem:[#allocation221_spill] sm:$0xff]  ;;  %v16259_v4 = vld [vmem:[#allocation95_spill] sm:$0xff]  ;;  %v16264_v54 = vld [vmem:[#allocation92_spill] sm:$0xff] }
 0x5f4   :  { %v16333_v47 = vld [vmem:[#allocation148_spill] sm:$0xff] }
 0x5f5   :  { %v9385_v12 = vadd.f32 %v14946_v9, %v9317_v32  ;;  %v16254_v32 = vld [vmem:[#allocation35_spill] sm:$0xff] }
 0x5f6   :  { %v7100_v7 = vpop.f32.mrf.mxu3 }
 0x5f7   :  { %v7250_v50 = vadd.f32 %v7100_v7, %v6695_v38  ;;  %v9449_v10 = vmax.f32 %v9385_v12, 0.0  ;;  %v16252_v38 = vld [vmem:[#allocation247_spill] sm:$0xff]  ;;  %v16258_v12 = vld [vmem:[#allocation249_spill] sm:$0xff] }
 0x5f9   :  { %v8540_v22 = vadd.f32 %v16243_v2, %v7250_v50  ;;  %v4630_v50 = vadd.f32 %v16254_v32, %v16253_v3  ;;  %v16255_v2 = vld [vmem:[#allocation88_spill] sm:$0xff] }
 0x5fb   :  { %v9318_v61 = vadd.f32 %v16245_v60, %v8540_v22  ;;  %7142 = vmatmul.bf16.gmra.mxu3 %v11352_v43  ;;  %v6697_v22 = vadd.f32 %v16255_v2, %v5919_v13  ;;  %v5920_v57 = vadd.f32 %v16259_v4, %v4630_v50  ;;  %v16265_v50 = vld [vmem:[#allocation100_spill] sm:$0xff] }
 0x5fd   :  { %9290 = vmatmul.bf16.gmra.mxu1 %v16246_v49  ;;  %v9386_v58 = vadd.f32 %v14946_v9, %v9318_v61  ;;  %v15042_v61 = vpop.f32.mrf.mxu2  ;;  %v15044_v49 = vpop.f32.mrf.mxu1  ;;  %v6698_v13 = vadd.f32 %v16264_v54, %v5920_v57  ;;  %v16270_v57 = vld [vmem:[#allocation96_spill] sm:$0xff] }
 0x5fe   :  { %v7103_v21 = vpop.f32.mrf.mxu3  ;;  %16257 = vst [vmem:[#allocation173_spill] sm:$0xff] %v15042_v61 }
 0x5ff   :  { %v7251_v5 = vadd.f32 %v7103_v21, %v6696_v15  ;;  %v9450_v18 = vmax.f32 %v9386_v58, 0.0  ;;  %v16260_v15 = vld [vmem:[#allocation275_spill] sm:$0xff] }
 0x601   :  { %v9510_v0 = vpack.c.bf16 %v9450_v18, %v9449_v10  ;;  %v8541_v7 = vadd.f32 %v16252_v38, %v7251_v5  ;;  %v16261_v5 = vld [vmem:[#allocation260_spill] sm:$0xff]  ;;  %v16262_v10 = vld [vmem:[#allocation225_spill] sm:$0xff] }
 0x602   :  { %v16263_v18 = vld [vmem:[#allocation37_spill] sm:$0xff] }
 0x603   :  { %9630 = vmatmul.bf16.gmra.mxu2 %v9510_v0  ;;  %v9319_v48 = vadd.f32 %v16256_v33, %v8541_v7  ;;  %v4631_v0 = vadd.f32 %v16263_v18, %v16262_v10  ;;  %v16272_v18 = vld [vmem:[#allocation253_spill] sm:$0xff] }
 0x605   :  { %v9387_v21 = vadd.f32 %v14946_v9, %v9319_v48  ;;  %v15056_v33 = vpop.f32.mrf.mxu2  ;;  %v16267_v48 = vld [vmem:[#allocation251_spill] sm:$0xff] }
 0x606   :  { %v7105_v43 = vpop.f32.mrf.mxu3  ;;  %16266 = vst [vmem:[#allocation111_spill] sm:$0xff] %v15056_v33 }
 0x607   :  { %v7252_v60 = vadd.f32 %v7105_v43, %v6697_v22  ;;  %v9451_v32 = vmax.f32 %v9387_v21, 0.0  ;;  %v5921_v43 = vadd.f32 %v16265_v50, %v4631_v0  ;;  %v16273_v0 = vld [vmem:[#allocation104_spill] sm:$0xff]  ;;  %v16276_v50 = vld [vmem:[#allocation269_spill] sm:$0xff] }
 0x609   :  { %v8542_v16 = vadd.f32 %v16258_v12, %v7252_v60  ;;  %v15058_v60 = vpop.f32.mrf.mxu1 }
 0x60b   :  { %v9320_v58 = vadd.f32 %v16260_v15, %v8542_v16  ;;  %7147 = vmatmul.bf16.gmra.mxu3 %v11353_v24  ;;  %v16268_v16 = vld [vmem:[#allocation229_spill] sm:$0xff]  ;;  %v16269_v24 = vld [vmem:[#allocation39_spill] sm:$0xff]  ;;  %v6699_v15 = vadd.f32 %v16270_v57, %v5921_v43 }
 0x60c   :  { %v4632_v4 = vadd.f32 %v16269_v24, %v16268_v16  ;;  %v16277_v43 = vld [vmem:[#allocation231_spill] sm:$0xff]  ;;  %v16279_v16 = vld [vmem:[#allocation101_spill] sm:$0xff] }
 0x60d   :  { %9295 = vmatmul.bf16.gmra.mxu1 %v16261_v5  ;;  %v9388_v38 = vadd.f32 %v14946_v9, %v9320_v58  ;;  %v16271_v5 = vld [vmem:[#allocation144_spill] sm:$0xff] }
 0x60e   :  { %v7108_v7 = vpop.f32.mrf.mxu3 }
 0x60f   :  { %v7253_v3 = vadd.f32 %v7108_v7, %v6698_v13  ;;  %v9452_v2 = vmax.f32 %v9388_v38, 0.0  ;;  %v11354_v13 = vld [vmem:[#allocation2 + $0xc0] sm:$0xff]  ;;  %v5922_v38 = vadd.f32 %v16273_v0, %v4632_v4  ;;  %v16274_v7 = vld [vmem:[#allocation278_spill] sm:$0xff] }
 0x610   :  { %v16282_v0 = vld [vmem:[#allocation233_spill] sm:$0xff] }
 0x611   :  { %v9511_v22 = vpack.c.bf16 %v9452_v2, %v9451_v32  ;;  %v8543_v12 = vadd.f32 %v16267_v48, %v7253_v3  ;;  %v15069_v2 = vpop.f32.mrf.mxu2  ;;  %v16278_v48 = vld [vmem:[#allocation41_spill] sm:$0xff]  ;;  %v6700_v24 = vadd.f32 %v16279_v16, %v5922_v38  ;;  %v11355_v16 = vld [vmem:[#allocation2 + $0xcc] sm:$0xff] }
 0x612   :  { %16275 = vst [vmem:[#allocation176_spill] sm:$0xff] %v15069_v2  ;;  %v16284_v2 = vld [vmem:[#allocation105_spill] sm:$0xff] }
 0x613   :  { %9635 = vmatmul.bf16.gmra.mxu2 %v9511_v22  ;;  %v9321_v10 = vadd.f32 %v16271_v5, %v8543_v12  ;;  %v15071_v22 = vpop.f32.mrf.mxu1  ;;  %v4633_v12 = vadd.f32 %v16278_v48, %v16277_v43 }
 0x615   :  { %v9389_v3 = vadd.f32 %v14946_v9, %v9321_v10 }
 0x616   :  { %v7110_v58 = vpop.f32.mrf.mxu3 }
 0x617   :  { %v7254_v21 = vadd.f32 %v7110_v58, %v6699_v15  ;;  %v9453_v58 = vmax.f32 %v9389_v3, 0.0  ;;  %v16286_v3 = vld [vmem:[#allocation259_spill] sm:$0xff] }
 0x619   :  { %v8544_v54 = vadd.f32 %v16272_v18, %v7254_v21  ;;  %v16280_v18 = vld [vmem:[#allocation109_spill] sm:$0xff]  ;;  %v15083_v43 = vpop.f32.mrf.mxu2 }
 0x61a   :  { %v5923_v10 = vadd.f32 %v16280_v18, %v4633_v12  ;;  %16285 = vst [vmem:[#allocation114_spill] sm:$0xff] %v15083_v43  ;;  %v16288_v12 = vld [vmem:[#allocation280_spill] sm:$0xff] }
 0x61b   :  { %v9322_v32 = vadd.f32 %v16274_v7, %v8544_v54  ;;  %7152 = vmatmul.bf16.gmra.mxu3 %v11354_v13  ;;  %v16281_v54 = vld [vmem:[#allocation256_spill] sm:$0xff]  ;;  %v16283_v7 = vld [vmem:[#allocation43_spill] sm:$0xff] }
 0x61c   :  { %v6701_v33 = vadd.f32 %v16284_v2, %v5923_v10  ;;  %v16291_v2 = vld [vmem:[#allocation110_spill] sm:$0xff] }
 0x61d   :  { %9300 = vmatmul.bf16.gmra.mxu1 %v16276_v50  ;;  %v9390_v57 = vadd.f32 %v14946_v9, %v9322_v32  ;;  %v4634_v50 = vadd.f32 %v16283_v7, %v16282_v0 }
 0x61e   :  { %v7113_v15 = vpop.f32.mrf.mxu3 }
 0x61f   :  { %v7255_v4 = vadd.f32 %v7113_v15, %v6700_v24  ;;  %v9454_v5 = vmax.f32 %v9390_v57, 0.0  ;;  %v16287_v57 = vld [vmem:[#allocation113_spill] sm:$0xff] }
 0x620   :  { %v5924_v15 = vadd.f32 %v16287_v57, %v4634_v50  ;;  %v16293_v50 = vld [vmem:[#allocation117_spill] sm:$0xff] }
 0x621   :  { %v9512_v21 = vpack.c.bf16 %v9454_v5, %v9453_v58  ;;  %v8545_v13 = vadd.f32 %v16281_v54, %v7255_v4  ;;  %v16289_v5 = vld [vmem:[#allocation235_spill] sm:$0xff]  ;;  %v15094_v7 = vpop.f32.mrf.mxu2 }
 0x622   :  { %v6702_v10 = vadd.f32 %v16291_v2, %v5924_v15  ;;  %16292 = vst [vmem:[#allocation180_spill] sm:$0xff] %v15094_v7 }
 0x623   :  { %9640 = vmatmul.bf16.gmra.mxu2 %v9512_v21  ;;  %v9323_v32 = vadd.f32 %v14702_v19, %v8545_v13  ;;  %v16290_v21 = vld [vmem:[#allocation45_spill] sm:$0xff] }
 0x624   :  { %v4635_v18 = vadd.f32 %v16290_v21, %v16289_v5  ;;  %v16298_v21 = vld [vmem:[#allocation282_spill] sm:$0xff] }
 0x625   :  { %v9391_v4 = vadd.f32 %v14946_v9, %v9323_v32  ;;  %v16295_v32 = vld [vmem:[#allocation237_spill] sm:$0xff] }
 0x626   :  { %v7115_v38 = vpop.f32.mrf.mxu3 }
 0x627   :  { %v7256_v48 = vadd.f32 %v7115_v38, %v6701_v33  ;;  %v9455_v33 = vmax.f32 %v9391_v4, 0.0 }
 0x629   :  { %v8546_v24 = vadd.f32 %v16286_v3, %v7256_v48  ;;  %v5925_v48 = vadd.f32 %v16293_v50, %v4635_v18  ;;  %v16294_v3 = vld [vmem:[#allocation262_spill] sm:$0xff]  ;;  %v16302_v18 = vld [vmem:[#allocation283_spill] sm:$0xff]  ;;  %v16304_v50 = vld [vmem:[#allocation49_spill] sm:$0xff] }
 0x62b   :  { %v9324_v58 = vadd.f32 %v16288_v12, %v8546_v24  ;;  %7157 = vmatmul.bf16.gmra.mxu3 %v11355_v16  ;;  %v16296_v24 = vld [vmem:[#allocation47_spill] sm:$0xff] }
 0x62c   :  { %v4636_v57 = vadd.f32 %v16296_v24, %v16295_v32  ;;  %v16297_v12 = vld [vmem:[#allocation115_spill] sm:$0xff] }
 0x62d   :  { %v9392_v54 = vadd.f32 %v14946_v9, %v9324_v58  ;;  %v6703_v5 = vadd.f32 %v16297_v12, %v5925_v48  ;;  %v16305_v48 = vld [vmem:[#allocation121_spill] sm:$0xff] }
 0x62e   :  { %v7118_v0 = vpop.f32.mrf.mxu3 }
 0x62f   :  { %v7257_v19 = vadd.f32 %v7118_v0, %v6702_v10  ;;  %v9456_v13 = vmax.f32 %v9392_v54, 0.0  ;;  %v16299_v10 = vld [vmem:[#allocation264_spill] sm:$0xff]  ;;  %v11356_v54 = vld [vmem:[#allocation2 + $0xf0] sm:$0xff]  ;;  %v16300_v0 = vld [vmem:[#allocation122_spill] sm:$0xff] }
 0x630   :  { %v5926_v7 = vadd.f32 %v16300_v0, %v4636_v57  ;;  %v16306_v57 = vld [vmem:[#allocation125_spill] sm:$0xff] }
 0x631   :  { %v9513_v38 = vpack.c.bf16 %v9456_v13, %v9455_v33  ;;  %v8547_v16 = vadd.f32 %v16294_v3, %v7257_v19  ;;  %v15104_v33 = vpop.f32.mrf.mxu2 }
 0x632   :  { %16301 = vst [vmem:[#allocation119_spill] sm:$0xff] %v15104_v33  ;;  %v6704_v32 = vadd.f32 %v16305_v48, %v5926_v7  ;;  %v16312_v48 = vld [vmem:[#allocation284_spill] sm:$0xff] }
 0x633   :  { %9645 = vmatmul.bf16.gmra.mxu2 %v9513_v38  ;;  %v9325_v58 = vadd.f32 %v16298_v21, %v8547_v16  ;;  %v16303_v38 = vld [vmem:[#allocation239_spill] sm:$0xff] }
 0x634   :  { %v4637_v3 = vadd.f32 %v16304_v50, %v16303_v38  ;;  %v16311_v38 = vld [vmem:[#allocation126_spill] sm:$0xff] }
 0x635   :  { %v9393_v19 = vadd.f32 %v14946_v9, %v9325_v58  ;;  %v16309_v58 = vld [vmem:[#allocation241_spill] sm:$0xff] }
 0x636   :  { %v7120_v15 = vpop.f32.mrf.mxu3 }
 0x637   :  { %v7258_v2 = vadd.f32 %v7120_v15, %v6703_v5  ;;  %v9457_v5 = vmax.f32 %v9393_v19, 0.0 }
 0x639   :  { %v8548_v4 = vadd.f32 %v16299_v10, %v7258_v2  ;;  %v5927_v2 = vadd.f32 %v16306_v57, %v4637_v3  ;;  %v16307_v10 = vld [vmem:[#allocation266_spill] sm:$0xff] }
 0x63b   :  { %v9326_v13 = vadd.f32 %v16302_v18, %v8548_v4  ;;  %7162 = vmatmul.bf16.gmra.mxu3 %v11356_v54  ;;  %v15114_v4 = vpop.f32.mrf.mxu2  ;;  %v16310_v54 = vld [vmem:[#allocation51_spill] sm:$0xff]  ;;  %v6705_v50 = vadd.f32 %v16311_v38, %v5927_v2 }
 0x63c   :  { %16308 = vst [vmem:[#allocation185_spill] sm:$0xff] %v15114_v4  ;;  %v4638_v18 = vadd.f32 %v16310_v54, %v16309_v58  ;;  %v16330_v4 = vld [vmem:[#allocation270_spill] sm:$0xff] }
 0x63d   :  { %v9394_v16 = vadd.f32 %v14946_v9, %v9326_v13 }
 0x63e   :  { %v7123_v24 = vpop.f32.mrf.mxu3 }
 0x63f   :  { %v7259_v12 = vadd.f32 %v7123_v24, %v6704_v32  ;;  %v9458_v15 = vmax.f32 %v9394_v16, 0.0  ;;  %v16313_v32 = vld [vmem:[#allocation268_spill] sm:$0xff]  ;;  %v16314_v24 = vld [vmem:[#allocation130_spill] sm:$0xff] }
 0x640   :  { %v11357_v16 = vld [vmem:[#allocation2 + $0xfc] sm:$0xff] }
 0x641   :  { %v9514_v21 = vpack.c.bf16 %v9458_v15, %v9457_v5  ;;  %v8549_v0 = vadd.f32 %v16307_v10, %v7259_v12  ;;  %v5928_v5 = vadd.f32 %v16314_v24, %v4638_v18  ;;  %v16315_v15 = vld [vmem:[#allocation5_spill] sm:$0xff]  ;;  %v16317_v10 = vld [vmem:[#allocation131_spill] sm:$0xff]  ;;  %v16319_v18 = vld [vmem:[#allocation134_spill] sm:$0xff] }
 0x642   :  { %v16323_v24 = vld [vmem:[#allocation137_spill] sm:$0xff] }
 0x643   :  { %9650 = vmatmul.bf16.gmra.mxu2 %v9514_v21  ;;  %v9327_v13 = vadd.f32 %v16312_v48, %v8549_v0  ;;  %v16316_v21 = vld [vmem:[#allocation54_spill] sm:$0xff]  ;;  %v6706_v58 = vadd.f32 %v16317_v10, %v5928_v5  ;;  %v15128_v54 = vpop.f32.mrf.mxu2 }
 0x644   :  { %v4639_v57 = vadd.f32 %v16316_v21, %v16315_v15  ;;  %16318 = vst [vmem:[#allocation189_spill] sm:$0xff] %v15128_v54 }
 0x645   :  { %v9395_v12 = vadd.f32 %v14946_v9, %v9327_v13  ;;  %v16321_v13 = vld [vmem:[#allocation6_spill] sm:$0xff] }
 0x646   :  { %v7125_v7 = vpop.f32.mrf.mxu3  ;;  %v5929_v48 = vadd.f32 %v16319_v18, %v4639_v57  ;;  %v27_v57 = vld [vmem:[%s15759_s0] sm:$0xf] }
 0x647   :  { %v7260_v33 = vadd.f32 %v7125_v7, %v6705_v50 }
 0x648   :  { %v6707_v15 = vadd.f32 %v16323_v24, %v5929_v48  ;;  %v9776_v48 = vunpack.c.l.bf16 %v27_v57  ;;  %v16329_v57 = vld [vmem:[#allocation143_spill] sm:$0xff] }
 0x649   :  { %v8550_v19 = vadd.f32 %v16313_v32, %v7260_v33  ;;  %v9459_v33 = vmax.f32 %v9395_v12, 0.0  ;;  %v15139_v12 = vld [vmem:[%s15763_s6] ss:$0 sm:$0xff] }
 0x64b   :  { %v9328_v3 = vadd.f32 %v14778_v29, %v8550_v19  ;;  %7167 = vmatmul.bf16.gmra.mxu3 %v11357_v16  ;;  %v16320_v29 = vld [vmem:[#allocation22_spill] sm:$0xff] }
 0x64c   :  { %v16322_v19 = vld [vmem:[#allocation58_spill] sm:$0xff] }
 0x64d   :  { %v9396_v2 = vadd.f32 %v14946_v9, %v9328_v3  ;;  %v4640_v16 = vadd.f32 %v16322_v19, %v16321_v13  ;;  %v16328_v19 = vld [vmem:[#allocation142_spill] sm:$0xff] }
 0x64e   :  { %v7128_v0 = vpop.f32.mrf.mxu3 }
 0x64f   :  { %v7261_v38 = vadd.f32 %v7128_v0, %v6706_v58  ;;  %v9460_v50 = vmax.f32 %v9396_v2, 0.0  ;;  %v16324_v58 = vld [vmem:[#allocation106_spill] sm:$0xff] }
 0x650   :  { %v11358_v0 = vld [vmem:[#allocation2 + $0x108] sm:$0xff] }
 0x651   :  { %v9515_v7 = vpack.c.bf16 %v9460_v50, %v9459_v33  ;;  %v8551_v32 = vadd.f32 %v16320_v29, %v7261_v38  ;;  %v16325_v38 = vld [vmem:[#allocation139_spill] sm:$0xff] }
 0x652   :  { %v5930_v33 = vadd.f32 %v16325_v38, %v4640_v16  ;;  %v16326_v29 = vld [vmem:[#allocation7_spill] sm:$0xff] }
 0x653   :  { %9655 = vmatmul.bf16.gmra.mxu2 %v9515_v7  ;;  %v9329_v5 = vadd.f32 %v14794_v26, %v8551_v32  ;;  %v28_v26 = vld [vmem:[%s15759_s0 + $0x4] sm:$0xff]  }
 0x654   :  { %v16327_v32 = vld [vmem:[#allocation62_spill] sm:$0xff]  ;;  %v6708_v24 = vadd.f32 %v16328_v19, %v5930_v33  ;;  %v16331_v33 = vld [vmem:[#allocation8_spill] sm:$0xff] }
 0x655   :  { %v9397_v50 = vadd.f32 %v14946_v9, %v9329_v5  ;;  %v4641_v13 = vadd.f32 %v16327_v32, %v16326_v29  ;;  %v16332_v19 = vld [vmem:[#allocation66_spill] sm:$0xff] }
 0x656   :  { %v7130_v3 = vpop.f32.mrf.mxu3  ;;  %v9616_v21 = vpop.f32.mrf.mxu2 }
 0x657   :  { %v7262_v10 = vadd.f32 %v7130_v3, %v6707_v15  ;;  %v9617_v18 = vadd.f32 %v15139_v12, %v9616_v21  ;;  %v9777_v15 = vunpack.c.l.bf16 %v28_v26 }
 0x659   :  { %v8552_v2 = vadd.f32 %v16324_v58, %v7262_v10  ;;  %v9461_v58 = vmax.f32 %v9397_v50, 0.0  ;;  %v9840_v38 = vadd.f32 %v9776_v48, %v9617_v18 }
 0x65b   :  { %v9330_v7 = vadd.f32 %v14811_v34, %v8552_v2  ;;  %7172 = vmatmul.bf16.gmra.mxu3 %v11358_v0  ;;  %v5931_v0 = vadd.f32 %v16329_v57, %v4641_v13  ;;  %v9904_v29 = vmax.f32 %v9840_v38, 0.0  ;;  %v16336_v38 = vld [vmem:[#allocation9_spill] sm:$0xff] }
 0x65d   :  { %v9398_v16 = vadd.f32 %v14946_v9, %v9330_v7  ;;  %v4642_v7 = vadd.f32 %v16332_v19, %v16331_v33  ;;  %v6709_v50 = vadd.f32 %v16333_v47, %v5931_v0 }
 0x65e   :  { %v7133_v3 = vpop.f32.mrf.mxu3  ;;  %v9618_v10 = vpop.f32.mrf.mxu2 }
 0x65f   :  { %v7263_v54 = vadd.f32 %v7133_v3, %v6708_v24  ;;  %v9619_v5 = vadd.f32 %v15139_v12, %v9618_v10  ;;  %v9462_v34 = vmax.f32 %v9398_v16, 0.0  ;;  %v16335_v16 = vld [vmem:[#allocation147_spill] sm:$0xff] }
 0x660   :  { %v5932_v3 = vadd.f32 %v16335_v16, %v4642_v7  ;;  %v30_v10 = vld [vmem:[%s15759_s0 + $0xc] sm:$0xff]  }
 0x661   :  { %v9841_v2 = vadd.f32 %v9777_v15, %v9619_v5  ;;  %v9516_v21 = vpack.c.bf16 %v9462_v34, %v9461_v58  ;;  %v8553_v43 = vadd.f32 %v16330_v4, %v7263_v54  ;;  %v16334_v15 = vld [vmem:[#allocation30_spill] sm:$0xff]  ;;  %v11359_v54 = vld [vmem:[#allocation2 + $0x114] sm:$0xff]  ;;  %v9778_v58 = vunpack.c.h.bf16 %v28_v26  ;;  %v16338_v34 = vld [vmem:[#allocation153_spill] sm:$0xff] }
 0x662   :  { %v16339_v26 = vld [vmem:[#allocation151_spill] sm:$0xff]  ;;  %v16342_v16 = vld [vmem:[#allocation74_spill] sm:$0xff] }
 0x663   :  { %v9905_v32 = vmax.f32 %v9841_v2, 0.0  ;;  %9660 = vmatmul.bf16.gmra.mxu2 %v9516_v21  ;;  %v9331_v18 = vadd.f32 %v14832_v40, %v8553_v43  ;;  %v6710_v2 = vadd.f32 %v16338_v34, %v5932_v3  ;;  %v9779_v21 = vunpack.c.l.bf16 %v30_v10  ;;  %v16344_v34 = vld [vmem:[#allocation273_spill] sm:$0xff] }
 0x665   :  { %v11407_v61 = vpack.c.bf16 %v9905_v32, %v9904_v29  ;;  %v9399_v47 = vadd.f32 %v14946_v9, %v9331_v18 }
 0x666   :  { %v7135_v48 = vpop.f32.mrf.mxu3  ;;  %v9621_v24 = vpop.f32.mrf.mxu2 }
 0x667   :  { %11408 = vst [vmem:[%s15764_s7] sm:$0xff] %v11407_v61   ;;  %v7264_v13 = vadd.f32 %v7135_v48, %v6709_v50  ;;  %v9622_v43 = vadd.f32 %v15139_v12, %v9621_v24  ;;  %v16337_v61 = vld [vmem:[#allocation70_spill] sm:$0xff]  ;;  %v9463_v32 = vmax.f32 %v9399_v47, 0.0  ;;  %v16340_v24 = vld [vmem:[#allocation127_spill] sm:$0xff] }
 0x668   :  { %v4643_v5 = vadd.f32 %v16337_v61, %v16336_v38  ;;  %v16343_v38 = vld [vmem:[#allocation158_spill] sm:$0xff] }
 0x669   :  { %v8554_v4 = vadd.f32 %v16334_v15, %v7264_v13  ;;  %v9842_v33 = vadd.f32 %v9778_v58, %v9622_v43 }
 0x66a   :  { %v5933_v48 = vadd.f32 %v16339_v26, %v4643_v5 }
 0x66b   :  { %v9332_v40 = vadd.f32 %v14852_v11, %v8554_v4  ;;  %7177 = vmatmul.bf16.gmra.mxu3 %v11359_v54  ;;  %v9906_v15 = vmax.f32 %v9842_v33, 0.0  ;;  %v16341_v54 = vld [vmem:[#allocation10_spill] sm:$0xff] }
 0x66c   :  { %v4644_v3 = vadd.f32 %v16342_v16, %v16341_v54  ;;  %v6711_v47 = vadd.f32 %v16343_v38, %v5933_v48 }
 0x66d   :  { %v9400_v57 = vadd.f32 %v14946_v9, %v9332_v40 }
 0x66e   :  { %v7138_v0 = vpop.f32.mrf.mxu3  ;;  %v9623_v29 = vpop.f32.mrf.mxu2 }
 0x66f   :  { %v7265_v19 = vadd.f32 %v7138_v0, %v6710_v2  ;;  %v9624_v7 = vadd.f32 %v15139_v12, %v9623_v29  ;;  %v9464_v11 = vmax.f32 %v9400_v57, 0.0  ;;  %v16345_v57 = vld [vmem:[#allocation156_spill] sm:$0xff] }
 0x670   :  { %v5934_v0 = vadd.f32 %v16345_v57, %v4644_v3  ;;  %v32_v29 = vld [vmem:[%s15759_s0 + $0x14] sm:$0xff]  }
 0x671   :  { %v9843_v50 = vadd.f32 %v9779_v21, %v9624_v7  ;;  %v9517_v18 = vpack.c.bf16 %v9464_v11, %v9463_v32  ;;  %v8555_v13 = vadd.f32 %v16340_v24, %v7265_v19  ;;  %v11360_v21 = vld [vmem:[#allocation2 + $0x120] sm:$0xff]  ;;  %v9780_v19 = vunpack.c.h.bf16 %v30_v10  ;;  %v16346_v7 = vld [vmem:[#allocation11_spill] sm:$0xff]  ;;  %v16347_v11 = vld [vmem:[#allocation78_spill] sm:$0xff] }
 0x672   :  { %v9781_v48 = vunpack.c.l.bf16 %v32_v29  ;;  %v16349_v10 = vld [vmem:[#allocation160_spill] sm:$0xff] }
 0x673   :  { %v9907_v4 = vmax.f32 %v9843_v50, 0.0  ;;  %9665 = vmatmul.bf16.gmra.mxu2 %v9517_v18  ;;  %v9333_v43 = vadd.f32 %v14869_v23, %v8555_v13  ;;  %v4645_v50 = vadd.f32 %v16347_v11, %v16346_v7  ;;  %v16348_v18 = vld [vmem:[#allocation163_spill] sm:$0xff]  ;;  %v16354_v11 = vld [vmem:[#allocation276_spill] sm:$0xff] }
 0x674   :  { %v6712_v26 = vadd.f32 %v16348_v18, %v5934_v0  ;;  %v16353_v0 = vld [vmem:[#allocation168_spill] sm:$0xff]  ;;  %v11361_v18 = vld [vmem:[#allocation2 + $0x12c] sm:$0xff] }
 0x675   :  { %v11412_v40 = vpack.c.bf16 %v9907_v4, %v9906_v15  ;;  %v9401_v32 = vadd.f32 %v14946_v9, %v9333_v43  ;;  %v16350_v43 = vld [vmem:[#allocation38_spill] sm:$0xff] }
 0x676   :  { %v7140_v58 = vpop.f32.mrf.mxu3  ;;  %v9626_v61 = vpop.f32.mrf.mxu2 }
 0x677   :  { %11564 = vst [vmem:[%s15764_s7 + $0x8] sm:$0xff] %v11412_v40   ;;  %v7266_v5 = vadd.f32 %v7140_v58, %v6711_v47  ;;  %v9627_v33 = vadd.f32 %v15139_v12, %v9626_v61  ;;  %v9465_v4 = vmax.f32 %v9401_v32, 0.0  ;;  %v5935_v47 = vadd.f32 %v16349_v10, %v4645_v50 }
 0x679   :  { %v8556_v2 = vadd.f32 %v16344_v34, %v7266_v5  ;;  %v9844_v54 = vadd.f32 %v9780_v19, %v9627_v33  ;;  %v16351_v34 = vld [vmem:[#allocation12_spill] sm:$0xff]  ;;  %v6713_v32 = vadd.f32 %v16353_v0, %v5935_v47  ;;  %v16360_v0 = vld [vmem:[#allocation277_spill] sm:$0xff] }
 0x67b   :  { %v9334_v23 = vadd.f32 %v14880_v6, %v8556_v2  ;;  %7182 = vmatmul.bf16.gmra.mxu3 %v11360_v21  ;;  %v9908_v61 = vmax.f32 %v9844_v54, 0.0  ;;  %v16352_v2 = vld [vmem:[#allocation82_spill] sm:$0xff]  ;;  %v16356_v54 = vld [vmem:[#allocation13_spill] sm:$0xff] }
 0x67c   :  { %v4646_v21 = vadd.f32 %v16352_v2, %v16351_v34 }
 0x67d   :  { %v9402_v24 = vadd.f32 %v14946_v9, %v9334_v23 }
 0x67e   :  { %v7143_v13 = vpop.f32.mrf.mxu3  ;;  %v9628_v15 = vpop.f32.mrf.mxu2 }
 0x67f   :  { %v7267_v16 = vadd.f32 %v7143_v13, %v6712_v26  ;;  %v9629_v3 = vadd.f32 %v15139_v12, %v9628_v15  ;;  %v9466_v6 = vmax.f32 %v9402_v24, 0.0  ;;  %v16355_v26 = vld [vmem:[#allocation164_spill] sm:$0xff] }
 0x680   :  { %v34_v24 = vld [vmem:[%s15759_s0 + $0x1c] sm:$0xff]  }
 0x681   :  { %v9845_v40 = vadd.f32 %v9781_v48, %v9629_v3  ;;  %v9518_v38 = vpack.c.bf16 %v9466_v6, %v9465_v4  ;;  %v8557_v58 = vadd.f32 %v16350_v43, %v7267_v16  ;;  %v5936_v48 = vadd.f32 %v16355_v26, %v4646_v21  ;;  %v16357_v16 = vld [vmem:[#allocation86_spill] sm:$0xff]  ;;  %v16358_v6 = vld [vmem:[#allocation172_spill] sm:$0xff] }
 0x682   :  { %v9782_v4 = vunpack.c.h.bf16 %v32_v29  ;;  %v4647_v3 = vadd.f32 %v16357_v16, %v16356_v54  ;;  %v16359_v29 = vld [vmem:[#allocation167_spill] sm:$0xff]  ;;  %v11362_v16 = vld [vmem:[#allocation2 + $0x138] sm:$0xff] }
 0x683   :  { %v9909_v5 = vmax.f32 %v9845_v40, 0.0  ;;  %9670 = vmatmul.bf16.gmra.mxu2 %v9518_v38  ;;  %v9335_v23 = vadd.f32 %v14893_v52, %v8557_v58  ;;  %v6714_v40 = vadd.f32 %v16358_v6, %v5936_v48  ;;  %v9783_v38 = vunpack.c.l.bf16 %v34_v24 }
 0x685   :  { %v11417_v57 = vpack.c.bf16 %v9909_v5, %v9908_v61  ;;  %v9403_v13 = vadd.f32 %v14946_v9, %v9335_v23 }
 0x686   :  { %v7145_v33 = vpop.f32.mrf.mxu3  ;;  %v9631_v19 = vpop.f32.mrf.mxu2 }
 0x687   :  { %11565 = vst [vmem:[%s15764_s7 + $0x10] sm:$0xff] %v11417_v57   ;;  %v7268_v7 = vadd.f32 %v7145_v33, %v6713_v32  ;;  %v9632_v15 = vadd.f32 %v15139_v12, %v9631_v19  ;;  %v9467_v58 = vmax.f32 %v9403_v13, 0.0  ;;  %v5937_v57 = vadd.f32 %v16359_v29, %v4647_v3  ;;  %v16361_v19 = vld [vmem:[#allocation14_spill] sm:$0xff]  ;;  %v16365_v3 = vld [vmem:[#allocation171_spill] sm:$0xff] }
 0x689   :  { %v8558_v50 = vadd.f32 %v16354_v11, %v7268_v7  ;;  %v9846_v61 = vadd.f32 %v9782_v4, %v9632_v15  ;;  %v16362_v7 = vld [vmem:[#allocation90_spill] sm:$0xff]  ;;  %v16364_v4 = vld [vmem:[#allocation152_spill] sm:$0xff] }
 0x68a   :  { %v4648_v11 = vadd.f32 %v16362_v7, %v16361_v19 }
 0x68b   :  { %v9336_v52 = vadd.f32 %v14901_v20, %v8558_v50  ;;  %7187 = vmatmul.bf16.gmra.mxu3 %v11361_v18  ;;  %v9910_v23 = vmax.f32 %v9846_v61, 0.0  ;;  %v16363_v18 = vld [vmem:[#allocation177_spill] sm:$0xff] }
 0x68c   :  { %v6715_v26 = vadd.f32 %v16363_v18, %v5937_v57  ;;  %v5938_v6 = vadd.f32 %v16365_v3, %v4648_v11  ;;  %v16370_v11 = vld [vmem:[#allocation279_spill] sm:$0xff] }
 0x68d   :  { %v9404_v10 = vadd.f32 %v14946_v9, %v9336_v52 }
 0x68e   :  { %v7148_v47 = vpop.f32.mrf.mxu3  ;;  %v9633_v43 = vpop.f32.mrf.mxu2 }
 0x68f   :  { %v7269_v5 = vadd.f32 %v7148_v47, %v6714_v40  ;;  %v9634_v34 = vadd.f32 %v15139_v12, %v9633_v43  ;;  %v9468_v20 = vmax.f32 %v9404_v10, 0.0  ;;  %v36_v40 = vld [vmem:[%s15759_s0 + $0x24] sm:$0xff]   ;;  %v9784_v47 = vunpack.c.h.bf16 %v34_v24  ;;  %v16366_v43 = vld [vmem:[#allocation16_spill] sm:$0xff]  ;;  %v16369_v24 = vld [vmem:[#allocation175_spill] sm:$0xff] }
 0x691   :  { %v9847_v2 = vadd.f32 %v9783_v38, %v9634_v34  ;;  %v9519_v21 = vpack.c.bf16 %v9468_v20, %v9467_v58  ;;  %v8559_v32 = vadd.f32 %v16360_v0, %v7269_v5  ;;  %v16367_v58 = vld [vmem:[#allocation94_spill] sm:$0xff]  ;;  %v9785_v20 = vunpack.c.l.bf16 %v36_v40 }
 0x692   :  { %v4649_v61 = vadd.f32 %v16367_v58, %v16366_v43  ;;  %v16368_v5 = vld [vmem:[#allocation182_spill] sm:$0xff]  ;;  %v16375_v43 = vld [vmem:[#allocation179_spill] sm:$0xff] }
 0x693   :  { %v9911_v33 = vmax.f32 %v9847_v2, 0.0  ;;  %9675 = vmatmul.bf16.gmra.mxu2 %v9519_v21  ;;  %v9337_v48 = vadd.f32 %v14912_v36, %v8559_v32  ;;  %v6716_v34 = vadd.f32 %v16368_v5, %v5938_v6 }
 0x694   :  { %v5939_v7 = vadd.f32 %v16369_v24, %v4649_v61  ;;  %v38_v61 = vld [vmem:[%s15759_s0 + $0x2c] sm:$0xff]  }
 0x695   :  { %v11422_v50 = vpack.c.bf16 %v9911_v33, %v9910_v23  ;;  %v9405_v38 = vadd.f32 %v14946_v9, %v9337_v48  ;;  %v16371_v48 = vld [vmem:[#allocation18_spill] sm:$0xff] }
 0x696   :  { %v7150_v13 = vpop.f32.mrf.mxu3  ;;  %v9636_v52 = vpop.f32.mrf.mxu2 }
 0x697   :  { %11566 = vst [vmem:[%s15764_s7 + $0x18] sm:$0xff] %v11422_v50   ;;  %v7270_v15 = vadd.f32 %v7150_v13, %v6715_v26  ;;  %v9637_v10 = vadd.f32 %v15139_v12, %v9636_v52  ;;  %v9469_v57 = vmax.f32 %v9405_v38, 0.0  ;;  %v16372_v13 = vld [vmem:[#allocation99_spill] sm:$0xff] }
 0x698   :  { %v4650_v52 = vadd.f32 %v16372_v13, %v16371_v48  ;;  %v16380_v48 = vld [vmem:[#allocation57_spill] sm:$0xff] }
 0x699   :  { %v8560_v54 = vadd.f32 %v16364_v4, %v7270_v15  ;;  %v9848_v0 = vadd.f32 %v9784_v47, %v9637_v10  ;;  %v16373_v4 = vld [vmem:[#allocation188_spill] sm:$0xff]  ;;  %v11363_v47 = vld [vmem:[#allocation2 + $0x144] sm:$0xff] }
 0x69a   :  { %v5940_v58 = vadd.f32 %v16375_v43, %v4650_v52 }
 0x69b   :  { %v9338_v36 = vadd.f32 %v14926_v51, %v8560_v54  ;;  %7192 = vmatmul.bf16.gmra.mxu3 %v11362_v16  ;;  %v9912_v18 = vmax.f32 %v9848_v0, 0.0  ;;  %v6717_v54 = vadd.f32 %v16373_v4, %v5939_v7  ;;  %v16381_v4 = vld [vmem:[#allocation97_spill] sm:$0xff] }
 0x69d   :  { %v9406_v2 = vadd.f32 %v14946_v9, %v9338_v36  ;;  %v16374_v36 = vld [vmem:[#allocation281_spill] sm:$0xff] }
 0x69e   :  { %v7153_v21 = vpop.f32.mrf.mxu3  ;;  %v9638_v29 = vpop.f32.mrf.mxu2 }
 0x69f   :  { %v7271_v32 = vadd.f32 %v7153_v21, %v6716_v34  ;;  %v9639_v23 = vadd.f32 %v15139_v12, %v9638_v29  ;;  %v9470_v51 = vmax.f32 %v9406_v2, 0.0  ;;  %v16376_v2 = vld [vmem:[#allocation20_spill] sm:$0xff]  ;;  %v16377_v21 = vld [vmem:[#allocation103_spill] sm:$0xff] }
 0x6a0   :  { %v4651_v29 = vadd.f32 %v16377_v21, %v16376_v2  ;;  %v40_v2 = vld [vmem:[%s15759_s0 + $0x34] sm:$0xff]  }
 0x6a1   :  { %v9849_v33 = vadd.f32 %v9785_v20, %v9639_v23  ;;  %v9520_v19 = vpack.c.bf16 %v9470_v51, %v9469_v57  ;;  %v8561_v50 = vadd.f32 %v16370_v11, %v7271_v32  ;;  %v9786_v20 = vunpack.c.h.bf16 %v36_v40  ;;  %v16378_v57 = vld [vmem:[#allocation192_spill] sm:$0xff]  ;;  %v16379_v40 = vld [vmem:[#allocation183_spill] sm:$0xff] }
 0x6a2   :  { %v6718_v0 = vadd.f32 %v16378_v57, %v5940_v58  ;;  %v9787_v32 = vunpack.c.l.bf16 %v38_v61  ;;  %v16384_v58 = vld [vmem:[#allocation61_spill] sm:$0xff]  ;;  %v9788_v57 = vunpack.c.h.bf16 %v38_v61  ;;  %v15291_v61 = vpop.f32.mrf.mxu1 }
 0x6a3   :  { %v9913_v26 = vmax.f32 %v9849_v33, 0.0  ;;  %9680 = vmatmul.bf16.gmra.mxu2 %v9520_v19  ;;  %v9339_v16 = vadd.f32 %v14936_v45, %v8561_v50 }
 0x6a5   :  { %v11427_v15 = vpack.c.bf16 %v9913_v26, %v9912_v18  ;;  %v9407_v5 = vadd.f32 %v14946_v9, %v9339_v16  ;;  %v5941_v26 = vadd.f32 %v16379_v40, %v4651_v29 }
 0x6a6   :  { %v7155_v3 = vpop.f32.mrf.mxu3  ;;  %v9641_v6 = vpop.f32.mrf.mxu2 }
 0x6a7   :  { %11567 = vst [vmem:[%s15764_s7 + $0x20] sm:$0xff] %v11427_v15   ;;  %v7272_v38 = vadd.f32 %v7155_v3, %v6717_v54  ;;  %v9642_v34 = vadd.f32 %v15139_v12, %v9641_v6  ;;  %v9471_v19 = vmax.f32 %v9407_v5, 0.0  ;;  %v16382_v54 = vld [vmem:[#allocation108_spill] sm:$0xff] }
 0x6a8   :  { %v4652_v16 = vadd.f32 %v16382_v54, %v16381_v4  ;;  %v16383_v6 = vld [vmem:[#allocation196_spill] sm:$0xff] }
 0x6a9   :  { %v8562_v10 = vadd.f32 %v16374_v36, %v7272_v38  ;;  %v9850_v24 = vadd.f32 %v9786_v20, %v9642_v34  ;;  %v6719_v38 = vadd.f32 %v16383_v6, %v5941_v26  ;;  %v16385_v34 = vld [vmem:[#allocation187_spill] sm:$0xff]  ;;  %v16391_v6 = vld [vmem:[#allocation116_spill] sm:$0xff] }
 0x6aa   :  { %v5942_v20 = vadd.f32 %v16385_v34, %v4652_v16 }
 0x6ab   :  { %v9340_v45 = vadd.f32 %v14955_v31, %v8562_v10  ;;  %7197 = vmatmul.bf16.gmra.mxu3 %v11363_v47  ;;  %v9914_v52 = vmax.f32 %v9850_v24, 0.0 }
 0x6ad   :  { %v9408_v23 = vadd.f32 %v14946_v9, %v9340_v45  ;;  %v11364_v45 = vld [vmem:[#allocation2 + $0x150] sm:$0xff] }
 0x6ae   :  { %v7158_v51 = vpop.f32.mrf.mxu3  ;;  %v9643_v33 = vpop.f32.mrf.mxu2 }
 0x6af   :  { %v7273_v7 = vadd.f32 %v7158_v51, %v6718_v0  ;;  %v9644_v11 = vadd.f32 %v15139_v12, %v9643_v33  ;;  %v9472_v31 = vmax.f32 %v9408_v23, 0.0  ;;  %v16386_v0 = vld [vmem:[#allocation24_spill] sm:$0xff] }
 0x6b0   :  { %v16388_v51 = vld [vmem:[#allocation200_spill] sm:$0xff] }
 0x6b1   :  { %v9851_v50 = vadd.f32 %v9787_v32, %v9644_v11  ;;  %v9521_v18 = vpack.c.bf16 %v9472_v31, %v9471_v19  ;;  %v8563_v13 = vadd.f32 %v16380_v48, %v7273_v7  ;;  %v16387_v32 = vld [vmem:[#allocation112_spill] sm:$0xff]  ;;  %v6720_v33 = vadd.f32 %v16388_v51, %v5942_v20 }
 0x6b2   :  { %v4653_v23 = vadd.f32 %v16387_v32, %v16386_v0  ;;  %v9789_v19 = vunpack.c.l.bf16 %v40_v2  ;;  %v15310_v0 = vpop.f32.mrf.mxu1  ;;  %v9790_v51 = vunpack.c.h.bf16 %v40_v2 }
 0x6b3   :  { %v9915_v15 = vmax.f32 %v9851_v50, 0.0  ;;  %9685 = vmatmul.bf16.gmra.mxu2 %v9521_v18  ;;  %v9341_v36 = vadd.f32 %v14974_v44, %v8563_v13  ;;  %v15288_v50 = vpop.f32.mrf.mxu0 }
 0x6b5   :  { %v11432_v3 = vpack.c.bf16 %v9915_v15, %v9914_v52  ;;  %v9409_v21 = vadd.f32 %v14946_v9, %v9341_v36  ;;  %v16389_v52 = vld [vmem:[#allocation191_spill] sm:$0xff] }
 0x6b6   :  { %v7160_v10 = vpop.f32.mrf.mxu3  ;;  %v9646_v47 = vpop.f32.mrf.mxu2  ;;  %v5943_v15 = vadd.f32 %v16389_v52, %v4653_v23 }
 0x6b7   :  { %11568 = vst [vmem:[%s15764_s7 + $0x28] sm:$0xff] %v11432_v3   ;;  %v7274_v43 = vadd.f32 %v7160_v10, %v6719_v38  ;;  %v9647_v29 = vadd.f32 %v15139_v12, %v9646_v47  ;;  %v9473_v31 = vmax.f32 %v9409_v21, 0.0  ;;  %v16390_v3 = vld [vmem:[#allocation26_spill] sm:$0xff]  ;;  %v16392_v10 = vld [vmem:[#allocation204_spill] sm:$0xff] }
 0x6b8   :  { %v4654_v38 = vadd.f32 %v16391_v6, %v16390_v3  ;;  %v6721_v47 = vadd.f32 %v16392_v10, %v5943_v15  ;;  %v11365_v21 = vld [vmem:[#allocation2 + $0x15c] sm:$0xff] }
 0x6b9   :  { %v8564_v5 = vadd.f32 %v16384_v58, %v7274_v43  ;;  %v9852_v18 = vadd.f32 %v9788_v57, %v9647_v29  ;;  %v42_v57 = vld [vmem:[%s15759_s0 + $0x3c] sm:$0xff]  }
 0x6ba   :  { %v16400_v10 = vld [vmem:[#allocation124_spill] sm:$0xff] }
 0x6bb   :  { %v9342_v44 = vadd.f32 %v14989_v28, %v8564_v5  ;;  %7202 = vmatmul.bf16.gmra.mxu3 %v11364_v45  ;;  %v9916_v54 = vmax.f32 %v9852_v18, 0.0  ;;  %v15302_v34 = vpop.f32.mrf.mxu0  ;;  %v15320_v18 = vld [vmem:[%s15762_s4] ss:$0 sm:$0xff] }
 0x6bd   :  { %v9410_v24 = vadd.f32 %v14946_v9, %v9342_v44  ;;  %v16394_v44 = vld [vmem:[#allocation195_spill] sm:$0xff] }
 0x6be   :  { %v7163_v7 = vpop.f32.mrf.mxu3  ;;  %v9648_v11 = vpop.f32.mrf.mxu2  ;;  %v5944_v29 = vadd.f32 %v16394_v44, %v4654_v38 }
 0x6bf   :  { %v7275_v40 = vadd.f32 %v7163_v7, %v6720_v33  ;;  %v9649_v28 = vadd.f32 %v15139_v12, %v9648_v11  ;;  %v9474_v26 = vmax.f32 %v9410_v24, 0.0  ;;  %v16395_v33 = vld [vmem:[#allocation28_spill] sm:$0xff]  ;;  %v16397_v7 = vld [vmem:[#allocation207_spill] sm:$0xff] }
 0x6c0   :  { %v6722_v11 = vadd.f32 %v16397_v7, %v5944_v29  ;;  %v11366_v29 = vld [vmem:[#allocation2 + $0x168] sm:$0xff]  ;;  %v16404_v7 = vld [vmem:[#allocation129_spill] sm:$0xff] }
 0x6c1   :  { %v9853_v48 = vadd.f32 %v9789_v19, %v9649_v28  ;;  %v9522_v13 = vpack.c.bf16 %v9474_v26, %v9473_v31  ;;  %v8565_v4 = vadd.f32 %v14776_v1, %v7275_v40  ;;  %v16393_v1 = vld [vmem:[#allocation132_spill] sm:$0xff]  ;;  %v9791_v31 = vunpack.c.l.bf16 %v42_v57 }
 0x6c2   :  { %v16396_v19 = vld [vmem:[#allocation120_spill] sm:$0xff] }
 0x6c3   :  { %v9917_v16 = vmax.f32 %v9853_v48, 0.0  ;;  %9690 = vmatmul.bf16.gmra.mxu2 %v9522_v13  ;;  %v9343_v43 = vadd.f32 %v15005_v30, %v8565_v4  ;;  %v4655_v24 = vadd.f32 %v16396_v19, %v16395_v33  ;;  %v16398_v4 = vld [vmem:[#allocation198_spill] sm:$0xff]  ;;  %v15326_v3 = vpop.f32.mrf.mxu0  ;;  %v9792_v19 = vunpack.c.h.bf16 %v42_v57 }
 0x6c5   :  { %v11437_v36 = vpack.c.bf16 %v9917_v16, %v9916_v54  ;;  %v9411_v30 = vadd.f32 %v14946_v9, %v9343_v43  ;;  %v5945_v54 = vadd.f32 %v16398_v4, %v4655_v24  ;;  %v15330_v43 = vpop.f32.mrf.mxu1  ;;  %v16403_v24 = vld [vmem:[#allocation32_spill] sm:$0xff] }
 0x6c6   :  { %v7165_v58 = vpop.f32.mrf.mxu3  ;;  %v9651_v5 = vpop.f32.mrf.mxu2 }
 0x6c7   :  { %11569 = vst [vmem:[%s15764_s7 + $0x30] sm:$0xff] %v11437_v36   ;;  %v7276_v45 = vadd.f32 %v7165_v58, %v6721_v47  ;;  %v9652_v23 = vadd.f32 %v15139_v12, %v9651_v5  ;;  %v16399_v36 = vld [vmem:[#allocation118_spill] sm:$0xff] }
 0x6c8   :  { %v4656_v47 = vadd.f32 %v16400_v10, %v16399_v36  ;;  %v16401_v5 = vld [vmem:[#allocation210_spill] sm:$0xff] }
 0x6c9   :  { %v8566_v20 = vadd.f32 %v16393_v1, %v7276_v45  ;;  %v9854_v26 = vadd.f32 %v9790_v51, %v9652_v23  ;;  %v6723_v45 = vadd.f32 %v16401_v5, %v5945_v54  ;;  %v44_v23 = vld [vmem:[%s15759_s0 + $0x44] sm:$0xff]   ;;  %v16406_v54 = vld [vmem:[#allocation203_spill] sm:$0xff] }
 0x6ca   :  { %v16407_v10 = vld [vmem:[#allocation34_spill] sm:$0xff] }
 0x6cb   :  { %v9344_v32 = vadd.f32 %v15017_v27, %v8566_v20  ;;  %7207 = vmatmul.bf16.gmra.mxu3 %v11365_v21  ;;  %v9475_v27 = vmax.f32 %v9411_v30, 0.0  ;;  %v9918_v6 = vmax.f32 %v9854_v26, 0.0  ;;  %v16402_v30 = vld [vmem:[#allocation201_spill] sm:$0xff] }
 0x6cd   :  { %v9412_v9 = vadd.f32 %v15320_v18, %v9344_v32  ;;  %v5946_v32 = vadd.f32 %v16402_v30, %v4656_v47  ;;  %v16408_v47 = vld [vmem:[#allocation133_spill] sm:$0xff] }
 0x6ce   :  { %v7168_v40 = vpop.f32.mrf.mxu3  ;;  %v9653_v28 = vpop.f32.mrf.mxu2 }
 0x6cf   :  { %v7277_v48 = vadd.f32 %v7168_v40, %v6722_v11  ;;  %v9654_v2 = vadd.f32 %v15139_v12, %v9653_v28  ;;  %v9476_v13 = vmax.f32 %v9412_v9, 0.0  ;;  %v4657_v11 = vadd.f32 %v16404_v7, %v16403_v24 }
 0x6d0   :  { %v9793_v40 = vunpack.c.l.bf16 %v44_v23  ;;  %v9794_v7 = vunpack.c.h.bf16 %v44_v23 }
 0x6d1   :  { %v9855_v52 = vadd.f32 %v9791_v31, %v9654_v2  ;;  %v9523_v15 = vpack.c.bf16 %v9476_v13, %v9475_v27  ;;  %v8567_v16 = vadd.f32 %v14805_v59, %v7277_v48  ;;  %v15347_v31 = vpop.f32.mrf.mxu0  ;;  %v15351_v2 = vpop.f32.mrf.mxu1 }
 0x6d3   :  { %v9919_v38 = vmax.f32 %v9855_v52, 0.0  ;;  %9695 = vmatmul.bf16.gmra.mxu2 %v9523_v15  ;;  %v9345_v1 = vadd.f32 %v15034_v25, %v8567_v16  ;;  %v5947_v16 = vadd.f32 %v16406_v54, %v4657_v11  ;;  %v16411_v11 = vld [vmem:[#allocation36_spill] sm:$0xff]  ;;  %v16414_v54 = vld [vmem:[#allocation209_spill] sm:$0xff] }
 0x6d5   :  { %v11442_v58 = vpack.c.bf16 %v9919_v38, %v9918_v6  ;;  %v9413_v51 = vadd.f32 %v15320_v18, %v9345_v1 }
 0x6d6   :  { %v7170_v20 = vpop.f32.mrf.mxu3  ;;  %v9656_v21 = vpop.f32.mrf.mxu2 }
 0x6d7   :  { %11570 = vst [vmem:[%s15764_s7 + $0x38] sm:$0xff] %v11442_v58   ;;  %v7278_v59 = vadd.f32 %v7170_v20, %v6723_v45  ;;  %v9657_v33 = vadd.f32 %v15139_v12, %v9656_v21  ;;  %v9477_v48 = vmax.f32 %v9413_v51, 0.0  ;;  %v4658_v58 = vadd.f32 %v16408_v47, %v16407_v10  ;;  %v16409_v45 = vld [vmem:[#allocation220_spill] sm:$0xff]  ;;  %v16410_v51 = vld [vmem:[#allocation206_spill] sm:$0xff]  ;;  %v16415_v47 = vld [vmem:[#allocation135_spill] sm:$0xff] }
 0x6d8   :  { %v6725_v1 = vadd.f32 %v16409_v45, %v5947_v16 }
 0x6d9   :  { %v8568_v44 = vadd.f32 %v14822_v8, %v7278_v59  ;;  %v16405_v8 = vld [vmem:[#allocation215_spill] sm:$0xff] }
 0x6da   :  { %v6724_v9 = vadd.f32 %v16405_v8, %v5946_v32  ;;  %v11367_v32 = vld [vmem:[#allocation2 + $0x174] sm:$0xff]  ;;  %v16412_v8 = vld [vmem:[#allocation138_spill] sm:$0xff] }
 0x6db   :  { %v9346_v25 = vadd.f32 %v15044_v49, %v8568_v44  ;;  %7212 = vmatmul.bf16.gmra.mxu3 %v11366_v29  ;;  %v9856_v49 = vadd.f32 %v9792_v19, %v9657_v33  ;;  %v15360_v44 = vpop.f32.mrf.mxu0  ;;  %v15365_v29 = vpop.f32.mrf.mxu1 }
 0x6dd   :  { %v9414_v28 = vadd.f32 %v15320_v18, %v9346_v25  ;;  %v9920_v38 = vmax.f32 %v9856_v49, 0.0  ;;  %v5948_v25 = vadd.f32 %v16410_v51, %v4658_v58  ;;  %v16416_v58 = vld [vmem:[#allocation141_spill] sm:$0xff]  ;;  %v16418_v51 = vld [vmem:[#allocation212_spill] sm:$0xff] }
 0x6de   :  { %v7173_v27 = vpop.f32.mrf.mxu3  ;;  %v9658_v26 = vpop.f32.mrf.mxu2 }
 0x6df   :  { %v7279_v13 = vadd.f32 %v7173_v27, %v6724_v9  ;;  %v9659_v57 = vadd.f32 %v15139_v12, %v9658_v26  ;;  %v9478_v52 = vmax.f32 %v9414_v28, 0.0  ;;  %v4659_v9 = vadd.f32 %v16412_v8, %v16411_v11  ;;  %v16419_v8 = vld [vmem:[#allocation40_spill] sm:$0xff] }
 0x6e1   :  { %v9857_v15 = vadd.f32 %v9793_v40, %v9659_v57  ;;  %v9524_v4 = vpack.c.bf16 %v9478_v52, %v9477_v48  ;;  %v8569_v6 = vadd.f32 %v14843_v63, %v7279_v13  ;;  %v16413_v40 = vld [vmem:[#allocation224_spill] sm:$0xff]  ;;  %v5949_v16 = vadd.f32 %v16414_v54, %v4659_v9  ;;  %v16420_v9 = vld [vmem:[#allocation146_spill] sm:$0xff] }
 0x6e3   :  { %v9921_v36 = vmax.f32 %v9857_v15, 0.0  ;;  %9700 = vmatmul.bf16.gmra.mxu2 %v9524_v4  ;;  %v9347_v20 = vadd.f32 %v15058_v60, %v8569_v6  ;;  %v46_v60 = vld [vmem:[%s15759_s0 + $0x4c] sm:$0xff]   ;;  %v15380_v15 = vpop.f32.mrf.mxu0 }
 0x6e4   :  { %v9795_v28 = vunpack.c.l.bf16 %v46_v60  ;;  %v9796_v11 = vunpack.c.h.bf16 %v46_v60 }
 0x6e5   :  { %v11447_v5 = vpack.c.bf16 %v9921_v36, %v9920_v38  ;;  %v9415_v33 = vadd.f32 %v15320_v18, %v9347_v20  ;;  %v15384_v38 = vpop.f32.mrf.mxu1 }
 0x6e6   :  { %v7175_v21 = vpop.f32.mrf.mxu3  ;;  %v9661_v59 = vpop.f32.mrf.mxu2 }
 0x6e7   :  { %11571 = vst [vmem:[%s15764_s7 + $0x40] sm:$0xff] %v11447_v5   ;;  %v7280_v63 = vadd.f32 %v7175_v21, %v6725_v1  ;;  %v9662_v24 = vadd.f32 %v15139_v12, %v9661_v59  ;;  %v9479_v49 = vmax.f32 %v9415_v33, 0.0  ;;  %v4660_v5 = vadd.f32 %v16416_v58, %v16415_v47  ;;  %v16417_v1 = vld [vmem:[#allocation228_spill] sm:$0xff] }
 0x6e8   :  { %v6727_v20 = vadd.f32 %v16417_v1, %v5949_v16  ;;  %v48_v33 = vld [vmem:[%s15759_s0 + $0x54] sm:$0xff]   ;;  %v16422_v16 = vld [vmem:[#allocation42_spill] sm:$0xff] }
 0x6e9   :  { %v8570_v30 = vadd.f32 %v14859_v62, %v7280_v63  ;;  %v6726_v62 = vadd.f32 %v16413_v40, %v5948_v25  ;;  %v9858_v13 = vadd.f32 %v9794_v7, %v9662_v24  ;;  %v5950_v25 = vadd.f32 %v16418_v51, %v4660_v5  ;;  %v15429_v51 = vld [vmem:[%s15759_s0 + $0x5c] sm:$0xff]  }
 0x6eb   :  { %v9348_v19 = vadd.f32 %v15071_v22, %v8570_v30  ;;  %7217 = vmatmul.bf16.gmra.mxu3 %v11367_v32  ;;  %v9922_v36 = vmax.f32 %v9858_v13, 0.0  ;;  %v11368_v32 = vld [vmem:[#allocation2 + $0x180] sm:$0xff]  ;;  %v15399_v24 = vpop.f32.mrf.mxu0 }
 0x6ed   :  { %v9416_v27 = vadd.f32 %v15320_v18, %v9348_v19  ;;  %v15405_v40 = vpop.f32.mrf.mxu1 }
 0x6ee   :  { %v7178_v26 = vpop.f32.mrf.mxu3  ;;  %v9663_v48 = vpop.f32.mrf.mxu2 }
 0x6ef   :  { %v7281_v57 = vadd.f32 %v7178_v26, %v6726_v62  ;;  %v9664_v52 = vadd.f32 %v15139_v12, %v9663_v48  ;;  %v9480_v22 = vmax.f32 %v9416_v27, 0.0  ;;  %v6728_v62 = vadd.f32 %v14807_v17, %v5950_v25 }
 0x6f1   :  { %v9859_v23 = vadd.f32 %v9795_v28, %v9664_v52  ;;  %v9525_v4 = vpack.c.bf16 %v9480_v22, %v9479_v49  ;;  %v8571_v6 = vadd.f32 %v15288_v50, %v7281_v57  ;;  %v9797_v28 = vunpack.c.l.bf16 %v48_v33 }
 0x6f3   :  { %v9923_v10 = vmax.f32 %v9859_v23, 0.0  ;;  %9705 = vmatmul.bf16.gmra.mxu2 %v9525_v4  ;;  %v9349_v21 = vadd.f32 %v15291_v61, %v8571_v6  ;;  %v16421_v4 = vld [vmem:[#allocation216_spill] sm:$0xff]  ;;  %v16423_v6 = vld [vmem:[#allocation150_spill] sm:$0xff]  ;;  %v15415_v58 = vpop.f32.mrf.mxu0 }
 0x6f4   :  { %v4662_v17 = vadd.f32 %v16423_v6, %v16422_v16 }
 0x6f5   :  { %v11452_v45 = vpack.c.bf16 %v9923_v10, %v9922_v36  ;;  %v9417_v19 = vadd.f32 %v15320_v18, %v9349_v21 }
 0x6f6   :  { %v7180_v59 = vpop.f32.mrf.mxu3  ;;  %v9666_v63 = vpop.f32.mrf.mxu2 }
 0x6f7   :  { %11572 = vst [vmem:[%s15764_s7 + $0x48] sm:$0xff] %v11452_v45   ;;  %v7282_v50 = vadd.f32 %v7180_v59, %v6727_v20  ;;  %v9667_v7 = vadd.f32 %v15139_v12, %v9666_v63  ;;  %v9481_v49 = vmax.f32 %v9417_v19, 0.0  ;;  %v16424_v45 = vld [vmem:[#allocation140_spill] sm:$0xff]  ;;  %v15419_v63 = vpop.f32.mrf.mxu1  ;;  %v11369_v19 = vld [vmem:[#allocation2 + $0x18c] sm:$0xff] }
 0x6f9   :  { %v8572_v30 = vadd.f32 %v15302_v34, %v7282_v50  ;;  %v4661_v34 = vadd.f32 %v16420_v9, %v16419_v8  ;;  %v9860_v13 = vadd.f32 %v9796_v11, %v9667_v7  ;;  %v16427_v7 = vld [vmem:[#allocation155_spill] sm:$0xff] }
 0x6fb   :  { %v9350_v61 = vadd.f32 %v15310_v0, %v8572_v30  ;;  %7222 = vmatmul.bf16.gmra.mxu3 %v11368_v32  ;;  %v5951_v54 = vadd.f32 %v16421_v4, %v4661_v34  ;;  %v9924_v36 = vmax.f32 %v9860_v13, 0.0  ;;  %v9798_v30 = vunpack.c.h.bf16 %v48_v33  ;;  %v15438_v6 = vpop.f32.mrf.mxu0 }
 0x6fc   :  { %v9799_v33 = vunpack.c.l.bf16 %v15429_v51 }
 0x6fd   :  { %v9418_v27 = vadd.f32 %v15320_v18, %v9350_v61  ;;  %v6729_v1 = vadd.f32 %v16424_v45, %v5951_v54  ;;  %v16426_v61 = vld [vmem:[#allocation44_spill] sm:$0xff] }
 0x6fe   :  { %v7183_v26 = vpop.f32.mrf.mxu3  ;;  %v9668_v48 = vpop.f32.mrf.mxu2  ;;  %v4663_v11 = vadd.f32 %v16427_v7, %v16426_v61 }
 0x6ff   :  { %v7283_v57 = vadd.f32 %v7183_v26, %v6728_v62  ;;  %v9669_v0 = vadd.f32 %v15139_v12, %v9668_v48  ;;  %v9482_v52 = vmax.f32 %v9418_v27, 0.0  ;;  %v7401_v27 = vld [vmem:[#allocation2 + $0x1a8] sm:$0xf]  ;;  %v7402_v26 = vld [vmem:[#allocation2 + $0x1ac] sm:$0x1] }
 0x700   :  { %v8157_v13 = vshll.u32 %v7401_v27, 16 }
 0x701   :  { %v8573_v60 = vadd.f32 %v15326_v3, %v7283_v57  ;;  %v9861_v22 = vadd.f32 %v9797_v28, %v9669_v0  ;;  %v9526_v23 = vpack.c.bf16 %v9482_v52, %v9481_v49  ;;  %v16425_v3 = vld [vmem:[#allocation219_spill] sm:$0xff]  ;;  %v7400_v28 = vld [vmem:[#allocation2 + $0x1a4] sm:$0xf]  ;;  %v8167_v0 = vshll.u32 %v7402_v26, 16 }
 0x702   :  { %v5952_v59 = vadd.f32 %v16425_v3, %v4662_v17  ;;  %v8148_v48 = vshrl.u32 %v7400_v28, 16  ;;  %v8151_v49 = vshll.u32 %v7400_v28, 16  ;;  %v8628_v52 = vld [vmem:[#allocation2 + $0x1a4] sm:$0xe]  ;;  %v8159_v54 = vrot.slane %v8157_v13, 5 }
 0x703   :  { %v9351_v10 = vadd.f32 %v15330_v43, %v8573_v60  ;;  %v9925_v47 = vmax.f32 %v9861_v22, 0.0  ;;  %9710 = vmatmul.bf16.gmra.mxu2 %v9526_v23  ;;  %v8944_v60 = vrot.slane %v7401_v27, 5 }
 0x704   :  { %v6730_v8 = vadd.f32 %v14849_v35, %v5952_v59  ;;  %v8947_v35 = vrot.slane %v7402_v26, 5  ;;  %v8150_v23 = vrot.slane %v8148_v48, 4  ;;  %v8153_v4 = vrot.slane %v8151_v49, 5  ;;  %v16430_v26 = vld [vmem:[#allocation159_spill] sm:$0xff] }
 0x705   :  { %v11457_v5 = vpack.c.bf16 %v9925_v47, %v9924_v36  ;;  %v9419_v32 = vadd.f32 %v15320_v18, %v9351_v10  ;;  %v8169_v47 = vrot.slane %v8167_v0, 5 }
 0x706   :  { %v7185_v20 = vpop.f32.mrf.mxu3  ;;  %v9671_v21 = vpop.f32.mrf.mxu2 }
 0x707   :  { %11573 = vst [vmem:[%s15764_s7 + $0x50] sm:$0xff] %v11457_v5   ;;  %v7284_v50 = vadd.f32 %v7185_v20, %v6729_v1  ;;  %v9672_v43 = vadd.f32 %v15139_v12, %v9671_v21  ;;  %v9483_v62 = vmax.f32 %v9419_v32, 0.0  ;;  %v8154_v5 = vor.u32 %v8153_v4, %v8150_v23  ;;  %v15441_v21 = vpop.f32.mrf.mxu1 }
 0x708   :  { %v11107_v1 = vrot.slane %v8628_v52, 9  ;;  %v8946_v20 = vrot.slane %v8944_v60, 4 }
 0x709   :  { %v8574_v25 = vadd.f32 %v15347_v31, %v7284_v50  ;;  %v9862_v34 = vadd.f32 %v9798_v30, %v9672_v43  ;;  %v8161_v31 = vshrl.u32 %v7401_v27, 16  ;;  %v16428_v43 = vld [vmem:[#allocation223_spill] sm:$0xff]  ;;  %v8155_v32 = vrot.slane %v8154_v5, 4  ;;  %v16429_v27 = vld [vmem:[#allocation46_spill] sm:$0xff] }
 0x70a   :  { %v5953_v30 = vadd.f32 %v16428_v43, %v4663_v11  ;;  %v8948_v61 = vsel %vm12456_vm14, %v8946_v20, %v8947_v35  ;;  %v11370_v35 = vld [vmem:[#allocation2 + $0x198] sm:$0xff] }
 0x70b   :  { %v9352_v9 = vadd.f32 %v15351_v2, %v8574_v25  ;;  %7227 = vmatmul.bf16.gmra.mxu3 %v11369_v19  ;;  %v8163_v16 = vrot.slane %v8161_v31, 4  ;;  %v8945_v19 = vsel %vm12456_vm14, %v11107_v1, %v8944_v60  ;;  %v9926_v7 = vmax.f32 %v9862_v34, 0.0  ;;  %v15460_v60 = vpop.f32.mrf.mxu0 }
 0x70c   :  { %v9029_v28 = vunpack.c.l.b16 %v8948_v61  ;;  %v6731_v48 = vadd.f32 %v14865_v14, %v5953_v30  ;;  %v16431_v14 = vld [vmem:[#allocation227_spill] sm:$0xff] }
 0x70d   :  { %v9420_v57 = vadd.f32 %v15320_v18, %v9352_v9  ;;  %v8164_v45 = vor.u32 %v8163_v16, %v8159_v54  ;;  %v9028_v9 = vunpack.c.l.b16 %v8945_v19  ;;  %v9800_v16 = vunpack.c.h.bf16 %v15429_v51  ;;  %v16435_v51 = vld [vmem:[#allocation230_spill] sm:$0xff] }
 0x70e   :  { %v7188_v22 = vpop.f32.mrf.mxu3  ;;  %v9673_v2 = vpop.f32.mrf.mxu2 }
 0x70f   :  { %v7285_v17 = vadd.f32 %v7188_v22, %v6730_v8  ;;  %v9674_v36 = vadd.f32 %v15139_v12, %v9673_v2  ;;  %v9484_v10 = vmax.f32 %v9420_v57, 0.0  ;;  %v8165_v25 = vrot.slane %v8164_v45, 4  ;;  %v15468_v23 = vpop.f32.mrf.mxu1 }
 0x710   :  { %v9061_v57 = vpack.c.b16 %v9029_v28, %v9028_v9  ;;  %v16436_v9 = vld [vmem:[#allocation50_spill] sm:$0xff] }
 0x711   :  { %v8575_v3 = vadd.f32 %v15360_v44, %v7285_v17  ;;  %v9863_v59 = vadd.f32 %v9799_v33, %v9674_v36  ;;  %v9527_v50 = vpack.c.bf16 %v9484_v10, %v9483_v62  ;;  %v4664_v44 = vadd.f32 %v16430_v26, %v16429_v27  ;;  %v16433_v17 = vld [vmem:[#allocation162_spill] sm:$0xff]  ;;  %v16434_v10 = vld [vmem:[#allocation149_spill] sm:$0xff] }
 0x712   :  { %v8160_v33 = vsel %vm11900_vm7, %v8155_v32, %v8159_v54  ;;  %v8170_v11 = vsel %vm11900_vm7, %v8165_v25, %v8169_v47  ;;  %9305 = vmatmul.bf16.gmra.mxu1 %v9061_v57  ;;  %v16437_v28 = vld [vmem:[#allocation166_spill] sm:$0xff] }
 0x713   :  { %v9927_v8 = vmax.f32 %v9863_v59, 0.0  ;;  %9715 = vmatmul.bf16.gmra.mxu2 %v9527_v50  ;;  %v8250_v49 = vunpack.c.l.b16 %v8160_v33  ;;  %v8251_v39 = vunpack.c.l.b16 %v8170_v11  ;;  %v9353_v34 = vadd.f32 %v15365_v29, %v8575_v3  ;;  %v52_v29 = vld [vmem:[%s15759_s0 + $0x64] sm:$0xff]   ;;  %v15480_v61 = vpop.f32.mrf.mxu0 }
 0x714   :  { %v5954_v22 = vadd.f32 %v16431_v14, %v4664_v44  ;;  %v9801_v5 = vunpack.c.l.bf16 %v52_v29  ;;  %v4666_v27 = vadd.f32 %v16437_v28, %v16436_v9  ;;  %v16438_v33 = vld [vmem:[#allocation89_spill] sm:$0xff] }
 0x715   :  { %v11462_v62 = vpack.c.bf16 %v9927_v8, %v9926_v7  ;;  %v8283_v52 = vpack.c.b16 %v8251_v39, %v8250_v49  ;;  %v9421_v2 = vadd.f32 %v15320_v18, %v9353_v34  ;;  %v11371_v49 = vld [vmem:[#allocation2 + $0x1a4] sm:$0xff]  ;;  %v16439_v34 = vld [vmem:[#allocation232_spill] sm:$0xff] }
 0x716   :  { %v7190_v13 = vpop.f32.mrf.mxu3  ;;  %v9676_v31 = vpop.f32.mrf.mxu2  ;;  %v6732_v47 = vadd.f32 %v16434_v10, %v5954_v22 }
 0x717   :  { %11574 = vst [vmem:[%s15764_s7 + $0x58] sm:$0xff] %v11462_v62   ;;  %v7286_v0 = vadd.f32 %v7190_v13, %v6731_v48  ;;  %8527 = vmatmul.bf16.gmra.mxu0 %v8283_v52  ;;  %v9677_v54 = vadd.f32 %v15139_v12, %v9676_v31  ;;  %v9485_v3 = vmax.f32 %v9421_v2, 0.0  ;;  %v15484_v26 = vpop.f32.mrf.mxu1  ;;  %v5956_v13 = vadd.f32 %v16439_v34, %v4666_v27  ;;  %v54_v31 = vld [vmem:[%s15759_s0 + $0x6c] sm:$0xff]   ;;  %v16442_v2 = vld [vmem:[#allocation93_spill] sm:$0xff] }
 0x719   :  { %v8576_v55 = vadd.f32 %v15380_v15, %v7286_v0  ;;  %v16432_v15 = vld [vmem:[#allocation48_spill] sm:$0xff]  ;;  %v9864_v59 = vadd.f32 %v9800_v16, %v9677_v54  ;;  %v15501_v0 = vld [vmem:[%s15763_s6] ss:$0 sm:$0xff]  ;;  %v9803_v54 = vunpack.c.l.bf16 %v54_v31 }
 0x71a   :  { %v4665_v36 = vadd.f32 %v16433_v17, %v16432_v15 }
 0x71b   :  { %v9354_v4 = vadd.f32 %v15384_v38, %v8576_v55  ;;  %7232 = vmatmul.bf16.gmra.mxu3 %v11370_v35  ;;  %v9928_v7 = vmax.f32 %v9864_v59, 0.0  ;;  %v9802_v55 = vunpack.c.h.bf16 %v52_v29  ;;  %v16441_v35 = vld [vmem:[#allocation170_spill] sm:$0xff]  ;;  %v15506_v22 = vpop.f32.mrf.mxu0 }
 0x71c   :  { %v5955_v25 = vadd.f32 %v16435_v51, %v4665_v36 }
 0x71d   :  { %v9422_v45 = vadd.f32 %v15320_v18, %v9354_v4  ;;  %v6734_v4 = vadd.f32 %v16442_v2, %v5956_v13 }
 0x71e   :  { %v7193_v1 = vpop.f32.mrf.mxu3  ;;  %v9678_v20 = vpop.f32.mrf.mxu2 }
 0x71f   :  { %v7287_v50 = vadd.f32 %v7193_v1, %v6732_v47  ;;  %v9679_v38 = vadd.f32 %v15139_v12, %v9678_v20  ;;  %v9486_v43 = vmax.f32 %v9422_v45, 0.0  ;;  %v6733_v12 = vadd.f32 %v16438_v33, %v5955_v25  ;;  %v9273_v36 = vpop.f32.mrf.mxu1  ;;  %v16443_v20 = vld [vmem:[#allocation234_spill] sm:$0xff]  ;;  %v16447_v33 = vld [vmem:[#allocation236_spill] sm:$0xff] }
 0x720   :  { %v16446_v25 = vld [vmem:[#allocation98_spill] sm:$0xff] }
 0x721   :  { %v9865_v30 = vadd.f32 %v9801_v5, %v9679_v38  ;;  %v9528_v32 = vpack.c.bf16 %v9486_v43, %v9485_v3  ;;  %v8577_v19 = vadd.f32 %v15399_v24, %v7287_v50  ;;  %v16444_v43 = vld [vmem:[#allocation123_spill] sm:$0xff] }
 0x723   :  { %v9929_v8 = vmax.f32 %v9865_v30, 0.0  ;;  %9720 = vmatmul.bf16.gmra.mxu2 %v9528_v32  ;;  %v9355_v11 = vadd.f32 %v15405_v40, %v8577_v19  ;;  %v16445_v30 = vld [vmem:[#allocation174_spill] sm:$0xff]  ;;  %v8498_v28 = vpop.f32.mrf.mxu0 }
 0x724   :  { %v4668_v32 = vadd.f32 %v16445_v30, %v16444_v43  ;;  %v58_v43 = vld [vmem:[%s15759_s0 + $0x7c] sm:$0xff]  }
 0x725   :  { %v11467_v44 = vpack.c.bf16 %v9929_v8, %v9928_v7  ;;  %v9423_v57 = vadd.f32 %v15320_v18, %v9355_v11  ;;  %v56_v11 = vld [vmem:[%s15759_s0 + $0x74] sm:$0xff]  }
 0x726   :  { %v7195_v62 = vpop.f32.mrf.mxu3  ;;  %v9681_v48 = vpop.f32.mrf.mxu2 }
 0x727   :  { %11575 = vst [vmem:[%s15764_s7 + $0x60] sm:$0xff] %v11467_v44   ;;  %v7288_v24 = vadd.f32 %v7195_v62, %v6733_v12  ;;  %v9682_v52 = vadd.f32 %v15501_v0, %v9681_v48  ;;  %v9487_v17 = vmax.f32 %v9423_v57, 0.0  ;;  %v5958_v12 = vadd.f32 %v16447_v33, %v4668_v32 }
 0x728   :  { %v9805_v57 = vunpack.c.l.bf16 %v56_v11 }
 0x729   :  { %v8578_v39 = vadd.f32 %v15415_v58, %v7288_v24  ;;  %v16440_v58 = vld [vmem:[#allocation52_spill] sm:$0xff]  ;;  %v9866_v10 = vadd.f32 %v9802_v55, %v9682_v52  ;;  %v9804_v24 = vunpack.c.h.bf16 %v54_v31  ;;  %v6736_v13 = vadd.f32 %v14922_v46, %v5958_v12  ;;  %v16450_v31 = vld [vmem:[#allocation238_spill] sm:$0xff] }
 0x72a   :  { %v4667_v14 = vadd.f32 %v16441_v35, %v16440_v58 }
 0x72b   :  { %v9356_v40 = vadd.f32 %v15419_v63, %v8578_v39  ;;  %7237 = vmatmul.bf16.gmra.mxu3 %v11371_v49  ;;  %v9930_v50 = vmax.f32 %v9866_v10, 0.0  ;;  %v16448_v49 = vld [vmem:[#allocation128_spill] sm:$0xff]  ;;  %v16449_v39 = vld [vmem:[#allocation178_spill] sm:$0xff] }
 0x72c   :  { %v5957_v3 = vadd.f32 %v16443_v20, %v4667_v14  ;;  %v4669_v34 = vadd.f32 %v16449_v39, %v16448_v49  ;;  %v16451_v10 = vld [vmem:[#allocation184_spill] sm:$0xff] }
 0x72d   :  { %v9424_v16 = vadd.f32 %v15320_v18, %v9356_v40 }
 0x72e   :  { %v7198_v63 = vpop.f32.mrf.mxu3  ;;  %v9683_v15 = vpop.f32.mrf.mxu2  ;;  %v6735_v19 = vadd.f32 %v16446_v25, %v5957_v3  ;;  %v16454_v25 = vld [vmem:[#allocation65_spill] sm:$0xff] }
 0x72f   :  { %v7289_v47 = vadd.f32 %v7198_v63, %v6734_v4  ;;  %v9684_v5 = vadd.f32 %v15501_v0, %v9683_v15  ;;  %v9488_v29 = vmax.f32 %v9424_v16, 0.0  ;;  %v5959_v16 = vadd.f32 %v16450_v31, %v4669_v34 }
 0x731   :  { %v9867_v45 = vadd.f32 %v9803_v54, %v9684_v5  ;;  %v9529_v1 = vpack.c.bf16 %v9488_v29, %v9487_v17  ;;  %v8579_v59 = vadd.f32 %v15438_v6, %v7289_v47  ;;  %v15520_v6 = vpop.f32.mrf.mxu1  ;;  %v16452_v47 = vld [vmem:[#allocation181_spill] sm:$0xff] }
 0x732   :  { %v4670_v5 = vadd.f32 %v16452_v47, %v16451_v10  ;;  %v9808_v47 = vunpack.c.h.bf16 %v58_v43 }
 0x733   :  { %v9931_v38 = vmax.f32 %v9867_v45, 0.0  ;;  %9725 = vmatmul.bf16.gmra.mxu2 %v9529_v1  ;;  %v9357_v7 = vadd.f32 %v15441_v21, %v8579_v59  ;;  %v6737_v45 = vadd.f32 %v14933_v37, %v5959_v16 }
 0x735   :  { %v11472_v51 = vpack.c.bf16 %v9931_v38, %v9930_v50  ;;  %v9425_v21 = vadd.f32 %v15320_v18, %v9357_v7  ;;  %v16453_v50 = vld [vmem:[#allocation240_spill] sm:$0xff] }
 0x736   :  { %v7200_v8 = vpop.f32.mrf.mxu3  ;;  %v9686_v9 = vpop.f32.mrf.mxu2  ;;  %v5960_v38 = vadd.f32 %v16453_v50, %v4670_v5  ;;  %v16461_v5 = vld [vmem:[#allocation136_spill] sm:$0xff] }
 0x737   :  { %11576 = vst [vmem:[%s15764_s7 + $0x68] sm:$0xff] %v11472_v51   ;;  %v7290_v27 = vadd.f32 %v7200_v8, %v6735_v19  ;;  %v9687_v48 = vadd.f32 %v15501_v0, %v9686_v9  ;;  %v9489_v55 = vmax.f32 %v9425_v21, 0.0  ;;  %v9806_v51 = vunpack.c.h.bf16 %v56_v11  ;;  %v16455_v19 = vld [vmem:[#allocation186_spill] sm:$0xff]  ;;  %v16456_v9 = vld [vmem:[#allocation169_spill] sm:$0xff]  ;;  %v16457_v11 = vld [vmem:[#allocation243_spill] sm:$0xff] }
 0x738   :  { %v4671_v7 = vadd.f32 %v16455_v19, %v16454_v25  ;;  %v16463_v25 = vld [vmem:[#allocation246_spill] sm:$0xff] }
 0x739   :  { %v8580_v44 = vadd.f32 %v15460_v60, %v7290_v27  ;;  %v9868_v58 = vadd.f32 %v9804_v24, %v9687_v48  ;;  %v9278_v15 = vpop.f32.mrf.mxu1  ;;  %v6738_v27 = vadd.f32 %v16456_v9, %v5960_v38 }
 0x73a   :  { %v5961_v34 = vadd.f32 %v16457_v11, %v4671_v7  ;;  %v62_v11 = vld [vmem:[%s15759_s0 + $0x8c] sm:$0xff]  }
 0x73b   :  { %v9358_v62 = vadd.f32 %v15468_v23, %v8580_v44  ;;  %v8500_v23 = vpop.f32.mrf.mxu0  ;;  %v9932_v46 = vmax.f32 %v9868_v58, 0.0 }
 0x73d   :  { %v9426_v60 = vadd.f32 %v15320_v18, %v9358_v62 }
 0x73e   :  { %v7203_v40 = vpop.f32.mrf.mxu3  ;;  %v9688_v52 = vpop.f32.mrf.mxu2 }
 0x73f   :  { %v7291_v35 = vadd.f32 %v7203_v40, %v6736_v13  ;;  %v9689_v14 = vadd.f32 %v15501_v0, %v9688_v52  ;;  %v9490_v2 = vmax.f32 %v9426_v60, 0.0  ;;  %v16458_v40 = vld [vmem:[#allocation69_spill] sm:$0xff]  ;;  %v16459_v52 = vld [vmem:[#allocation190_spill] sm:$0xff] }
 0x741   :  { %v9869_v4 = vadd.f32 %v9805_v57, %v9689_v14  ;;  %v9530_v54 = vpack.c.bf16 %v9490_v2, %v9489_v55  ;;  %v8581_v63 = vadd.f32 %v15480_v61, %v7291_v35  ;;  %v9281_v8 = vpop.f32.mrf.mxu1  ;;  %v4672_v55 = vadd.f32 %v16459_v52, %v16458_v40  ;;  %v16468_v40 = vld [vmem:[#allocation199_spill] sm:$0xff] }
 0x742   :  { %v6739_v14 = vadd.f32 %v14971_v56, %v5961_v34 }
 0x743   :  { %v9933_v17 = vmax.f32 %v9869_v4, 0.0  ;;  %9730 = vmatmul.bf16.gmra.mxu2 %v9530_v54  ;;  %v9359_v1 = vadd.f32 %v15484_v26, %v8581_v63  ;;  %v8503_v37 = vpop.f32.mrf.mxu0  ;;  %v16460_v63 = vld [vmem:[#allocation245_spill] sm:$0xff] }
 0x745   :  { %v11477_v29 = vpack.c.bf16 %v9933_v17, %v9932_v46  ;;  %v9427_v30 = vadd.f32 %v15320_v18, %v9359_v1  ;;  %v5962_v46 = vadd.f32 %v16460_v63, %v4672_v55  ;;  %v60_v17 = vld [vmem:[%s15759_s0 + $0x84] sm:$0xff]  }
 0x746   :  { %v7205_v20 = vpop.f32.mrf.mxu3  ;;  %v9691_v3 = vpop.f32.mrf.mxu2 }
 0x747   :  { %11577 = vst [vmem:[%s15764_s7 + $0x70] sm:$0xff] %v11477_v29   ;;  %v7292_v59 = vadd.f32 %v7205_v20, %v6737_v45  ;;  %v9692_v26 = vadd.f32 %v15501_v0, %v9691_v3  ;;  %v9491_v21 = vmax.f32 %v9427_v30, 0.0  ;;  %v16462_v29 = vld [vmem:[#allocation194_spill] sm:$0xff]  ;;  %v6740_v1 = vadd.f32 %v14986_v42, %v5962_v46 }
 0x748   :  { %v4673_v45 = vadd.f32 %v16462_v29, %v16461_v5  ;;  %v9809_v20 = vunpack.c.l.bf16 %v60_v17  ;;  %v16471_v29 = vld [vmem:[#allocation202_spill] sm:$0xff] }
 0x749   :  { %v8582_v61 = vadd.f32 %v15506_v22, %v7292_v59  ;;  %v9807_v22 = vunpack.c.l.bf16 %v58_v43  ;;  %v9870_v62 = vadd.f32 %v9806_v51, %v9692_v26  ;;  %v9283_v31 = vpop.f32.mrf.mxu1 }
 0x74a   :  { %v5963_v19 = vadd.f32 %v16463_v25, %v4673_v45 }
 0x74b   :  { %v9360_v32 = vadd.f32 %v9273_v36, %v8582_v61  ;;  %v9934_v57 = vmax.f32 %v9870_v62, 0.0  ;;  %v8505_v58 = vpop.f32.mrf.mxu0 }
 0x74d   :  { %v9428_v44 = vadd.f32 %v15320_v18, %v9360_v32 }
 0x74e   :  { %v7208_v33 = vpop.f32.mrf.mxu3  ;;  %v9693_v12 = vpop.f32.mrf.mxu2 }
 0x74f   :  { %v7293_v48 = vadd.f32 %v7208_v33, %v6738_v27  ;;  %v9694_v24 = vadd.f32 %v15501_v0, %v9693_v12  ;;  %v9492_v36 = vmax.f32 %v9428_v44, 0.0  ;;  %v16464_v27 = vld [vmem:[#allocation73_spill] sm:$0xff]  ;;  %v6741_v12 = vadd.f32 %v15001_v41, %v5963_v19 }
 0x751   :  { %v9871_v49 = vadd.f32 %v9807_v22, %v9694_v24  ;;  %v9531_v39 = vpack.c.bf16 %v9492_v36, %v9491_v21  ;;  %v8583_v13 = vadd.f32 %v8498_v28, %v7293_v48  ;;  %v9286_v26 = vpop.f32.mrf.mxu1  ;;  %v16465_v22 = vld [vmem:[#allocation197_spill] sm:$0xff] }
 0x752   :  { %v4674_v44 = vadd.f32 %v16465_v22, %v16464_v27  ;;  %v16476_v22 = vld [vmem:[#allocation173_spill] sm:$0xff] }
 0x753   :  { %v9935_v60 = vmax.f32 %v9871_v49, 0.0  ;;  %9735 = vmatmul.bf16.gmra.mxu2 %v9531_v39  ;;  %v9361_v2 = vadd.f32 %v15520_v6, %v8583_v13  ;;  %v8508_v50 = vpop.f32.mrf.mxu0 }
 0x755   :  { %v11482_v35 = vpack.c.bf16 %v9935_v60, %v9934_v57  ;;  %v9429_v10 = vadd.f32 %v15320_v18, %v9361_v2  ;;  %v9810_v57 = vunpack.c.h.bf16 %v60_v17  ;;  %v16467_v60 = vld [vmem:[#allocation77_spill] sm:$0xff] }
 0x756   :  { %v7210_v4 = vpop.f32.mrf.mxu3  ;;  %v9696_v54 = vpop.f32.mrf.mxu2  ;;  %v4675_v52 = vadd.f32 %v16468_v40, %v16467_v60  ;;  %v16478_v40 = vld [vmem:[#allocation85_spill] sm:$0xff] }
 0x757   :  { %11578 = vst [vmem:[%s15764_s7 + $0x78] sm:$0xff] %v11482_v35   ;;  %v7294_v28 = vadd.f32 %v7210_v4, %v6739_v14  ;;  %v9697_v6 = vadd.f32 %v15501_v0, %v9696_v54  ;;  %v9493_v61 = vmax.f32 %v9429_v10, 0.0  ;;  %v9811_v35 = vunpack.c.l.bf16 %v62_v11  ;;  %v16469_v10 = vld [vmem:[#allocation250_spill] sm:$0xff] }
 0x758   :  { %v5965_v17 = vadd.f32 %v16469_v10, %v4675_v52  ;;  %v16479_v52 = vld [vmem:[#allocation208_spill] sm:$0xff] }
 0x759   :  { %v8584_v16 = vadd.f32 %v8500_v23, %v7294_v28  ;;  %v9872_v38 = vadd.f32 %v9808_v47, %v9697_v6  ;;  %v9288_v13 = vpop.f32.mrf.mxu1 }
 0x75b   :  { %v9362_v56 = vadd.f32 %v9278_v15, %v8584_v16  ;;  %v9936_v9 = vmax.f32 %v9872_v38, 0.0  ;;  %v8510_v36 = vpop.f32.mrf.mxu0 }
 0x75d   :  { %v9430_v23 = vadd.f32 %v15320_v18, %v9362_v56 }
 0x75e   :  { %v7213_v3 = vpop.f32.mrf.mxu3  ;;  %v9698_v59 = vpop.f32.mrf.mxu2 }
 0x75f   :  { %v7295_v30 = vadd.f32 %v7213_v3, %v6740_v1  ;;  %v9699_v32 = vadd.f32 %v15501_v0, %v9698_v59  ;;  %v9494_v15 = vmax.f32 %v9430_v23, 0.0  ;;  %v16472_v23 = vld [vmem:[#allocation107_spill] sm:$0xff] }
 0x760   :  { %v6743_v3 = vadd.f32 %v16472_v23, %v5965_v17  ;;  %v66_v17 = vld [vmem:[%s15759_s0 + $0x9c] sm:$0xff]  }
 0x761   :  { %v9873_v51 = vadd.f32 %v9809_v20, %v9699_v32  ;;  %v9532_v43 = vpack.c.bf16 %v9494_v15, %v9493_v61  ;;  %v8585_v7 = vadd.f32 %v8503_v37, %v7295_v30  ;;  %v16466_v37 = vld [vmem:[#allocation248_spill] sm:$0xff]  ;;  %v9291_v1 = vpop.f32.mrf.mxu1  ;;  %v9815_v23 = vunpack.c.l.bf16 %v66_v17 }
 0x762   :  { %v5964_v39 = vadd.f32 %v16466_v37, %v4674_v44  ;;  %v16473_v32 = vld [vmem:[#allocation252_spill] sm:$0xff] }
 0x763   :  { %v9937_v42 = vmax.f32 %v9873_v51, 0.0  ;;  %9740 = vmatmul.bf16.gmra.mxu2 %v9532_v43  ;;  %v9363_v21 = vadd.f32 %v9281_v8, %v8585_v7  ;;  %v8513_v6 = vpop.f32.mrf.mxu0  ;;  %v64_v51 = vld [vmem:[%s15759_s0 + $0x94] sm:$0xff]   ;;  %v16474_v7 = vld [vmem:[#allocation81_spill] sm:$0xff] }
 0x764   :  { %v6742_v55 = vadd.f32 %v15014_v53, %v5964_v39  ;;  %v16470_v53 = vld [vmem:[#allocation145_spill] sm:$0xff] }
 0x765   :  { %v11487_v33 = vpack.c.bf16 %v9937_v42, %v9936_v9  ;;  %v9431_v34 = vadd.f32 %v15320_v18, %v9363_v21  ;;  %v4676_v45 = vadd.f32 %v16471_v29, %v16470_v53  ;;  %v16475_v9 = vld [vmem:[#allocation205_spill] sm:$0xff]  ;;  %v16482_v53 = vld [vmem:[#allocation154_spill] sm:$0xff]  ;;  %v16483_v29 = vld [vmem:[#allocation211_spill] sm:$0xff] }
 0x766   :  { %v7215_v62 = vpop.f32.mrf.mxu3  ;;  %v9701_v48 = vpop.f32.mrf.mxu2  ;;  %v4677_v42 = vadd.f32 %v16475_v9, %v16474_v7 }
 0x767   :  { %11579 = vst [vmem:[%s15764_s7 + $0x80] sm:$0xff] %v11487_v33   ;;  %v7296_v24 = vadd.f32 %v7215_v62, %v6741_v12  ;;  %v9702_v8 = vadd.f32 %v15501_v0, %v9701_v48  ;;  %v9495_v4 = vmax.f32 %v9431_v34, 0.0  ;;  %v5966_v15 = vadd.f32 %v16473_v32, %v4676_v45 }
 0x768   :  { %v9813_v33 = vunpack.c.l.bf16 %v64_v51  ;;  %v4679_v45 = vadd.f32 %v16483_v29, %v16482_v53 }
 0x769   :  { %v8586_v49 = vadd.f32 %v8505_v58, %v7296_v24  ;;  %v9874_v54 = vadd.f32 %v9810_v57, %v9702_v8  ;;  %v6744_v44 = vadd.f32 %v16476_v22, %v5966_v15  ;;  %v9293_v24 = vpop.f32.mrf.mxu1  ;;  %v16486_v22 = vld [vmem:[#allocation157_spill] sm:$0xff] }
 0x76b   :  { %v9364_v41 = vadd.f32 %v9283_v31, %v8586_v49  ;;  %v9938_v47 = vmax.f32 %v9874_v54, 0.0  ;;  %v8515_v27 = vpop.f32.mrf.mxu0 }
 0x76d   :  { %v9432_v58 = vadd.f32 %v15320_v18, %v9364_v41 }
 0x76e   :  { %v7218_v14 = vpop.f32.mrf.mxu3  ;;  %v9703_v2 = vpop.f32.mrf.mxu2 }
 0x76f   :  { %v7297_v28 = vadd.f32 %v7218_v14, %v6742_v55  ;;  %v9704_v16 = vadd.f32 %v15501_v0, %v9703_v2  ;;  %v9496_v63 = vmax.f32 %v9432_v58, 0.0  ;;  %v4678_v55 = vadd.f32 %v16479_v52, %v16478_v40  ;;  %v16480_v58 = vld [vmem:[#allocation111_spill] sm:$0xff]  ;;  %v16490_v40 = vld [vmem:[#allocation161_spill] sm:$0xff]  ;;  %v16491_v52 = vld [vmem:[#allocation218_spill] sm:$0xff] }
 0x771   :  { %v9875_v31 = vadd.f32 %v9811_v35, %v9704_v16  ;;  %v9533_v46 = vpack.c.bf16 %v9496_v63, %v9495_v4  ;;  %v8587_v56 = vadd.f32 %v8508_v50, %v7297_v28  ;;  %v9296_v63 = vpop.f32.mrf.mxu1 }
 0x773   :  { %v9939_v5 = vmax.f32 %v9875_v31, 0.0  ;;  %9745 = vmatmul.bf16.gmra.mxu2 %v9533_v46  ;;  %v9365_v59 = vadd.f32 %v9286_v26, %v8587_v56  ;;  %v9812_v26 = vunpack.c.h.bf16 %v62_v11  ;;  %v8518_v28 = vpop.f32.mrf.mxu0  ;;  %v16481_v46 = vld [vmem:[#allocation257_spill] sm:$0xff] }
 0x774   :  { %v5968_v10 = vadd.f32 %v16481_v46, %v4678_v55  ;;  %v4681_v55 = vadd.f32 %v16491_v52, %v16490_v40 }
 0x775   :  { %v11492_v20 = vpack.c.bf16 %v9939_v5, %v9938_v47  ;;  %v9433_v43 = vadd.f32 %v15320_v18, %v9365_v59  ;;  %v9814_v5 = vunpack.c.h.bf16 %v64_v51  ;;  %v16485_v51 = vld [vmem:[#allocation258_spill] sm:$0xff] }
 0x776   :  { %v7220_v61 = vpop.f32.mrf.mxu3  ;;  %v9706_v38 = vpop.f32.mrf.mxu2 }
 0x777   :  { %11580 = vst [vmem:[%s15764_s7 + $0x88] sm:$0xff] %v11492_v20   ;;  %v7298_v30 = vadd.f32 %v7220_v61, %v6743_v3  ;;  %v9707_v19 = vadd.f32 %v15501_v0, %v9706_v38  ;;  %v9497_v48 = vmax.f32 %v9433_v43, 0.0 }
 0x779   :  { %v8588_v50 = vadd.f32 %v8510_v36, %v7298_v30  ;;  %v9876_v36 = vadd.f32 %v9812_v26, %v9707_v19  ;;  %v5969_v26 = vadd.f32 %v16485_v51, %v4679_v45  ;;  %v9298_v9 = vpop.f32.mrf.mxu1  ;;  %v16494_v45 = vld [vmem:[#allocation165_spill] sm:$0xff]  ;;  %v70_v51 = vld [vmem:[%s15759_s0 + $0xac] sm:$0xff]  }
 0x77b   :  { %v9366_v25 = vadd.f32 %v9288_v13, %v8588_v50  ;;  %v16477_v13 = vld [vmem:[#allocation254_spill] sm:$0xff]  ;;  %v9940_v57 = vmax.f32 %v9876_v36, 0.0  ;;  %v8520_v43 = vpop.f32.mrf.mxu0 }
 0x77c   :  { %v5967_v41 = vadd.f32 %v16477_v13, %v4677_v42 }
 0x77d   :  { %v9434_v12 = vadd.f32 %v15320_v18, %v9366_v25 }
 0x77e   :  { %v7223_v21 = vpop.f32.mrf.mxu3  ;;  %v9708_v62 = vpop.f32.mrf.mxu2  ;;  %v6745_v14 = vadd.f32 %v16480_v58, %v5967_v41  ;;  %v16492_v58 = vld [vmem:[#allocation180_spill] sm:$0xff] }
 0x77f   :  { %v7299_v49 = vadd.f32 %v7223_v21, %v6744_v44  ;;  %v9709_v37 = vadd.f32 %v15501_v0, %v9708_v62  ;;  %v9498_v39 = vmax.f32 %v9434_v12, 0.0  ;;  %v16487_v44 = vld [vmem:[#allocation214_spill] sm:$0xff] }
 0x780   :  { %v16488_v21 = vld [vmem:[#allocation114_spill] sm:$0xff] }
 0x781   :  { %v9877_v34 = vadd.f32 %v9813_v33, %v9709_v37  ;;  %v9534_v11 = vpack.c.bf16 %v9498_v39, %v9497_v48  ;;  %v8589_v8 = vadd.f32 %v8513_v6, %v7299_v49  ;;  %v4680_v33 = vadd.f32 %v16487_v44, %v16486_v22  ;;  %v16489_v39 = vld [vmem:[#allocation261_spill] sm:$0xff]  ;;  %v16499_v22 = vld [vmem:[#allocation226_spill] sm:$0xff] }
 0x782   :  { %v6747_v62 = vadd.f32 %v16488_v21, %v5969_v26 }
 0x783   :  { %v9941_v60 = vmax.f32 %v9877_v34, 0.0  ;;  %9750 = vmatmul.bf16.gmra.mxu2 %v9534_v11  ;;  %v9367_v2 = vadd.f32 %v9291_v1, %v8589_v8  ;;  %v16484_v1 = vld [vmem:[#allocation176_spill] sm:$0xff]  ;;  %v5970_v34 = vadd.f32 %v16489_v39, %v4680_v33  ;;  %v68_v11 = vld [vmem:[%s15759_s0 + $0xa4] sm:$0xff]   ;;  %v8523_v41 = vpop.f32.mrf.mxu0 }
 0x784   :  { %v6746_v20 = vadd.f32 %v16484_v1, %v5968_v10  ;;  %v16495_v1 = vld [vmem:[#allocation222_spill] sm:$0xff] }
 0x785   :  { %v11497_v35 = vpack.c.bf16 %v9941_v60, %v9940_v57  ;;  %v9435_v56 = vadd.f32 %v15320_v18, %v9367_v2  ;;  %v9816_v60 = vunpack.c.h.bf16 %v66_v17  ;;  %v9817_v2 = vunpack.c.l.bf16 %v68_v11 }
 0x786   :  { %v7225_v4 = vpop.f32.mrf.mxu3  ;;  %v9711_v54 = vpop.f32.mrf.mxu2 }
 0x787   :  { %11581 = vst [vmem:[%s15764_s7 + $0x90] sm:$0xff] %v11497_v35   ;;  %v7300_v16 = vadd.f32 %v7225_v4, %v6745_v14  ;;  %v9712_v47 = vadd.f32 %v15501_v0, %v9711_v54  ;;  %v9499_v38 = vmax.f32 %v9435_v56, 0.0  ;;  %v9301_v35 = vpop.f32.mrf.mxu1  ;;  %v6748_v14 = vadd.f32 %v16492_v58, %v5970_v34  ;;  %v15648_v4 = vld [vmem:[%s15762_s4] ss:$0 sm:$0xff] }
 0x788   :  { %v16502_v58 = vld [vmem:[#allocation189_spill] sm:$0xff] }
 0x789   :  { %v8590_v31 = vadd.f32 %v8515_v27, %v7300_v16  ;;  %v9878_v30 = vadd.f32 %v9814_v5, %v9712_v47 }
 0x78b   :  { %v9368_v6 = vadd.f32 %v9293_v24, %v8590_v31  ;;  %v9942_v42 = vmax.f32 %v9878_v30, 0.0 }
 0x78d   :  { %v9436_v3 = vadd.f32 %v15320_v18, %v9368_v6  ;;  %v16493_v6 = vld [vmem:[#allocation263_spill] sm:$0xff] }
 0x78e   :  { %v7228_v59 = vpop.f32.mrf.mxu3  ;;  %v9713_v61 = vpop.f32.mrf.mxu2  ;;  %v5971_v47 = vadd.f32 %v16493_v6, %v4681_v55 }
 0x78f   :  { %v7301_v50 = vadd.f32 %v7228_v59, %v6746_v20  ;;  %v9714_v32 = vadd.f32 %v15501_v0, %v9713_v61  ;;  %v9500_v15 = vmax.f32 %v9436_v3, 0.0  ;;  %v4682_v20 = vadd.f32 %v16495_v1, %v16494_v45  ;;  %v16496_v59 = vld [vmem:[#allocation119_spill] sm:$0xff] }
 0x790   :  { %v6749_v61 = vadd.f32 %v16496_v59, %v5971_v47 }
 0x791   :  { %v9879_v25 = vadd.f32 %v9815_v23, %v9714_v32  ;;  %v9535_v19 = vpack.c.bf16 %v9500_v15, %v9499_v38  ;;  %v8591_v7 = vadd.f32 %v8518_v28, %v7301_v50  ;;  %v8525_v23 = vpop.f32.mrf.mxu0  ;;  %v9303_v15 = vpop.f32.mrf.mxu1 }
 0x793   :  { %v9943_v27 = vmax.f32 %v9879_v25, 0.0  ;;  %9755 = vmatmul.bf16.gmra.mxu2 %v9535_v19  ;;  %v9369_v48 = vadd.f32 %v9296_v63, %v8591_v7  ;;  %v16497_v25 = vld [vmem:[#allocation265_spill] sm:$0xff] }
 0x794   :  { %v5972_v19 = vadd.f32 %v16497_v25, %v4682_v20 }
 0x795   :  { %v11502_v12 = vpack.c.bf16 %v9943_v27, %v9942_v42  ;;  %v9437_v13 = vadd.f32 %v15320_v18, %v9369_v48  ;;  %v9818_v42 = vunpack.c.h.bf16 %v68_v11  ;;  %v16498_v27 = vld [vmem:[#allocation102_spill] sm:$0xff] }
 0x796   :  { %v7230_v24 = vpop.f32.mrf.mxu3  ;;  %v9716_v36 = vpop.f32.mrf.mxu2  ;;  %v4683_v44 = vadd.f32 %v16499_v22, %v16498_v27  ;;  %v76_v27 = vld [vmem:[%s15759_s0 + $0xc4] sm:$0xff]  }
 0x797   :  { %11582 = vst [vmem:[%s15764_s7 + $0x98] sm:$0xff] %v11502_v12   ;;  %v7302_v49 = vadd.f32 %v7230_v24, %v6747_v62  ;;  %v9717_v57 = vadd.f32 %v15501_v0, %v9716_v36  ;;  %v9501_v16 = vmax.f32 %v9437_v13, 0.0  ;;  %v16500_v12 = vld [vmem:[#allocation185_spill] sm:$0xff]  ;;  %v9819_v62 = vunpack.c.l.bf16 %v70_v51 }
 0x798   :  { %v6750_v21 = vadd.f32 %v16500_v12, %v5972_v19 }
 0x799   :  { %v8592_v37 = vadd.f32 %v8520_v43, %v7302_v49  ;;  %v9880_v63 = vadd.f32 %v9816_v60, %v9717_v57  ;;  %v8528_v33 = vpop.f32.mrf.mxu0  ;;  %v16501_v57 = vld [vmem:[#allocation267_spill] sm:$0xff] }
 0x79a   :  { %v5973_v60 = vadd.f32 %v16501_v57, %v4683_v44 }
 0x79b   :  { %v9370_v8 = vadd.f32 %v9298_v9, %v8592_v37  ;;  %v9944_v53 = vmax.f32 %v9880_v63, 0.0 }
 0x79d   :  { %v9438_v54 = vadd.f32 %v15648_v4, %v9370_v8 }
 0x79e   :  { %v7233_v18 = vpop.f32.mrf.mxu3  ;;  %v9718_v28 = vpop.f32.mrf.mxu2 }
 0x79f   :  { %v7303_v31 = vadd.f32 %v7233_v18, %v6748_v14  ;;  %v9719_v46 = vadd.f32 %v15501_v0, %v9718_v28  ;;  %v9502_v10 = vmax.f32 %v9438_v54, 0.0  ;;  %v6751_v14 = vadd.f32 %v16502_v58, %v5973_v60  ;;  %v80_v58 = vld [vmem:[%s15759_s0 + $0xd4] sm:$0xff]  }
 0x7a1   :  { %v9881_v17 = vadd.f32 %v9817_v2, %v9719_v46  ;;  %v9536_v56 = vpack.c.bf16 %v9502_v10, %v9501_v16  ;;  %v8593_v5 = vadd.f32 %v8523_v41, %v7303_v31  ;;  %v9306_v41 = vpop.f32.mrf.mxu1  ;;  %v8530_v16 = vpop.f32.mrf.mxu0  ;;  %v72_v46 = vld [vmem:[%s15759_s0 + $0xb4] sm:$0xff]  }
 0x7a2   :  { %v9821_v47 = vunpack.c.l.bf16 %v72_v46 }
 0x7a3   :  { %v9945_v29 = vmax.f32 %v9881_v17, 0.0  ;;  %9760 = vmatmul.bf16.gmra.mxu2 %v9536_v56  ;;  %v9371_v38 = vadd.f32 %v9301_v35, %v8593_v5  ;;  %v9820_v56 = vunpack.c.h.bf16 %v70_v51 }
 0x7a5   :  { %v11507_v3 = vpack.c.bf16 %v9945_v29, %v9944_v53  ;;  %v9439_v26 = vadd.f32 %v15648_v4, %v9371_v38 }
 0x7a6   :  { %v7235_v30 = vpop.f32.mrf.mxu3  ;;  %v9721_v50 = vpop.f32.mrf.mxu2 }
 0x7a7   :  { %11583 = vst [vmem:[%s15764_s7 + $0xa0] sm:$0xff] %v11507_v3   ;;  %v7304_v32 = vadd.f32 %v7235_v30, %v6749_v61  ;;  %v9722_v9 = vadd.f32 %v15501_v0, %v9721_v50  ;;  %v9503_v49 = vmax.f32 %v9439_v26, 0.0 }
 0x7a9   :  { %v8594_v43 = vadd.f32 %v8525_v23, %v7304_v32  ;;  %v9882_v37 = vadd.f32 %v9818_v42, %v9722_v9  ;;  %v9308_v31 = vpop.f32.mrf.mxu1  ;;  %v9822_v32 = vunpack.c.h.bf16 %v72_v46 }
 0x7ab   :  { %v9372_v7 = vadd.f32 %v9303_v15, %v8594_v43  ;;  %v9946_v40 = vmax.f32 %v9882_v37, 0.0 }
 0x7ad   :  { %v9440_v48 = vadd.f32 %v15648_v4, %v9372_v7 }
 0x7ae   :  { %v7238_v24 = vpop.f32.mrf.mxu3  ;;  %v9723_v36 = vpop.f32.mrf.mxu2 }
 0x7af   :  { %v7305_v39 = vadd.f32 %v7238_v24, %v6750_v21  ;;  %v9724_v34 = vadd.f32 %v15501_v0, %v9723_v36  ;;  %v9504_v13 = vmax.f32 %v9440_v48, 0.0 }
 0x7b1   :  { %v9883_v8 = vadd.f32 %v9819_v62, %v9724_v34  ;;  %v9537_v11 = vpack.c.bf16 %v9504_v13, %v9503_v49  ;;  %v8595_v52 = vadd.f32 %v8528_v33, %v7305_v39  ;;  %v9825_v33 = vunpack.c.l.bf16 %v76_v27  ;;  %v78_v39 = vld [vmem:[%s15759_s0 + $0xcc] sm:$0xff]  }
 0x7b2   :  { %v9826_v13 = vunpack.c.h.bf16 %v76_v27 }
 0x7b3   :  { %v9947_v55 = vmax.f32 %v9883_v8, 0.0  ;;  %9765 = vmatmul.bf16.gmra.mxu2 %v9537_v11  ;;  %v9373_v18 = vadd.f32 %v9306_v41, %v8595_v52  ;;  %v9827_v41 = vunpack.c.l.bf16 %v78_v39 }
 0x7b5   :  { %v11512_v35 = vpack.c.bf16 %v9947_v55, %v9946_v40  ;;  %v9441_v6 = vadd.f32 %v15648_v4, %v9373_v18 }
 0x7b6   :  { %v7240_v2 = vpop.f32.mrf.mxu3  ;;  %v9726_v54 = vpop.f32.mrf.mxu2 }
 0x7b7   :  { %11584 = vst [vmem:[%s15764_s7 + $0xa8] sm:$0xff] %v11512_v35   ;;  %v7306_v28 = vadd.f32 %v7240_v2, %v6751_v14  ;;  %v9727_v17 = vadd.f32 %v15501_v0, %v9726_v54  ;;  %v9505_v1 = vmax.f32 %v9441_v6, 0.0  ;;  %v9828_v2 = vunpack.c.h.bf16 %v78_v39 }
 0x7b8   :  { %v9829_v54 = vunpack.c.l.bf16 %v80_v58 }
 0x7b9   :  { %v8596_v63 = vadd.f32 %v8530_v16, %v7306_v28  ;;  %v9884_v29 = vadd.f32 %v9820_v56, %v9727_v17  ;;  %v82_v56 = vld [vmem:[%s15759_s0 + $0xdc] sm:$0xff]  }
 0x7bb   :  { %v9374_v10 = vadd.f32 %v9308_v31, %v8596_v63  ;;  %v9948_v59 = vmax.f32 %v9884_v29, 0.0 }
 0x7bd   :  { %v9442_v5 = vadd.f32 %v15648_v4, %v9374_v10  ;;  %v74_v4 = vld [vmem:[%s15759_s0 + $0xbc] sm:$0xff]  }
 0x7be   :  { %v9728_v53 = vpop.f32.mrf.mxu2  ;;  %v9823_v15 = vunpack.c.l.bf16 %v74_v4  ;;  %v9824_v44 = vunpack.c.h.bf16 %v74_v4 }
 0x7bf   :  { %v9729_v45 = vadd.f32 %v15501_v0, %v9728_v53  ;;  %v9506_v20 = vmax.f32 %v9442_v5, 0.0  ;;  %v9831_v5 = vunpack.c.l.bf16 %v82_v56 }
 0x7c1   :  { %v9885_v23 = vadd.f32 %v9821_v47, %v9729_v45  ;;  %v9538_v3 = vpack.c.bf16 %v9506_v20, %v9505_v1  ;;  %v9830_v47 = vunpack.c.h.bf16 %v80_v58 }
 0x7c3   :  { %v9949_v61 = vmax.f32 %v9885_v23, 0.0  ;;  %9770 = vmatmul.bf16.gmra.mxu2 %v9538_v3 }
 0x7c5   :  { %v11517_v38 = vpack.c.bf16 %v9949_v61, %v9948_v59  ;;  %v84_v61 = vld [vmem:[%s15759_s0 + $0xe4] sm:$0xff]  }
 0x7c6   :  { %v9731_v30 = vpop.f32.mrf.mxu2  ;;  %v9833_v4 = vunpack.c.l.bf16 %v84_v61 }
 0x7c7   :  { %11585 = vst [vmem:[%s15764_s7 + $0xb0] sm:$0xff] %v11517_v38   ;;  %v9732_v50 = vadd.f32 %v15501_v0, %v9731_v30  ;;  %v9832_v30 = vunpack.c.h.bf16 %v82_v56 }
 0x7c9   :  { %v9886_v25 = vadd.f32 %v9822_v32, %v9732_v50 }
 0x7cb   :  { %v9950_v26 = vmax.f32 %v9886_v25, 0.0 }
 0x7ce   :  { %v9733_v43 = vpop.f32.mrf.mxu2 }
 0x7cf   :  { %v9734_v19 = vadd.f32 %v15501_v0, %v9733_v43 }
 0x7d1   :  { %v9887_v51 = vadd.f32 %v9823_v15, %v9734_v19 }
 0x7d3   :  { %v9951_v7 = vmax.f32 %v9887_v51, 0.0 }
 0x7d5   :  { %v11522_v9 = vpack.c.bf16 %v9951_v7, %v9950_v26  ;;  %v86_v7 = vld [vmem:[%s15759_s0 + $0xec] sm:$0xff]  }
 0x7d6   :  { %v9736_v42 = vpop.f32.mrf.mxu2  ;;  %v9835_v27 = vunpack.c.l.bf16 %v86_v7 }
 0x7d7   :  { %11586 = vst [vmem:[%s15764_s7 + $0xb8] sm:$0xff] %v11522_v9   ;;  %v9737_v22 = vadd.f32 %v15501_v0, %v9736_v42  ;;  %v9834_v42 = vunpack.c.h.bf16 %v84_v61 }
 0x7d9   :  { %v9888_v21 = vadd.f32 %v9824_v44, %v9737_v22 }
 0x7db   :  { %v9952_v24 = vmax.f32 %v9888_v21, 0.0 }
 0x7de   :  { %v9738_v12 = vpop.f32.mrf.mxu2 }
 0x7df   :  { %v9739_v62 = vadd.f32 %v15501_v0, %v9738_v12 }
 0x7e1   :  { %v9889_v48 = vadd.f32 %v9825_v33, %v9739_v62 }
 0x7e3   :  { %v9953_v36 = vmax.f32 %v9889_v48, 0.0 }
 0x7e5   :  { %v11527_v49 = vpack.c.bf16 %v9953_v36, %v9952_v24  ;;  %v88_v36 = vld [vmem:[%s15759_s0 + $0xf4] sm:$0xff]  }
 0x7e6   :  { %v9741_v37 = vpop.f32.mrf.mxu2  ;;  %v9837_v39 = vunpack.c.l.bf16 %v88_v36 }
 0x7e7   :  { %11587 = vst [vmem:[%s15764_s7 + $0xc0] sm:$0xff] %v11527_v49   ;;  %v9742_v34 = vadd.f32 %v15501_v0, %v9741_v37  ;;  %v9836_v37 = vunpack.c.h.bf16 %v86_v7 }
 0x7e9   :  { %v9890_v11 = vadd.f32 %v9826_v13, %v9742_v34 }
 0x7eb   :  { %v9954_v40 = vmax.f32 %v9890_v11, 0.0 }
 0x7ee   :  { %v9743_v8 = vpop.f32.mrf.mxu2 }
 0x7ef   :  { %v9744_v57 = vadd.f32 %v15501_v0, %v9743_v8 }
 0x7f1   :  { %v9891_v60 = vadd.f32 %v9827_v41, %v9744_v57 }
 0x7f3   :  { %v9955_v52 = vmax.f32 %v9891_v60, 0.0 }
 0x7f5   :  { %v11532_v55 = vpack.c.bf16 %v9955_v52, %v9954_v40  ;;  %v90_v52 = vld [vmem:[%s15759_s0 + $0xfc] sm:$0xf] }
 0x7f6   :  { %v9746_v35 = vpop.f32.mrf.mxu2  ;;  %v9839_v58 = vunpack.c.l.bf16 %v90_v52 }
 0x7f7   :  { %11588 = vst [vmem:[%s15764_s7 + $0xc8] sm:$0xff] %v11532_v55   ;;  %v9747_v14 = vadd.f32 %v15501_v0, %v9746_v35  ;;  %v9838_v35 = vunpack.c.h.bf16 %v88_v36 }
 0x7f9   :  { %v9892_v28 = vadd.f32 %v9828_v2, %v9747_v14 }
 0x7fb   :  { %v9956_v31 = vmax.f32 %v9892_v28, 0.0 }
 0x7fe   :  { %v9748_v18 = vpop.f32.mrf.mxu2 }
 0x7ff   :  { %v9749_v16 = vadd.f32 %v15501_v0, %v9748_v18 }
 0x801   :  { %v9893_v63 = vadd.f32 %v9829_v54, %v9749_v16 }
 0x803   :  { %v9957_v46 = vmax.f32 %v9893_v63, 0.0 }
 0x805   :  { %v11537_v10 = vpack.c.bf16 %v9957_v46, %v9956_v31 }
 0x806   :  { %v9751_v17 = vpop.f32.mrf.mxu2 }
 0x807   :  { %11589 = vst [vmem:[%s15764_s7 + $0xd0] sm:$0xff] %v11537_v10   ;;  %v9752_v6 = vadd.f32 %v15501_v0, %v9751_v17 }
 0x809   :  { %v9894_v29 = vadd.f32 %v9830_v47, %v9752_v6 }
 0x80b   :  { %v9958_v20 = vmax.f32 %v9894_v29, 0.0 }
 0x80e   :  { %v9753_v53 = vpop.f32.mrf.mxu2 }
 0x80f   :  { %v9754_v45 = vadd.f32 %v15501_v0, %v9753_v53 }
 0x811   :  { %v9895_v1 = vadd.f32 %v9831_v5, %v9754_v45 }
 0x813   :  { %v9959_v23 = vmax.f32 %v9895_v1, 0.0 }
 0x815   :  { %v11542_v3 = vpack.c.bf16 %v9959_v23, %v9958_v20 }
 0x816   :  { %v9756_v59 = vpop.f32.mrf.mxu2 }
 0x817   :  { %11590 = vst [vmem:[%s15764_s7 + $0xd8] sm:$0xff] %v11542_v3   ;;  %v9757_v38 = vadd.f32 %v15501_v0, %v9756_v59 }
 0x819   :  { %v9896_v32 = vadd.f32 %v9832_v30, %v9757_v38 }
 0x81b   :  { %v9960_v25 = vmax.f32 %v9896_v32, 0.0 }
 0x81e   :  { %v9758_v50 = vpop.f32.mrf.mxu2 }
 0x81f   :  { %v9759_v15 = vadd.f32 %v15501_v0, %v9758_v50 }
 0x821   :  { %v9897_v43 = vadd.f32 %v9833_v4, %v9759_v15 }
 0x823   :  { %v9961_v19 = vmax.f32 %v9897_v43, 0.0 }
 0x825   :  { %v11547_v51 = vpack.c.bf16 %v9961_v19, %v9960_v25 }
 0x826   :  { %v9761_v26 = vpop.f32.mrf.mxu2 }
 0x827   :  { %11591 = vst [vmem:[%s15764_s7 + $0xe0] sm:$0xff] %v11547_v51   ;;  %v9762_v9 = vadd.f32 %v15501_v0, %v9761_v26 }
 0x829   :  { %v9898_v44 = vadd.f32 %v9834_v42, %v9762_v9 }
 0x82b   :  { %v9962_v21 = vmax.f32 %v9898_v44, 0.0 }
 0x82e   :  { %v9763_v22 = vpop.f32.mrf.mxu2 }
 0x82f   :  { %v9764_v33 = vadd.f32 %v15501_v0, %v9763_v22 }
 0x831   :  { %v9899_v12 = vadd.f32 %v9835_v27, %v9764_v33 }
 0x833   :  { %v9963_v62 = vmax.f32 %v9899_v12, 0.0 }
 0x835   :  { %v11552_v48 = vpack.c.bf16 %v9963_v62, %v9962_v21 }
 0x836   :  { %v9766_v24 = vpop.f32.mrf.mxu2 }
 0x837   :  { %11592 = vst [vmem:[%s15764_s7 + $0xe8] sm:$0xff] %v11552_v48   ;;  %v9767_v49 = vadd.f32 %v15501_v0, %v9766_v24 }
 0x839   :  { %v9900_v13 = vadd.f32 %v9836_v37, %v9767_v49 }
 0x83b   :  { %v9964_v11 = vmax.f32 %v9900_v13, 0.0 }
 0x83e   :  { %v9768_v34 = vpop.f32.mrf.mxu2 }
 0x83f   :  { %v9769_v41 = vadd.f32 %v15501_v0, %v9768_v34 }
 0x841   :  { %v9901_v8 = vadd.f32 %v9837_v39, %v9769_v41 }
 0x843   :  { %v9965_v57 = vmax.f32 %v9901_v8, 0.0 }
 0x845   :  { %v11557_v60 = vpack.c.bf16 %v9965_v57, %v9964_v11 }
 0x846   :  { %v9771_v40 = vpop.f32.mrf.mxu2 }
 0x847   :  { %11593 = vst [vmem:[%s15764_s7 + $0xf0] sm:$0xff] %v11557_v60   ;;  %v9772_v55 = vadd.f32 %v15501_v0, %v9771_v40 }
 0x849   :  { %v9902_v2 = vadd.f32 %v9838_v35, %v9772_v55 }
 0x84b   :  { %v9966_v28 = vmax.f32 %v9902_v2, 0.0 }
 0x84e   :  { %v9773_v14 = vpop.f32.mrf.mxu2 }
 0x84f   :  { %v9774_v54 = vadd.f32 %v15501_v0, %v9773_v14 }
 0x851   :  { %v9903_v18 = vadd.f32 %v9839_v58, %v9774_v54 }
 0x853   :  { %v9967_v16 = vmax.f32 %v9903_v18, 0.0 }
 0x855   :  { %v11562_v63 = vpack.c.bf16 %v9967_v16, %v9966_v28 }
 0x857   :  { %11594 = vst [vmem:[%s15764_s7 + $0xf8] sm:$0xff] %v11562_v63  }

</bundles_post_ra>
